<compile_context>
chip_gen: v7x
topology: tpu7x:2x2x1
jax: 0.10.0
libtpu: 0.0.40
codegen_flags: <defaults>
</compile_context>

<pallas_src>
import functools

import jax
import jax.numpy as jnp
from jax import lax
from jax.experimental import pallas as pl
from jax.experimental.pallas import tpu as pltpu

# Module constants (from v2.py)
BLOCK_SIZE = 256
EMB_SIZE = 384
N_HEADS = 6
HEAD_SIZE = EMB_SIZE // N_HEADS  # 64


def _mha_fused_kernel(x_ref, wqkv_ref, wproj_ref, bproj_ref, o_ref, *,
                      scale, n_heads, head_size):
    """Fused MHA for one batch element.

    x_ref     : (1, T, E)     f32
    wqkv_ref  : (E, 3*E)      bf16   columns = [Q heads | K heads | V heads]
    wproj_ref : (E, E)        bf16   (x @ W + b orientation)
    bproj_ref : (1, E)        f32
    o_ref     : (1, T, E)     f32
    """
    x = x_ref[0]                                   # (T, E) f32
    T = x.shape[0]
    E = n_heads * head_size

    # --- fused QKV projection: one (T,E) x (E,3E) matmul (bf16 in, f32 accumulate) ---
    qkv = jnp.dot(x.astype(jnp.bfloat16), wqkv_ref[...],
                  preferred_element_type=jnp.float32)          # (T, 3E) f32
    q_all = qkv[:, :E]
    k_all = qkv[:, E:2 * E]
    v_all = qkv[:, 2 * E:]

    # --- causal mask, built once per batch step (shared by all heads) ---
    row = lax.broadcasted_iota(jnp.int32, (T, T), 0)
    col = lax.broadcasted_iota(jnp.int32, (T, T), 1)
    causal = col <= row

    # --- per-head attention (statically unrolled; H=6) ---
    head_outs = []
    for h in range(n_heads):
        sl = slice(h * head_size, (h + 1) * head_size)
        q = q_all[:, sl].astype(jnp.bfloat16)                  # (T, HS)
        k = k_all[:, sl].astype(jnp.bfloat16)                  # (T, HS)
        v = v_all[:, sl].astype(jnp.bfloat16)                  # (T, HS)

        # weights = q @ k^T * emb_size ** -0.5   (scaled by emb_size, exactly as in v2.py)
        s = jnp.dot(q, k.T, preferred_element_type=jnp.float32) * scale   # (T, T) f32
        s = jnp.where(causal, s, -jnp.inf)

        # softmax over last axis (f32)
        m = jnp.max(s, axis=-1, keepdims=True)
        p = jnp.exp(s - m)
        inv_l = pl.reciprocal(jnp.sum(p, axis=-1, keepdims=True), approx=True)
        w = p * inv_l

        # dropout(p=0.2) in eval mode == identity
        head_outs.append(jnp.dot(w.astype(jnp.bfloat16), v,
                                 preferred_element_type=jnp.float32))     # (T, HS) f32

    # --- concat heads + output projection (+ bias), all in VMEM ---
    concat = jnp.concatenate(head_outs, axis=-1)                # (T, E) f32
    out = jnp.dot(concat.astype(jnp.bfloat16), wproj_ref[...],
                  preferred_element_type=jnp.float32)           # (T, E) f32
    out = out + bproj_ref[...]                                  # (1, E) broadcasts over T

    # dropout(p=0.2) in eval mode == identity
    o_ref[0] = out.astype(o_ref.dtype)


def multi_head_attention(x, wq, wk, wv, w_proj, b_proj):
    """x: (B, T, E); wq/wk/wv: (n_heads, E, HS); w_proj: (E, E); b_proj: (E,)."""
    B, T, E = x.shape
    H, _, HS = wq.shape
    assert E == EMB_SIZE and H == N_HEADS and HS == HEAD_SIZE
    assert T <= BLOCK_SIZE and T % 8 == 0

    scale = float(E) ** -0.5

    # Pack per-head weights into one (E, 3E) matrix: [Wq_h0..Wq_h5 | Wk_h0.. | Wv_h0..],
    # cast to bf16 for the MXU (halves weight DMA bytes; f32 accumulation in-kernel).
    def pack(w):  # (H, E, HS) -> (E, H*HS)
        return jnp.transpose(w, (1, 0, 2)).reshape(E, H * HS)

    wqkv = jnp.concatenate([pack(wq), pack(wk), pack(wv)], axis=-1).astype(jnp.bfloat16)
    wproj_bf16 = w_proj.astype(jnp.bfloat16)
    bproj_2d = b_proj.reshape(1, E)

    kernel = functools.partial(_mha_fused_kernel, scale=scale,
                               n_heads=H, head_size=HS)

    return pl.pallas_call(
        kernel,
        out_shape=jax.ShapeDtypeStruct((B, T, E), jnp.float32),
        grid_spec=pltpu.PrefetchScalarGridSpec(
            num_scalar_prefetch=0,
            grid=(B,),
            in_specs=[
                pl.BlockSpec((1, T, E), lambda b: (b, 0, 0)),       # x
                pl.BlockSpec((E, 3 * E), lambda b: (0, 0)),         # packed Wqkv (bf16)
                pl.BlockSpec((E, E), lambda b: (0, 0)),             # W_proj (bf16)
                pl.BlockSpec((1, E), lambda b: (0, 0)),             # b_proj
            ],
            out_specs=pl.BlockSpec((1, T, E), lambda b: (b, 0, 0)),
        ),
        compiler_params=pltpu.CompilerParams(
            dimension_semantics=("parallel",)),
    )(x, wqkv, wproj_bf16, bproj_2d)


def _init_params(key):
    """Deterministic synthetic parameters (shapes match the PyTorch module)."""
    kq, kk, kv, kw, kb = jax.random.split(key, 5)
    s_in = 1.0 / (EMB_SIZE ** 0.5)
    wq = jax.random.uniform(kq, (N_HEADS, EMB_SIZE, HEAD_SIZE), jnp.float32, -s_in, s_in)
    wk = jax.random.uniform(kk, (N_HEADS, EMB_SIZE, HEAD_SIZE), jnp.float32, -s_in, s_in)
    wv = jax.random.uniform(kv, (N_HEADS, EMB_SIZE, HEAD_SIZE), jnp.float32, -s_in, s_in)
    w_proj = jax.random.uniform(kw, (EMB_SIZE, EMB_SIZE), jnp.float32, -s_in, s_in)
    b_proj = jax.random.uniform(kb, (EMB_SIZE,), jnp.float32, -s_in, s_in)
    return wq, wk, wv, w_proj, b_proj


if __name__ == "__main__":
    key = jax.random.PRNGKey(0)
    k_x, k_p = jax.random.split(key)

    B, T = 2, 128  # T <= block_size (256)
    x = jax.random.normal(k_x, (B, T, EMB_SIZE), jnp.float32)
    wq, wk, wv, w_proj, b_proj = _init_params(k_p)

    out = multi_head_attention(x, wq, wk, wv, w_proj, b_proj)
    jax.block_until_ready(out)

    # sanity check vs. pure-JAX f32 reference (kernel uses bf16 MXU inputs -> looser tolerance)
    def ref(x):
        q = jnp.einsum("bte,hed->bhtd", x, wq)
        k = jnp.einsum("bte,hed->bhtd", x, wk)
        v = jnp.einsum("bte,hed->bhtd", x, wv)
        s = jnp.einsum("bhqd,bhkd->bhqk", q, k) * (EMB_SIZE ** -0.5)
        mask = jnp.tril(jnp.ones((T, T), bool))
        s = jnp.where(mask, s, -jnp.inf)
        w = jax.nn.softmax(s, axis=-1)
        o = jnp.einsum("bhqk,bhkd->bhqd", w, v)
        o = jnp.transpose(o, (0, 2, 1, 3)).reshape(B, T, EMB_SIZE)
        return o @ w_proj + b_proj

    ref_out = ref(x)
    assert out.shape == (B, T, EMB_SIZE)
    assert jnp.allclose(out, ref_out, atol=2e-2, rtol=2e-2), (
        float(jnp.max(jnp.abs(out - ref_out))))

    print("KERNEL_OK")
</pallas_src>

<mosaic_0001>
module attributes {stable_mosaic.version = 11 : i64} {
  func.func @_mha_fused_kernel(%arg0: i32, %arg1: memref<1x128x384xf32, #tpu.memory_space<vmem>>, %arg2: memref<384x1152xbf16, #tpu.memory_space<vmem>>, %arg3: memref<384x384xbf16, #tpu.memory_space<vmem>>, %arg4: memref<1x384xf32, #tpu.memory_space<vmem>>, %arg5: memref<1x128x384xf32, #tpu.memory_space<vmem>>) attributes {dimension_semantics = [#tpu.dimension_semantics<parallel>], iteration_bounds = array<i64: 2>, scalar_prefetch = 0 : i64, scratch_operands = 0 : i64, tpu.core_type = #tpu.core_type<tc>, window_params = [{transform_indices = @transform_0, window_bounds = array<i64: 1, 128, 384>}, {pipeline_mode = #tpu.pipeline_mode<synchronous>, transform_indices = @transform_1, window_bounds = array<i64: 384, 1152>}, {pipeline_mode = #tpu.pipeline_mode<synchronous>, transform_indices = @transform_2, window_bounds = array<i64: 384, 384>}, {pipeline_mode = #tpu.pipeline_mode<synchronous>, transform_indices = @transform_3, window_bounds = array<i64: 1, 384>}, {transform_indices = @transform_4, window_bounds = array<i64: 1, 128, 384>}]} {
    %c0 = arith.constant 0 : index
    %c0_0 = arith.constant 0 : index
    %c0_1 = arith.constant 0 : index
    %0 = vector.load %arg1[%c0, %c0_0, %c0_1] : memref<1x128x384xf32, #tpu.memory_space<vmem>>, vector<1x128x384xf32>
    %1 = vector.shape_cast %0 : vector<1x128x384xf32> to vector<128x384xf32>
    %2 = arith.truncf %1 : vector<128x384xf32> to vector<128x384xbf16>
    %c0_2 = arith.constant 0 : index
    %c0_3 = arith.constant 0 : index
    %3 = vector.load %arg2[%c0_2, %c0_3] : memref<384x1152xbf16, #tpu.memory_space<vmem>>, vector<384x1152xbf16>
    %cst = arith.constant dense<0.000000e+00> : vector<128x1152xf32>
    %4 = tpu.matmul %2, %3, %cst {dimension_numbers = #tpu.dot_dimension_numbers<[1], [0], [0], [1], [0, 0, 1, 1], [], []>} : vector<128x384xbf16>, vector<384x1152xbf16>, vector<128x1152xf32> -> vector<128x1152xf32>
    %5 = vector.extract_strided_slice %4 {offsets = [0, 0], sizes = [128, 384], strides = [1, 1]} : vector<128x1152xf32> to vector<128x384xf32>
    %6 = vector.extract_strided_slice %4 {offsets = [0, 384], sizes = [128, 384], strides = [1, 1]} : vector<128x1152xf32> to vector<128x384xf32>
    %7 = vector.extract_strided_slice %4 {offsets = [0, 768], sizes = [128, 384], strides = [1, 1]} : vector<128x1152xf32> to vector<128x384xf32>
    %8 = tpu.iota {dimensions = array<i32: 0>} : vector<128x128xi32>
    %9 = tpu.iota {dimensions = array<i32: 1>} : vector<128x128xi32>
    %10 = arith.cmpi sle, %9, %8 : vector<128x128xi32>
    %11 = vector.extract_strided_slice %5 {offsets = [0, 0], sizes = [128, 64], strides = [1, 1]} : vector<128x384xf32> to vector<128x64xf32>
    %12 = arith.truncf %11 : vector<128x64xf32> to vector<128x64xbf16>
    %13 = vector.extract_strided_slice %6 {offsets = [0, 0], sizes = [128, 64], strides = [1, 1]} : vector<128x384xf32> to vector<128x64xf32>
    %14 = arith.truncf %13 : vector<128x64xf32> to vector<128x64xbf16>
    %15 = vector.extract_strided_slice %7 {offsets = [0, 0], sizes = [128, 64], strides = [1, 1]} : vector<128x384xf32> to vector<128x64xf32>
    %16 = arith.truncf %15 : vector<128x64xf32> to vector<128x64xbf16>
    %17 = tpu.transpose %14, [1, 0] : vector<128x64xbf16> -> vector<64x128xbf16>
    %cst_4 = arith.constant dense<0.000000e+00> : vector<128x128xf32>
    %18 = tpu.matmul %12, %17, %cst_4 {dimension_numbers = #tpu.dot_dimension_numbers<[1], [0], [0], [1], [0, 0, 1, 1], [], []>} : vector<128x64xbf16>, vector<64x128xbf16>, vector<128x128xf32> -> vector<128x128xf32>
    %cst_5 = arith.constant 0.0510310382 : f32
    %19 = vector.broadcast %cst_5 : f32 to vector<128x128xf32>
    %20 = arith.mulf %18, %19 : vector<128x128xf32>
    %cst_6 = arith.constant 0xFF800000 : f32
    %21 = vector.broadcast %cst_6 : f32 to vector<128x128xf32>
    %22 = arith.select %10, %20, %21 : vector<128x128xi1>, vector<128x128xf32>
    %cst_7 = arith.constant dense<0xFF800000> : vector<128xf32>
    %23 = vector.multi_reduction <maximumf>, %22, %cst_7 [1] : vector<128x128xf32> to vector<128xf32>
    %24 = vector.shape_cast %23 : vector<128xf32> to vector<128x1xf32>
    %25 = vector.broadcast %24 : vector<128x1xf32> to vector<128x128xf32>
    %26 = arith.subf %22, %25 : vector<128x128xf32>
    %27 = math.exp %26 : vector<128x128xf32>
    %cst_8 = arith.constant dense<0.000000e+00> : vector<128xf32>
    %28 = vector.multi_reduction <add>, %27, %cst_8 [1] : vector<128x128xf32> to vector<128xf32>
    %29 = vector.shape_cast %28 : vector<128xf32> to vector<128x1xf32>
    %30 = tpu.reciprocal %29 {approx = true} : vector<128x1xf32> -> vector<128x1xf32>
    %31 = vector.broadcast %30 : vector<128x1xf32> to vector<128x128xf32>
    %32 = arith.mulf %27, %31 : vector<128x128xf32>
    %33 = arith.truncf %32 : vector<128x128xf32> to vector<128x128xbf16>
    %cst_9 = arith.constant dense<0.000000e+00> : vector<128x64xf32>
    %34 = tpu.matmul %33, %16, %cst_9 {dimension_numbers = #tpu.dot_dimension_numbers<[1], [0], [0], [1], [0, 0, 1, 1], [], []>} : vector<128x128xbf16>, vector<128x64xbf16>, vector<128x64xf32> -> vector<128x64xf32>
    %35 = vector.extract_strided_slice %5 {offsets = [0, 64], sizes = [128, 64], strides = [1, 1]} : vector<128x384xf32> to vector<128x64xf32>
    %36 = arith.truncf %35 : vector<128x64xf32> to vector<128x64xbf16>
    %37 = vector.extract_strided_slice %6 {offsets = [0, 64], sizes = [128, 64], strides = [1, 1]} : vector<128x384xf32> to vector<128x64xf32>
    %38 = arith.truncf %37 : vector<128x64xf32> to vector<128x64xbf16>
    %39 = vector.extract_strided_slice %7 {offsets = [0, 64], sizes = [128, 64], strides = [1, 1]} : vector<128x384xf32> to vector<128x64xf32>
    %40 = arith.truncf %39 : vector<128x64xf32> to vector<128x64xbf16>
    %41 = tpu.transpose %38, [1, 0] : vector<128x64xbf16> -> vector<64x128xbf16>
    %cst_10 = arith.constant dense<0.000000e+00> : vector<128x128xf32>
    %42 = tpu.matmul %36, %41, %cst_10 {dimension_numbers = #tpu.dot_dimension_numbers<[1], [0], [0], [1], [0, 0, 1, 1], [], []>} : vector<128x64xbf16>, vector<64x128xbf16>, vector<128x128xf32> -> vector<128x128xf32>
    %cst_11 = arith.constant 0.0510310382 : f32
    %43 = vector.broadcast %cst_11 : f32 to vector<128x128xf32>
    %44 = arith.mulf %42, %43 : vector<128x128xf32>
    %cst_12 = arith.constant 0xFF800000 : f32
    %45 = vector.broadcast %cst_12 : f32 to vector<128x128xf32>
    %46 = arith.select %10, %44, %45 : vector<128x128xi1>, vector<128x128xf32>
    %cst_13 = arith.constant dense<0xFF800000> : vector<128xf32>
    %47 = vector.multi_reduction <maximumf>, %46, %cst_13 [1] : vector<128x128xf32> to vector<128xf32>
    %48 = vector.shape_cast %47 : vector<128xf32> to vector<128x1xf32>
    %49 = vector.broadcast %48 : vector<128x1xf32> to vector<128x128xf32>
    %50 = arith.subf %46, %49 : vector<128x128xf32>
    %51 = math.exp %50 : vector<128x128xf32>
    %cst_14 = arith.constant dense<0.000000e+00> : vector<128xf32>
    %52 = vector.multi_reduction <add>, %51, %cst_14 [1] : vector<128x128xf32> to vector<128xf32>
    %53 = vector.shape_cast %52 : vector<128xf32> to vector<128x1xf32>
    %54 = tpu.reciprocal %53 {approx = true} : vector<128x1xf32> -> vector<128x1xf32>
    %55 = vector.broadcast %54 : vector<128x1xf32> to vector<128x128xf32>
    %56 = arith.mulf %51, %55 : vector<128x128xf32>
    %57 = arith.truncf %56 : vector<128x128xf32> to vector<128x128xbf16>
    %cst_15 = arith.constant dense<0.000000e+00> : vector<128x64xf32>
    %58 = tpu.matmul %57, %40, %cst_15 {dimension_numbers = #tpu.dot_dimension_numbers<[1], [0], [0], [1], [0, 0, 1, 1], [], []>} : vector<128x128xbf16>, vector<128x64xbf16>, vector<128x64xf32> -> vector<128x64xf32>
    %59 = vector.extract_strided_slice %5 {offsets = [0, 128], sizes = [128, 64], strides = [1, 1]} : vector<128x384xf32> to vector<128x64xf32>
    %60 = arith.truncf %59 : vector<128x64xf32> to vector<128x64xbf16>
    %61 = vector.extract_strided_slice %6 {offsets = [0, 128], sizes = [128, 64], strides = [1, 1]} : vector<128x384xf32> to vector<128x64xf32>
    %62 = arith.truncf %61 : vector<128x64xf32> to vector<128x64xbf16>
    %63 = vector.extract_strided_slice %7 {offsets = [0, 128], sizes = [128, 64], strides = [1, 1]} : vector<128x384xf32> to vector<128x64xf32>
    %64 = arith.truncf %63 : vector<128x64xf32> to vector<128x64xbf16>
    %65 = tpu.transpose %62, [1, 0] : vector<128x64xbf16> -> vector<64x128xbf16>
    %cst_16 = arith.constant dense<0.000000e+00> : vector<128x128xf32>
    %66 = tpu.matmul %60, %65, %cst_16 {dimension_numbers = #tpu.dot_dimension_numbers<[1], [0], [0], [1], [0, 0, 1, 1], [], []>} : vector<128x64xbf16>, vector<64x128xbf16>, vector<128x128xf32> -> vector<128x128xf32>
    %cst_17 = arith.constant 0.0510310382 : f32
    %67 = vector.broadcast %cst_17 : f32 to vector<128x128xf32>
    %68 = arith.mulf %66, %67 : vector<128x128xf32>
    %cst_18 = arith.constant 0xFF800000 : f32
    %69 = vector.broadcast %cst_18 : f32 to vector<128x128xf32>
    %70 = arith.select %10, %68, %69 : vector<128x128xi1>, vector<128x128xf32>
    %cst_19 = arith.constant dense<0xFF800000> : vector<128xf32>
    %71 = vector.multi_reduction <maximumf>, %70, %cst_19 [1] : vector<128x128xf32> to vector<128xf32>
    %72 = vector.shape_cast %71 : vector<128xf32> to vector<128x1xf32>
    %73 = vector.broadcast %72 : vector<128x1xf32> to vector<128x128xf32>
    %74 = arith.subf %70, %73 : vector<128x128xf32>
    %75 = math.exp %74 : vector<128x128xf32>
    %cst_20 = arith.constant dense<0.000000e+00> : vector<128xf32>
    %76 = vector.multi_reduction <add>, %75, %cst_20 [1] : vector<128x128xf32> to vector<128xf32>
    %77 = vector.shape_cast %76 : vector<128xf32> to vector<128x1xf32>
    %78 = tpu.reciprocal %77 {approx = true} : vector<128x1xf32> -> vector<128x1xf32>
    %79 = vector.broadcast %78 : vector<128x1xf32> to vector<128x128xf32>
    %80 = arith.mulf %75, %79 : vector<128x128xf32>
    %81 = arith.truncf %80 : vector<128x128xf32> to vector<128x128xbf16>
    %cst_21 = arith.constant dense<0.000000e+00> : vector<128x64xf32>
    %82 = tpu.matmul %81, %64, %cst_21 {dimension_numbers = #tpu.dot_dimension_numbers<[1], [0], [0], [1], [0, 0, 1, 1], [], []>} : vector<128x128xbf16>, vector<128x64xbf16>, vector<128x64xf32> -> vector<128x64xf32>
    %83 = vector.extract_strided_slice %5 {offsets = [0, 192], sizes = [128, 64], strides = [1, 1]} : vector<128x384xf32> to vector<128x64xf32>
    %84 = arith.truncf %83 : vector<128x64xf32> to vector<128x64xbf16>
    %85 = vector.extract_strided_slice %6 {offsets = [0, 192], sizes = [128, 64], strides = [1, 1]} : vector<128x384xf32> to vector<128x64xf32>
    %86 = arith.truncf %85 : vector<128x64xf32> to vector<128x64xbf16>
    %87 = vector.extract_strided_slice %7 {offsets = [0, 192], sizes = [128, 64], strides = [1, 1]} : vector<128x384xf32> to vector<128x64xf32>
    %88 = arith.truncf %87 : vector<128x64xf32> to vector<128x64xbf16>
    %89 = tpu.transpose %86, [1, 0] : vector<128x64xbf16> -> vector<64x128xbf16>
    %cst_22 = arith.constant dense<0.000000e+00> : vector<128x128xf32>
    %90 = tpu.matmul %84, %89, %cst_22 {dimension_numbers = #tpu.dot_dimension_numbers<[1], [0], [0], [1], [0, 0, 1, 1], [], []>} : vector<128x64xbf16>, vector<64x128xbf16>, vector<128x128xf32> -> vector<128x128xf32>
    %cst_23 = arith.constant 0.0510310382 : f32
    %91 = vector.broadcast %cst_23 : f32 to vector<128x128xf32>
    %92 = arith.mulf %90, %91 : vector<128x128xf32>
    %cst_24 = arith.constant 0xFF800000 : f32
    %93 = vector.broadcast %cst_24 : f32 to vector<128x128xf32>
    %94 = arith.select %10, %92, %93 : vector<128x128xi1>, vector<128x128xf32>
    %cst_25 = arith.constant dense<0xFF800000> : vector<128xf32>
    %95 = vector.multi_reduction <maximumf>, %94, %cst_25 [1] : vector<128x128xf32> to vector<128xf32>
    %96 = vector.shape_cast %95 : vector<128xf32> to vector<128x1xf32>
    %97 = vector.broadcast %96 : vector<128x1xf32> to vector<128x128xf32>
    %98 = arith.subf %94, %97 : vector<128x128xf32>
    %99 = math.exp %98 : vector<128x128xf32>
    %cst_26 = arith.constant dense<0.000000e+00> : vector<128xf32>
    %100 = vector.multi_reduction <add>, %99, %cst_26 [1] : vector<128x128xf32> to vector<128xf32>
    %101 = vector.shape_cast %100 : vector<128xf32> to vector<128x1xf32>
    %102 = tpu.reciprocal %101 {approx = true} : vector<128x1xf32> -> vector<128x1xf32>
    %103 = vector.broadcast %102 : vector<128x1xf32> to vector<128x128xf32>
    %104 = arith.mulf %99, %103 : vector<128x128xf32>
    %105 = arith.truncf %104 : vector<128x128xf32> to vector<128x128xbf16>
    %cst_27 = arith.constant dense<0.000000e+00> : vector<128x64xf32>
    %106 = tpu.matmul %105, %88, %cst_27 {dimension_numbers = #tpu.dot_dimension_numbers<[1], [0], [0], [1], [0, 0, 1, 1], [], []>} : vector<128x128xbf16>, vector<128x64xbf16>, vector<128x64xf32> -> vector<128x64xf32>
    %107 = vector.extract_strided_slice %5 {offsets = [0, 256], sizes = [128, 64], strides = [1, 1]} : vector<128x384xf32> to vector<128x64xf32>
    %108 = arith.truncf %107 : vector<128x64xf32> to vector<128x64xbf16>
    %109 = vector.extract_strided_slice %6 {offsets = [0, 256], sizes = [128, 64], strides = [1, 1]} : vector<128x384xf32> to vector<128x64xf32>
    %110 = arith.truncf %109 : vector<128x64xf32> to vector<128x64xbf16>
    %111 = vector.extract_strided_slice %7 {offsets = [0, 256], sizes = [128, 64], strides = [1, 1]} : vector<128x384xf32> to vector<128x64xf32>
    %112 = arith.truncf %111 : vector<128x64xf32> to vector<128x64xbf16>
    %113 = tpu.transpose %110, [1, 0] : vector<128x64xbf16> -> vector<64x128xbf16>
    %cst_28 = arith.constant dense<0.000000e+00> : vector<128x128xf32>
    %114 = tpu.matmul %108, %113, %cst_28 {dimension_numbers = #tpu.dot_dimension_numbers<[1], [0], [0], [1], [0, 0, 1, 1], [], []>} : vector<128x64xbf16>, vector<64x128xbf16>, vector<128x128xf32> -> vector<128x128xf32>
    %cst_29 = arith.constant 0.0510310382 : f32
    %115 = vector.broadcast %cst_29 : f32 to vector<128x128xf32>
    %116 = arith.mulf %114, %115 : vector<128x128xf32>
    %cst_30 = arith.constant 0xFF800000 : f32
    %117 = vector.broadcast %cst_30 : f32 to vector<128x128xf32>
    %118 = arith.select %10, %116, %117 : vector<128x128xi1>, vector<128x128xf32>
    %cst_31 = arith.constant dense<0xFF800000> : vector<128xf32>
    %119 = vector.multi_reduction <maximumf>, %118, %cst_31 [1] : vector<128x128xf32> to vector<128xf32>
    %120 = vector.shape_cast %119 : vector<128xf32> to vector<128x1xf32>
    %121 = vector.broadcast %120 : vector<128x1xf32> to vector<128x128xf32>
    %122 = arith.subf %118, %121 : vector<128x128xf32>
    %123 = math.exp %122 : vector<128x128xf32>
    %cst_32 = arith.constant dense<0.000000e+00> : vector<128xf32>
    %124 = vector.multi_reduction <add>, %123, %cst_32 [1] : vector<128x128xf32> to vector<128xf32>
    %125 = vector.shape_cast %124 : vector<128xf32> to vector<128x1xf32>
    %126 = tpu.reciprocal %125 {approx = true} : vector<128x1xf32> -> vector<128x1xf32>
    %127 = vector.broadcast %126 : vector<128x1xf32> to vector<128x128xf32>
    %128 = arith.mulf %123, %127 : vector<128x128xf32>
    %129 = arith.truncf %128 : vector<128x128xf32> to vector<128x128xbf16>
    %cst_33 = arith.constant dense<0.000000e+00> : vector<128x64xf32>
    %130 = tpu.matmul %129, %112, %cst_33 {dimension_numbers = #tpu.dot_dimension_numbers<[1], [0], [0], [1], [0, 0, 1, 1], [], []>} : vector<128x128xbf16>, vector<128x64xbf16>, vector<128x64xf32> -> vector<128x64xf32>
    %131 = vector.extract_strided_slice %5 {offsets = [0, 320], sizes = [128, 64], strides = [1, 1]} : vector<128x384xf32> to vector<128x64xf32>
    %132 = arith.truncf %131 : vector<128x64xf32> to vector<128x64xbf16>
    %133 = vector.extract_strided_slice %6 {offsets = [0, 320], sizes = [128, 64], strides = [1, 1]} : vector<128x384xf32> to vector<128x64xf32>
    %134 = arith.truncf %133 : vector<128x64xf32> to vector<128x64xbf16>
    %135 = vector.extract_strided_slice %7 {offsets = [0, 320], sizes = [128, 64], strides = [1, 1]} : vector<128x384xf32> to vector<128x64xf32>
    %136 = arith.truncf %135 : vector<128x64xf32> to vector<128x64xbf16>
    %137 = tpu.transpose %134, [1, 0] : vector<128x64xbf16> -> vector<64x128xbf16>
    %cst_34 = arith.constant dense<0.000000e+00> : vector<128x128xf32>
    %138 = tpu.matmul %132, %137, %cst_34 {dimension_numbers = #tpu.dot_dimension_numbers<[1], [0], [0], [1], [0, 0, 1, 1], [], []>} : vector<128x64xbf16>, vector<64x128xbf16>, vector<128x128xf32> -> vector<128x128xf32>
    %cst_35 = arith.constant 0.0510310382 : f32
    %139 = vector.broadcast %cst_35 : f32 to vector<128x128xf32>
    %140 = arith.mulf %138, %139 : vector<128x128xf32>
    %cst_36 = arith.constant 0xFF800000 : f32
    %141 = vector.broadcast %cst_36 : f32 to vector<128x128xf32>
    %142 = arith.select %10, %140, %141 : vector<128x128xi1>, vector<128x128xf32>
    %cst_37 = arith.constant dense<0xFF800000> : vector<128xf32>
    %143 = vector.multi_reduction <maximumf>, %142, %cst_37 [1] : vector<128x128xf32> to vector<128xf32>
    %144 = vector.shape_cast %143 : vector<128xf32> to vector<128x1xf32>
    %145 = vector.broadcast %144 : vector<128x1xf32> to vector<128x128xf32>
    %146 = arith.subf %142, %145 : vector<128x128xf32>
    %147 = math.exp %146 : vector<128x128xf32>
    %cst_38 = arith.constant dense<0.000000e+00> : vector<128xf32>
    %148 = vector.multi_reduction <add>, %147, %cst_38 [1] : vector<128x128xf32> to vector<128xf32>
    %149 = vector.shape_cast %148 : vector<128xf32> to vector<128x1xf32>
    %150 = tpu.reciprocal %149 {approx = true} : vector<128x1xf32> -> vector<128x1xf32>
    %151 = vector.broadcast %150 : vector<128x1xf32> to vector<128x128xf32>
    %152 = arith.mulf %147, %151 : vector<128x128xf32>
    %153 = arith.truncf %152 : vector<128x128xf32> to vector<128x128xbf16>
    %cst_39 = arith.constant dense<0.000000e+00> : vector<128x64xf32>
    %154 = tpu.matmul %153, %136, %cst_39 {dimension_numbers = #tpu.dot_dimension_numbers<[1], [0], [0], [1], [0, 0, 1, 1], [], []>} : vector<128x128xbf16>, vector<128x64xbf16>, vector<128x64xf32> -> vector<128x64xf32>
    %155 = tpu.concatenate %34, %58, %82, %106, %130, %154 in 1 : vector<128x64xf32>, vector<128x64xf32>, vector<128x64xf32>, vector<128x64xf32>, vector<128x64xf32>, vector<128x64xf32> -> vector<128x384xf32>
    %156 = arith.truncf %155 : vector<128x384xf32> to vector<128x384xbf16>
    %c0_40 = arith.constant 0 : index
    %c0_41 = arith.constant 0 : index
    %157 = vector.load %arg3[%c0_40, %c0_41] : memref<384x384xbf16, #tpu.memory_space<vmem>>, vector<384x384xbf16>
    %cst_42 = arith.constant dense<0.000000e+00> : vector<128x384xf32>
    %158 = tpu.matmul %156, %157, %cst_42 {dimension_numbers = #tpu.dot_dimension_numbers<[1], [0], [0], [1], [0, 0, 1, 1], [], []>} : vector<128x384xbf16>, vector<384x384xbf16>, vector<128x384xf32> -> vector<128x384xf32>
    %c0_43 = arith.constant 0 : index
    %c0_44 = arith.constant 0 : index
    %159 = vector.load %arg4[%c0_43, %c0_44] : memref<1x384xf32, #tpu.memory_space<vmem>>, vector<1x384xf32>
    %160 = vector.broadcast %159 : vector<1x384xf32> to vector<128x384xf32>
    %161 = arith.addf %158, %160 : vector<128x384xf32>
    %c0_45 = arith.constant 0 : index
    %c0_46 = arith.constant 0 : index
    %c0_47 = arith.constant 0 : index
    %162 = vector.load %arg5[%c0_45, %c0_46, %c0_47] : memref<1x128x384xf32, #tpu.memory_space<vmem>>, vector<1x128x384xf32>
    %163 = vector.shape_cast %162 : vector<1x128x384xf32> to vector<128x384xf32>
    %164 = vector.shape_cast %161 : vector<128x384xf32> to vector<1x128x384xf32>
    tpu.vector_store %arg5[%c0_45, %c0_46, %c0_47], %164 {strides = array<i32>} : memref<1x128x384xf32, #tpu.memory_space<vmem>>, vector<1x128x384xf32>,
    return
  }
  func.func @transform_0(%arg0: i32) -> (i32, i32, i32) {
    %c0_i32 = arith.constant 0 : i32
    %c0_i32_0 = arith.constant 0 : i32
    %c0_i32_1 = arith.constant 0 : i32
    return %arg0, %c0_i32, %c0_i32_0 : i32, i32, i32
  }
  func.func @transform_1(%arg0: i32) -> (i32, i32) {
    %c0_i32 = arith.constant 0 : i32
    %c0_i32_0 = arith.constant 0 : i32
    %c0_i32_1 = arith.constant 0 : i32
    return %c0_i32, %c0_i32_0 : i32, i32
  }
  func.func @transform_2(%arg0: i32) -> (i32, i32) {
    %c0_i32 = arith.constant 0 : i32
    %c0_i32_0 = arith.constant 0 : i32
    %c0_i32_1 = arith.constant 0 : i32
    return %c0_i32, %c0_i32_0 : i32, i32
  }
  func.func @transform_3(%arg0: i32) -> (i32, i32) {
    %c0_i32 = arith.constant 0 : i32
    %c0_i32_0 = arith.constant 0 : i32
    %c0_i32_1 = arith.constant 0 : i32
    return %c0_i32, %c0_i32_0 : i32, i32
  }
  func.func @transform_4(%arg0: i32) -> (i32, i32, i32) {
    %c0_i32 = arith.constant 0 : i32
    %c0_i32_0 = arith.constant 0 : i32
    %c0_i32_1 = arith.constant 0 : i32
    return %arg0, %c0_i32, %c0_i32_0 : i32, i32, i32
  }
}

</mosaic_0001>

<bundles_post_ra>
// kernel: tpu_custom_call.1
= control target key start
LH: loop header
LB: loop body
LE: loop exit
PB: predicated region body
PF: predicated region fallthrough
CT: control target
= control target key end

     0   :  { %9 = vsyncpa [#allocation3], 0  ;;  %s12401_s0 = inlined_call_operand.hbm [shape: f32[2,128,384], index: 0, kind: input, shape index: {}]   ;;  %s12402_s1 = inlined_call_operand.hbm [shape: bf16[384,1152], index: 1, kind: input, shape index: {}]   ;;  %s12403_s2 = inlined_call_operand.hbm [shape: bf16[384,384], index: 2, kind: input, shape index: {}]   ;;  %s12404_s3 = inlined_call_operand.vmem [shape: f32[1,384], index: 3, kind: input, shape index: {}]   ;;  %s12405_s4 = inlined_call_operand.hbm [shape: f32[2,128,384], index: 4, kind: output, shape index: {}]  }
   0x1   :  { %11 = vsyncpa [#allocation3 + $0x1], 0 }
   0x2   :  { %12 = vsyncpa [#allocation6], 0 }
   0x3   :  { %13 = vsyncpa [#allocation4], 0 }
   0x4   :  { %15 = vsyncpa [#allocation4 + $0x1], 0  ;;  %s9593_s15 = smov 0   ;;  %s9595_s16 = smov 0  }
   0x5   :  { %s9597_s17 = smov 0   ;;  %s9599_s18 = smov 0  }
   0x6 LB: > { %s9614_s19 = sadd.s32 4294967295, %s9552_s18   ;;  %s6999_s20 = sadd.s32 4294967294, %s9552_s18   ;;  %s9552_s18 = sphi %s9599_s18, %s13056_s18   ;;  %s9548_s17 = sphi %s9597_s17, %s13055_s17   ;;  %s9544_s16 = sphi %s9595_s16, %s13054_s16   ;;  %s9540_s15 = sphi %s9593_s15, %s13053_s15  }
   0x7   : > { %p41_p0 = scmp.ne.s32.totalorder %s9544_s16, %s9540_s15  ;;  %p12406_p1 = scmp.eq.s32.totalorder %s9614_s19, 0 }
   0x8   : > { %p134_p3 = scmp.eq.s32.totalorder %s6999_s20, 1  ;;  %p7000_p5 = scmp.ge.s32.totalorder %s9552_s18, 1 }
   0x9   : > { %p9623_p4 = por %p12406_p1, %p41_p0  ;;  %p141_p7 = scmp.lt.s32.totalorder %s9552_s18, 3 }
   0xa   : > { %p9628_p6 = por %p134_p3, %p41_p0  ;;  %s9554_s24 = smov [#allocation5]  }
   0xb   : > { %s12547_s21 = scalar_select %p9623_p4, 1, 0 }
   0xc   : > { %s12548_s22 = scalar_select %p9628_p6, 1, 0 }
   0xd   : > { %p9633_p8 = pnand %p7000_p5, %p141_p7  ;;  %s153_s25 = sshll.u32 %s9554_s24, 4  ;;  %s9637_s25 = int_to_ptr.vmem [resolvable:$true] %s153_s25 }
   0xe   : > { %s9555_s27 = smov [#allocation7]   ;;  %s9396_s5 = scalar_lea.hbm %s12402_s1, 27648 }
   0xf   : > { %p8419_p9 = pneg %p9633_p8  ;;  %s166_s28 = sshll.u32 %s9555_s27, 4  ;;  %s9648_s28 = int_to_ptr.vmem [resolvable:$true] %s166_s28 }
  0x10   : > { %p9397_p12 = scmp.ne.s32.totalorder %s12402_s1, %s9396_s5  ;;  %p9403_p5 = scmp.lt.u32.totalorder %s9396_s5, %s12402_s1 }
  0x11   : > { %p9644_p11 = pnand %p8419_p9, %p12406_p1 }
  0x13   : > { %p9398_p13 = pneg %p9644_p11 }
  0x15   : > { %p9399_p0 = pnand %p9398_p13, %p9397_p12 }
  0x17   : > { %p9400_p3 = pneg %p9399_p0 }
  0x19   : > { %p9405_p7 = pnand %p9403_p5, %p9400_p3 }
  0x1b   : > { %9408 = shalt.err (!%p9405_p7)
}
  0x1c   : > { %s9409_s10 = scalar_lea.vmem %s9637_s25, 27648  ;;  %p9417_p2 = scmp.lt.s32.totalorder %s9637_s25, %s9637_s25 }
  0x1d   : > { %p9410_p9 = scmp.ne.s32.totalorder %s9637_s25, %s9409_s10  ;;  %p9418_p12 = scmp.lt.s32.totalorder %s9409_s10, %s9409_s10 }
  0x1f   : > { %p9412_p10 = pnand %p9410_p9, %p9398_p13  ;;  %p9419_p0 = por %p9418_p12, %p9417_p2 }
  0x21   : > { %p9413_p1 = pneg %p9412_p10 }
  0x23   : > { %p9420_p6 = pnand %p9419_p0, %p9413_p1 }
  0x25   : > { %9423 = shalt.err (!%p9420_p6)
}
  0x26   : > { %s9556_s11 = smov 576   ;;  %s9557_s12 = smov 36  }
  0x27   : > { %8422 = dma.hbm_to_vmem [thread:$0]  (!%p9644_p11), %s12402_s1, 27648, %s9637_s25, [#allocation6], %s9556_s11, %s9556_s11, %s9557_s12  }
  0x28   : > { %s9424_s27 = scalar_lea.hbm %s12403_s2, 9216 }
  0x29   : > { %p9425_p2 = scmp.ne.s32.totalorder %s12403_s2, %s9424_s27  ;;  %p9431_p10 = scmp.lt.u32.totalorder %s9424_s27, %s12403_s2 }
  0x2b   : > { %p9427_p1 = pnand %p9425_p2, %p9398_p13 }
  0x2d   : > { %p9428_p6 = pneg %p9427_p1 }
  0x2f   : > { %p9433_p3 = pnand %p9431_p10, %p9428_p6 }
  0x31   : > { %9436 = shalt.err (!%p9433_p3)
}
  0x32   : > { %s9437_s25 = scalar_lea.vmem %s9648_s28, 9216  ;;  %p9445_p12 = scmp.lt.s32.totalorder %s9648_s28, %s9648_s28 }
  0x33   : > { %p9438_p5 = scmp.ne.s32.totalorder %s9648_s28, %s9437_s25  ;;  %p9446_p0 = scmp.lt.s32.totalorder %s9437_s25, %s9437_s25 }
  0x35   : > { %p9440_p7 = pnand %p9438_p5, %p9398_p13  ;;  %p9447_p2 = por %p9446_p0, %p9445_p12 }
  0x37   : > { %p9441_p9 = pneg %p9440_p7 }
  0x39   : > { %p9448_p1 = pnand %p9447_p2, %p9441_p9 }
  0x3b   : > { %9451 = shalt.err (!%p9448_p1)
}
  0x3c   : > { %s9558_s7 = smov 192   ;;  %s9559_s8 = smov 12  }
  0x3d   : > { %8425 = dma.hbm_to_vmem [thread:$0]  (!%p9644_p11), %s12403_s2, 9216, %s9648_s28, [#allocation6], %s9558_s7, %s9558_s7, %s9559_s8  }
  0x3e   : > { %s9703_s11 = sadd.s32 1, %s9552_s18   ;;  %s28_s13 = sadd.s32 1, %s9548_s17 }
  0x3f   : > { %s25_s12 = ssub.s32 %s9552_s18, %s9703_s11  ;;  %p35_p6 = scmp.ne.s32.totalorder %s9548_s17, %s9544_s16 }
  0x40   : > { %p26_p13 = scmp.eq.s32.totalorder %s25_s12, 0  ;;  %p36_p10 = scmp.eq.s32.totalorder %s9552_s18, 0 }
  0x41   : > { %p12551_p5 = scmp.eq.s32.totalorder %s9614_s19, 1  ;;  %p8436_p9 = scmp.lt.s32.totalorder %s9552_s18, 2 }
  0x42   : > { %s9712_s14 = scalar_select %p26_p13, %s9548_s17, %s28_s13  }
  0x43   : > { %p37_p3 = por %p36_p10, %p35_p6  ;;  %p9716_p7 = por %p12551_p5, %p35_p6 }
  0x44   : > { %s183_s26 = sand.u32 1, %s9548_s17   ;;  %s8404_s28 = smul.u32 6144, %s9552_s18 }
  0x45   : > { %s12552_s20 = scalar_select %p9716_p7, 1, 0 }
  0x46   : > { %s8403_s24 = smul.u32 384, %s183_s26  ;;  %p9723_p11 = pnand %p8436_p9, %p37_p3 }
  0x47   : > { %s9730_s5 = scalar_lea.hbm %s12401_s0, %s8404_s28  ;;  %s9734_s7 = scalar_lea.sflag [#allocation3], %s183_s26 }
  0x48   : > { %s187_s6 = scalar_lea.vmem [#allocation2], %s8403_s24  ;;  %s9452_s8 = scalar_lea.hbm %s9730_s5, 6144 }
  0x49   : > { %s194_s25 = sshll.u32 %s187_s6, 4  ;;  %p9453_p12 = scmp.ne.s32.totalorder %s9730_s5, %s9452_s8  ;;  %s9732_s25 = int_to_ptr.vmem [resolvable:$true] %s194_s25 }
  0x4a   : > { %p9454_p0 = pneg %p9723_p11  ;;  %s9457_s12 = scalar_lea.hbm %s12401_s0, 12288 }
  0x4b   : > { %p9458_p13 = scmp.lt.u32.totalorder %s9730_s5, %s12401_s0  ;;  %p9459_p6 = scmp.lt.u32.totalorder %s9457_s12, %s9452_s8 }
  0x4c   : > { %p9455_p2 = pnand %p9454_p0, %p9453_p12  ;;  %p9461_p3 = scmp.lt.u32.totalorder %s9452_s8, %s9730_s5 }
  0x4d   : > { %p9460_p10 = por %p9459_p6, %p9458_p13 }
  0x4e   : > { %p9456_p1 = pneg %p9455_p2 }
  0x4f   : > { %p9462_p5 = por %p9461_p3, %p9460_p10 }
  0x51   : > { %p9463_p9 = pnand %p9462_p5, %p9456_p1 }
  0x53   : > { %9466 = shalt.err (!%p9463_p9)
}
  0x54   : > { %s9467_s26 = scalar_lea.vmem %s9732_s25, 6144  ;;  %s9560_s24 = smov [#allocation2]  }
  0x55   : > { %p9468_p12 = scmp.ne.s32.totalorder %s9732_s25, %s9467_s26  ;;  %s9472_s29 = sshll.u32 %s9560_s24, 4  ;;  %s9473_s29 = int_to_ptr.vmem [resolvable:$false] %s9472_s29 }
  0x56   : > { %s9474_s30 = scalar_lea.vmem %s9473_s29, 12288  ;;  %p9475_p4 = scmp.lt.s32.totalorder %s9732_s25, %s9473_s29 }
  0x57   : > { %p9470_p2 = pnand %p9468_p12, %p9454_p0  ;;  %p9476_p13 = scmp.lt.s32.totalorder %s9474_s30, %s9467_s26 }
  0x59   : > { %p9471_p7 = pneg %p9470_p2  ;;  %p9477_p6 = por %p9476_p13, %p9475_p4 }
  0x5b   : > { %p9478_p10 = pnand %p9477_p6, %p9471_p7 }
  0x5d   : > { %9481 = shalt.err (!%p9478_p10)
}
  0x5e   : > { %s9561_s6 = smov 384   ;;  %s9562_s8 = smov 24  }
  0x5f   : > { %8429 = dma.hbm_to_vmem [thread:$0]  (!%p9723_p11), %s9730_s5, 6144, %s9732_s25, %s9734_s7, %s9561_s6, %s9561_s6, %s9562_s8  }
  0x60   : > { %206 = sbr.rel (%p9633_p8) target bundleno = 4885 (0x1315), region = 36 }
  0x67   : > { %s9765_s9 = sand.u32 1, %s9544_s16   ;;  %p12554_p4 = scmp.ne.s32.totalorder %s12547_s21, 0 }
  0x68   : > { %s8405_s10 = smul.u32 384, %s9765_s9  ;;  %s209_s12 = scalar_lea.sflag [#allocation3], %s9765_s9 }
  0x6a   : > { %s9771_s13 = scalar_lea.vmem [#allocation2], %s8405_s10 }
  0x6b   : > { %9527 = dma.done.wait (%p12554_p4), %s209_s12, 6144  }
  0x6c   : > { %9529 = vsyncadd (%p12554_p4), %s209_s12, 4294961152  ;;  %p12555_p7 = scmp.eq.s32.totalorder %s9614_s19, 0 }
  0x6e   : > { %9531 = dma.done.wait (%p12555_p7), [#allocation6], 36864   ;;  %p12556_p8 = pmov %p12555_p7 }
  0x6f   : > { %v12409_v0 = vmov 0   ;;  %v8604_v1 = vld [vmem:[#allocation5 + $0x4] ss:$36 sps:$4 sm:$0xff]   ;;  %v8610_v5 = vld [vmem:[#allocation5 + $0x4c] ss:$36 sps:$4 sm:$0xff]   ;;  %v257_v46 = vld [vmem:[%s9771_s13 + $0x58] sm:$0xff] }
  0x70   : > { %9533 = vsyncadd (%p12556_p8), [#allocation6], 4294930432  ;;  %1807 = vmatprep.mubr.bf16.mxu1 %v12409_v0  ;;  %v8606_v2 = vld [vmem:[#allocation5 + $0x484] ss:$36 sps:$4 sm:$0xff]   ;;  %1662 = vmatprep.subr.bf16.mxu0 %v8604_v1  ;;  %v8612_v6 = vld [vmem:[#allocation5 + $0x4cc] ss:$36 sps:$4 sm:$0xff]  }
  0x71   : > { %v8608_v3 = vld [vmem:[#allocation5] ss:$36 sps:$4 sm:$0xff]   ;;  %1775 = vmatprep.subr.bf16.mxu1 %v8606_v2  ;;  %v8614_v7 = vld [vmem:[#allocation5 + $0x48] ss:$36 sps:$4 sm:$0xff]   ;;  %v8616_v9 = vld [vmem:[#allocation5 + $0x94] ss:$36 sps:$4 sm:$0xff]  }
  0x72   : > { %v8609_v4 = vld [vmem:[#allocation5 + $0x480] ss:$36 sps:$4 sm:$0xff]   ;;  %1663 = vmatpush1.bf16.msra.mxu0 %v8608_v3  ;;  %v8615_v8 = vld [vmem:[#allocation5 + $0x4c8] ss:$36 sps:$4 sm:$0xff]   ;;  %v8618_v10 = vld [vmem:[#allocation5 + $0x514] ss:$36 sps:$4 sm:$0xff]  }
  0x73   : > { %1776 = vmatpush1.bf16.msra.mxu1 %v8609_v4  ;;  %1664 = vmatprep.subr.bf16.mxu0 %v8610_v5  ;;  %v8620_v11 = vld [vmem:[#allocation5 + $0x90] ss:$36 sps:$4 sm:$0xff]   ;;  %v8622_v13 = vld [vmem:[#allocation5 + $0xdc] ss:$36 sps:$4 sm:$0xff]   ;;  %v8628_v17 = vld [vmem:[#allocation5 + $0x124] ss:$36 sps:$4 sm:$0xff]  }
  0x74   : > { %1777 = vmatprep.subr.bf16.mxu1 %v8612_v6  ;;  %v8621_v12 = vld [vmem:[#allocation5 + $0x510] ss:$36 sps:$4 sm:$0xff]   ;;  %v8624_v14 = vld [vmem:[#allocation5 + $0x55c] ss:$36 sps:$4 sm:$0xff]   ;;  %v8630_v18 = vld [vmem:[#allocation5 + $0x5a4] ss:$36 sps:$4 sm:$0xff]  }
  0x75   : > { %v8626_v15 = vld [vmem:[#allocation5 + $0xd8] ss:$36 sps:$4 sm:$0xff]   ;;  %v8632_v19 = vld [vmem:[#allocation5 + $0x120] ss:$36 sps:$4 sm:$0xff]   ;;  %v8634_v21 = vld [vmem:[#allocation5 + $0x16c] ss:$36 sps:$4 sm:$0xff]  }
  0x76   : > { %1665 = vmatpush1.bf16.msra.mxu0 %v8614_v7  ;;  %v8627_v16 = vld [vmem:[#allocation5 + $0x558] ss:$36 sps:$4 sm:$0xff]   ;;  %v8633_v20 = vld [vmem:[#allocation5 + $0x5a0] ss:$36 sps:$4 sm:$0xff]   ;;  %v8636_v22 = vld [vmem:[#allocation5 + $0x5ec] ss:$36 sps:$4 sm:$0xff]  }
  0x77   : > { %1778 = vmatpush1.bf16.msra.mxu1 %v8615_v8  ;;  %1666 = vmatprep.subr.bf16.mxu0 %v8616_v9  ;;  %v8638_v23 = vld [vmem:[#allocation5 + $0x168] ss:$36 sps:$4 sm:$0xff]   ;;  %v8640_v25 = vld [vmem:[#allocation5 + $0x1b4] ss:$36 sps:$4 sm:$0xff]   ;;  %v8646_v29 = vld [vmem:[#allocation5 + $0x1fc] ss:$36 sps:$4 sm:$0xff]  }
  0x78   : > { %1779 = vmatprep.subr.bf16.mxu1 %v8618_v10  ;;  %v8639_v24 = vld [vmem:[#allocation5 + $0x5e8] ss:$36 sps:$4 sm:$0xff]   ;;  %v8642_v26 = vld [vmem:[#allocation5 + $0x634] ss:$36 sps:$4 sm:$0xff]   ;;  %v8648_v30 = vld [vmem:[#allocation5 + $0x67c] ss:$36 sps:$4 sm:$0xff]  }
  0x79   : > { %v8644_v27 = vld [vmem:[#allocation5 + $0x1b0] ss:$36 sps:$4 sm:$0xff]   ;;  %v8650_v31 = vld [vmem:[#allocation5 + $0x1f8] ss:$36 sps:$4 sm:$0xff]   ;;  %v8652_v33 = vld [vmem:[#allocation5 + $0x244] ss:$36 sps:$4 sm:$0xff]  }
  0x7a   : > { %1667 = vmatpush1.bf16.msra.mxu0 %v8620_v11  ;;  %v8645_v28 = vld [vmem:[#allocation5 + $0x630] ss:$36 sps:$4 sm:$0xff]   ;;  %v8651_v32 = vld [vmem:[#allocation5 + $0x678] ss:$36 sps:$4 sm:$0xff]   ;;  %v251_v35 = vld [vmem:[%s9771_s13 + $0x28] sm:$0xff]  ;;  %vm12457_vm0 = vcmask 523264  }
  0x7b   : > { %1780 = vmatpush1.bf16.msra.mxu1 %v8621_v12  ;;  %1668 = vmatprep.subr.bf16.mxu0 %v8622_v13  ;;  %v248_v34 = vld [vmem:[%s9771_s13 + $0x10] sm:$0xff]  ;;  %v8654_v38 = vld [vmem:[#allocation5 + $0x8] ss:$36 sps:$4 sm:$0xff]   ;;  %v8657_v39 = vld [vmem:[#allocation5 + $0x240] ss:$36 sps:$4 sm:$0xff]   ;;  %s9564_s21 = smov 64  }
  0x7c   : > { %1781 = vmatprep.subr.bf16.mxu1 %v8624_v14  ;;  %v8656_v36 = vld [vmem:[#allocation5 + $0xc] ss:$36 sps:$4 sm:$0xff]   ;;  %v9784_v37 = vpack.c.bf16 %v251_v35, %v248_v34  ;;  %v8662_v41 = vld [vmem:[#allocation5 + $0x54] ss:$36 sps:$4 sm:$0xff]   ;;  %v254_v45 = vld [vmem:[%s9771_s13 + $0x40] sm:$0xff]  ;;  %s12232_s5 = scalar_lea.vmem [#allocation8], %s8405_s10 }
  0x7d   : > { %v8658_v40 = vld [vmem:[#allocation5 + $0x28c] ss:$36 sps:$4 sm:$0xff]   ;;  %v8664_v44 = vld [vmem:[#allocation5 + $0x2d4] ss:$36 sps:$4 sm:$0xff]   ;;  %v8668_v47 = vld [vmem:[#allocation5 + $0x9c] ss:$36 sps:$4 sm:$0xff]   ;;  %v9790_v48 = vpack.c.bf16 %v257_v46, %v254_v45 }
  0x7e   : > { %1669 = vmatpush1.bf16.msra.mxu0 %v8626_v15  ;;  %v8660_v42 = vld [vmem:[#allocation5 + $0x50] ss:$36 sps:$4 sm:$0xff]   ;;  %v8663_v43 = vld [vmem:[#allocation5 + $0x288] ss:$36 sps:$4 sm:$0xff]   ;;  %v8666_v49 = vld [vmem:[#allocation5 + $0x98] ss:$36 sps:$4 sm:$0xff]  }
  0x7f   : > { %1782 = vmatpush1.bf16.msra.mxu1 %v8627_v16  ;;  %1670 = vmatprep.subr.bf16.mxu0 %v8628_v17  ;;  %v8669_v50 = vld [vmem:[#allocation5 + $0x2d0] ss:$36 sps:$4 sm:$0xff]   ;;  %v8670_v51 = vld [vmem:[#allocation5 + $0x31c] ss:$36 sps:$4 sm:$0xff]   ;;  %v8674_v52 = vld [vmem:[#allocation5 + $0xe4] ss:$36 sps:$4 sm:$0xff]  }
  0x80   : > { %1783 = vmatprep.subr.bf16.mxu1 %v8630_v18  ;;  %v8672_v53 = vld [vmem:[#allocation5 + $0xe0] ss:$36 sps:$4 sm:$0xff]   ;;  %v8675_v54 = vld [vmem:[#allocation5 + $0x318] ss:$36 sps:$4 sm:$0xff]   ;;  %v260_v56 = vld [vmem:[%s9771_s13 + $0x70] sm:$0xff]  ;;  %s8406_s25 = smul.u32 6144, %s9614_s19 }
  0x81   : > { %v8676_v55 = vld [vmem:[#allocation5 + $0x364] ss:$36 sps:$4 sm:$0xff]   ;;  %v8680_v58 = vld [vmem:[#allocation5 + $0x12c] ss:$36 sps:$4 sm:$0xff]   ;;  %v8686_v3 = vld [vmem:[#allocation5 + $0x174] ss:$36 sps:$4 sm:$0xff]  }
  0x82   : > { %1671 = vmatpush1.bf16.msra.mxu0 %v8632_v19  ;;  %v263_v57 = vld [vmem:[%s9771_s13 + $0x88] sm:$0xff]  ;;  %v250_v60 = vld [vmem:[%s9771_s13 + $0x20] sm:$0xff]  ;;  %v8684_v4 = vld [vmem:[#allocation5 + $0x170] ss:$36 sps:$4 sm:$0xff]   ;;  %s6907_s7 = sshll.u32 %s12232_s5, 4  ;;  %s12352_s24 = scalar_lea.hbm %s12405_s4, %s8406_s25  ;;  %s12354_s7 = int_to_ptr.vmem [resolvable:$true] %s6907_s7 }
  0x83   : > { %1784 = vmatpush1.bf16.msra.mxu1 %v8633_v20  ;;  %1672 = vmatprep.subr.bf16.mxu0 %v8634_v21  ;;  %v247_v59 = vld [vmem:[%s9771_s13 + $0x8] sm:$0xff]  ;;  %v9800_v62 = vpack.c.bf16 %v263_v57, %v260_v56  ;;  %v8681_v1 = vld [vmem:[#allocation5 + $0x360] ss:$36 sps:$4 sm:$0xff]   ;;  %v269_v7 = vld [vmem:[%s9771_s13 + $0xb8] sm:$0xff]  ;;  %s6894_s19 = scalar_lea.sflag [#allocation4], %s9765_s9  ;;  %s9482_s29 = scalar_lea.vmem %s12354_s7, 6144 }
  0x84   : > { %1785 = vmatprep.subr.bf16.mxu1 %v8636_v22  ;;  %v9798_v61 = vpack.c.bf16 %v250_v60, %v247_v59  ;;  %v8678_v63 = vld [vmem:[#allocation5 + $0x128] ss:$36 sps:$4 sm:$0xff]   ;;  %v266_v6 = vld [vmem:[%s9771_s13 + $0xa0] sm:$0xff]  ;;  %v8688_v8 = vld [vmem:[#allocation5 + $0x3f4] ss:$36 sps:$4 sm:$0xff]   ;;  %p9483_p11 = scmp.ne.s32.totalorder %s12354_s7, %s9482_s29  ;;  %p13050_p0 = scmp.ne.s32.totalorder %s12552_s20, 0 }
  0x85   : > { %v8682_v2 = vld [vmem:[#allocation5 + $0x3ac] ss:$36 sps:$4 sm:$0xff]   ;;  %v8692_v9 = vld [vmem:[#allocation5 + $0x1bc] ss:$36 sps:$4 sm:$0xff]   ;;  %v9807_v10 = vpack.c.bf16 %v269_v7, %v266_v6  ;;  %v8698_v14 = vld [vmem:[#allocation5 + $0x204] ss:$36 sps:$4 sm:$0xff]  }
  0x86   : > { %1673 = vmatpush1.bf16.msra.mxu0 %v8638_v23  ;;  %1694 = vmatprep.mubr.bf16.mxu0 %v9798_v61  ;;  %v8687_v5 = vld [vmem:[#allocation5 + $0x3a8] ss:$36 sps:$4 sm:$0xff]   ;;  %v8690_v11 = vld [vmem:[#allocation5 + $0x1b8] ss:$36 sps:$4 sm:$0xff]   ;;  %v8693_v12 = vld [vmem:[#allocation5 + $0x3f0] ss:$36 sps:$4 sm:$0xff]   ;;  %p9484_p1 = pnand %p9483_p11, %p13050_p0 }
  0x87   : > { %1786 = vmatpush1.bf16.msra.mxu1 %v8639_v24  ;;  %1674 = vmatprep.subr.bf16.mxu0 %v8640_v25  ;;  %v8694_v13 = vld [vmem:[#allocation5 + $0x43c] ss:$36 sps:$4 sm:$0xff]   ;;  %v272_v19 = vld [vmem:[%s9771_s13 + $0xd0] sm:$0xff]  ;;  %v275_v20 = vld [vmem:[%s9771_s13 + $0xe8] sm:$0xff]  ;;  %s9565_s30 = smov [#allocation8]  }
  0x88   : > { %1787 = vmatprep.subr.bf16.mxu1 %v8642_v26  ;;  %v8696_v15 = vld [vmem:[#allocation5 + $0x200] ss:$36 sps:$4 sm:$0xff]   ;;  %v8699_v16 = vld [vmem:[#allocation5 + $0x438] ss:$36 sps:$4 sm:$0xff]   ;;  %v8702_v21 = vld [vmem:[#allocation5 + $0x24c] ss:$36 sps:$4 sm:$0xff]   ;;  %v9818_v25 = vpack.c.bf16 %v275_v20, %v272_v19  ;;  %p9485_p3 = pneg %p9484_p1 }
  0x89   : > { %v246_v17 = vld [vmem:[%s9771_s13] sm:$0xff]  ;;  %v249_v18 = vld [vmem:[%s9771_s13 + $0x18] sm:$0xff]  ;;  %v256_v26 = vld [vmem:[%s9771_s13 + $0x50] sm:$0xff]  ;;  %s9486_s6 = sshll.u32 %s9565_s30, 4  ;;  %s9487_s6 = int_to_ptr.vmem [resolvable:$false] %s9486_s6 }
  0x8a   : > { %1675 = vmatpush1.bf16.msra.mxu0 %v8644_v27  ;;  %v8705_v22 = vld [vmem:[#allocation5 + $0x14] ss:$36 sps:$4 sm:$0xff]   ;;  %v9816_v24 = vpack.c.bf16 %v249_v18, %v246_v17  ;;  %v8700_v27 = vld [vmem:[#allocation5 + $0x248] ss:$36 sps:$4 sm:$0xff]   ;;  %v262_v46 = vld [vmem:[%s9771_s13 + $0x80] sm:$0xff]  ;;  %s9488_s8 = scalar_lea.vmem %s9487_s6, 12288  ;;  %p9489_p5 = scmp.lt.s32.totalorder %s12354_s7, %s9487_s6 }
  0x8b   : > { %1788 = vmatpush1.bf16.msra.mxu1 %v8645_v28  ;;  %1676 = vmatprep.subr.bf16.mxu0 %v8646_v29  ;;  %v253_v23 = vld [vmem:[%s9771_s13 + $0x38] sm:$0xff]  ;;  %v8703_v28 = vld [vmem:[#allocation5 + $0x10] ss:$36 sps:$4 sm:$0xff]   ;;  %v255_v35 = vld [vmem:[%s9771_s13 + $0x48] sm:$0xff]  ;;  %p9490_p9 = scmp.lt.s32.totalorder %s9488_s8, %s9482_s29 }
  0x8c   : > { %1789 = vmatprep.subr.bf16.mxu1 %v8648_v30  ;;  %v8708_v29 = vld [vmem:[#allocation5 + $0x294] ss:$36 sps:$4 sm:$0xff]   ;;  %v8711_v30 = vld [vmem:[#allocation5 + $0x5c] ss:$36 sps:$4 sm:$0xff]   ;;  %v259_v45 = vld [vmem:[%s9771_s13 + $0x68] sm:$0xff] }
  0x8d   : > { %v252_v34 = vld [vmem:[%s9771_s13 + $0x30] sm:$0xff]  ;;  %v287_v56 = vld [vmem:[%s9771_s13 + $0x148] sm:$0xff]  ;;  %v8733_v7 = vld [vmem:[#allocation5 + $0x178] ss:$36 sps:$4 sm:$0xff]   ;;  %p9491_p12 = por %p9490_p9, %p9489_p5 }
  0x8e   : > { %1677 = vmatpush1.bf16.msra.mxu0 %v8650_v31  ;;  %v8706_v31 = vld [vmem:[#allocation5 + $0x290] ss:$36 sps:$4 sm:$0xff]   ;;  %v8739_v17 = vld [vmem:[#allocation5 + $0x1c0] ss:$36 sps:$4 sm:$0xff]   ;;  %v271_v20 = vld [vmem:[%s9771_s13 + $0xc8] sm:$0xff] }
  0x8f   : > { %1790 = vmatpush1.bf16.msra.mxu1 %v8651_v32  ;;  %1678 = vmatprep.subr.bf16.mxu0 %v8652_v33  ;;  %v9821_v32 = vpack.c.bf16 %v256_v26, %v253_v23  ;;  %v8709_v33 = vld [vmem:[#allocation5 + $0x58] ss:$36 sps:$4 sm:$0xff]   ;;  %v8726_v57 = vld [vmem:[#allocation5 + $0x36c] ss:$36 sps:$4 sm:$0xff]   ;;  %v8742_v26 = vld [vmem:[#allocation5 + $0x440] ss:$36 sps:$4 sm:$0xff]   ;;  %p9492_p2 = pnand %p9491_p12, %p9485_p3 }
  0x90   : > { %1888 = vmatprep.subr.bf16.mxu1 %v8656_v36  ;;  %v278_v36 = vld [vmem:[%s9771_s13 + $0x100] sm:$0xff]  ;;  %v8730_v6 = vld [vmem:[#allocation5 + $0x3b0] ss:$36 sps:$4 sm:$0xff]  }
  0x91   : > { %v8747_v23 = vld [vmem:[#allocation5 + $0x20c] ss:$36 sps:$4 sm:$0xff]  }
  0x92   : > { %1808 = vmatmul.mubr.bf16.vlgmr.msra.gmra.mrb[0].mxu1 %v9784_v37  ;;  %1679 = vmatpush1.bf16.msra.mxu0 %v8657_v39  ;;  %v8714_v39 = vld [vmem:[#allocation5 + $0x2dc] ss:$36 sps:$4 sm:$0xff]  }
  0x93   : > { %1889 = vmatpush1.bf16.msra.mxu1 %v8654_v38  ;;  %1680 = vmatprep.subr.bf16.mxu0 %v8658_v40  ;;  %v281_v38 = vld [vmem:[%s9771_s13 + $0x118] sm:$0xff]  ;;  %v8717_v40 = vld [vmem:[#allocation5 + $0xa4] ss:$36 sps:$4 sm:$0xff]  }
  0x94   : > { %1890 = vmatprep.subr.bf16.mxu1 %v8662_v41  ;;  %1817 = vmatprep.mubr.bf16.mxu1 %v12409_v0  ;;  %v8712_v41 = vld [vmem:[#allocation5 + $0x2d8] ss:$36 sps:$4 sm:$0xff]  }
  0x96   : > { %1681 = vmatpush1.bf16.msra.mxu0 %v8663_v43  ;;  %v9831_v43 = vpack.c.bf16 %v255_v35, %v252_v34  ;;  %v277_v34 = vld [vmem:[%s9771_s13 + $0xf8] sm:$0xff]  ;;  %v280_v35 = vld [vmem:[%s9771_s13 + $0x110] sm:$0xff] }
  0x97   : > { %1891 = vmatpush1.bf16.msra.mxu1 %v8660_v42  ;;  %1682 = vmatprep.subr.bf16.mxu0 %v8664_v44  ;;  %v8715_v42 = vld [vmem:[#allocation5 + $0xa0] ss:$36 sps:$4 sm:$0xff]   ;;  %v9833_v44 = vpack.c.bf16 %v281_v38, %v278_v36  ;;  %v8748_v38 = vld [vmem:[#allocation5 + $0x488] ss:$36 sps:$4 sm:$0xff]  }
  0x98   : > { %1892 = vmatprep.subr.bf16.mxu1 %v8668_v47  ;;  %v8720_v47 = vld [vmem:[#allocation5 + $0x324] ss:$36 sps:$4 sm:$0xff]  }
  0x9a   : > { %1818 = vmatmul.mubr.bf16.gmra.mrb[4].mxu1 %v9790_v48  ;;  %1683 = vmatpush1.bf16.msra.mxu0 %v8669_v50  ;;  %v8718_v50 = vld [vmem:[#allocation5 + $0x320] ss:$36 sps:$4 sm:$0xff]  }
  0x9b   : > { %1893 = vmatpush1.bf16.msra.mxu1 %v8666_v49  ;;  %1684 = vmatprep.subr.bf16.mxu0 %v8670_v51  ;;  %v8723_v49 = vld [vmem:[#allocation5 + $0xec] ss:$36 sps:$4 sm:$0xff]  }
  0x9c   : > { %1894 = vmatprep.subr.bf16.mxu1 %v8674_v52  ;;  %1827 = vmatprep.mubr.bf16.mxu1 %v12409_v0  ;;  %v8721_v51 = vld [vmem:[#allocation5 + $0xe8] ss:$36 sps:$4 sm:$0xff]   ;;  %v9837_v52 = vpack.c.bf16 %v262_v46, %v259_v45  ;;  %v276_v45 = vld [vmem:[%s9771_s13 + $0xf0] sm:$0xff] }
  0x9d   : > { %v279_v46 = vld [vmem:[%s9771_s13 + $0x108] sm:$0xff] }
  0x9e   : > { %1685 = vmatpush1.bf16.msra.mxu0 %v8675_v54  ;;  %v261_v54 = vld [vmem:[%s9771_s13 + $0x78] sm:$0xff] }
  0x9f   : > { %1895 = vmatpush1.bf16.msra.mxu1 %v8672_v53  ;;  %1686 = vmatprep.subr.bf16.mxu0 %v8676_v55  ;;  %v258_v53 = vld [vmem:[%s9771_s13 + $0x60] sm:$0xff]  ;;  %v284_v55 = vld [vmem:[%s9771_s13 + $0x130] sm:$0xff] }
  0xa0   : > { %1896 = vmatprep.subr.bf16.mxu1 %v8680_v58  ;;  %v8729_v58 = vld [vmem:[#allocation5 + $0x134] ss:$36 sps:$4 sm:$0xff]   ;;  %v9847_v59 = vpack.c.bf16 %v261_v54, %v258_v53  ;;  %v9849_v60 = vpack.c.bf16 %v287_v56, %v284_v55  ;;  %v286_v53 = vld [vmem:[%s9771_s13 + $0x140] sm:$0xff]  ;;  %v9891_v55 = vpack.c.bf16 %v279_v46, %v276_v45 }
  0xa1   : > { %v8768_v54 = vld [vmem:[#allocation5 + $0x51c] ss:$36 sps:$4 sm:$0xff]  }
  0xa2   : > { %1828 = vmatmul.mubr.bf16.gmra.mrb[8].mxu1 %v9800_v62  ;;  %1687 = vmatpush1.bf16.msra.mxu0 %v8681_v1  ;;  %v268_v1 = vld [vmem:[%s9771_s13 + $0xb0] sm:$0xff]  ;;  %v8760_v56 = vld [vmem:[#allocation5 + $0x2e0] ss:$36 sps:$4 sm:$0xff]   ;;  %v8802_v46 = vld [vmem:[#allocation5 + $0x4d8] ss:$36 sps:$4 sm:$0xff]  }
  0xa3   : > { %1897 = vmatpush1.bf16.msra.mxu1 %v8678_v63  ;;  %1688 = vmatprep.subr.bf16.mxu0 %v8682_v2  ;;  %v265_v63 = vld [vmem:[%s9771_s13 + $0x98] sm:$0xff]  ;;  %v8724_v2 = vld [vmem:[#allocation5 + $0x368] ss:$36 sps:$4 sm:$0xff]  }
  0xa4   : > { %1898 = vmatprep.subr.bf16.mxu1 %v8686_v3  ;;  %1837 = vmatprep.mubr.bf16.mxu1 %v12409_v0  ;;  %v8727_v3 = vld [vmem:[#allocation5 + $0x130] ss:$36 sps:$4 sm:$0xff]   ;;  %v8801_v45 = vld [vmem:[#allocation5 + $0x1c] ss:$36 sps:$4 sm:$0xff]  }
  0xa6   : > { %1689 = vmatpush1.bf16.msra.mxu0 %v8687_v5  ;;  %v8735_v5 = vld [vmem:[#allocation5 + $0x17c] ss:$36 sps:$4 sm:$0xff]  }
  0xa7   : > { %1899 = vmatpush1.bf16.msra.mxu1 %v8684_v4  ;;  %1690 = vmatprep.subr.bf16.mxu0 %v8688_v8  ;;  %v8732_v4 = vld [vmem:[#allocation5 + $0x3b4] ss:$36 sps:$4 sm:$0xff]   ;;  %v9853_v8 = vpack.c.bf16 %v268_v1, %v265_v63  ;;  %v8763_v63 = vld [vmem:[#allocation5 + $0x328] ss:$36 sps:$4 sm:$0xff]   ;;  %v282_v1 = vld [vmem:[%s9771_s13 + $0x120] sm:$0xff] }
  0xa8   : > { %1900 = vmatprep.subr.bf16.mxu1 %v8692_v9  ;;  %v264_v9 = vld [vmem:[%s9771_s13 + $0x90] sm:$0xff] }
  0xaa   : > { %1838 = vmatmul.mubr.bf16.gmra.mrb[12].mxu1 %v9807_v10  ;;  %1691 = vmatpush1.bf16.msra.mxu0 %v8693_v12  ;;  %v290_v12 = vld [vmem:[%s9771_s13 + $0x160] sm:$0xff] }
  0xab   : > { %1901 = vmatpush1.bf16.msra.mxu1 %v8690_v11  ;;  %1692 = vmatprep.subr.bf16.mxu0 %v8694_v13  ;;  %v267_v11 = vld [vmem:[%s9771_s13 + $0xa8] sm:$0xff]  ;;  %v293_v13 = vld [vmem:[%s9771_s13 + $0x178] sm:$0xff] }
  0xac   : > { %1902 = vmatprep.subr.bf16.mxu1 %v8698_v14  ;;  %1847 = vmatprep.mubr.bf16.mxu1 %v12409_v0  ;;  %v8738_v14 = vld [vmem:[#allocation5 + $0x3fc] ss:$36 sps:$4 sm:$0xff]   ;;  %v9863_v18 = vpack.c.bf16 %v267_v11, %v264_v9  ;;  %v9865_v19 = vpack.c.bf16 %v293_v13, %v290_v12  ;;  %v8769_v12 = vld [vmem:[#allocation5 + $0x370] ss:$36 sps:$4 sm:$0xff]  }
  0xad   : > { %v8775_v9 = vld [vmem:[#allocation5 + $0x560] ss:$36 sps:$4 sm:$0xff]  }
  0xae   : > { %1693 = vmatpush1.bf16.msra.mxu0 %v8699_v16  ;;  %v8736_v16 = vld [vmem:[#allocation5 + $0x3f8] ss:$36 sps:$4 sm:$0xff]  }
  0xaf   : > { %1903 = vmatpush1.bf16.msra.mxu1 %v8696_v15  ;;  %2114 = vmatprep.subr.bf16.mxu0 %v8705_v22  ;;  %v8741_v15 = vld [vmem:[#allocation5 + $0x1c4] ss:$36 sps:$4 sm:$0xff]  }
  0xb0   : > { %1904 = vmatprep.subr.bf16.mxu1 %v8702_v21  ;;  %v274_v21 = vld [vmem:[%s9771_s13 + $0xe0] sm:$0xff] }
  0xb1   : > { %1695 = vmatmul.mubr.bf16.vlgmr.msra.gmra.mrb[0].mxu0 %v9816_v24  ;;  %v8744_v22 = vld [vmem:[#allocation5 + $0x444] ss:$36 sps:$4 sm:$0xff]  }
  0xb2   : > { %1848 = vmatmul.mubr.bf16.gmra.mrb[16].mxu1 %v9818_v25  ;;  %2115 = vmatpush1.bf16.msra.mxu0 %v8703_v28  ;;  %v8745_v28 = vld [vmem:[#allocation5 + $0x208] ss:$36 sps:$4 sm:$0xff]  }
  0xb3   : > { %1905 = vmatpush1.bf16.msra.mxu1 %v8700_v27  ;;  %2116 = vmatprep.subr.bf16.mxu0 %v8711_v30  ;;  %v9869_v27 = vpack.c.bf16 %v274_v21, %v271_v20  ;;  %v273_v30 = vld [vmem:[%s9771_s13 + $0xd8] sm:$0xff]  ;;  %v291_v20 = vld [vmem:[%s9771_s13 + $0x168] sm:$0xff] }
  0xb4   : > { %1906 = vmatprep.subr.bf16.mxu1 %v8708_v29  ;;  %1704 = vmatprep.mubr.bf16.mxu0 %v9821_v32  ;;  %v270_v29 = vld [vmem:[%s9771_s13 + $0xc0] sm:$0xff]  ;;  %v8784_v21 = vld [vmem:[#allocation5 + $0x5a8] ss:$36 sps:$4 sm:$0xff]  }
  0xb5   : > { %1857 = vmatprep.mubr.bf16.mxu1 %v12409_v0  ;;  %v9879_v36 = vpack.c.bf16 %v273_v30, %v270_v29  ;;  %v8783_v29 = vld [vmem:[#allocation5 + $0x44c] ss:$36 sps:$4 sm:$0xff]  }
  0xb6   : > { %2117 = vmatpush1.bf16.msra.mxu0 %v8709_v33  ;;  %v8753_v33 = vld [vmem:[#allocation5 + $0x254] ss:$36 sps:$4 sm:$0xff]  }
  0xb7   : > { %1907 = vmatpush1.bf16.msra.mxu1 %v8706_v31  ;;  %2118 = vmatprep.subr.bf16.mxu0 %v8717_v40  ;;  %v8750_v31 = vld [vmem:[#allocation5 + $0x48c] ss:$36 sps:$4 sm:$0xff]   ;;  %v8756_v40 = vld [vmem:[#allocation5 + $0x29c] ss:$36 sps:$4 sm:$0xff]  }
  0xb8   : > { %1908 = vmatprep.subr.bf16.mxu1 %v8714_v39  ;;  %v8751_v39 = vld [vmem:[#allocation5 + $0x250] ss:$36 sps:$4 sm:$0xff]  }
  0xb9   : > { %1705 = vmatmul.mubr.bf16.gmra.mrb[4].mxu0 %v9831_v43  ;;  %v8787_v30 = vld [vmem:[#allocation5 + $0x5f0] ss:$36 sps:$4 sm:$0xff]  }
  0xba   : > { %1858 = vmatmul.mubr.bf16.gmra.mrb[20].mxu1 %v9833_v44  ;;  %2119 = vmatpush1.bf16.msra.mxu0 %v8715_v42  ;;  %v8754_v42 = vld [vmem:[#allocation5 + $0x298] ss:$36 sps:$4 sm:$0xff]  }
  0xbb   : > { %1909 = vmatpush1.bf16.msra.mxu1 %v8712_v41  ;;  %2120 = vmatprep.subr.bf16.mxu0 %v8723_v49  ;;  %v9881_v41 = vpack.c.bf16 %v280_v35, %v277_v34  ;;  %v8759_v49 = vld [vmem:[#allocation5 + $0x4d4] ss:$36 sps:$4 sm:$0xff]  }
  0xbc   : > { %1910 = vmatprep.subr.bf16.mxu1 %v8720_v47  ;;  %1714 = vmatprep.mubr.bf16.mxu0 %v9837_v52  ;;  %v8757_v47 = vld [vmem:[#allocation5 + $0x4d0] ss:$36 sps:$4 sm:$0xff]   ;;  %v8790_v35 = vld [vmem:[#allocation5 + $0x638] ss:$36 sps:$4 sm:$0xff]  }
  0xbd   : > { %1867 = vmatprep.mubr.bf16.mxu1 %v12409_v0  ;;  %v8798_v34 = vld [vmem:[#allocation5 + $0x494] ss:$36 sps:$4 sm:$0xff]  }
  0xbe   : > { %2121 = vmatpush1.bf16.msra.mxu0 %v8721_v51  ;;  %v283_v51 = vld [vmem:[%s9771_s13 + $0x128] sm:$0xff] }
  0xbf   : > { %1911 = vmatpush1.bf16.msra.mxu1 %v8718_v50  ;;  %2122 = vmatprep.subr.bf16.mxu0 %v8729_v58  ;;  %v8762_v50 = vld [vmem:[#allocation5 + $0x2e4] ss:$36 sps:$4 sm:$0xff]   ;;  %v8765_v58 = vld [vmem:[#allocation5 + $0x32c] ss:$36 sps:$4 sm:$0xff]  }
  0xc0   : > { %1912 = vmatprep.subr.bf16.mxu1 %v8726_v57  ;;  %v9893_v57 = vpack.c.bf16 %v286_v53, %v283_v51  ;;  %v8814_v51 = vld [vmem:[#allocation5 + $0x568] ss:$36 sps:$4 sm:$0xff]   ;;  %v8822_v53 = vld [vmem:[#allocation5 + $0x5b4] ss:$36 sps:$4 sm:$0xff]  }
  0xc1   : > { %1715 = vmatmul.mubr.bf16.gmra.mrb[8].mxu0 %v9847_v59 }
  0xc2   : > { %1868 = vmatmul.mubr.bf16.gmra.mrb[24].mxu1 %v9849_v60  ;;  %2123 = vmatpush1.bf16.msra.mxu0 %v8727_v3  ;;  %v8766_v3 = vld [vmem:[#allocation5 + $0x518] ss:$36 sps:$4 sm:$0xff]  }
  0xc3   : > { %1913 = vmatpush1.bf16.msra.mxu1 %v8724_v2  ;;  %2124 = vmatprep.subr.bf16.mxu0 %v8735_v5  ;;  %v285_v2 = vld [vmem:[%s9771_s13 + $0x138] sm:$0xff]  ;;  %v8777_v5 = vld [vmem:[#allocation5 + $0x564] ss:$36 sps:$4 sm:$0xff]  }
  0xc4   : > { %1914 = vmatprep.subr.bf16.mxu1 %v8732_v4  ;;  %1724 = vmatprep.mubr.bf16.mxu0 %v9853_v8  ;;  %v8771_v4 = vld [vmem:[#allocation5 + $0x374] ss:$36 sps:$4 sm:$0xff]   ;;  %v9903_v11 = vpack.c.bf16 %v285_v2, %v282_v1  ;;  %v8832_v1 = vld [vmem:[#allocation5 + $0x640] ss:$36 sps:$4 sm:$0xff]   ;;  %v8840_v2 = vld [vmem:[#allocation5 + $0x68c] ss:$36 sps:$4 sm:$0xff]  }
  0xc5   : > { %1877 = vmatprep.mubr.bf16.mxu1 %v12409_v0 }
  0xc6   : > { %2125 = vmatpush1.bf16.msra.mxu0 %v8733_v7  ;;  %v292_v7 = vld [vmem:[%s9771_s13 + $0x170] sm:$0xff] }
  0xc7   : > { %1915 = vmatpush1.bf16.msra.mxu1 %v8730_v6  ;;  %2126 = vmatprep.subr.bf16.mxu0 %v8741_v15  ;;  %v289_v6 = vld [vmem:[%s9771_s13 + $0x158] sm:$0xff] }
  0xc8   : > { %1916 = vmatprep.subr.bf16.mxu1 %v8738_v14  ;;  %v9905_v13 = vpack.c.bf16 %v292_v7, %v289_v6  ;;  %v8774_v14 = vld [vmem:[#allocation5 + $0x3bc] ss:$36 sps:$4 sm:$0xff]   ;;  %v8807_v6 = vld [vmem:[#allocation5 + $0x64] ss:$36 sps:$4 sm:$0xff]  }
  0xc9   : > { %1725 = vmatmul.mubr.bf16.gmra.mrb[12].mxu0 %v9863_v18  ;;  %v8772_v15 = vld [vmem:[#allocation5 + $0x3b8] ss:$36 sps:$4 sm:$0xff]   ;;  %v8805_v7 = vld [vmem:[#allocation5 + $0x60] ss:$36 sps:$4 sm:$0xff]  }
  0xca   : > { %1878 = vmatmul.mubr.bf16.gmra.mrb[28].mxu1 %v9865_v19  ;;  %2127 = vmatpush1.bf16.msra.mxu0 %v8739_v17  ;;  %v8786_v17 = vld [vmem:[#allocation5 + $0x5ac] ss:$36 sps:$4 sm:$0xff]  }
  0xcb   : > { %1917 = vmatpush1.bf16.msra.mxu1 %v8736_v16  ;;  %2128 = vmatprep.subr.bf16.mxu0 %v8747_v23  ;;  %v288_v16 = vld [vmem:[%s9771_s13 + $0x150] sm:$0xff]  ;;  %v8780_v23 = vld [vmem:[#allocation5 + $0x404] ss:$36 sps:$4 sm:$0xff]  }
  0xcc   : > { %1918 = vmatprep.subr.bf16.mxu1 %v8744_v22  ;;  %1734 = vmatprep.mubr.bf16.mxu0 %v9869_v27  ;;  %v8789_v22 = vld [vmem:[#allocation5 + $0x5f4] ss:$36 sps:$4 sm:$0xff]  }
  0xcd   : > { %1920 = vmatprep.mubr.bf16.mxu1 %v9798_v61 }
  0xce   : > { %2129 = vmatpush1.bf16.msra.mxu0 %v8745_v28  ;;  %v8778_v28 = vld [vmem:[#allocation5 + $0x400] ss:$36 sps:$4 sm:$0xff]  }
  0xcf   : > { %1919 = vmatpush1.bf16.msra.mxu1 %v8742_v26  ;;  %2130 = vmatprep.subr.bf16.mxu0 %v8753_v33  ;;  %v9913_v26 = vpack.c.bf16 %v291_v20, %v288_v16  ;;  %v8781_v33 = vld [vmem:[#allocation5 + $0x448] ss:$36 sps:$4 sm:$0xff]   ;;  %v8825_v16 = vld [vmem:[#allocation5 + $0x13c] ss:$36 sps:$4 sm:$0xff]  }
  0xd0   : > { %2001 = vmatprep.subr.bf16.mxu1 %v8750_v31  ;;  %v8792_v31 = vld [vmem:[#allocation5 + $0x63c] ss:$36 sps:$4 sm:$0xff]   ;;  %v8831_v20 = vld [vmem:[#allocation5 + $0x184] ss:$36 sps:$4 sm:$0xff]  }
  0xd1   : > { %1735 = vmatmul.mubr.bf16.gmra.mrb[16].mxu0 %v9879_v36 }
  0xd2   : > { %1921 = vmatmul.mubr.bf16.vlgmr.msra.gmra.mrb[32].mxu1 %v9816_v24  ;;  %2131 = vmatpush1.bf16.msra.mxu0 %v8751_v39  ;;  %v8796_v39 = vld [vmem:[#allocation5 + $0x490] ss:$36 sps:$4 sm:$0xff]  }
  0xd3   : > { %2002 = vmatpush1.bf16.msra.mxu1 %v8748_v38  ;;  %2132 = vmatprep.subr.bf16.mxu0 %v8756_v40  ;;  %v8795_v38 = vld [vmem:[#allocation5 + $0x684] ss:$36 sps:$4 sm:$0xff]  }
  0xd4   : > { %1744 = vmatprep.mubr.bf16.mxu0 %v9881_v41  ;;  %1930 = vmatprep.mubr.bf16.mxu1 %v9821_v32  ;;  %v8793_v40 = vld [vmem:[#allocation5 + $0x680] ss:$36 sps:$4 sm:$0xff]  }
  0xd5   : > { %2003 = vmatprep.subr.bf16.mxu1 %v8759_v49  ;;  %v8808_v49 = vld [vmem:[#allocation5 + $0x520] ss:$36 sps:$4 sm:$0xff]  }
  0xd6   : > { %2133 = vmatpush1.bf16.msra.mxu0 %v8754_v42  ;;  %v8804_v42 = vld [vmem:[#allocation5 + $0x4dc] ss:$36 sps:$4 sm:$0xff]  }
  0xd7   : > { %2004 = vmatpush1.bf16.msra.mxu1 %v8757_v47  ;;  %2134 = vmatprep.subr.bf16.mxu0 %v8762_v50  ;;  %v8810_v47 = vld [vmem:[#allocation5 + $0x524] ss:$36 sps:$4 sm:$0xff]   ;;  %v8816_v50 = vld [vmem:[#allocation5 + $0x56c] ss:$36 sps:$4 sm:$0xff]  }
  0xd8   : > { %2005 = vmatprep.subr.bf16.mxu1 %v8768_v54  ;;  %v8820_v54 = vld [vmem:[#allocation5 + $0x5b0] ss:$36 sps:$4 sm:$0xff]  }
  0xd9   : > { %1745 = vmatmul.mubr.bf16.gmra.mrb[20].mxu0 %v9891_v55 }
  0xda   : > { %1931 = vmatmul.mubr.bf16.gmra.mrb[36].mxu1 %v9831_v43  ;;  %2135 = vmatpush1.bf16.msra.mxu0 %v8760_v56  ;;  %v8828_v56 = vld [vmem:[#allocation5 + $0x5fc] ss:$36 sps:$4 sm:$0xff]  }
  0xdb   : > { %1754 = vmatprep.mubr.bf16.mxu0 %v9893_v57  ;;  %2136 = vmatprep.subr.bf16.mxu0 %v8765_v58  ;;  %v8826_v58 = vld [vmem:[#allocation5 + $0x5f8] ss:$36 sps:$4 sm:$0xff]  }
  0xdc   : > { %1940 = vmatprep.mubr.bf16.mxu1 %v9837_v52  ;;  %2006 = vmatpush1.bf16.msra.mxu1 %v8766_v3  ;;  %v8838_v3 = vld [vmem:[#allocation5 + $0x688] ss:$36 sps:$4 sm:$0xff]  }
  0xdd   : > { %2007 = vmatprep.subr.bf16.mxu1 %v8777_v5  ;;  %v8799_v5 = vld [vmem:[#allocation5 + $0x18] ss:$36 sps:$4 sm:$0xff]  }
  0xde   : > { %2137 = vmatpush1.bf16.msra.mxu0 %v8763_v63  ;;  %v8834_v63 = vld [vmem:[#allocation5 + $0x644] ss:$36 sps:$4 sm:$0xff]  }
  0xdf   : > { %2138 = vmatprep.subr.bf16.mxu0 %v8771_v4  ;;  %v8868_v4 = vld [vmem:[#allocation5 + $0x260] ss:$36 sps:$4 sm:$0xff]  }
  0xe0   : > { %2008 = vmatpush1.bf16.msra.mxu1 %v8775_v9  ;;  %v8813_v9 = vld [vmem:[#allocation5 + $0xac] ss:$36 sps:$4 sm:$0xff]  }
  0xe1   : > { %1755 = vmatmul.mubr.bf16.gmra.mrb[24].mxu0 %v9903_v11  ;;  %2009 = vmatprep.subr.bf16.mxu1 %v8786_v17  ;;  %v8823_v17 = vld [vmem:[#allocation5 + $0x138] ss:$36 sps:$4 sm:$0xff]  }
  0xe2   : > { %1941 = vmatmul.mubr.bf16.gmra.mrb[40].mxu1 %v9847_v59  ;;  %2139 = vmatpush1.bf16.msra.mxu0 %v8769_v12  ;;  %v8811_v12 = vld [vmem:[#allocation5 + $0xa8] ss:$36 sps:$4 sm:$0xff]  }
  0xe3   : > { %1764 = vmatprep.mubr.bf16.mxu0 %v9905_v13  ;;  %2140 = vmatprep.subr.bf16.mxu0 %v8774_v14  ;;  %v8819_v14 = vld [vmem:[#allocation5 + $0xf4] ss:$36 sps:$4 sm:$0xff]  }
  0xe4   : > { %1950 = vmatprep.mubr.bf16.mxu1 %v9853_v8  ;;  %2010 = vmatpush1.bf16.msra.mxu1 %v8784_v21  ;;  %v8829_v21 = vld [vmem:[#allocation5 + $0x180] ss:$36 sps:$4 sm:$0xff]  }
  0xe5   : > { %2011 = vmatprep.subr.bf16.mxu1 %v8789_v22  ;;  %v8837_v22 = vld [vmem:[#allocation5 + $0x1cc] ss:$36 sps:$4 sm:$0xff]  }
  0xe6   : > { %2141 = vmatpush1.bf16.msra.mxu0 %v8772_v15  ;;  %v8817_v15 = vld [vmem:[#allocation5 + $0xf0] ss:$36 sps:$4 sm:$0xff]  }
  0xe7   : > { %2142 = vmatprep.subr.bf16.mxu0 %v8780_v23  ;;  %v8835_v23 = vld [vmem:[#allocation5 + $0x1c8] ss:$36 sps:$4 sm:$0xff]  }
  0xe8   : > { %2012 = vmatpush1.bf16.msra.mxu1 %v8787_v30  ;;  %v8846_v30 = vld [vmem:[#allocation5 + $0x25c] ss:$36 sps:$4 sm:$0xff]  }
  0xe9   : > { %1765 = vmatmul.mubr.bf16.gmra.mrb[28].mxu0 %v9913_v26  ;;  %2013 = vmatprep.subr.bf16.mxu1 %v8792_v31  ;;  %v8844_v31 = vld [vmem:[#allocation5 + $0x258] ss:$36 sps:$4 sm:$0xff]  }
  0xea   : > { %1951 = vmatmul.mubr.bf16.gmra.mrb[44].mxu1 %v9863_v18  ;;  %2143 = vmatpush1.bf16.msra.mxu0 %v8778_v28  ;;  %v8843_v28 = vld [vmem:[#allocation5 + $0x214] ss:$36 sps:$4 sm:$0xff]  }
  0xeb   : > { %1960 = vmatprep.mubr.bf16.mxu1 %v9869_v27  ;;  %2144 = vmatprep.subr.bf16.mxu0 %v8783_v29  ;;  %v8841_v29 = vld [vmem:[#allocation5 + $0x210] ss:$36 sps:$4 sm:$0xff]  }
  0xec   : > { %2146 = vmatprep.mubr.bf16.mxu0 %v9798_v61  ;;  %2014 = vmatpush1.bf16.msra.mxu1 %v8790_v35  ;;  %v8870_v35 = vld [vmem:[#allocation5 + $0x2a8] ss:$36 sps:$4 sm:$0xff]  }
  0xed   : > { %2015 = vmatprep.subr.bf16.mxu1 %v8795_v38  ;;  %v8847_v38 = vld [vmem:[#allocation5 + $0x2a0] ss:$36 sps:$4 sm:$0xff]  }
  0xee   : > { %2145 = vmatpush1.bf16.msra.mxu0 %v8781_v33  ;;  %v8849_v33 = vld [vmem:[#allocation5 + $0x2a4] ss:$36 sps:$4 sm:$0xff]  }
  0xef   : > { %2227 = vmatprep.subr.bf16.mxu0 %v8798_v34  ;;  %v8869_v34 = vld [vmem:[#allocation5 + $0x20] ss:$36 sps:$4 sm:$0xff]  }
  0xf0   : > { %2016 = vmatpush1.bf16.msra.mxu1 %v8793_v40  ;;  %v8871_v40 = vld [vmem:[#allocation5 + $0x68] ss:$36 sps:$4 sm:$0xff]  }
  0xf1   : > { %2147 = vmatmul.mubr.bf16.vlgmr.msra.gmra.mrb[32].mxu0 %v9816_v24  ;;  %2340 = vmatprep.subr.bf16.mxu1 %v8801_v45  ;;  %v8855_v45 = vld [vmem:[#allocation5 + $0x334] ss:$36 sps:$4 sm:$0xff]  }
  0xf2   : > { %1961 = vmatmul.mubr.bf16.gmra.mrb[48].mxu1 %v9879_v36  ;;  %2156 = vmatprep.mubr.bf16.mxu0 %v9821_v32 }
  0xf3   : > { %1970 = vmatprep.mubr.bf16.mxu1 %v9881_v41  ;;  %2228 = vmatpush1.bf16.msra.mxu0 %v8796_v39  ;;  %v8852_v39 = vld [vmem:[#allocation5 + $0x2ec] ss:$36 sps:$4 sm:$0xff]  }
  0xf4   : > { %2229 = vmatprep.subr.bf16.mxu0 %v8804_v42  ;;  %v8850_v42 = vld [vmem:[#allocation5 + $0x2e8] ss:$36 sps:$4 sm:$0xff]  }
  0xf7   : > { %2230 = vmatpush1.bf16.msra.mxu0 %v8802_v46  ;;  %v8872_v46 = vld [vmem:[#allocation5 + $0x2f0] ss:$36 sps:$4 sm:$0xff]  }
  0xf8   : > { %2231 = vmatprep.subr.bf16.mxu0 %v8810_v47  ;;  %v8873_v47 = vld [vmem:[#allocation5 + $0xb0] ss:$36 sps:$4 sm:$0xff]  }
  0xf9   : > { %2157 = vmatmul.mubr.bf16.gmra.mrb[36].mxu0 %v9831_v43 }
  0xfa   : > { %1971 = vmatmul.mubr.bf16.gmra.mrb[52].mxu1 %v9891_v55  ;;  %2166 = vmatprep.mubr.bf16.mxu0 %v9837_v52 }
  0xfb   : > { %1980 = vmatprep.mubr.bf16.mxu1 %v9893_v57  ;;  %2232 = vmatpush1.bf16.msra.mxu0 %v8808_v49  ;;  %v8853_v49 = vld [vmem:[#allocation5 + $0x330] ss:$36 sps:$4 sm:$0xff]  }
  0xfc   : > { %2233 = vmatprep.subr.bf16.mxu0 %v8816_v50  ;;  %v8874_v50 = vld [vmem:[#allocation5 + $0x338] ss:$36 sps:$4 sm:$0xff]  }
  0xff   : > { %2234 = vmatpush1.bf16.msra.mxu0 %v8814_v51  ;;  %v8858_v51 = vld [vmem:[#allocation5 + $0x37c] ss:$36 sps:$4 sm:$0xff]  }
 0x100   : > { %2235 = vmatprep.subr.bf16.mxu0 %v8822_v53  ;;  %v8856_v53 = vld [vmem:[#allocation5 + $0x378] ss:$36 sps:$4 sm:$0xff]  }
 0x101   : > { %2167 = vmatmul.mubr.bf16.gmra.mrb[40].mxu0 %v9847_v59 }
 0x102   : > { %1981 = vmatmul.mubr.bf16.gmra.mrb[56].mxu1 %v9903_v11  ;;  %2176 = vmatprep.mubr.bf16.mxu0 %v9853_v8 }
 0x103   : > { %1990 = vmatprep.mubr.bf16.mxu1 %v9905_v13  ;;  %2236 = vmatpush1.bf16.msra.mxu0 %v8820_v54  ;;  %v8861_v54 = vld [vmem:[#allocation5 + $0x3c4] ss:$36 sps:$4 sm:$0xff]  }
 0x104   : > { %2237 = vmatprep.subr.bf16.mxu0 %v8828_v56  ;;  %v8875_v56 = vld [vmem:[#allocation5 + $0xf8] ss:$36 sps:$4 sm:$0xff]  }
 0x107   : > { %2238 = vmatpush1.bf16.msra.mxu0 %v8826_v58  ;;  %v8876_v58 = vld [vmem:[#allocation5 + $0x380] ss:$36 sps:$4 sm:$0xff]  }
 0x108   : > { %2239 = vmatprep.subr.bf16.mxu0 %v8834_v63  ;;  %v8859_v63 = vld [vmem:[#allocation5 + $0x3c0] ss:$36 sps:$4 sm:$0xff]  }
 0x109   : > { %2177 = vmatmul.mubr.bf16.gmra.mrb[44].mxu0 %v9863_v18 }
 0x10a   : > { %1991 = vmatmul.mubr.bf16.gmra.mrb[60].mxu1 %v9913_v26  ;;  %2186 = vmatprep.mubr.bf16.mxu0 %v9869_v27 }
 0x10b   : > { %2033 = vmatprep.mubr.bf16.mxu1 %v12409_v0  ;;  %2240 = vmatpush1.bf16.msra.mxu0 %v8832_v1  ;;  %v8864_v1 = vld [vmem:[#allocation5 + $0x40c] ss:$36 sps:$4 sm:$0xff]  }
 0x10c   : > { %2241 = vmatprep.subr.bf16.mxu0 %v8840_v2  ;;  %v8877_v2 = vld [vmem:[#allocation5 + $0x140] ss:$36 sps:$4 sm:$0xff]  }
 0x10f   : > { %2242 = vmatpush1.bf16.msra.mxu0 %v8838_v3  ;;  %v8862_v3 = vld [vmem:[#allocation5 + $0x408] ss:$36 sps:$4 sm:$0xff]  }
 0x110   : > { %7347 = vmatprep.subr.bf16.mxu0 %v8868_v4  ;;  %v8867_v4 = vld [vmem:[#allocation5 + $0x454] ss:$36 sps:$4 sm:$0xff]  }
 0x111   : > { %2187 = vmatmul.mubr.bf16.gmra.mrb[48].mxu0 %v9879_v36 }
 0x112   : > { %2034 = vmatmul.mubr.bf16.vlgmr.msra.gmra.mrb[32].mxu1 %v9784_v37  ;;  %2196 = vmatprep.mubr.bf16.mxu0 %v9881_v41 }
 0x113   : > { %2341 = vmatpush1.bf16.msra.mxu1 %v8799_v5  ;;  %2043 = vmatprep.mubr.bf16.mxu1 %v12409_v0  ;;  %v8878_v5 = vld [vmem:[#allocation5 + $0x3c8] ss:$36 sps:$4 sm:$0xff]  }
 0x114   : > { %2342 = vmatprep.subr.bf16.mxu1 %v8807_v6  ;;  %v8879_v6 = vld [vmem:[#allocation5 + $0x188] ss:$36 sps:$4 sm:$0xff]  }
 0x117   : > { %2343 = vmatpush1.bf16.msra.mxu1 %v8805_v7  ;;  %v8865_v7 = vld [vmem:[#allocation5 + $0x450] ss:$36 sps:$4 sm:$0xff]  }
 0x118   : > { %2344 = vmatprep.subr.bf16.mxu1 %v8813_v9  ;;  %v8880_v9 = vld [vmem:[#allocation5 + $0x410] ss:$36 sps:$4 sm:$0xff]  }
 0x119   : > { %2197 = vmatmul.mubr.bf16.gmra.mrb[52].mxu0 %v9891_v55 }
 0x11a   : > { %2044 = vmatmul.mubr.bf16.gmra.mrb[36].mxu1 %v9790_v48  ;;  %2206 = vmatprep.mubr.bf16.mxu0 %v9893_v57 }
 0x11b   : > { %2345 = vmatpush1.bf16.msra.mxu1 %v8811_v12  ;;  %2053 = vmatprep.mubr.bf16.mxu1 %v12409_v0  ;;  %v8886_v12 = vld [vmem:[#allocation5 + $0x49c] ss:$36 sps:$4 sm:$0xff]  }
 0x11c   : > { %2346 = vmatprep.subr.bf16.mxu1 %v8819_v14  ;;  %v8881_v14 = vld [vmem:[#allocation5 + $0x1d0] ss:$36 sps:$4 sm:$0xff]  }
 0x11f   : > { %2347 = vmatpush1.bf16.msra.mxu1 %v8817_v15  ;;  %v8884_v15 = vld [vmem:[#allocation5 + $0x498] ss:$36 sps:$4 sm:$0xff]  }
 0x120   : > { %2348 = vmatprep.subr.bf16.mxu1 %v8825_v16  ;;  %v8882_v16 = vld [vmem:[#allocation5 + $0x458] ss:$36 sps:$4 sm:$0xff]  }
 0x121   : > { %2207 = vmatmul.mubr.bf16.gmra.mrb[56].mxu0 %v9903_v11 }
 0x122   : > { %2054 = vmatmul.mubr.bf16.gmra.mrb[40].mxu1 %v9800_v62  ;;  %2216 = vmatprep.mubr.bf16.mxu0 %v9905_v13 }
 0x123   : > { %2349 = vmatpush1.bf16.msra.mxu1 %v8823_v17  ;;  %2063 = vmatprep.mubr.bf16.mxu1 %v12409_v0  ;;  %v8889_v17 = vld [vmem:[#allocation5 + $0x4e4] ss:$36 sps:$4 sm:$0xff]  }
 0x124   : > { %2350 = vmatprep.subr.bf16.mxu1 %v8831_v20  ;;  %v8883_v20 = vld [vmem:[#allocation5 + $0x218] ss:$36 sps:$4 sm:$0xff]  }
 0x127   : > { %2351 = vmatpush1.bf16.msra.mxu1 %v8829_v21  ;;  %v8887_v21 = vld [vmem:[#allocation5 + $0x4e0] ss:$36 sps:$4 sm:$0xff]  }
 0x128   : > { %2352 = vmatprep.subr.bf16.mxu1 %v8837_v22  ;;  %v8892_v22 = vld [vmem:[#allocation5 + $0x52c] ss:$36 sps:$4 sm:$0xff]  }
 0x129   : > { %2217 = vmatmul.mubr.bf16.gmra.mrb[60].mxu0 %v9913_v26 }
 0x12a   : > { %2064 = vmatmul.mubr.bf16.gmra.mrb[44].mxu1 %v9807_v10  ;;  %2259 = vmatprep.mubr.bf16.mxu0 %v12409_v0 }
 0x12b   : > { %2353 = vmatpush1.bf16.msra.mxu1 %v8835_v23  ;;  %2073 = vmatprep.mubr.bf16.mxu1 %v12409_v0  ;;  %v8890_v23 = vld [vmem:[#allocation5 + $0x528] ss:$36 sps:$4 sm:$0xff]  }
 0x12c   : > { %2354 = vmatprep.subr.bf16.mxu1 %v8843_v28  ;;  %v8895_v28 = vld [vmem:[#allocation5 + $0x574] ss:$36 sps:$4 sm:$0xff]  }
 0x12f   : > { %2355 = vmatpush1.bf16.msra.mxu1 %v8841_v29  ;;  %v8893_v29 = vld [vmem:[#allocation5 + $0x570] ss:$36 sps:$4 sm:$0xff]  }
 0x130   : > { %2356 = vmatprep.subr.bf16.mxu1 %v8846_v30  ;;  %v8898_v30 = vld [vmem:[#allocation5 + $0x5bc] ss:$36 sps:$4 sm:$0xff]  }
 0x131   : > { %2260 = vmatmul.mubr.bf16.vlgmr.msra.gmra.mrb[32].mxu0 %v9784_v37 }
 0x132   : > { %2074 = vmatmul.mubr.bf16.gmra.mrb[48].mxu1 %v9818_v25  ;;  %2269 = vmatprep.mubr.bf16.mxu0 %v12409_v0 }
 0x133   : > { %2357 = vmatpush1.bf16.msra.mxu1 %v8844_v31  ;;  %2083 = vmatprep.mubr.bf16.mxu1 %v12409_v0  ;;  %v8896_v31 = vld [vmem:[#allocation5 + $0x5b8] ss:$36 sps:$4 sm:$0xff]  }
 0x134   : > { %2358 = vmatprep.subr.bf16.mxu1 %v8849_v33  ;;  %7348 = vmatpush3.bf16.msra.mxu0 %v8869_v34  ;;  %v8901_v33 = vld [vmem:[#allocation5 + $0x604] ss:$36 sps:$4 sm:$0xff]  }
 0x135   : > { %7349 = vmatprep.subr.bf16.mxu0 %v8870_v35  ;;  %v8899_v34 = vld [vmem:[#allocation5 + $0x600] ss:$36 sps:$4 sm:$0xff]  }
 0x137   : > { %2359 = vmatpush1.bf16.msra.mxu1 %v8847_v38  ;;  %v8904_v38 = vld [vmem:[#allocation5 + $0x64c] ss:$36 sps:$4 sm:$0xff]  }
 0x138   : > { %2360 = vmatprep.subr.bf16.mxu1 %v8852_v39  ;;  %7350 = vmatpush3.bf16.msra.mxu0 %v8871_v40 }
 0x139   : > { %2270 = vmatmul.mubr.bf16.gmra.mrb[36].mxu0 %v9790_v48  ;;  %7351 = vmatprep.subr.bf16.mxu0 %v8872_v46  ;;  %v8907_v46 = vld [vmem:[#allocation5 + $0x694] ss:$36 sps:$4 sm:$0xff]  }
 0x13a   : > { %2084 = vmatmul.mubr.bf16.gmra.mrb[52].mxu1 %v9833_v44  ;;  %2279 = vmatprep.mubr.bf16.mxu0 %v12409_v0 }
 0x13b   : > { %2361 = vmatpush1.bf16.msra.mxu1 %v8850_v42  ;;  %2093 = vmatprep.mubr.bf16.mxu1 %v12409_v0 }
 0x13c   : > { %2362 = vmatprep.subr.bf16.mxu1 %v8855_v45  ;;  %7352 = vmatpush3.bf16.msra.mxu0 %v8873_v47  ;;  %v8902_v45 = vld [vmem:[#allocation5 + $0x648] ss:$36 sps:$4 sm:$0xff]   ;;  %v8905_v47 = vld [vmem:[#allocation5 + $0x690] ss:$36 sps:$4 sm:$0xff]  }
 0x13d   : > { %7353 = vmatprep.subr.bf16.mxu0 %v8874_v50  ;;  %v8908_v50 = vld [vmem:[#allocation5 + $0x4a0] ss:$36 sps:$4 sm:$0xff]  }
 0x13f   : > { %2363 = vmatpush1.bf16.msra.mxu1 %v8853_v49 }
 0x140   : > { %2364 = vmatprep.subr.bf16.mxu1 %v8858_v51  ;;  %7354 = vmatpush3.bf16.msra.mxu0 %v8875_v56 }
 0x141   : > { %2280 = vmatmul.mubr.bf16.gmra.mrb[40].mxu0 %v9800_v62  ;;  %7355 = vmatprep.subr.bf16.mxu0 %v8876_v58 }
 0x142   : > { %2094 = vmatmul.mubr.bf16.gmra.mrb[56].mxu1 %v9849_v60  ;;  %2289 = vmatprep.mubr.bf16.mxu0 %v12409_v0 }
 0x143   : > { %2365 = vmatpush1.bf16.msra.mxu1 %v8856_v53  ;;  %2103 = vmatprep.mubr.bf16.mxu1 %v12409_v0 }
 0x144   : > { %2366 = vmatprep.subr.bf16.mxu1 %v8861_v54  ;;  %7356 = vmatpush3.bf16.msra.mxu0 %v8877_v2 }
 0x145   : > { %7357 = vmatprep.subr.bf16.mxu0 %v8878_v5 }
 0x147   : > { %2367 = vmatpush1.bf16.msra.mxu1 %v8859_v63 }
 0x148   : > { %2368 = vmatprep.subr.bf16.mxu1 %v8864_v1  ;;  %7358 = vmatpush3.bf16.msra.mxu0 %v8879_v6 }
 0x149   : > { %2290 = vmatmul.mubr.bf16.gmra.mrb[44].mxu0 %v9807_v10  ;;  %7359 = vmatprep.subr.bf16.mxu0 %v8880_v9 }
 0x14a   : > { %2104 = vmatmul.mubr.bf16.gmra.mrb[60].mxu1 %v9865_v19  ;;  %2299 = vmatprep.mubr.bf16.mxu0 %v12409_v0 }
 0x14b   : > { %2369 = vmatpush1.bf16.msra.mxu1 %v8862_v3  ;;  %2372 = vmatprep.mubr.bf16.mxu1 %v9798_v61 }
 0x14c   : > { %2370 = vmatprep.subr.bf16.mxu1 %v8867_v4  ;;  %7360 = vmatpush3.bf16.msra.mxu0 %v8881_v14 }
 0x14d   : > { %7361 = vmatprep.subr.bf16.mxu0 %v8882_v16 }
 0x14f   : > { %2371 = vmatpush1.bf16.msra.mxu1 %v8865_v7 }
 0x150   : > { %2453 = vmatprep.subr.bf16.mxu1 %v8886_v12  ;;  %7362 = vmatpush3.bf16.msra.mxu0 %v8883_v20 }
 0x151   : > { %2300 = vmatmul.mubr.bf16.gmra.mrb[48].mxu0 %v9818_v25 }
 0x152   : > { %2373 = vmatmul.mubr.bf16.vlgmr.msra.gmra.mrb[64].mxu1 %v9816_v24  ;;  %2309 = vmatprep.mubr.bf16.mxu0 %v12409_v0 }
 0x153   : > { %2382 = vmatprep.mubr.bf16.mxu1 %v9821_v32  ;;  %2454 = vmatpush1.bf16.msra.mxu1 %v8884_v15 }
 0x154   : > { %2455 = vmatprep.subr.bf16.mxu1 %v8889_v17 }
 0x157   : > { %2456 = vmatpush1.bf16.msra.mxu1 %v8887_v21 }
 0x158   : > { %2457 = vmatprep.subr.bf16.mxu1 %v8892_v22 }
 0x159   : > { %2310 = vmatmul.mubr.bf16.gmra.mrb[52].mxu0 %v9833_v44 }
 0x15a   : > { %2383 = vmatmul.mubr.bf16.gmra.mrb[68].mxu1 %v9831_v43  ;;  %2319 = vmatprep.mubr.bf16.mxu0 %v12409_v0 }
 0x15b   : > { %2392 = vmatprep.mubr.bf16.mxu1 %v9837_v52  ;;  %2458 = vmatpush1.bf16.msra.mxu1 %v8890_v23 }
 0x15c   : > { %2459 = vmatprep.subr.bf16.mxu1 %v8895_v28 }
 0x15f   : > { %2460 = vmatpush1.bf16.msra.mxu1 %v8893_v29 }
 0x160   : > { %2461 = vmatprep.subr.bf16.mxu1 %v8898_v30 }
 0x161   : > { %2320 = vmatmul.mubr.bf16.gmra.mrb[56].mxu0 %v9849_v60 }
 0x162   : > { %2393 = vmatmul.mubr.bf16.gmra.mrb[72].mxu1 %v9847_v59  ;;  %2329 = vmatprep.mubr.bf16.mxu0 %v12409_v0 }
 0x163   : > { %2402 = vmatprep.mubr.bf16.mxu1 %v9853_v8  ;;  %2462 = vmatpush1.bf16.msra.mxu1 %v8896_v31 }
 0x164   : > { %2463 = vmatprep.subr.bf16.mxu1 %v8901_v33 }
 0x165   : > { %v1809_v35 = vpop.f32.mrb[0].mxu1 }
 0x166   : > { %v1811_v39 = vpop.f32.mrb[1].mxu1 }
 0x167   : > { %v1813_v40 = vpop.f32.mrb[2].mxu1  ;;  %2464 = vmatpush1.bf16.msra.mxu1 %v8899_v34 }
 0x168   : > { %v1815_v42 = vpop.f32.mrb[3].mxu1  ;;  %2465 = vmatprep.subr.bf16.mxu1 %v8904_v38 }
 0x169   : > { %2330 = vmatmul.mubr.bf16.gmra.mrb[60].mxu0 %v9865_v19 }
 0x16a   : > { %2403 = vmatmul.mubr.bf16.gmra.mrb[76].mxu1 %v9863_v18  ;;  %2598 = vmatprep.mubr.bf16.mxu0 %v9798_v61 }
 0x16b   : > { %2412 = vmatprep.mubr.bf16.mxu1 %v9869_v27  ;;  %2466 = vmatpush1.bf16.msra.mxu1 %v8902_v45 }
 0x16c   : > { %2467 = vmatprep.subr.bf16.mxu1 %v8907_v46 }
 0x16d   : > { %v1819_v49 = vpop.f32.mrb[4].mxu1 }
 0x16e   : > { %v1821_v51 = vpop.f32.mrb[5].mxu1 }
 0x16f   : > { %v1823_v53 = vpop.f32.mrb[6].mxu1  ;;  %2468 = vmatpush1.bf16.msra.mxu1 %v8905_v47 }
 0x170   : > { %v1825_v54 = vpop.f32.mrb[7].mxu1  ;;  %7699 = vmatprep.subr.bf16.mxu1 %v8908_v50 }
 0x171   : > { %2599 = vmatmul.mubr.bf16.vlgmr.msra.gmra.mrb[64].mxu0 %v9816_v24 }
 0x172   : > { %2413 = vmatmul.mubr.bf16.gmra.mrb[80].mxu1 %v9879_v36  ;;  %2606 = vmatprep.mubr.bf16.mxu0 %v9821_v32 }
 0x173   : > { %2422 = vmatprep.mubr.bf16.mxu1 %v9881_v41 }
 0x175   : > { %v1829_v56 = vpop.f32.mrb[8].mxu1 }
 0x176   : > { %v1831_v61 = vpop.f32.mrb[9].mxu1 }
 0x177   : > { %v1833_v58 = vpop.f32.mrb[10].mxu1 }
 0x178   : > { %v9987_v63 = vpop.f32.mrb[11].mxu1 }
 0x179   : > { %2607 = vmatmul.mubr.bf16.gmra.mrb[68].mxu0 %v9831_v43 }
 0x17a   : > { %2423 = vmatmul.mubr.bf16.gmra.mrb[84].mxu1 %v9891_v55  ;;  %2614 = vmatprep.mubr.bf16.mxu0 %v9837_v52 }
 0x17b   : > { %2432 = vmatprep.mubr.bf16.mxu1 %v9893_v57 }
 0x17d   : > { %v9993_v1 = vpop.f32.mrb[12].mxu1 }
 0x17e   : > { %v9995_v24 = vpop.f32.mrb[13].mxu1 }
 0x17f   : > { %v9997_v2 = vpop.f32.mrb[14].mxu1 }
 0x180   : > { %v9999_v32 = vpop.f32.mrb[15].mxu1 }
 0x181   : > { %2615 = vmatmul.mubr.bf16.gmra.mrb[72].mxu0 %v9847_v59 }
 0x182   : > { %2433 = vmatmul.mubr.bf16.gmra.mrb[88].mxu1 %v9903_v11  ;;  %2622 = vmatprep.mubr.bf16.mxu0 %v9853_v8 }
 0x183   : > { %2442 = vmatprep.mubr.bf16.mxu1 %v9905_v13 }
 0x184   : > { %v1696_v43 = vpop.f32.mrb[0].mxu0 }
 0x185   : > { %v10005_v3 = vpop.f32.mrb[16].mxu1  ;;  %v1810_v52 = vadd.f32 %v1809_v35, %v1696_v43  ;;  %v1698_v4 = vpop.f32.mrb[1].mxu0  ;;  %v8909_v35 = vld [vmem:[#allocation5 + $0x4e8] ss:$36 sps:$4 sm:$0xff]  }
 0x186   : > { %v10007_v5 = vpop.f32.mrb[17].mxu1  ;;  %v1812_v6 = vadd.f32 %v1811_v39, %v1698_v4  ;;  %v1700_v7 = vpop.f32.mrb[2].mxu0 }
 0x187   : > { %v10009_v9 = vpop.f32.mrb[18].mxu1  ;;  %v1814_v12 = vadd.f32 %v1813_v40, %v1700_v7  ;;  %v1702_v14 = vpop.f32.mrb[3].mxu0 }
 0x188   : > { %v10011_v15 = vpop.f32.mrb[19].mxu1  ;;  %v1816_v59 = vadd.f32 %v1815_v42, %v1702_v14  ;;  %v8910_v42 = vld [vmem:[#allocation5 + $0x530] ss:$36 sps:$4 sm:$0xff]  }
 0x189   : > { %v10013_v16 = vpack.c.bf16 %v1814_v12, %v1810_v52  ;;  %2623 = vmatmul.mubr.bf16.gmra.mrb[76].mxu0 %v9863_v18 }
 0x18a   : > { %2443 = vmatmul.mubr.bf16.gmra.mrb[92].mxu1 %v9913_v26  ;;  %v10017_v8 = vpack.c.bf16 %v1816_v59, %v1812_v6  ;;  %2630 = vmatprep.mubr.bf16.mxu0 %v9869_v27 }
 0x18b   : > { %2485 = vmatprep.mubr.bf16.mxu1 %v12409_v0 }
 0x18c   : > { %12557 = vst [vmem:[#allocation12_spill] sm:$0xff] %v10017_v8  ;;  %v1706_v17 = vpop.f32.mrb[4].mxu0 }
 0x18d   : > { %v10021_v20 = vpop.f32.mrb[20].mxu1  ;;  %v1820_v21 = vadd.f32 %v1819_v49, %v1706_v17  ;;  %v1708_v22 = vpop.f32.mrb[5].mxu0 }
 0x18e   : > { %v10023_v23 = vpop.f32.mrb[21].mxu1  ;;  %v1822_v28 = vadd.f32 %v1821_v51, %v1708_v22  ;;  %v1710_v29 = vpop.f32.mrb[6].mxu0  ;;  %v8913_v22 = vld [vmem:[#allocation5 + $0x608] ss:$36 sps:$4 sm:$0xff]  }
 0x18f   : > { %v10025_v30 = vpop.f32.mrb[22].mxu1  ;;  %v1824_v31 = vadd.f32 %v1823_v53, %v1710_v29  ;;  %v1712_v33 = vpop.f32.mrb[7].mxu0 }
 0x190   : > { %v10027_v18 = vpop.f32.mrb[23].mxu1  ;;  %v1826_v34 = vadd.f32 %v1825_v54, %v1712_v33 }
 0x191   : > { %v10029_v38 = vpack.c.bf16 %v1824_v31, %v1820_v21  ;;  %2631 = vmatmul.mubr.bf16.gmra.mrb[80].mxu0 %v9879_v36 }
 0x192   : > { %2486 = vmatmul.mubr.bf16.vlgmr.msra.gmra.mrb[64].mxu1 %v9784_v37  ;;  %v10033_v27 = vpack.c.bf16 %v1826_v34, %v1822_v28  ;;  %2638 = vmatprep.mubr.bf16.mxu0 %v9881_v41 }
 0x193   : > { %2495 = vmatprep.mubr.bf16.mxu1 %v12409_v0  ;;  %7700 = vmatpush3.bf16.msra.mxu1 %v8908_v50  ;;  %v8911_v50 = vld [vmem:[#allocation5 + $0x578] ss:$36 sps:$4 sm:$0xff]  }
 0x194   : > { %12558 = vst [vmem:[#allocation13_spill] sm:$0xff] %v10033_v27  ;;  %v1716_v39 = vpop.f32.mrb[8].mxu0  ;;  %7701 = vmatprep.subr.bf16.mxu1 %v8909_v35 }
 0x195   : > { %v10037_v40 = vpop.f32.mrb[24].mxu1  ;;  %v1830_v45 = vadd.f32 %v1829_v56, %v1716_v39  ;;  %v1718_v46 = vpop.f32.mrb[9].mxu0  ;;  %v8915_v39 = vld [vmem:[#allocation5 + $0x698] ss:$36 sps:$4 sm:$0xff]  }
 0x196   : > { %v10039_v47 = vpop.f32.mrb[25].mxu1  ;;  %v1832_v49 = vadd.f32 %v1831_v61, %v1718_v46  ;;  %v1720_v51 = vpop.f32.mrb[10].mxu0 }
 0x197   : > { %v10041_v53 = vpop.f32.mrb[26].mxu1  ;;  %v1834_v36 = vadd.f32 %v1833_v58, %v1720_v51  ;;  %v1722_v54 = vpop.f32.mrb[11].mxu0  ;;  %7702 = vmatpush3.bf16.msra.mxu1 %v8909_v35 }
 0x198   : > { %v10043_v43 = vpop.f32.mrb[27].mxu1  ;;  %v1836_v41 = vadd.f32 %v9987_v63, %v1722_v54  ;;  %7703 = vmatprep.subr.bf16.mxu1 %v8910_v42  ;;  %v8912_v63 = vld [vmem:[#allocation5 + $0x5c0] ss:$36 sps:$4 sm:$0xff]  }
 0x199   : > { %v10046_v52 = vpack.c.bf16 %v1834_v36, %v1830_v45  ;;  %2639 = vmatmul.mubr.bf16.gmra.mrb[84].mxu0 %v9891_v55 }
 0x19a   : > { %2496 = vmatmul.mubr.bf16.gmra.mrb[68].mxu1 %v9790_v48  ;;  %v10050_v56 = vpack.c.bf16 %v1836_v41, %v1832_v49  ;;  %2646 = vmatprep.mubr.bf16.mxu0 %v9893_v57 }
 0x19b   : > { %2505 = vmatprep.mubr.bf16.mxu1 %v12409_v0  ;;  %7704 = vmatpush3.bf16.msra.mxu1 %v8910_v42 }
 0x19c   : > { %12559 = vst [vmem:[#allocation14_spill] sm:$0xff] %v10050_v56  ;;  %v1726_v61 = vpop.f32.mrb[12].mxu0  ;;  %7705 = vmatprep.subr.bf16.mxu1 %v8911_v50 }
 0x19d   : > { %v10054_v58 = vpop.f32.mrb[28].mxu1  ;;  %v1840_v4 = vadd.f32 %v9993_v1, %v1726_v61  ;;  %v1728_v6 = vpop.f32.mrb[13].mxu0 }
 0x19e   : > { %v10057_v7 = vpop.f32.mrb[29].mxu1  ;;  %v1842_v12 = vadd.f32 %v9995_v24, %v1728_v6  ;;  %v1730_v55 = vpop.f32.mrb[14].mxu0 }
 0x19f   : > { %v10060_v14 = vpop.f32.mrb[30].mxu1  ;;  %v1844_v59 = vadd.f32 %v9997_v2, %v1730_v55  ;;  %v1732_v17 = vpop.f32.mrb[15].mxu0  ;;  %7706 = vmatpush3.bf16.msra.mxu1 %v8911_v50  ;;  %v8914_v2 = vld [vmem:[#allocation5 + $0x650] ss:$36 sps:$4 sm:$0xff]  }
 0x1a0   : > { %v10063_v57 = vpop.f32.mrb[31].mxu1  ;;  %v1846_v21 = vadd.f32 %v9999_v32, %v1732_v17  ;;  %7707 = vmatprep.subr.bf16.mxu1 %v8912_v63 }
 0x1a1   : > { %v10066_v28 = vpack.c.bf16 %v1844_v59, %v1840_v4  ;;  %2647 = vmatmul.mubr.bf16.gmra.mrb[88].mxu0 %v9903_v11 }
 0x1a2   : > { %2506 = vmatmul.mubr.bf16.gmra.mrb[72].mxu1 %v9800_v62  ;;  %v10070_v1 = vpack.c.bf16 %v1846_v21, %v1842_v12  ;;  %2654 = vmatprep.mubr.bf16.mxu0 %v9905_v13 }
 0x1a3   : > { %2515 = vmatprep.mubr.bf16.mxu1 %v12409_v0  ;;  %7708 = vmatpush3.bf16.msra.mxu1 %v8912_v63 }
 0x1a4   : > { %12560 = vst [vmem:[#allocation15_spill] sm:$0xff] %v10070_v1  ;;  %v1736_v24 = vpop.f32.mrb[16].mxu0  ;;  %7709 = vmatprep.subr.bf16.mxu1 %v8913_v22 }
 0x1a5   : > { %v1850_v32 = vadd.f32 %v10005_v3, %v1736_v24  ;;  %v1738_v29 = vpop.f32.mrb[17].mxu0 }
 0x1a6   : > { %v1852_v31 = vadd.f32 %v10007_v5, %v1738_v29  ;;  %v1740_v33 = vpop.f32.mrb[18].mxu0 }
 0x1a7   : > { %v1854_v34 = vadd.f32 %v10009_v9, %v1740_v33  ;;  %v1742_v35 = vpop.f32.mrb[19].mxu0  ;;  %7710 = vmatpush3.bf16.msra.mxu1 %v8913_v22 }
 0x1a8   : > { %v1856_v11 = vadd.f32 %v10011_v15, %v1742_v35  ;;  %7711 = vmatprep.subr.bf16.mxu1 %v8914_v2 }
 0x1a9   : > { %v10078_v13 = vpack.c.bf16 %v1854_v34, %v1850_v32  ;;  %2655 = vmatmul.mubr.bf16.gmra.mrb[92].mxu0 %v9913_v26 }
 0x1aa   : > { %2516 = vmatmul.mubr.bf16.gmra.mrb[76].mxu1 %v9807_v10  ;;  %v10082_v3 = vpack.c.bf16 %v1856_v11, %v1852_v31  ;;  %7747 = vmatprep.mubr.msk.bf16.mxu0 %vm12457_vm0, %v10013_v16 }
 0x1ab   : > { %2525 = vmatprep.mubr.bf16.mxu1 %v12409_v0  ;;  %7712 = vmatpush3.bf16.msra.mxu1 %v8914_v2 }
 0x1ac   : > { %12561 = vst [vmem:[#allocation16_spill] sm:$0xff] %v10082_v3  ;;  %v1746_v5 = vpop.f32.mrb[20].mxu0  ;;  %7713 = vmatprep.subr.bf16.mxu1 %v8915_v39 }
 0x1ad   : > { %v1860_v9 = vadd.f32 %v10021_v20, %v1746_v5  ;;  %v1748_v15 = vpop.f32.mrb[21].mxu0 }
 0x1ae   : > { %v1862_v42 = vadd.f32 %v10023_v23, %v1748_v15  ;;  %v1750_v45 = vpop.f32.mrb[22].mxu0 }
 0x1af   : > { %v1864_v46 = vadd.f32 %v10025_v30, %v1750_v45  ;;  %v1752_v49 = vpop.f32.mrb[23].mxu0  ;;  %7714 = vmatpush3.bf16.msra.mxu1 %v8915_v39 }
 0x1b0   : > { %v1866_v26 = vadd.f32 %v10027_v18, %v1752_v49 }
 0x1b1   : > { %v10091_v51 = vpack.c.bf16 %v1864_v46, %v1860_v9 }
 0x1b2   : > { %2526 = vmatmul.mubr.bf16.gmra.mrb[80].mxu1 %v9818_v25  ;;  %v10094_v36 = vpack.c.bf16 %v1866_v26, %v1862_v42 }
 0x1b3   : > { %2535 = vmatprep.mubr.bf16.mxu1 %v12409_v0 }
 0x1b4   : > { %12562 = vst [vmem:[#allocation17_spill] sm:$0xff] %v10094_v36  ;;  %v1756_v54 = vpop.f32.mrb[24].mxu0 }
 0x1b5   : > { %v1870_v20 = vadd.f32 %v10037_v40, %v1756_v54  ;;  %v1758_v41 = vpop.f32.mrb[25].mxu0 }
 0x1b6   : > { %v1872_v23 = vadd.f32 %v10039_v47, %v1758_v41  ;;  %v1760_v50 = vpop.f32.mrb[26].mxu0 }
 0x1b7   : > { %v1874_v30 = vadd.f32 %v10041_v53, %v1760_v50  ;;  %v1762_v61 = vpop.f32.mrb[27].mxu0 }
 0x1b8   : > { %v1876_v18 = vadd.f32 %v10043_v43, %v1762_v61 }
 0x1b9   : > { %v10101_v63 = vpack.c.bf16 %v1874_v30, %v1870_v20 }
 0x1ba   : > { %2536 = vmatmul.mubr.bf16.gmra.mrb[84].mxu1 %v9833_v44  ;;  %v10104_v4 = vpack.c.bf16 %v1876_v18, %v1872_v23 }
 0x1bb   : > { %2545 = vmatprep.mubr.bf16.mxu1 %v12409_v0 }
 0x1bc   : > { %12563 = vst [vmem:[#allocation18_spill] sm:$0xff] %v10104_v4  ;;  %v1766_v6 = vpop.f32.mrb[28].mxu0 }
 0x1bd   : > { %v1880_v40 = vadd.f32 %v10054_v58, %v1766_v6  ;;  %v1768_v12 = vpop.f32.mrb[29].mxu0 }
 0x1be   : > { %v1882_v47 = vadd.f32 %v10057_v7, %v1768_v12  ;;  %v1770_v55 = vpop.f32.mrb[30].mxu0 }
 0x1bf   : > { %v1884_v53 = vadd.f32 %v10060_v14, %v1770_v55  ;;  %v1772_v59 = vpop.f32.mrb[31].mxu0 }
 0x1c0   : > { %v1886_v43 = vadd.f32 %v10063_v57, %v1772_v59 }
 0x1c1   : > { %v10111_v17 = vpack.c.bf16 %v1884_v53, %v1880_v40 }
 0x1c2   : > { %2546 = vmatmul.mubr.bf16.gmra.mrb[88].mxu1 %v9849_v60  ;;  %v10114_v21 = vpack.c.bf16 %v1886_v43, %v1882_v47 }
 0x1c3   : > { %2555 = vmatprep.mubr.bf16.mxu1 %v12409_v0 }
 0x1c4   : > { %12564 = vst [vmem:[#allocation19_spill] sm:$0xff] %v10114_v21 }
 0x1ca   : > { %2556 = vmatmul.mubr.bf16.gmra.mrb[92].mxu1 %v9865_v19 }
 0x1cb   : > { %7715 = vmatprep.mubr.bf16.mxu1 %v9784_v37 }
 0x1d2   : > { %7716 = vmatmul.mubr.bf16.vlgmr.msra.gmra.mrb[96].mxu1 %v9790_v48 }
 0x1d3   : > { %7719 = vmatprep.mubr.bf16.mxu1 %v9800_v62 }
 0x1da   : > { %7720 = vmatmul.mubr.bf16.gmra.mrb[100].mxu1 %v9807_v10 }
 0x1db   : > { %7723 = vmatprep.mubr.bf16.mxu1 %v9818_v25 }
 0x1e2   : > { %7724 = vmatmul.mubr.bf16.gmra.mrb[104].mxu1 %v9833_v44 }
 0x1e3   : > { %7727 = vmatprep.mubr.bf16.mxu1 %v9849_v60 }
 0x1e5   : > { %v2035_v58 = vpop.f32.mrb[32].mxu1 }
 0x1e6   : > { %v2037_v7 = vpop.f32.mrb[33].mxu1 }
 0x1e7   : > { %v2039_v14 = vpop.f32.mrb[34].mxu1 }
 0x1e8   : > { %v10125_v57 = vpack.c.bf16 %v2039_v14, %v2035_v58  ;;  %v2041_v22 = vpop.f32.mrb[35].mxu1 }
 0x1e9   : > { %v2803_v24 = vpack.c.bf16 %v2041_v22, %v2037_v7 }
 0x1ea   : > { %12565 = vst [vmem:[#allocation20_spill] sm:$0xff] %v10125_v57  ;;  %7728 = vmatmul.mubr.bf16.gmra.mrb[108].mxu1 %v9865_v19 }
 0x1eb   : > { %3278 = vrot.lane.b32.xlu0 %v2803_v24, %s9564_s21  ;;  %8355 = vmatprep.subr.msk.bf16.mxu0 %vm12457_vm0, %v2803_v24  ;;  %v2845_v37 = vsel %vm12457_vm0, %v2803_v24, 0 }
 0x1ec   : > { %7732 = vmatpush3.bf16.xpose.msra.mxu0 %v2845_v37 }
 0x1ed   : > { %v2045_v48 = vpop.f32.mrb[36].mxu1 }
 0x1ee   : > { %v2047_v62 = vpop.f32.mrb[37].mxu1 }
 0x1ef   : > { %v2049_v10 = vpop.f32.mrb[38].mxu1 }
 0x1f0   : > { %v10131_v25 = vpack.c.bf16 %v2049_v10, %v2045_v48  ;;  %v2051_v44 = vpop.f32.mrb[39].mxu1 }
 0x1f1   : > { %v2804_v60 = vpack.c.bf16 %v2051_v44, %v2047_v62 }
 0x1f2   : > { %12566 = vst [vmem:[#allocation21_spill] sm:$0xff] %v10131_v25 }
 0x1f3   : > { %3280 = vrot.lane.b32.xlu1 %v2804_v60, %s9564_s21  ;;  %8356 = vmatprep.subr.msk.bf16.mxu0 %vm12457_vm0, %v2804_v60  ;;  %v2848_v19 = vsel %vm12457_vm0, %v2804_v60, 0 }
 0x1f4   : > { %7734 = vmatpush3.bf16.xpose.msra.mxu0 %v2848_v19 }
 0x1f5   : > { %v2055_v2 = vpop.f32.mrb[40].mxu1 }
 0x1f6   : > { %v2057_v32 = vpop.f32.mrb[41].mxu1 }
 0x1f7   : > { %v2059_v29 = vpop.f32.mrb[42].mxu1 }
 0x1f8   : > { %v10136_v31 = vpack.c.bf16 %v2059_v29, %v2055_v2  ;;  %v2061_v33 = vpop.f32.mrb[43].mxu1 }
 0x1f9   : > { %v10138_v34 = vpack.c.bf16 %v2061_v33, %v2057_v32 }
 0x1fa   : > { %12567 = vst [vmem:[#allocation22_spill] sm:$0xff] %v10136_v31 }
 0x1fb   : > { %8357 = vmatprep.subr.msk.bf16.mxu0 %vm12457_vm0, %v10138_v34  ;;  %v2851_v35 = vsel %vm12457_vm0, %v10138_v34, 0 }
 0x1fc   : > { %7736 = vmatpush3.bf16.xpose.msra.mxu0 %v2851_v35 }
 0x1fd   : > { %v2065_v11 = vpop.f32.mrb[44].mxu1 }
 0x1fe   : > { %v2067_v39 = vpop.f32.mrb[45].mxu1 }
 0x1ff   : > { %v2069_v5 = vpop.f32.mrb[46].mxu1 }
 0x200   : > { %v10144_v9 = vpack.c.bf16 %v2069_v5, %v2065_v11  ;;  %v2071_v15 = vpop.f32.mrb[47].mxu1 }
 0x201   : > { %v10146_v42 = vpack.c.bf16 %v2071_v15, %v2067_v39 }
 0x202   : > { %12568 = vst [vmem:[#allocation23_spill] sm:$0xff] %v10144_v9 }
 0x203   : > { %8358 = vmatprep.subr.msk.bf16.mxu0 %vm12457_vm0, %v10146_v42  ;;  %v2854_v45 = vsel %vm12457_vm0, %v10146_v42, 0 }
 0x204   : > { %7738 = vmatpush3.bf16.xpose.msra.mxu0 %v2854_v45  ;;  %v2261_v49 = vpop.f32.mrb[32].mxu0 }
 0x205   : > { %v2075_v46 = vpop.f32.mrb[48].mxu1  ;;  %v2263_v54 = vpop.f32.mrb[33].mxu0 }
 0x206   : > { %v2077_v26 = vpop.f32.mrb[49].mxu1  ;;  %v2265_v41 = vpop.f32.mrb[34].mxu0 }
 0x207   : > { %v2079_v20 = vpop.f32.mrb[50].mxu1  ;;  %v10154_v30 = vpack.c.bf16 %v2265_v41, %v2261_v49  ;;  %v2267_v61 = vpop.f32.mrb[35].mxu0 }
 0x208   : > { %v10152_v23 = vpack.c.bf16 %v2079_v20, %v2075_v46  ;;  %v2081_v50 = vpop.f32.mrb[51].mxu1  ;;  %v10158_v6 = vpack.c.bf16 %v2267_v61, %v2263_v54 }
 0x209   : > { %12570 = vst [vmem:[#allocation25_spill] sm:$0xff] %v10154_v30  ;;  %v10156_v18 = vpack.c.bf16 %v2081_v50, %v2077_v26 }
 0x20a   : > { %12569 = vst [vmem:[#allocation24_spill] sm:$0xff] %v10152_v23  ;;  %12571 = vst [vmem:[#allocation26_spill] sm:$0xff] %v10158_v6 }
 0x20b   : > { %8359 = vmatprep.subr.msk.bf16.mxu0 %vm12457_vm0, %v10156_v18  ;;  %v2857_v40 = vsel %vm12457_vm0, %v10156_v18, 0 }
 0x20c   : > { %7740 = vmatpush3.bf16.xpose.msra.mxu0 %v2857_v40  ;;  %v2271_v47 = vpop.f32.mrb[36].mxu0 }
 0x20d   : > { %v2085_v12 = vpop.f32.mrb[52].mxu1  ;;  %v2273_v53 = vpop.f32.mrb[37].mxu0 }
 0x20e   : > { %v2087_v55 = vpop.f32.mrb[53].mxu1  ;;  %v2275_v43 = vpop.f32.mrb[38].mxu0 }
 0x20f   : > { %v2089_v59 = vpop.f32.mrb[54].mxu1  ;;  %v10166_v14 = vpack.c.bf16 %v2275_v43, %v2271_v47  ;;  %v2277_v22 = vpop.f32.mrb[39].mxu0 }
 0x210   : > { %v10164_v58 = vpack.c.bf16 %v2089_v59, %v2085_v12  ;;  %v2091_v7 = vpop.f32.mrb[55].mxu1  ;;  %v10170_v37 = vpack.c.bf16 %v2277_v22, %v2273_v53 }
 0x211   : > { %12573 = vst [vmem:[#allocation28_spill] sm:$0xff] %v10166_v14  ;;  %v10168_v24 = vpack.c.bf16 %v2091_v7, %v2087_v55  ;;  %v12631_v14 = vmov 0 }
 0x212   : > { %12572 = vst [vmem:[#allocation27_spill] sm:$0xff] %v10164_v58  ;;  %12574 = vst [vmem:[#allocation29_spill] sm:$0xff] %v10170_v37 }
 0x213   : > { %8360 = vmatprep.subr.msk.bf16.mxu0 %vm12457_vm0, %v10168_v24  ;;  %v2860_v48 = vsel %vm12457_vm0, %v10168_v24, 0 }
 0x214   : > { %7742 = vmatpush3.bf16.xpose.msra.mxu0 %v2860_v48  ;;  %v2281_v10 = vpop.f32.mrb[40].mxu0 }
 0x215   : > { %v2095_v62 = vpop.f32.mrb[56].mxu1  ;;  %v2283_v60 = vpop.f32.mrb[41].mxu0 }
 0x216   : > { %v2097_v44 = vpop.f32.mrb[57].mxu1  ;;  %v2285_v2 = vpop.f32.mrb[42].mxu0 }
 0x217   : > { %v2099_v19 = vpop.f32.mrb[58].mxu1  ;;  %v10178_v33 = vpack.c.bf16 %v2285_v2, %v2281_v10  ;;  %v2287_v35 = vpop.f32.mrb[43].mxu0 }
 0x218   : > { %v10176_v32 = vpack.c.bf16 %v2099_v19, %v2095_v62  ;;  %v2101_v29 = vpop.f32.mrb[59].mxu1  ;;  %v10182_v39 = vpack.c.bf16 %v2287_v35, %v2283_v60 }
 0x219   : > { %12576 = vst [vmem:[#allocation31_spill] sm:$0xff] %v10178_v33  ;;  %v10180_v11 = vpack.c.bf16 %v2101_v29, %v2097_v44 }
 0x21a   : > { %12575 = vst [vmem:[#allocation30_spill] sm:$0xff] %v10176_v32  ;;  %12577 = vst [vmem:[#allocation32_spill] sm:$0xff] %v10182_v39 }
 0x21b   : > { %8361 = vmatprep.subr.msk.bf16.mxu0 %vm12457_vm0, %v10180_v11  ;;  %v2863_v5 = vsel %vm12457_vm0, %v10180_v11, 0 }
 0x21c   : > { %7744 = vmatpush3.bf16.xpose.msra.mxu0 %v2863_v5  ;;  %v2291_v45 = vpop.f32.mrb[44].mxu0 }
 0x21d   : > { %v2105_v15 = vpop.f32.mrb[60].mxu1  ;;  %v2293_v49 = vpop.f32.mrb[45].mxu0 }
 0x21e   : > { %v2107_v46 = vpop.f32.mrb[61].mxu1  ;;  %v2295_v54 = vpop.f32.mrb[46].mxu0 }
 0x21f   : > { %v2109_v26 = vpop.f32.mrb[62].mxu1  ;;  %v10190_v50 = vpack.c.bf16 %v2295_v54, %v2291_v45  ;;  %v2297_v61 = vpop.f32.mrb[47].mxu0 }
 0x220   : > { %v10188_v20 = vpack.c.bf16 %v2109_v26, %v2105_v15  ;;  %v2111_v41 = vpop.f32.mrb[63].mxu1  ;;  %v10194_v12 = vpack.c.bf16 %v2297_v61, %v2293_v49 }
 0x221   : > { %12579 = vst [vmem:[#allocation34_spill] sm:$0xff] %v10190_v50  ;;  %v10192_v40 = vpack.c.bf16 %v2111_v41, %v2107_v46 }
 0x222   : > { %12578 = vst [vmem:[#allocation33_spill] sm:$0xff] %v10188_v20  ;;  %12580 = vst [vmem:[#allocation35_spill] sm:$0xff] %v10194_v12 }
 0x223   : > { %8362 = vmatprep.subr.msk.bf16.mxu0 %vm12457_vm0, %v10192_v40  ;;  %v2866_v47 = vsel %vm12457_vm0, %v10192_v40, 0 }
 0x224   : > { %7746 = vmatpush3.bf16.xpose.msra.mxu0 %v2866_v47  ;;  %v2301_v55 = vpop.f32.mrb[48].mxu0 }
 0x225   : > { %v2303_v53 = vpop.f32.mrb[49].mxu0 }
 0x226   : > { %v2305_v59 = vpop.f32.mrb[50].mxu0 }
 0x227   : > { %v10200_v43 = vpack.c.bf16 %v2305_v59, %v2301_v55  ;;  %v2307_v7 = vpop.f32.mrb[51].mxu0 }
 0x228   : > { %v10202_v22 = vpack.c.bf16 %v2307_v7, %v2303_v53 }
 0x229   : > { %12581 = vst [vmem:[#allocation36_spill] sm:$0xff] %v10200_v43 }
 0x22a   : > { %12582 = vst [vmem:[#allocation37_spill] sm:$0xff] %v10202_v22 }
 0x22b   : > { %7748 = vmatmul.mubr.msk.bf16.vlgmr.msra.gmra.mrb[96].mxu0 %vm12457_vm0, %v10029_v38 }
 0x22c   : > { %7751 = vmatprep.mubr.msk.bf16.mxu0 %vm12457_vm0, %v10046_v52  ;;  %v2311_v48 = vpop.f32.mrb[52].mxu0 }
 0x22d   : > { %v2313_v62 = vpop.f32.mrb[53].mxu0 }
 0x22e   : > { %v2315_v10 = vpop.f32.mrb[54].mxu0 }
 0x22f   : > { %v10208_v44 = vpack.c.bf16 %v2315_v10, %v2311_v48  ;;  %v2317_v60 = vpop.f32.mrb[55].mxu0 }
 0x230   : > { %v10210_v19 = vpack.c.bf16 %v2317_v60, %v2313_v62 }
 0x231   : > { %12583 = vst [vmem:[#allocation38_spill] sm:$0xff] %v10208_v44 }
 0x232   : > { %12584 = vst [vmem:[#allocation39_spill] sm:$0xff] %v10210_v19 }
 0x233   : > { %7752 = vmatmul.mubr.msk.bf16.gmra.mrb[100].mxu0 %vm12457_vm0, %v10066_v28 }
 0x234   : > { %7755 = vmatprep.mubr.msk.bf16.mxu0 %vm12457_vm0, %v10078_v13  ;;  %v2321_v2 = vpop.f32.mrb[56].mxu0 }
 0x235   : > { %v2323_v29 = vpop.f32.mrb[57].mxu0 }
 0x236   : > { %v2325_v35 = vpop.f32.mrb[58].mxu0 }
 0x237   : > { %v10216_v5 = vpack.c.bf16 %v2325_v35, %v2321_v2  ;;  %v2327_v15 = vpop.f32.mrb[59].mxu0 }
 0x238   : > { %v10218_v45 = vpack.c.bf16 %v2327_v15, %v2323_v29 }
 0x239   : > { %12585 = vst [vmem:[#allocation40_spill] sm:$0xff] %v10216_v5 }
 0x23a   : > { %12586 = vst [vmem:[#allocation41_spill] sm:$0xff] %v10218_v45 }
 0x23b   : > { %7756 = vmatmul.mubr.msk.bf16.gmra.mrb[104].mxu0 %vm12457_vm0, %v10091_v51 }
 0x23c   : > { %7759 = vmatprep.mubr.msk.bf16.mxu0 %vm12457_vm0, %v10101_v63  ;;  %v2331_v46 = vpop.f32.mrb[60].mxu0 }
 0x23d   : > { %v2333_v49 = vpop.f32.mrb[61].mxu0 }
 0x23e   : > { %v2335_v26 = vpop.f32.mrb[62].mxu0 }
 0x23f   : > { %v10224_v54 = vpack.c.bf16 %v2335_v26, %v2331_v46  ;;  %v2337_v41 = vpop.f32.mrb[63].mxu0 }
 0x240   : > { %v10226_v61 = vpack.c.bf16 %v2337_v41, %v2333_v49 }
 0x241   : > { %12587 = vst [vmem:[#allocation42_spill] sm:$0xff] %v10224_v54 }
 0x242   : > { %12588 = vst [vmem:[#allocation43_spill] sm:$0xff] %v10226_v61 }
 0x243   : > { %7760 = vmatmul.mubr.msk.bf16.gmra.mrb[108].mxu0 %vm12457_vm0, %v10111_v17 }
 0x244   : > { %v7363_v47 = vpop.f32.mrb[64].mxu0 }
 0x245   : > { %v7364_v55 = vpop.f32.mrb[65].mxu0 }
 0x246   : > { %v10230_v53 = vadd.f32 %v7364_v55, %v7363_v47  ;;  %v7366_v59 = vpop.f32.mrb[66].mxu0 }
 0x247   : > { %v7367_v7 = vpop.f32.mrb[67].mxu0 }
 0x248   : > { %v10232_v48 = vadd.f32 %v7367_v7, %v7366_v59 }
 0x24c   : > { %v7369_v62 = vpop.f32.mrb[68].mxu0 }
 0x24d   : > { %v7370_v10 = vpop.f32.mrb[69].mxu0 }
 0x24e   : > { %v10234_v60 = vadd.f32 %v7370_v10, %v7369_v62  ;;  %v7372_v2 = vpop.f32.mrb[70].mxu0 }
 0x24f   : > { %v7373_v29 = vpop.f32.mrb[71].mxu0 }
 0x250   : > { %v10236_v35 = vadd.f32 %v7373_v29, %v7372_v2 }
 0x254   : > { %v7375_v15 = vpop.f32.mrb[72].mxu0 }
 0x255   : > { %v7376_v46 = vpop.f32.mrb[73].mxu0 }
 0x256   : > { %v10238_v49 = vadd.f32 %v7376_v46, %v7375_v15  ;;  %v7378_v26 = vpop.f32.mrb[74].mxu0 }
 0x257   : > { %v7379_v41 = vpop.f32.mrb[75].mxu0 }
 0x258   : > { %v10240_v47 = vadd.f32 %v7379_v41, %v7378_v26 }
 0x25c   : > { %v7381_v55 = vpop.f32.mrb[76].mxu0 }
 0x25d   : > { %v7382_v0 = vpop.f32.mrb[77].mxu0  ;;  %v10309_v27 = vpop.permute.xlu0 %3278 }
 0x25e   : > { %v10242_v59 = vadd.f32 %v7382_v0, %v7381_v55  ;;  %v7384_v7 = vpop.f32.mrb[78].mxu0 }
 0x25f   : > { %v7385_v20 = vpop.f32.mrb[79].mxu0 }
 0x260   : > { %v10244_v62 = vadd.f32 %v7385_v20, %v7384_v7 }
 0x264   : > { %v7387_v2 = vpop.f32.mrb[80].mxu0 }
 0x265   : > { %v2487_v10 = vpop.f32.mrb[64].mxu1  ;;  %v7388_v58 = vpop.f32.mrb[81].mxu0 }
 0x266   : > { %v2489_v32 = vpop.f32.mrb[65].mxu1  ;;  %v10248_v46 = vadd.f32 %v7388_v58, %v7387_v2  ;;  %v7390_v26 = vpop.f32.mrb[82].mxu0 }
 0x267   : > { %v2491_v29 = vpop.f32.mrb[66].mxu1  ;;  %v7391_v9 = vpop.f32.mrb[83].mxu0 }
 0x268   : > { %v10246_v23 = vpack.c.bf16 %v2491_v29, %v2487_v10  ;;  %v2493_v15 = vpop.f32.mrb[67].mxu1  ;;  %v10253_v0 = vadd.f32 %v7391_v9, %v7390_v26 }
 0x269   : > { %v10250_v41 = vpack.c.bf16 %v2493_v15, %v2489_v32 }
 0x26a   : > { %7763 = vmatprep.subr.bf16.mxu1 %v10246_v23 }
 0x26b   : > { %7764 = vmatpush3.bf16.msra.mxu1 %v10246_v23 }
 0x26c   : > { %v7393_v55 = vpop.f32.mrb[84].mxu0 }
 0x26d   : > { %v2497_v20 = vpop.f32.mrb[68].mxu1  ;;  %v7394_v31 = vpop.f32.mrb[85].mxu0 }
 0x26e   : > { %v2499_v7 = vpop.f32.mrb[69].mxu1  ;;  %v10256_v10 = vadd.f32 %v7394_v31, %v7393_v55  ;;  %v7396_v29 = vpop.f32.mrb[86].mxu0 }
 0x26f   : > { %v2501_v25 = vpop.f32.mrb[70].mxu1  ;;  %v7397_v32 = vpop.f32.mrb[87].mxu0 }
 0x270   : > { %v10258_v58 = vpack.c.bf16 %v2501_v25, %v2497_v20  ;;  %v2503_v2 = vpop.f32.mrb[71].mxu1  ;;  %v10262_v57 = vadd.f32 %v7397_v32, %v7396_v29 }
 0x271   : > { %v10260_v15 = vpack.c.bf16 %v2503_v2, %v2499_v7 }
 0x272   : > { %7765 = vmatprep.subr.bf16.mxu1 %v10258_v58 }
 0x273   : > { %7766 = vmatpush3.bf16.msra.mxu1 %v10258_v58 }
 0x274   : > { %v7399_v26 = vpop.f32.mrb[88].mxu0 }
 0x275   : > { %v2507_v9 = vpop.f32.mrb[72].mxu1  ;;  %v7400_v45 = vpop.f32.mrb[89].mxu0 }
 0x276   : > { %v2509_v61 = vpop.f32.mrb[73].mxu1  ;;  %v10266_v31 = vadd.f32 %v7400_v45, %v7399_v26  ;;  %v7402_v55 = vpop.f32.mrb[90].mxu0 }
 0x277   : > { %v2511_v19 = vpop.f32.mrb[74].mxu1  ;;  %v7403_v22 = vpop.f32.mrb[91].mxu0 }
 0x278   : > { %v10268_v25 = vpack.c.bf16 %v2511_v19, %v2507_v9  ;;  %v2513_v20 = vpop.f32.mrb[75].mxu1  ;;  %v10272_v29 = vadd.f32 %v7403_v22, %v7402_v55 }
 0x279   : > { %v10270_v7 = vpack.c.bf16 %v2513_v20, %v2509_v61 }
 0x27a   : > { %7767 = vmatprep.subr.bf16.mxu1 %v10268_v25 }
 0x27b   : > { %7768 = vmatpush3.bf16.msra.mxu1 %v10268_v25 }
 0x27c   : > { %v7405_v32 = vpop.f32.mrb[92].mxu0 }
 0x27d   : > { %v2517_v2 = vpop.f32.mrb[76].mxu1  ;;  %v7406_v39 = vpop.f32.mrb[93].mxu0 }
 0x27e   : > { %v2519_v12 = vpop.f32.mrb[77].mxu1  ;;  %v10276_v45 = vadd.f32 %v7406_v39, %v7405_v32  ;;  %v7408_v26 = vpop.f32.mrb[94].mxu0 }
 0x27f   : > { %v2521_v6 = vpop.f32.mrb[78].mxu1  ;;  %v7409_v37 = vpop.f32.mrb[95].mxu0 }
 0x280   : > { %v10278_v19 = vpack.c.bf16 %v2521_v6, %v2517_v2  ;;  %v2523_v9 = vpop.f32.mrb[79].mxu1  ;;  %v10282_v22 = vadd.f32 %v7409_v37, %v7408_v26 }
 0x281   : > { %v10280_v61 = vpack.c.bf16 %v2523_v9, %v2519_v12 }
 0x282   : > { %7769 = vmatprep.subr.bf16.mxu1 %v10278_v19 }
 0x283   : > { %7770 = vmatpush3.bf16.msra.mxu1 %v10278_v19 }
 0x285   : > { %v2527_v55 = vpop.f32.mrb[80].mxu1 }
 0x286   : > { %v2529_v20 = vpop.f32.mrb[81].mxu1 }
 0x287   : > { %v2531_v21 = vpop.f32.mrb[82].mxu1 }
 0x288   : > { %v10286_v4 = vpack.c.bf16 %v2531_v21, %v2527_v55  ;;  %v2533_v39 = vpop.f32.mrb[83].mxu1 }
 0x289   : > { %v10288_v32 = vpack.c.bf16 %v2533_v39, %v2529_v20 }
 0x28a   : > { %12589 = vst [vmem:[#allocation44_spill] sm:$0xff] %v10286_v4  ;;  %7771 = vmatprep.subr.bf16.mxu1 %v10286_v4 }
 0x28b   : > { %12590 = vst [vmem:[#allocation45_spill] sm:$0xff] %v10288_v32  ;;  %7772 = vmatpush3.bf16.msra.mxu1 %v10286_v4 }
 0x28d   : > { %v2537_v6 = vpop.f32.mrb[84].mxu1 }
 0x28e   : > { %v2539_v12 = vpop.f32.mrb[85].mxu1 }
 0x28f   : > { %v2541_v37 = vpop.f32.mrb[86].mxu1 }
 0x290   : > { %v10292_v2 = vpack.c.bf16 %v2541_v37, %v2537_v6  ;;  %v2543_v26 = vpop.f32.mrb[87].mxu1 }
 0x291   : > { %v10294_v9 = vpack.c.bf16 %v2543_v26, %v2539_v12 }
 0x292   : > { %12591 = vst [vmem:[#allocation46_spill] sm:$0xff] %v10292_v2  ;;  %7773 = vmatprep.subr.bf16.mxu1 %v10292_v2 }
 0x293   : > { %12592 = vst [vmem:[#allocation47_spill] sm:$0xff] %v10294_v9  ;;  %7774 = vmatpush3.bf16.msra.mxu1 %v10292_v2 }
 0x295   : > { %v2547_v21 = vpop.f32.mrb[88].mxu1 }
 0x296   : > { %v2549_v55 = vpop.f32.mrb[89].mxu1 }
 0x297   : > { %v2551_v20 = vpop.f32.mrb[90].mxu1 }
 0x298   : > { %v10298_v39 = vpack.c.bf16 %v2551_v20, %v2547_v21  ;;  %v2553_v36 = vpop.f32.mrb[91].mxu1 }
 0x299   : > { %v10300_v3 = vpack.c.bf16 %v2553_v36, %v2549_v55 }
 0x29a   : > { %12593 = vst [vmem:[#allocation48_spill] sm:$0xff] %v10298_v39  ;;  %7775 = vmatprep.subr.bf16.mxu1 %v10298_v39 }
 0x29b   : > { %12594 = vst [vmem:[#allocation49_spill] sm:$0xff] %v10300_v3  ;;  %7776 = vmatpush3.bf16.msra.mxu1 %v10298_v39 }
 0x29d   : > { %v2557_v6 = vpop.f32.mrb[92].mxu1 }
 0x29e   : > { %v2559_v37 = vpop.f32.mrb[93].mxu1 }
 0x29f   : > { %v2561_v12 = vpop.f32.mrb[94].mxu1 }
 0x2a0   : > { %v10304_v26 = vpack.c.bf16 %v2561_v12, %v2557_v6  ;;  %v2563_v1 = vpop.f32.mrb[95].mxu1 }
 0x2a1   : > { %v10306_v56 = vpack.c.bf16 %v2563_v1, %v2559_v37 }
 0x2a2   : > { %12595 = vst [vmem:[#allocation50_spill] sm:$0xff] %v10304_v26  ;;  %7777 = vmatprep.subr.bf16.mxu1 %v10304_v26 }
 0x2a3   : > { %12596 = vst [vmem:[#allocation51_spill] sm:$0xff] %v10306_v56  ;;  %7778 = vmatpush3.bf16.msra.mxu1 %v10304_v26 }
 0x2a4   : > { %8363 = vmatprep.subr.msk.bf16.mxu1 %vm12457_vm0, %v10309_v27 }
 0x2a5   : > { %v7717_v36 = vpop.f32.mrb[96].mxu1 }
 0x2a6   : > { %v2697_v21 = vpop.f32.mrb[97].mxu1  ;;  %v2706_v55 = vadd.f32 %v7717_v36, %v10234_v60 }
 0x2a7   : > { %v2698_v20 = vadd.f32 %v10230_v53, %v2697_v21  ;;  %v7718_v6 = vpop.f32.mrb[98].mxu1 }
 0x2a8   : > { %v2700_v12 = vpop.f32.mrb[99].mxu1  ;;  %v2709_v1 = vadd.f32 %v7718_v6, %v10236_v35 }
 0x2a9   : > { %v2701_v37 = vadd.f32 %v10232_v48, %v2700_v12 }
 0x2aa   : > { %v10318_v8 = vpack.c.bf16 %v2709_v1, %v2706_v55 }
 0x2ab   : > { %v10320_v54 = vpack.c.bf16 %v2701_v37, %v2698_v20 }
 0x2ac   : > { %12597 = vst [vmem:[#allocation52_spill] sm:$0xff] %v10318_v8 }
 0x2ad   : > { %12598 = vst [vmem:[#allocation53_spill] sm:$0xff] %v10320_v54  ;;  %v7721_v5 = vpop.f32.mrb[100].mxu1 }
 0x2ae   : > { %v2713_v44 = vpop.f32.mrb[101].mxu1  ;;  %v2722_v43 = vadd.f32 %v7721_v5, %v10242_v59 }
 0x2af   : > { %v2714_v50 = vadd.f32 %v10238_v49, %v2713_v44  ;;  %v7722_v33 = vpop.f32.mrb[102].mxu1 }
 0x2b0   : > { %v2716_v60 = vpop.f32.mrb[103].mxu1  ;;  %v2725_v53 = vadd.f32 %v7722_v33, %v10244_v62 }
 0x2b1   : > { %v2717_v36 = vadd.f32 %v10240_v47, %v2716_v60 }
 0x2b2   : > { %v10326_v21 = vpack.c.bf16 %v2725_v53, %v2722_v43 }
 0x2b3   : > { %v10328_v35 = vpack.c.bf16 %v2717_v36, %v2714_v50 }
 0x2b4   : > { %12599 = vst [vmem:[#allocation54_spill] sm:$0xff] %v10326_v21 }
 0x2b5   : > { %12600 = vst [vmem:[#allocation55_spill] sm:$0xff] %v10328_v35  ;;  %v7725_v48 = vpop.f32.mrb[104].mxu1 }
 0x2b6   : > { %v2729_v55 = vpop.f32.mrb[105].mxu1  ;;  %v2738_v20 = vadd.f32 %v7725_v48, %v10256_v10 }
 0x2b7   : > { %v2730_v6 = vadd.f32 %v10248_v46, %v2729_v55  ;;  %v7726_v12 = vpop.f32.mrb[106].mxu1 }
 0x2b8   : > { %v2732_v5 = vpop.f32.mrb[107].mxu1  ;;  %v2741_v44 = vadd.f32 %v7726_v12, %v10262_v57 }
 0x2b9   : > { %v2733_v49 = vadd.f32 %v10253_v0, %v2732_v5  ;;  %v2760_v0 = vlaneseq }
 0x2ba   : > { %v10334_v59 = vpack.c.bf16 %v2741_v44, %v2738_v20 }
 0x2bb   : > { %v10336_v33 = vpack.c.bf16 %v2733_v49, %v2730_v6  ;;  %v10346_v53 = vshrl.u32 %v2760_v0, 7  ;;  %v10349_v48 = vand.u32 127, %v2760_v0 }
 0x2bc   : > { %12601 = vst [vmem:[#allocation56_spill] sm:$0xff] %v10334_v59 }
 0x2bd   : > { %12602 = vst [vmem:[#allocation57_spill] sm:$0xff] %v10336_v33  ;;  %v7729_v43 = vpop.f32.mrb[108].mxu1  ;;  %12605 = vst [vmem:[#allocation60_spill] sm:$0xff] %v10346_v53  ;;  %v2763_v36 = vadd.s32 16, %v10346_v53  ;;  %vm10359_vm2 = vcmp.le.s32.totalorder %v10349_v48, %v10346_v53  ;;  %v2762_v6 = vadd.s32 8, %v10346_v53  ;;  %v2769_v33 = vadd.s32 64, %v10346_v53 }
 0x2be   : > { %v2745_v47 = vpop.f32.mrb[109].mxu1  ;;  %v2754_v50 = vadd.f32 %v7729_v43, %v10276_v45  ;;  %v2775_v54 = vadd.s32 112, %v10346_v53  ;;  %v2773_v39 = vadd.s32 96, %v10346_v53  ;;  %v2774_v2 = vadd.s32 104, %v10346_v53 }
 0x2bf   : > { %v2746_v62 = vadd.f32 %v10266_v31, %v2745_v47  ;;  %v7730_v1 = vpop.f32.mrb[110].mxu1  ;;  %vm10352_vm1 = vcmp.le.s32.totalorder %v10349_v48, %v2763_v36  ;;  %vm10381_vm4 = vcmp.le.s32.totalorder %v10349_v48, %v2762_v6  ;;  %vm10463_vm11 = vcmp.le.s32.totalorder %v10349_v48, %v2769_v33 }
 0x2c0   : > { %v2748_v10 = vpop.f32.mrb[111].mxu1  ;;  %v2757_v46 = vadd.f32 %v7730_v1, %v10282_v22  ;;  %v2764_v22 = vadd.s32 24, %v10346_v53  ;;  %v2767_v1 = vadd.s32 48, %v10346_v53  ;;  %v12632_v14 = vsel %vm10463_vm11, 4294967295, %v12631_v14 }
 0x2c1   : > { %v2749_v37 = vadd.f32 %v10272_v29, %v2748_v10  ;;  %12633 = vst [vmem:[#allocation66_spill] sm:$0xff] %v12632_v14  ;;  %vm10478_vm13 = vcmp.le.s32.totalorder %v10349_v48, %v2775_v54  ;;  %vm10495_vm14 = vcmp.le.s32.totalorder %v10349_v48, %v2773_v39  ;;  %v12643_v39 = vmov 0 }
 0x2c2   : > { %v10342_v60 = vpack.c.bf16 %v2757_v46, %v2754_v50  ;;  %vm10374_vm3 = vcmp.le.s32.totalorder %v10349_v48, %v2764_v22  ;;  %v2768_v46 = vadd.s32 56, %v10346_v53  ;;  %vm10396_vm5 = vcmp.le.s32.totalorder %v10349_v48, %v2767_v1 }
 0x2c3   : > { %v10344_v57 = vpack.c.bf16 %v2749_v37, %v2746_v62  ;;  %vm10521_vm0 = vcmp.le.s32.totalorder %v10349_v48, %v2774_v2 }
 0x2c4   : > { %12603 = vst [vmem:[#allocation58_spill] sm:$0xff] %v10342_v60  ;;  %vm10403_vm6 = vcmp.le.s32.totalorder %v10349_v48, %v2768_v46 }
 0x2c5   : > { %12604 = vst [vmem:[#allocation59_spill] sm:$0xff] %v10344_v57  ;;  %v12619_v57 = vmov 0 }
 0x2fe   : > { %v7749_v45 = vpop.f32.mrb[96].mxu0 }
 0x2ff   : > { %v2967_v29 = vmul.f32 0.05103104, %v7749_v45  ;;  %v2902_v55 = vpop.f32.mrb[97].mxu0  ;;  %v12614_v45 = vmov 0 }
 0x300   : > { %v2965_v12 = vmul.f32 0.05103104, %v2902_v55  ;;  %v7750_v5 = vpop.f32.mrb[98].mxu0  ;;  %v12615_v45 = vsel %vm10396_vm5, 4294967295, %v12614_v45  ;;  %v2765_v55 = vadd.s32 32, %v10346_v53 }
 0x301   : > { %v2968_v44 = vmul.f32 0.05103104, %v7750_v5  ;;  %v2905_v49 = vpop.f32.mrb[99].mxu0  ;;  %v10366_v43 = vsel %vm10352_vm1, %v2967_v29, -inf  ;;  %12616 = vst [vmem:[#allocation61_spill] sm:$0xff] %v12615_v45  ;;  %v2766_v5 = vadd.s32 40, %v10346_v53 }
 0x302   : > { %v2966_v47 = vmul.f32 0.05103104, %v2905_v49  ;;  %3001 = vmax.xlane.f32.xlu1 %v10366_v43  ;;  %v10371_v50 = vsel %vm10359_vm2, %v2965_v12, -inf  ;;  %vm10419_vm7 = vcmp.le.s32.totalorder %v10349_v48, %v2765_v55  ;;  %v12625_v55 = vmov 0 }
 0x303   : > { %2997 = vmax.xlane.f32.xlu0 %v10371_v50  ;;  %v10388_v37 = vsel %vm10374_vm3, %v2968_v44, -inf  ;;  %v12620_v57 = vsel %vm10419_vm7, 4294967295, %v12619_v57  ;;  %vm10425_vm8 = vcmp.le.s32.totalorder %v10349_v48, %v2766_v5 }
 0x304   : > { %v10393_v36 = vsel %vm10381_vm4, %v2966_v47, -inf  ;;  %12621 = vst [vmem:[#allocation62_spill] sm:$0xff] %v12620_v57 }
 0x306   : > { %3003 = vmax.xlane.f32.xlu1 %v10388_v37  ;;  %v7753_v0 = vpop.f32.mrb[100].mxu0 }
 0x307   : > { %v2971_v22 = vmul.f32 0.05103104, %v7753_v0  ;;  %2999 = vmax.xlane.f32.xlu0 %v10393_v36  ;;  %v2918_v29 = vpop.f32.mrb[101].mxu0  ;;  %v2771_v0 = vadd.s32 80, %v10346_v53 }
 0x308   : > { %v7754_v6 = vpop.f32.mrb[102].mxu0  ;;  %v2969_v1 = vmul.f32 0.05103104, %v2918_v29  ;;  %v2772_v29 = vadd.s32 88, %v10346_v53 }
 0x309   : > { %v2972_v44 = vmul.f32 0.05103104, %v7754_v6  ;;  %v2921_v49 = vpop.f32.mrb[103].mxu0  ;;  %v10410_v47 = vsel %vm10396_vm5, %v2971_v22, -inf  ;;  %v12622_v22 = vmov 0  ;;  %vm10435_vm9 = vcmp.le.s32.totalorder %v10349_v48, %v2771_v0 }
 0x30a   : > { %v2970_v60 = vmul.f32 0.05103104, %v2921_v49  ;;  %v12623_v22 = vsel %vm10425_vm8, 4294967295, %v12622_v22  ;;  %v10432_v49 = vsel %vm10419_vm7, %v2969_v1, -inf  ;;  %v12626_v55 = vsel %vm10435_vm9, 4294967295, %v12625_v55 }
 0x30b   : > { %3009 = vmax.xlane.f32.xlu0 %v10410_v47  ;;  %v10416_v46 = vsel %vm10403_vm6, %v2972_v44, -inf  ;;  %12624 = vst [vmem:[#allocation63_spill] sm:$0xff] %v12623_v22  ;;  %12627 = vst [vmem:[#allocation64_spill] sm:$0xff] %v12626_v55  ;;  %vm10447_vm10 = vcmp.le.s32.totalorder %v10349_v48, %v2772_v29  ;;  %v12628_v1 = vmov 0  ;;  %v2770_v0 = vadd.s32 72, %v10346_v53 }
 0x30c   : > { %3011 = vmax.xlane.f32.xlu1 %v10416_v46  ;;  %v10442_v5 = vsel %vm10425_vm8, %v2970_v60, -inf  ;;  %v12629_v1 = vsel %vm10447_vm10, 4294967295, %v12628_v1 }
 0x30d   : > { %12630 = vst [vmem:[#allocation65_spill] sm:$0xff] %v12629_v1  ;;  %vm10469_vm12 = vcmp.le.s32.totalorder %v10349_v48, %v2770_v0 }
 0x30e   : > { %v7757_v6 = vpop.f32.mrb[104].mxu0 }
 0x30f   : > { %v2975_v44 = vmul.f32 0.05103104, %v7757_v6  ;;  %3005 = vmax.xlane.f32.xlu0 %v10432_v49  ;;  %v2934_v59 = vpop.f32.mrb[105].mxu0 }
 0x310   : > { %3007 = vmax.xlane.f32.xlu1 %v10442_v5  ;;  %v7758_v21 = vpop.f32.mrb[106].mxu0  ;;  %v2973_v60 = vmul.f32 0.05103104, %v2934_v59 }
 0x311   : > { %v2976_v6 = vmul.f32 0.05103104, %v7758_v21  ;;  %v2937_v35 = vpop.f32.mrb[107].mxu0  ;;  %v10454_v8 = vsel %vm10435_vm9, %v2975_v44, -inf  ;;  %v12634_v21 = vmov 0  ;;  %v12637_v44 = vmov 0 }
 0x312   : > { %v2974_v30 = vmul.f32 0.05103104, %v2937_v35  ;;  %v12635_v21 = vsel %vm10469_vm12, 4294967295, %v12634_v21  ;;  %v10475_v35 = vsel %vm10463_vm11, %v2973_v60, -inf  ;;  %v12638_v44 = vsel %vm10478_vm13, 4294967295, %v12637_v44 }
 0x313   : > { %3017 = vmax.xlane.f32.xlu0 %v10454_v8  ;;  %v10460_v29 = vsel %vm10447_vm10, %v2976_v6, -inf  ;;  %12636 = vst [vmem:[#allocation67_spill] sm:$0xff] %v12635_v21  ;;  %12639 = vst [vmem:[#allocation68_spill] sm:$0xff] %v12638_v44 }
 0x314   : > { %3019 = vmax.xlane.f32.xlu1 %v10460_v29  ;;  %v10485_v0 = vsel %vm10469_vm12, %v2974_v30, -inf }
 0x316   : > { %v7761_v59 = vpop.f32.mrb[108].mxu0 }
 0x317   : > { %v2979_v33 = vmul.f32 0.05103104, %v7761_v59  ;;  %3013 = vmax.xlane.f32.xlu0 %v10475_v35  ;;  %v2950_v6 = vpop.f32.mrb[109].mxu0  ;;  %v12640_v59 = vmov 0 }
 0x318   : > { %3015 = vmax.xlane.f32.xlu1 %v10485_v0  ;;  %v7762_v26 = vpop.f32.mrb[110].mxu0  ;;  %v2977_v4 = vmul.f32 0.05103104, %v2950_v6  ;;  %v12641_v59 = vsel %vm10495_vm14, 4294967295, %v12640_v59 }
 0x319   : > { %v2953_v60 = vpop.f32.mrb[111].mxu0  ;;  %v10491_v54 = vsel %vm10478_vm13, %v2979_v33, -inf  ;;  %12642 = vst [vmem:[#allocation69_spill] sm:$0xff] %v12641_v59  ;;  %v2776_v33 = vadd.s32 120, %v10346_v53  ;;  %v2980_v6 = vmul.f32 0.05103104, %v7762_v26  ;;  %v10530_v26 = vpop.permute.xlu1 %3280 }
 0x31a   : > { %v10501_v30 = vsel %vm10495_vm14, %v2977_v4, -inf  ;;  %v2978_v4 = vmul.f32 0.05103104, %v2953_v60  ;;  %vm12649_vm14 = vcmask 523264  }
 0x31b   : > { %3025 = vmax.xlane.f32.xlu0 %v10491_v54  ;;  %vm10510_vm15 = vcmp.le.s32.totalorder %v10349_v48, %v2776_v33 }
 0x31c   : > { %v12644_v39 = vsel %vm10510_vm15, 4294967295, %v12643_v39  ;;  %v10517_v59 = vsel %vm10510_vm15, %v2980_v6, -inf }
 0x31d   : > { %12645 = vst [vmem:[#allocation70_spill] sm:$0xff] %v12644_v39 }
 0x31f   : > { %3021 = vmax.xlane.f32.xlu0 %v10501_v30 }
 0x329   : > { %3284 = vrot.lane.b32.xlu1 %v10146_v42, %s9564_s21  ;;  %v10527_v42 = vsel %vm10521_vm0, %v2978_v4, -inf }
 0x335   : > { %3282 = vrot.lane.b32.xlu0 %v10138_v34, %s9564_s21  ;;  %v12646_v34 = vmov 0 }
 0x336   : > { %v12647_v34 = vsel %vm10521_vm0, 4294967295, %v12646_v34  ;;  %vm12650_vm0 = vmmov %vm12649_vm14 }
 0x337   : > { %12648 = vst [vmem:[#allocation71_spill] sm:$0xff] %v12647_v34  ;;  %vm12651_vm13 = vmmov %vm12650_vm0 }
 0x338   : > { %vm12652_vm15 = vmmov %vm12650_vm0 }
 0x339   : > { %vm12653_vm11 = vmmov %vm12650_vm0 }
 0x33a   : > { %vm12654_vm12 = vmmov %vm12650_vm0 }
 0x33b   : > { %vm12655_vm9 = vmmov %vm12650_vm0 }
 0x34d   : > { %3027 = vmax.xlane.f32.xlu1 %v10517_v59 }
 0x351   : > { %3023 = vmax.xlane.f32.xlu1 %v10527_v42 }
 0x38f   : > { %v3002_v60 = vpop.xlane.xlu1 %3001 }
 0x390   : > { %v3031_v33 = vsub.f32 %v10366_v43, %v3002_v60  ;;  %v2998_v6 = vpop.xlane.xlu0 %2997 }
 0x391   : > { %v3029_v53 = vsub.f32 %v10371_v50, %v2998_v6 }
 0x392   : > { %v3049_v44 = vmul.f32 1.442695, %v3031_v33 }
 0x393   : > { %v3045_v39 = vmul.f32 1.442695, %v3029_v53  ;;  %v3004_v2 = vpop.xlane.xlu1 %3003 }
 0x394   : > { %9012 = vpow2.f32 %v3049_v44  ;;  %v3032_v48 = vsub.f32 %v10388_v37, %v3004_v2  ;;  %v3000_v14 = vpop.xlane.xlu0 %2999 }
 0x395   : > { %v3030_v4 = vsub.f32 %v10393_v36, %v3000_v14  ;;  %9014 = vpow2.f32 %v3045_v39 }
 0x396   : > { %v3051_v34 = vmul.f32 1.442695, %v3032_v48 }
 0x397   : > { %v3047_v21 = vmul.f32 1.442695, %v3030_v4 }
 0x398   : > { %9016 = vpow2.f32 %v3051_v34  ;;  %v3010_v14 = vpop.xlane.xlu0 %3009 }
 0x399   : > { %9018 = vpow2.f32 %v3047_v21  ;;  %v3012_v21 = vpop.xlane.xlu1 %3011  ;;  %v3035_v34 = vsub.f32 %v10410_v47, %v3010_v14 }
 0x39a   : > { %v3036_v4 = vsub.f32 %v10416_v46, %v3012_v21 }
 0x39b   : > { %v3057_v6 = vmul.f32 1.442695, %v3035_v34 }
 0x39c   : > { %v3006_v37 = vpop.xlane.xlu0 %3005  ;;  %v3059_v22 = vmul.f32 1.442695, %v3036_v4 }
 0x39d   : > { %v3008_v39 = vpop.xlane.xlu1 %3007  ;;  %v3033_v60 = vsub.f32 %v10432_v49, %v3006_v37  ;;  %9020 = vpow2.f32 %v3057_v6 }
 0x39e   : > { %v10536_v55 = vpop.eup %9012  ;;  %v3034_v2 = vsub.f32 %v10442_v5, %v3008_v39 }
 0x39f   : > { %3081 = vadd.xlane.f32.xlu0 %v10536_v55  ;;  %v10539_v43 = vpop.eup %9014  ;;  %v3053_v1 = vmul.f32 1.442695, %v3033_v60 }
 0x3a0   : > { %v3018_v36 = vpop.xlane.xlu0 %3017 }
 0x3a1   : > { %v3020_v48 = vpop.xlane.xlu1 %3019  ;;  %9022 = vpow2.f32 %v3053_v1  ;;  %v3039_v45 = vsub.f32 %v10454_v8, %v3018_v36 }
 0x3a2   : > { %v10541_v50 = vpop.eup %9016  ;;  %v3040_v8 = vsub.f32 %v10460_v29, %v3020_v48 }
 0x3a3   : > { %3077 = vadd.xlane.f32.xlu0 %v10539_v43  ;;  %3083 = vadd.xlane.f32.xlu1 %v10541_v50  ;;  %v10545_v53 = vpop.eup %9018  ;;  %v3065_v5 = vmul.f32 1.442695, %v3039_v45 }
 0x3a4   : > { %v3014_v44 = vpop.xlane.xlu0 %3013 }
 0x3a5   : > { %v3016_v47 = vpop.xlane.xlu1 %3015  ;;  %v3037_v37 = vsub.f32 %v10475_v35, %v3014_v44  ;;  %v3067_v35 = vmul.f32 1.442695, %v3040_v8 }
 0x3a7   : > { %3079 = vadd.xlane.f32.xlu1 %v10545_v53  ;;  %v10562_v39 = vpop.eup %9020  ;;  %v3061_v1 = vmul.f32 1.442695, %v3037_v37 }
 0x3a8   : > { %v3026_v33 = vpop.xlane.xlu0 %3025 }
 0x3a9   : > { %v10560_v21 = vpop.permute.xlu1 %3284 }
 0x3ac   : > { %v3022_v57 = vpop.xlane.xlu0 %3021 }
 0x3ad   : > { %v3041_v14 = vsub.f32 %v10501_v30, %v3022_v57  ;;  %v3038_v30 = vsub.f32 %v10485_v0, %v3016_v47  ;;  %v3319_v47 = vsel %vm12649_vm14, %v10309_v27, 0  ;;  %vm12656_vm14 = vmmov %vm12650_vm0 }
 0x3af   : > { %v3069_v46 = vmul.f32 1.442695, %v3041_v14 }
 0x3b8   : > { %3288 = vrot.lane.b32.xlu1 %v10168_v24, %s9564_s21  ;;  %v3055_v24 = vmul.f32 1.442695, %v3034_v2 }
 0x3b9   : > { %3286 = vrot.lane.b32.xlu0 %v10156_v18, %s9564_s21  ;;  %v3043_v18 = vsub.f32 %v10491_v54, %v3026_v33  ;;  %v10566_v54 = vpop.eup %9022 }
 0x3ba   : > { %9024 = vpow2.f32 %v3055_v24 }
 0x3bb   : > { %v3073_v49 = vmul.f32 1.442695, %v3043_v18  ;;  %9026 = vpow2.f32 %v3059_v22 }
 0x3bd   : > { %9028 = vpow2.f32 %v3073_v49 }
 0x3be   : > { %9030 = vpow2.f32 %v3065_v5 }
 0x3bf   : > { %9032 = vpow2.f32 %v3069_v46 }
 0x3c0   : > { %9034 = vpow2.f32 %v3061_v1 }
 0x3c4   : > { %v10568_v22 = vpop.eup %9024 }
 0x3c5   : > { %v10574_v44 = vpop.eup %9026 }
 0x3c7   : > { %v10576_v34 = vpop.eup %9028 }
 0x3c8   : > { %v10581_v33 = vpop.eup %9030 }
 0x3c9   : > { %v10583_v6 = vpop.eup %9032 }
 0x3ca   : > { %v10587_v2 = vpop.eup %9034 }
 0x3d8   : > { %3089 = vadd.xlane.f32.xlu0 %v10562_v39 }
 0x3da   : > { %v3028_v57 = vpop.xlane.xlu1 %3027 }
 0x3db   : > { %v3044_v45 = vsub.f32 %v10517_v59, %v3028_v57  ;;  %v3063_v59 = vmul.f32 1.442695, %v3038_v30 }
 0x3dc   : > { %3087 = vadd.xlane.f32.xlu0 %v10568_v22  ;;  %3085 = vadd.xlane.f32.xlu1 %v10566_v54 }
 0x3dd   : > { %v3075_v36 = vmul.f32 1.442695, %v3044_v45 }
 0x3de   : > { %v3024_v29 = vpop.xlane.xlu1 %3023 }
 0x3df   : > { %9036 = vpow2.f32 %v3075_v36  ;;  %v3042_v60 = vsub.f32 %v10527_v42, %v3024_v29 }
 0x3e0   : > { %3105 = vadd.xlane.f32.xlu0 %v10576_v34  ;;  %3091 = vadd.xlane.f32.xlu1 %v10574_v44  ;;  %9038 = vpow2.f32 %v3067_v35 }
 0x3e1   : > { %9040 = vpow2.f32 %v3063_v59  ;;  %v3071_v0 = vmul.f32 1.442695, %v3042_v60 }
 0x3e3   : > { %9042 = vpow2.f32 %v3071_v0 }
 0x3e4   : > { %3101 = vadd.xlane.f32.xlu0 %v10583_v6  ;;  %3097 = vadd.xlane.f32.xlu1 %v10581_v33 }
 0x3e8   : > { %3093 = vadd.xlane.f32.xlu1 %v10587_v2 }
 0x3e9   : > { %v10590_v48 = vpop.eup %9036 }
 0x3ea   : > { %3107 = vadd.xlane.f32.xlu0 %v10590_v48  ;;  %v10593_v42 = vpop.eup %9038 }
 0x3eb   : > { %v10596_v4 = vpop.eup %9040 }
 0x3ec   : > { %3099 = vadd.xlane.f32.xlu1 %v10593_v42 }
 0x3ed   : > { %v10599_v24 = vpop.eup %9042 }
 0x3f0   : > { %3095 = vadd.xlane.f32.xlu1 %v10596_v4 }
 0x3f4   : > { %3103 = vadd.xlane.f32.xlu1 %v10599_v24 }
 0x400   : > { %3290 = vrot.lane.b32.xlu0 %v10180_v11, %s9564_s21 }
 0x404   : > { %3254 = vrot.lane.b32.xlu0 %v10013_v16, %s9564_s21  ;;  %v3283_v16 = vpop.permute.xlu0 %3282 }
 0x405   : > { %3292 = vrot.lane.b32.xlu1 %v10192_v40, %s9564_s21 }
 0x408   : > { %3258 = vrot.lane.b32.xlu0 %v10046_v52, %s9564_s21 }
 0x409   : > { %3256 = vrot.lane.b32.xlu1 %v10029_v38, %s9564_s21 }
 0x40c   : > { %3262 = vrot.lane.b32.xlu0 %v10078_v13, %s9564_s21 }
 0x40d   : > { %3260 = vrot.lane.b32.xlu1 %v10066_v28, %s9564_s21 }
 0x410   : > { %3266 = vrot.lane.b32.xlu0 %v10101_v63, %s9564_s21 }
 0x411   : > { %3264 = vrot.lane.b32.xlu1 %v10091_v51, %s9564_s21 }
 0x414   : > { %3631 = vrot.lane.b32.xlu0 %v10246_v23, %s9564_s21 }
 0x415   : > { %3268 = vrot.lane.b32.xlu1 %v10111_v17, %s9564_s21 }
 0x418   : > { %3635 = vrot.lane.b32.xlu0 %v10268_v25, %s9564_s21 }
 0x419   : > { %3633 = vrot.lane.b32.xlu1 %v10258_v58, %s9564_s21 }
 0x41d   : > { %3637 = vrot.lane.b32.xlu1 %v10278_v19, %s9564_s21 }
 0x42c   : > { %v3082_v38 = vpop.xlane.xlu0 %3081 }
 0x430   : > { %v3078_v52 = vpop.xlane.xlu0 %3077  ;;  %v3084_v28 = vpop.xlane.xlu1 %3083 }
 0x431   : > { %9044 = vrcp.f32 %v3084_v28 }
 0x432   : > { %9046 = vrcp.f32 %v3078_v52 }
 0x433   : > { %9048 = vrcp.f32 %v3082_v38 }
 0x434   : > { %v3080_v13 = vpop.xlane.xlu1 %3079  ;;  %v3287_v27 = vpop.permute.xlu0 %3286 }
 0x435   : > { %9050 = vrcp.f32 %v3080_v13 }
 0x43b   : > { %v9045_v51 = vpop.eup %9044 }
 0x43c   : > { %v9047_v63 = vpop.eup %9046  ;;  %v3128_v11 = vmul.f32 %v9045_v51, %v10541_v50  ;;  %v3322_v50 = vsel %vm12651_vm13, %v10530_v26, 0  ;;  %vm12657_vm13 = vmmov %vm12650_vm0 }
 0x43d   : > { %v9049_v17 = vpop.eup %9048  ;;  %v3125_v40 = vmul.f32 %v9047_v63, %v10539_v43  ;;  %v3325_v43 = vsel %vm12653_vm11, %v3283_v16, 0  ;;  %vm12658_vm11 = vmmov %vm12650_vm0 }
 0x43e   : > { %v3127_v25 = vmul.f32 %v9049_v17, %v10536_v55  ;;  %v3328_v55 = vsel %vm12655_vm9, %v10560_v21, 0  ;;  %vm12659_vm9 = vmmov %vm12650_vm0 }
 0x43f   : > { %v9051_v23 = vpop.eup %9050 }
 0x440   : > { %v3126_v58 = vmul.f32 %v9051_v23, %v10545_v53  ;;  %v3142_v18 = vpack.c.bf16 %v3128_v11, %v3127_v25  ;;  %v3289_v53 = vpop.permute.xlu1 %3288 }
 0x441   : > { %v3334_v46 = vsel %vm12658_vm11, %v3289_v53, 0  ;;  %vm12664_vm11 = vmmov %vm12650_vm0 }
 0x442   : > { %v3141_v19 = vpack.c.bf16 %v3126_v58, %v3125_v40 }
 0x444   : > { %7779 = vmatprep.mubr.bf16.mxu1 %v3141_v19 }
 0x445   : > { %7780 = vmatmul.mubr.bf16.vlgmr.msra.gmra.mrb[112].mxu1 %v3142_v18 }
 0x446   : > { %7796 = vmatpush3.bf16.xpose.msra.mxu1 %v3319_v47 }
 0x447   : > { %8364 = vmatprep.subr.msk.bf16.mxu1 %vm12650_vm0, %v10530_v26  ;;  %v3331_v26 = vsel %vm12650_vm0, %v3287_v27, 0 }
 0x44e   : > { %7798 = vmatpush3.bf16.xpose.msra.mxu1 %v3322_v50 }
 0x44f   : > { %8365 = vmatprep.subr.msk.bf16.mxu1 %vm12652_vm15, %v3283_v16  ;;  %vm12661_vm15 = vmmov %vm12650_vm0 }
 0x456   : > { %7800 = vmatpush3.bf16.xpose.msra.mxu1 %v3325_v43 }
 0x457   : > { %8366 = vmatprep.subr.msk.bf16.mxu1 %vm12654_vm12, %v10560_v21  ;;  %vm12660_vm12 = vmmov %vm12650_vm0 }
 0x45e   : > { %7802 = vmatpush3.bf16.xpose.msra.mxu1 %v3328_v55 }
 0x45f   : > { %8367 = vmatprep.subr.msk.bf16.mxu1 %vm12656_vm14, %v3287_v27  ;;  %vm12662_vm14 = vmmov %vm12650_vm0 }
 0x465   : > { %v3090_v49 = vpop.xlane.xlu0 %3089 }
 0x466   : > { %7804 = vmatpush3.bf16.xpose.msra.mxu1 %v3331_v26 }
 0x467   : > { %8368 = vmatprep.subr.msk.bf16.mxu1 %vm12657_vm13, %v3289_v53  ;;  %vm12663_vm13 = vmmov %vm12650_vm0 }
 0x469   : > { %v3088_v14 = vpop.xlane.xlu0 %3087  ;;  %v3086_v5 = vpop.xlane.xlu1 %3085 }
 0x46a   : > { %9052 = vrcp.f32 %v3088_v14 }
 0x46b   : > { %9054 = vrcp.f32 %v3086_v5 }
 0x46c   : > { %9056 = vrcp.f32 %v3090_v49 }
 0x46d   : > { %v3106_v37 = vpop.xlane.xlu0 %3105  ;;  %v3092_v21 = vpop.xlane.xlu1 %3091 }
 0x46e   : > { %7806 = vmatpush3.bf16.xpose.msra.mxu1 %v3334_v46  ;;  %9058 = vrcp.f32 %v3092_v21 }
 0x471   : > { %v3098_v8 = vpop.xlane.xlu1 %3097  ;;  %v3102_v1 = vpop.xlane.xlu0 %3101 }
 0x474   : > { %v9053_v57 = vpop.eup %9052 }
 0x475   : > { %v9055_v45 = vpop.eup %9054  ;;  %v3094_v35 = vpop.xlane.xlu1 %3093  ;;  %v3130_v30 = vmul.f32 %v9053_v57, %v10568_v22 }
 0x476   : > { %v3129_v36 = vmul.f32 %v9055_v45, %v10566_v54  ;;  %v9057_v29 = vpop.eup %9056 }
 0x477   : > { %v3108_v59 = vpop.xlane.xlu0 %3107  ;;  %v3131_v38 = vmul.f32 %v9057_v29, %v10562_v39 }
 0x478   : > { %v3143_v60 = vpack.c.bf16 %v3130_v30, %v3129_v36  ;;  %v9059_v0 = vpop.eup %9058 }
 0x479   : > { %v3100_v16 = vpop.xlane.xlu1 %3099  ;;  %v3132_v52 = vmul.f32 %v9059_v0, %v10574_v44 }
 0x47a   : > { %7783 = vmatprep.mubr.bf16.mxu1 %v3143_v60  ;;  %9060 = vrcp.f32 %v3100_v16 }
 0x47b   : > { %v3291_v28 = vpop.permute.xlu0 %3290  ;;  %9062 = vrcp.f32 %v3094_v35  ;;  %v3144_v13 = vpack.c.bf16 %v3132_v52, %v3131_v38 }
 0x47c   : > { %8369 = vmatprep.subr.msk.bf16.mxu1 %vm12659_vm9, %v3291_v28  ;;  %v3337_v22 = vsel %vm12660_vm12, %v3291_v28, 0  ;;  %9064 = vrcp.f32 %v3098_v8  ;;  %vm12665_vm9 = vmmov %vm12650_vm0 }
 0x47d   : > { %7808 = vmatpush3.bf16.xpose.msra.mxu1 %v3337_v22  ;;  %v3096_v54 = vpop.xlane.xlu1 %3095  ;;  %vm12666_vm12 = vmmov %vm12650_vm0 }
 0x47e   : > { %7784 = vmatmul.mubr.bf16.gmra.mrb[116].mxu1 %v3144_v13  ;;  %9066 = vrcp.f32 %v3096_v54 }
 0x47f   : > { %v3255_v51 = vpop.permute.xlu0 %3254  ;;  %9068 = vrcp.f32 %v3102_v1 }
 0x481   : > { %v3104_v63 = vpop.xlane.xlu1 %3103 }
 0x482   : > { %9070 = vrcp.f32 %v3104_v63 }
 0x483   : > { %9072 = vrcp.f32 %v3108_v59  ;;  %v3259_v39 = vpop.permute.xlu0 %3258 }
 0x484   : > { %v9061_v44 = vpop.eup %9060  ;;  %9074 = vrcp.f32 %v3106_v37 }
 0x485   : > { %v3293_v17 = vpop.permute.xlu1 %3292  ;;  %v9063_v23 = vpop.eup %9062  ;;  %v3136_v19 = vmul.f32 %v9061_v44, %v10593_v42 }
 0x486   : > { %8370 = vmatprep.subr.msk.bf16.mxu1 %vm12661_vm15, %v3293_v17  ;;  %v3340_v11 = vsel %vm12662_vm14, %v3293_v17, 0  ;;  %v9065_v40 = vpop.eup %9064  ;;  %v3133_v47 = vmul.f32 %v9063_v23, %v10587_v2  ;;  %vm12667_vm15 = vmmov %vm12650_vm0 }
 0x487   : > { %v3263_v58 = vpop.permute.xlu0 %3262  ;;  %7810 = vmatpush3.bf16.xpose.msra.mxu1 %v3340_v11  ;;  %v3135_v55 = vmul.f32 %v9065_v40, %v10581_v33  ;;  %vm12668_vm14 = vmmov %vm12650_vm0 }
 0x488   : > { %v9067_v25 = vpop.eup %9066  ;;  %7891 = vmatprep.subr.bf16.mxu1 %v10250_v41 }
 0x489   : > { %v3257_v18 = vpop.permute.xlu1 %3256  ;;  %v3134_v50 = vmul.f32 %v9067_v25, %v10596_v4  ;;  %v9069_v43 = vpop.eup %9068  ;;  %v3146_v26 = vpack.c.bf16 %v3136_v19, %v3135_v55 }
 0x48a   : > { %v3137_v37 = vmul.f32 %v9069_v43, %v10583_v6 }
 0x48b   : > { %v3267_v27 = vpop.permute.xlu0 %3266  ;;  %v3145_v53 = vpack.c.bf16 %v3134_v50, %v3133_v47 }
 0x48c   : > { %v9071_v49 = vpop.eup %9070 }
 0x48d   : > { %v9073_v14 = vpop.eup %9072  ;;  %7787 = vmatprep.mubr.bf16.mxu1 %v3145_v53  ;;  %v3261_v5 = vpop.permute.xlu1 %3260  ;;  %v3138_v46 = vmul.f32 %v9071_v49, %v10599_v24 }
 0x48e   : > { %7788 = vmatmul.mubr.bf16.gmra.mrb[120].mxu1 %v3146_v26  ;;  %v9075_v42 = vpop.eup %9074  ;;  %v3140_v4 = vmul.f32 %v9073_v14, %v10590_v48 }
 0x48f   : > { %v3632_v21 = vpop.permute.xlu0 %3631  ;;  %v3147_v2 = vpack.c.bf16 %v3138_v46, %v3137_v37  ;;  %v3139_v8 = vmul.f32 %v9075_v42, %v10576_v34 }
 0x490   : > { %7827 = vmatprep.subr.bf16.mxu0 %v3632_v21 }
 0x491   : > { %7791 = vmatprep.mubr.bf16.mxu1 %v3147_v2  ;;  %7828 = vmatpush3.bf16.msra.mxu0 %v3632_v21  ;;  %v3265_v33 = vpop.permute.xlu1 %3264  ;;  %v3148_v1 = vpack.c.bf16 %v3140_v4, %v3139_v8 }
 0x493   : > { %v3636_v24 = vpop.permute.xlu0 %3635 }
 0x495   : > { %v3269_v57 = vpop.permute.xlu1 %3268 }
 0x496   : > { %7792 = vmatmul.mubr.bf16.gmra.mrb[124].mxu1 %v3148_v1 }
 0x497   : > { %7811 = vmatprep.mubr.msk.bf16.mxu1 %vm12650_vm0, %v3255_v51 }
 0x499   : > { %v3634_v6 = vpop.permute.xlu1 %3633 }
 0x49a   : > { %7829 = vmatprep.subr.bf16.mxu0 %v3634_v6 }
 0x49b   : > { %7830 = vmatpush3.bf16.msra.mxu0 %v3634_v6 }
 0x49c   : > { %7831 = vmatprep.subr.bf16.mxu0 %v3636_v24 }
 0x49d   : > { %v3638_v48 = vpop.permute.xlu1 %3637 }
 0x49e   : > { %7812 = vmatmul.mubr.msk.bf16.vlgmr.msra.gmra.mrb[128].mxu1 %vm12663_vm13, %v3257_v18 }
 0x49f   : > { %7892 = vmatpush3.bf16.msra.mxu1 %v10250_v41  ;;  %7815 = vmatprep.mubr.msk.bf16.mxu1 %vm12664_vm11, %v3259_v39 }
 0x4a0   : > { %7832 = vmatpush3.bf16.msra.mxu0 %v3636_v24  ;;  %7893 = vmatprep.subr.bf16.mxu1 %v10260_v15 }
 0x4a1   : > { %7833 = vmatprep.subr.bf16.mxu0 %v3638_v48 }
 0x4a3   : > { %7894 = vmatpush3.bf16.msra.mxu1 %v10260_v15 }
 0x4a4   : > { %7834 = vmatpush3.bf16.msra.mxu0 %v3638_v48  ;;  %7895 = vmatprep.subr.bf16.mxu1 %v10270_v7  ;;  %v12688_v48 = vld [vmem:[#allocation65_spill] sm:$0xff] }
 0x4a6   : > { %7816 = vmatmul.mubr.msk.bf16.gmra.mrb[132].mxu1 %vm12665_vm9, %v3261_v5 }
 0x4a7   : > { %7896 = vmatpush3.bf16.msra.mxu1 %v10270_v7  ;;  %7819 = vmatprep.mubr.msk.bf16.mxu1 %vm12666_vm12, %v3263_v58 }
 0x4a8   : > { %7897 = vmatprep.subr.bf16.mxu1 %v10280_v61 }
 0x4ab   : > { %7898 = vmatpush3.bf16.msra.mxu1 %v10280_v61 }
 0x4ac   : > { %7899 = vmatprep.subr.bf16.mxu1 %v10288_v32 }
 0x4ae   : > { %7820 = vmatmul.mubr.msk.bf16.gmra.mrb[136].mxu1 %vm12667_vm15, %v3265_v33 }
 0x4af   : > { %7900 = vmatpush3.bf16.msra.mxu1 %v10288_v32  ;;  %7823 = vmatprep.mubr.msk.bf16.mxu1 %vm12668_vm14, %v3267_v27 }
 0x4b0   : > { %7901 = vmatprep.subr.bf16.mxu1 %v10294_v9 }
 0x4b3   : > { %7902 = vmatpush3.bf16.msra.mxu1 %v10294_v9 }
 0x4b4   : > { %7903 = vmatprep.subr.bf16.mxu1 %v10300_v3 }
 0x4b6   : > { %7824 = vmatmul.mubr.msk.bf16.gmra.mrb[140].mxu1 %vm12650_vm0, %v3269_v57 }
 0x4b7   : > { %7904 = vmatpush3.bf16.msra.mxu1 %v10300_v3 }
 0x4b8   : > { %7905 = vmatprep.subr.bf16.mxu1 %v10306_v56 }
 0x4bb   : > { %7906 = vmatpush3.bf16.msra.mxu1 %v10306_v56 }
 0x518   : > { %v10690_v34 = vpop.f32.mrb[112].mxu1 }
 0x519   : > { %12669 = vst [vmem:[#allocation72_spill] sm:$0xff] %v10690_v34  ;;  %v10692_v45 = vpop.f32.mrb[113].mxu1 }
 0x51a   : > { %12670 = vst [vmem:[#allocation73_spill] sm:$0xff] %v10692_v45  ;;  %v10694_v35 = vpop.f32.mrb[114].mxu1 }
 0x51b   : > { %12671 = vst [vmem:[#allocation74_spill] sm:$0xff] %v10694_v35  ;;  %v10696_v30 = vpop.f32.mrb[115].mxu1 }
 0x51c   : > { %12672 = vst [vmem:[#allocation75_spill] sm:$0xff] %v10696_v30 }
 0x551   : > { %v10698_v36 = vpop.f32.mrb[116].mxu1 }
 0x552   : > { %12673 = vst [vmem:[#allocation76_spill] sm:$0xff] %v10698_v36  ;;  %v10700_v29 = vpop.f32.mrb[117].mxu1 }
 0x553   : > { %12674 = vst [vmem:[#allocation77_spill] sm:$0xff] %v10700_v29  ;;  %v10702_v59 = vpop.f32.mrb[118].mxu1 }
 0x554   : > { %12675 = vst [vmem:[#allocation78_spill] sm:$0xff] %v10702_v59  ;;  %v10704_v60 = vpop.f32.mrb[119].mxu1 }
 0x555   : > { %12676 = vst [vmem:[#allocation79_spill] sm:$0xff] %v10704_v60 }
 0x561   : > { %v10706_v0 = vpop.f32.mrb[120].mxu1 }
 0x562   : > { %12677 = vst [vmem:[#allocation80_spill] sm:$0xff] %v10706_v0  ;;  %v10708_v16 = vpop.f32.mrb[121].mxu1 }
 0x563   : > { %12678 = vst [vmem:[#allocation81_spill] sm:$0xff] %v10708_v16  ;;  %v10710_v38 = vpop.f32.mrb[122].mxu1  ;;  %v12706_v16 = vld [vmem:[#allocation48_spill] sm:$0xff] }
 0x564   : > { %12679 = vst [vmem:[#allocation82_spill] sm:$0xff] %v10710_v38  ;;  %v10712_v52 = vpop.f32.mrb[123].mxu1 }
 0x565   : > { %12680 = vst [vmem:[#allocation83_spill] sm:$0xff] %v10712_v52 }
 0x569   : > { %v10714_v28 = vpop.f32.mrb[124].mxu1 }
 0x56a   : > { %12681 = vst [vmem:[#allocation84_spill] sm:$0xff] %v10714_v28  ;;  %v10716_v13 = vpop.f32.mrb[125].mxu1 }
 0x56b   : > { %12682 = vst [vmem:[#allocation85_spill] sm:$0xff] %v10716_v13  ;;  %v10718_v22 = vpop.f32.mrb[126].mxu1 }
 0x56c   : > { %12683 = vst [vmem:[#allocation86_spill] sm:$0xff] %v10718_v22  ;;  %v10720_v54 = vpop.f32.mrb[127].mxu1 }
 0x56d   : > { %12684 = vst [vmem:[#allocation87_spill] sm:$0xff] %v10720_v54 }
 0x571   : > { %v7813_v51 = vpop.f32.mrb[128].mxu1 }
 0x572   : > { %v3441_v63 = vmul.f32 0.05103104, %v7813_v51  ;;  %v3376_v39 = vpop.f32.mrb[129].mxu1 }
 0x573   : > { %v7814_v44 = vpop.f32.mrb[130].mxu1  ;;  %v3439_v17 = vmul.f32 0.05103104, %v3376_v39  ;;  %v12689_v39 = vld [vmem:[#allocation64_spill] sm:$0xff] }
 0x574   : > { %v3379_v23 = vpop.f32.mrb[131].mxu1  ;;  %v3457_v11 = vsel %vm10352_vm1, %v3441_v63, -inf  ;;  %v3442_v25 = vmul.f32 0.05103104, %v7814_v44  ;;  %vm12690_vm13 = vnez %v12689_v39 }
 0x575   : > { %v3440_v40 = vmul.f32 0.05103104, %v3379_v23  ;;  %3475 = vmax.xlane.f32.xlu0 %v3457_v11  ;;  %v10731_v19 = vsel %vm10359_vm2, %v3439_v17, -inf }
 0x576   : > { %v3458_v53 = vsel %vm10374_vm3, %v3442_v25, -inf }
 0x577   : > { %v10726_v58 = vsel %vm10381_vm4, %v3440_v40, -inf  ;;  %v12691_v40 = vld [vmem:[#allocation67_spill] sm:$0xff] }
 0x578   : > { %3473 = vmax.xlane.f32.xlu1 %v10726_v58  ;;  %vm12692_vm11 = vnez %v12691_v40 }
 0x579   : > { %3471 = vmax.xlane.f32.xlu0 %v10731_v19  ;;  %v7817_v18 = vpop.f32.mrb[132].mxu1 }
 0x57a   : > { %v3392_v47 = vpop.f32.mrb[133].mxu1  ;;  %v3445_v43 = vmul.f32 0.05103104, %v7817_v18 }
 0x57b   : > { %v7818_v50 = vpop.f32.mrb[134].mxu1  ;;  %v3443_v14 = vmul.f32 0.05103104, %v3392_v47 }
 0x57c   : > { %v3446_v55 = vmul.f32 0.05103104, %v7818_v50  ;;  %v3395_v27 = vpop.f32.mrb[135].mxu1  ;;  %v10743_v37 = vsel %vm10396_vm5, %v3445_v43, -inf }
 0x57d   : > { %3477 = vmax.xlane.f32.xlu0 %v3458_v53  ;;  %v3444_v49 = vmul.f32 0.05103104, %v3395_v27  ;;  %v10753_v6 = vsel %vm10419_vm7, %v3443_v14, -inf  ;;  %v12695_v14 = vld [vmem:[#allocation70_spill] sm:$0xff] }
 0x57e   : > { %v10738_v26 = vsel %vm10403_vm6, %v3446_v55, -inf  ;;  %v12693_v55 = vld [vmem:[#allocation66_spill] sm:$0xff]  ;;  %vm12696_vm12 = vnez %v12695_v14 }
 0x57f   : > { %3485 = vmax.xlane.f32.xlu1 %v10738_v26  ;;  %v10748_v2 = vsel %vm10425_vm8, %v3444_v49, -inf  ;;  %vm12694_vm9 = vnez %v12693_v55 }
 0x581   : > { %3483 = vmax.xlane.f32.xlu0 %v10743_v37  ;;  %v7821_v46 = vpop.f32.mrb[136].mxu1 }
 0x582   : > { %v3408_v42 = vpop.f32.mrb[137].mxu1  ;;  %v3449_v33 = vmul.f32 0.05103104, %v7821_v46 }
 0x583   : > { %3481 = vmax.xlane.f32.xlu1 %v10748_v2  ;;  %v7822_v4 = vpop.f32.mrb[138].mxu1  ;;  %v3447_v63 = vmul.f32 0.05103104, %v3408_v42 }
 0x584   : > { %v3450_v8 = vmul.f32 0.05103104, %v7822_v4  ;;  %v3411_v1 = vpop.f32.mrb[139].mxu1  ;;  %v10763_v44 = vsel %vm12690_vm13, %v3449_v33, -inf  ;;  %v12697_v4 = vld [vmem:[#allocation68_spill] sm:$0xff] }
 0x585   : > { %3479 = vmax.xlane.f32.xlu0 %v10753_v6  ;;  %v3448_v24 = vmul.f32 0.05103104, %v3411_v1  ;;  %v10773_v27 = vsel %vm12694_vm9, %v3447_v63, -inf  ;;  %vm12698_vm15 = vnez %v12697_v4 }
 0x586   : > { %v10758_v51 = vsel %vm10447_vm10, %v3450_v8, -inf  ;;  %v12699_v8 = vld [vmem:[#allocation71_spill] sm:$0xff] }
 0x587   : > { %3493 = vmax.xlane.f32.xlu1 %v10758_v51  ;;  %v10768_v25 = vsel %vm12692_vm11, %v3448_v24, -inf  ;;  %vm12700_vm14 = vnez %v12699_v8  ;;  %v12701_v24 = vld [vmem:[#allocation69_spill] sm:$0xff] }
 0x588   : > { %vm12702_vm0 = vnez %v12701_v24 }
 0x589   : > { %3491 = vmax.xlane.f32.xlu0 %v10763_v44  ;;  %v7825_v17 = vpop.f32.mrb[140].mxu1 }
 0x58a   : > { %v3424_v23 = vpop.f32.mrb[141].mxu1  ;;  %v3453_v47 = vmul.f32 0.05103104, %v7825_v17  ;;  %v12703_v17 = vld [vmem:[#allocation46_spill] sm:$0xff] }
 0x58b   : > { %3489 = vmax.xlane.f32.xlu1 %v10768_v25  ;;  %v7826_v18 = vpop.f32.mrb[142].mxu1  ;;  %v3451_v42 = vmul.f32 0.05103104, %v3424_v23  ;;  %v12704_v23 = vld [vmem:[#allocation44_spill] sm:$0xff] }
 0x58c   : > { %v3454_v50 = vmul.f32 0.05103104, %v7826_v18  ;;  %v3427_v43 = vpop.f32.mrb[143].mxu1  ;;  %v10783_v33 = vsel %vm12698_vm15, %v3453_v47, -inf }
 0x58d   : > { %3487 = vmax.xlane.f32.xlu0 %v10773_v27  ;;  %v3452_v49 = vmul.f32 0.05103104, %v3427_v43  ;;  %v10793_v63 = vsel %vm12702_vm0, %v3451_v42, -inf }
 0x58e   : > { %v10778_v46 = vsel %vm12696_vm12, %v3454_v50, -inf }
 0x58f   : > { %3501 = vmax.xlane.f32.xlu1 %v10778_v46  ;;  %v10788_v1 = vsel %vm12700_vm14, %v3452_v49, -inf  ;;  %vm12709_vm14 = vcmask 523264  }
 0x590   : > { %vm12710_vm12 = vmmov %vm12709_vm14 }
 0x591   : > { %3499 = vmax.xlane.f32.xlu0 %v10783_v33  ;;  %vm12712_vm0 = vmmov %vm12710_vm12 }
 0x592   : > { %vm12714_vm15 = vmmov %vm12712_vm0 }
 0x593   : > { %3497 = vmax.xlane.f32.xlu1 %v10788_v1  ;;  %vm12715_vm11 = vmmov %vm12712_vm0 }
 0x594   : > { %vm12717_vm9 = vmmov %vm12712_vm0 }
 0x595   : > { %3495 = vmax.xlane.f32.xlu0 %v10793_v63  ;;  %vm12742_vm10 = vmmov %vm12712_vm0 }
 0x5a4   : > { %3641 = vrot.lane.b32.xlu1 %v12703_v17, %s9564_s21 }
 0x5ab   : > { %3639 = vrot.lane.b32.xlu0 %v12704_v23, %s9564_s21 }
 0x602   : > { %v3476_v18 = vpop.xlane.xlu0 %3475 }
 0x603   : > { %v3505_v47 = vsub.f32 %v3457_v11, %v3476_v18 }
 0x605   : > { %v3523_v50 = vmul.f32 1.442695, %v3505_v47  ;;  %v3474_v43 = vpop.xlane.xlu1 %3473 }
 0x606   : > { %v3504_v49 = vsub.f32 %v10726_v58, %v3474_v43  ;;  %v3472_v22 = vpop.xlane.xlu0 %3471 }
 0x607   : > { %9076 = vpow2.f32 %v3523_v50  ;;  %v3503_v28 = vsub.f32 %v10731_v19, %v3472_v22 }
 0x608   : > { %v3521_v42 = vmul.f32 1.442695, %v3504_v49 }
 0x609   : > { %v3519_v54 = vmul.f32 1.442695, %v3503_v28 }
 0x60a   : > { %9078 = vpow2.f32 %v3521_v42  ;;  %v3478_v13 = vpop.xlane.xlu0 %3477  ;;  %v12705_v42 = vld [vmem:[#allocation50_spill] sm:$0xff] }
 0x60b   : > { %9080 = vpow2.f32 %v3519_v54  ;;  %v3506_v38 = vsub.f32 %v3458_v53, %v3478_v13 }
 0x60c   : > { %v3486_v17 = vpop.xlane.xlu1 %3485 }
 0x60d   : > { %v3525_v0 = vmul.f32 1.442695, %v3506_v38  ;;  %v3510_v35 = vsub.f32 %v10738_v26, %v3486_v17 }
 0x60e   : > { %v3484_v52 = vpop.xlane.xlu0 %3483 }
 0x60f   : > { %9082 = vpow2.f32 %v3525_v0  ;;  %v3509_v36 = vsub.f32 %v10743_v37, %v3484_v52  ;;  %v3533_v30 = vmul.f32 1.442695, %v3510_v35 }
 0x610   : > { %v3482_v23 = vpop.xlane.xlu1 %3481 }
 0x611   : > { %v10802_v11 = vpop.eup %9076  ;;  %v3508_v60 = vsub.f32 %v10748_v2, %v3482_v23  ;;  %v3531_v34 = vmul.f32 1.442695, %v3509_v36 }
 0x612   : > { %v3480_v18 = vpop.xlane.xlu0 %3479  ;;  %3555 = vadd.xlane.f32.xlu1 %v10802_v11 }
 0x613   : > { %v3507_v59 = vsub.f32 %v10753_v6, %v3480_v18 }
 0x614   : > { %v10805_v58 = vpop.eup %9078  ;;  %v3494_v47 = vpop.xlane.xlu1 %3493 }
 0x615   : > { %v10807_v22 = vpop.eup %9080  ;;  %3553 = vadd.xlane.f32.xlu0 %v10805_v58  ;;  %v3527_v29 = vmul.f32 1.442695, %v3507_v59 }
 0x616   : > { %v3492_v28 = vpop.xlane.xlu0 %3491  ;;  %3551 = vadd.xlane.f32.xlu1 %v10807_v22 }
 0x617   : > { %9084 = vpow2.f32 %v3527_v29  ;;  %v3513_v59 = vsub.f32 %v10763_v44, %v3492_v28  ;;  %v12707_v28 = vld [vmem:[#allocation28_spill] sm:$0xff] }
 0x618   : > { %v3490_v13 = vpop.xlane.xlu1 %3489  ;;  %9086 = vpow2.f32 %v3531_v34 }
 0x619   : > { %v10811_v38 = vpop.eup %9082  ;;  %v3512_v45 = vsub.f32 %v10768_v25, %v3490_v13  ;;  %v3539_v35 = vmul.f32 1.442695, %v3513_v59  ;;  %v12708_v13 = vld [vmem:[#allocation25_spill] sm:$0xff] }
 0x61a   : > { %v3488_v0 = vpop.xlane.xlu0 %3487  ;;  %3557 = vadd.xlane.f32.xlu1 %v10811_v38 }
 0x61b   : > { %v3537_v6 = vmul.f32 1.442695, %v3512_v45 }
 0x61c   : > { %v3502_v54 = vpop.xlane.xlu1 %3501 }
 0x61e   : > { %v3500_v19 = vpop.xlane.xlu0 %3499 }
 0x61f   : > { %v3517_v2 = vsub.f32 %v10783_v33, %v3500_v19 }
 0x620   : > { %v3498_v53 = vpop.xlane.xlu1 %3497 }
 0x621   : > { %v3516_v36 = vsub.f32 %v10788_v1, %v3498_v53  ;;  %v10827_v29 = vpop.eup %9084 }
 0x622   : > { %v3496_v50 = vpop.xlane.xlu0 %3495 }
 0x623   : > { %v3515_v34 = vsub.f32 %v10793_v63, %v3496_v50  ;;  %v3545_v45 = vmul.f32 1.442695, %v3516_v36 }
 0x624   : > { %v3642_v49 = vpop.permute.xlu1 %3641 }
 0x626   : > { %v3640_v43 = vpop.permute.xlu0 %3639 }
 0x627   : > { %7835 = vmatprep.subr.bf16.mxu0 %v3640_v43 }
 0x628   : > { %7836 = vmatpush3.bf16.msra.mxu0 %v3640_v43  ;;  %v3529_v43 = vmul.f32 1.442695, %v3508_v60  ;;  %v3518_v60 = vsub.f32 %v10778_v46, %v3502_v54  ;;  %v3547_v46 = vmul.f32 1.442695, %v3517_v2  ;;  %v12719_v2 = vld [vmem:[#allocation36_spill] sm:$0xff] }
 0x629   : > { %7837 = vmatprep.subr.bf16.mxu0 %v3642_v49 }
 0x62a   : > { %9088 = vpow2.f32 %v3529_v43  ;;  %v3549_v44 = vmul.f32 1.442695, %v3518_v60  ;;  %v3801_v60 = vsel %vm12710_vm12, %v12708_v13, 0 }
 0x62b   : > { %3645 = vrot.lane.b32.xlu1 %v12705_v42, %s9564_s21  ;;  %3643 = vrot.lane.b32.xlu0 %v12706_v16, %s9564_s21  ;;  %v3511_v42 = vsub.f32 %v10773_v27, %v3488_v0  ;;  %v3514_v16 = vsub.f32 %v10758_v51, %v3494_v47  ;;  %9090 = vpow2.f32 %v3533_v30  ;;  %v10832_v30 = vpop.eup %9086  ;;  %v3543_v51 = vmul.f32 1.442695, %v3515_v34 }
 0x62c   : > { %7838 = vmatpush3.bf16.msra.mxu0 %v3642_v49  ;;  %9092 = vpow2.f32 %v3537_v6 }
 0x62d   : > { %v3535_v52 = vmul.f32 1.442695, %v3511_v42  ;;  %v3541_v37 = vmul.f32 1.442695, %v3514_v16 }
 0x62f   : > { %9094 = vpow2.f32 %v3535_v52 }
 0x630   : > { %9096 = vpow2.f32 %v3541_v37 }
 0x631   : > { %9098 = vpow2.f32 %v3539_v35 }
 0x632   : > { %9100 = vpow2.f32 %v3545_v45 }
 0x633   : > { %9102 = vpow2.f32 %v3543_v51 }
 0x634   : > { %v10834_v26 = vpop.eup %9088  ;;  %9104 = vpow2.f32 %v3549_v44  ;;  %v3813_v44 = vsel %vm12712_vm0, %v12719_v2, 0 }
 0x635   : > { %v10839_v25 = vpop.eup %9090  ;;  %9106 = vpow2.f32 %v3547_v46  ;;  %v12721_v46 = vld [vmem:[#allocation38_spill] sm:$0xff] }
 0x636   : > { %v10841_v27 = vpop.eup %9092 }
 0x639   : > { %v10845_v1 = vpop.eup %9094 }
 0x63a   : > { %v10847_v63 = vpop.eup %9096 }
 0x63b   : > { %v10851_v33 = vpop.eup %9098 }
 0x63c   : > { %v10853_v17 = vpop.eup %9100 }
 0x63d   : > { %v10857_v23 = vpop.eup %9102 }
 0x63e   : > { %v10859_v18 = vpop.eup %9104 }
 0x63f   : > { %v10863_v47 = vpop.eup %9106 }
 0x64a   : > { %3559 = vadd.xlane.f32.xlu0 %v10827_v29 }
 0x64e   : > { %3563 = vadd.xlane.f32.xlu0 %v10832_v30 }
 0x64f   : > { %3561 = vadd.xlane.f32.xlu1 %v10834_v26 }
 0x652   : > { %3565 = vadd.xlane.f32.xlu0 %v10839_v25 }
 0x653   : > { %3569 = vadd.xlane.f32.xlu1 %v10841_v27 }
 0x656   : > { %3567 = vadd.xlane.f32.xlu0 %v10845_v1 }
 0x657   : > { %3573 = vadd.xlane.f32.xlu1 %v10847_v63 }
 0x65a   : > { %3571 = vadd.xlane.f32.xlu0 %v10851_v33 }
 0x65b   : > { %3577 = vadd.xlane.f32.xlu1 %v10853_v17 }
 0x65e   : > { %3575 = vadd.xlane.f32.xlu0 %v10857_v23 }
 0x65f   : > { %3581 = vadd.xlane.f32.xlu1 %v10859_v18 }
 0x662   : > { %3579 = vadd.xlane.f32.xlu0 %v10863_v47 }
 0x670   : > { %4236 = vrot.lane.b32.xlu1 %v12707_v28, %s9564_s21 }
 0x678   : > { %4234 = vrot.lane.b32.xlu0 %v12708_v13, %s9564_s21 }
 0x69f   : > { %v3556_v0 = vpop.xlane.xlu1 %3555 }
 0x6a2   : > { %v3554_v54 = vpop.xlane.xlu0 %3553 }
 0x6a3   : > { %9108 = vrcp.f32 %v3554_v54  ;;  %v3552_v19 = vpop.xlane.xlu1 %3551 }
 0x6a4   : > { %9110 = vrcp.f32 %v3552_v19 }
 0x6a5   : > { %9112 = vrcp.f32 %v3556_v0 }
 0x6a6   : > { %v3644_v53 = vpop.permute.xlu0 %3643 }
 0x6a7   : > { %7839 = vmatprep.subr.bf16.mxu0 %v3644_v53  ;;  %v3558_v50 = vpop.xlane.xlu1 %3557 }
 0x6a8   : > { %9114 = vrcp.f32 %v3558_v50  ;;  %7840 = vmatpush3.bf16.msra.mxu0 %v3644_v53  ;;  %v12724_v53 = vld [vmem:[#allocation40_spill] sm:$0xff] }
 0x6ab   : > { %v3646_v49 = vpop.permute.xlu1 %3645 }
 0x6ac   : > { %7841 = vmatprep.subr.bf16.mxu0 %v3646_v49 }
 0x6ad   : > { %v9109_v43 = vpop.eup %9108  ;;  %7842 = vmatpush3.bf16.msra.mxu0 %v3646_v49 }
 0x6ae   : > { %v9111_v42 = vpop.eup %9110  ;;  %8371 = vmatprep.subr.msk.bf16.mxu0 %vm12709_vm14, %v12708_v13  ;;  %v3600_v16 = vmul.f32 %v9109_v43, %v10805_v58  ;;  %vm12711_vm14 = vmmov %vm12710_vm12  ;;  %v3804_v58 = vsel %vm12712_vm0, %v12707_v28, 0 }
 0x6af   : > { %v3599_v6 = vmul.f32 %v9111_v42, %v10807_v22  ;;  %v9113_v59 = vpop.eup %9112  ;;  %v12713_v22 = vld [vmem:[#allocation31_spill] sm:$0xff]  ;;  %vm12718_vm12 = vmmov %vm12712_vm0 }
 0x6b0   : > { %v3601_v36 = vmul.f32 %v9113_v59, %v10802_v11  ;;  %v3807_v11 = vsel %vm12715_vm11, %v12713_v22, 0  ;;  %vm12723_vm11 = vmmov %vm12712_vm0 }
 0x6b1   : > { %v3615_v52 = vpack.c.bf16 %v3600_v16, %v3599_v6  ;;  %v3816_v54 = vsel %vm12723_vm11, %v12721_v46, 0  ;;  %vm12731_vm11 = vmmov %vm12712_vm0 }
 0x6b2   : > { %v9115_v37 = vpop.eup %9114 }
 0x6b3   : > { %v3602_v35 = vmul.f32 %v9115_v37, %v10811_v38  ;;  %7843 = vmatprep.mubr.bf16.mxu0 %v3615_v52  ;;  %v12716_v38 = vld [vmem:[#allocation34_spill] sm:$0xff] }
 0x6b4   : > { %v3810_v45 = vsel %vm12718_vm12, %v12716_v38, 0  ;;  %vm12726_vm12 = vmmov %vm12712_vm0 }
 0x6b5   : > { %v3616_v34 = vpack.c.bf16 %v3602_v35, %v3601_v36  ;;  %v3819_v6 = vsel %vm12726_vm12, %v12724_v53, 0  ;;  %v12727_v35 = vld [vmem:[#allocation42_spill] sm:$0xff]  ;;  %vm12735_vm12 = vmmov %vm12712_vm0 }
 0x6b7   : > { %7844 = vmatmul.mubr.bf16.vlgmr.msra.gmra.mrb[112].mxu0 %v3616_v34 }
 0x6b8   : > { %7860 = vmatpush3.bf16.xpose.msra.mxu0 %v3801_v60 }
 0x6b9   : > { %8372 = vmatprep.subr.msk.bf16.mxu0 %vm12711_vm14, %v12707_v28  ;;  %vm12720_vm14 = vmmov %vm12712_vm0 }
 0x6c0   : > { %7862 = vmatpush3.bf16.xpose.msra.mxu0 %v3804_v58 }
 0x6c1   : > { %8373 = vmatprep.subr.msk.bf16.mxu0 %vm12714_vm15, %v12713_v22  ;;  %vm12722_vm15 = vmmov %vm12712_vm0 }
 0x6c8   : > { %7864 = vmatpush3.bf16.xpose.msra.mxu0 %v3807_v11 }
 0x6c9   : > { %8374 = vmatprep.subr.msk.bf16.mxu0 %vm12717_vm9, %v12716_v38  ;;  %vm12725_vm9 = vmmov %vm12712_vm0 }
 0x6d0   : > { %7866 = vmatpush3.bf16.xpose.msra.mxu0 %v3810_v45 }
 0x6d1   : > { %8375 = vmatprep.subr.msk.bf16.mxu0 %vm12720_vm14, %v12719_v2  ;;  %vm12728_vm14 = vmmov %vm12712_vm0 }
 0x6d7   : > { %v3560_v51 = vpop.xlane.xlu0 %3559 }
 0x6d8   : > { %7868 = vmatpush3.bf16.xpose.msra.mxu0 %v3813_v44  ;;  %9116 = vrcp.f32 %v3560_v51 }
 0x6d9   : > { %8376 = vmatprep.subr.msk.bf16.mxu0 %vm12722_vm15, %v12721_v46  ;;  %vm12729_vm15 = vmmov %vm12712_vm0 }
 0x6db   : > { %v3564_v28 = vpop.xlane.xlu0 %3563 }
 0x6dc   : > { %v3562_v13 = vpop.xlane.xlu1 %3561 }
 0x6dd   : > { %9118 = vrcp.f32 %v3562_v13 }
 0x6de   : > { %9120 = vrcp.f32 %v3564_v28 }
 0x6df   : > { %v3566_v0 = vpop.xlane.xlu0 %3565 }
 0x6e0   : > { %9122 = vrcp.f32 %v3566_v0  ;;  %7870 = vmatpush3.bf16.xpose.msra.mxu0 %v3816_v54  ;;  %v3570_v19 = vpop.xlane.xlu1 %3569 }
 0x6e1   : > { %8377 = vmatprep.subr.msk.bf16.mxu0 %vm12725_vm9, %v12724_v53  ;;  %9124 = vrcp.f32 %v3570_v19  ;;  %vm12733_vm9 = vmmov %vm12712_vm0 }
 0x6e2   : > { %v9117_v43 = vpop.eup %9116 }
 0x6e3   : > { %v3568_v50 = vpop.xlane.xlu0 %3567  ;;  %v3603_v37 = vmul.f32 %v9117_v43, %v10827_v29 }
 0x6e4   : > { %9126 = vrcp.f32 %v3568_v50  ;;  %v3574_v49 = vpop.xlane.xlu1 %3573 }
 0x6e5   : > { %9128 = vrcp.f32 %v3574_v49 }
 0x6e7   : > { %v9119_v42 = vpop.eup %9118  ;;  %v3572_v16 = vpop.xlane.xlu0 %3571 }
 0x6e8   : > { %v9121_v59 = vpop.eup %9120  ;;  %9130 = vrcp.f32 %v3572_v16  ;;  %7872 = vmatpush3.bf16.xpose.msra.mxu0 %v3819_v6  ;;  %v3578_v52 = vpop.xlane.xlu1 %3577  ;;  %v3604_v36 = vmul.f32 %v9119_v42, %v10834_v26  ;;  %v3822_v26 = vsel %vm12712_vm0, %v12727_v35, 0 }
 0x6e9   : > { %8378 = vmatprep.subr.msk.bf16.mxu0 %vm12728_vm14, %v12727_v35  ;;  %9132 = vrcp.f32 %v3578_v52  ;;  %v3605_v11 = vmul.f32 %v9121_v59, %v10832_v30  ;;  %vm12737_vm14 = vmmov %vm12712_vm0 }
 0x6ea   : > { %v9123_v34 = vpop.eup %9122  ;;  %v3617_v60 = vpack.c.bf16 %v3604_v36, %v3603_v37 }
 0x6eb   : > { %v3576_v58 = vpop.xlane.xlu0 %3575  ;;  %v3606_v45 = vmul.f32 %v9123_v34, %v10839_v25  ;;  %v9125_v51 = vpop.eup %9124  ;;  %v12730_v34 = vld [vmem:[#allocation12_spill] sm:$0xff] }
 0x6ec   : > { %9134 = vrcp.f32 %v3576_v58  ;;  %7847 = vmatprep.mubr.bf16.mxu0 %v3617_v60  ;;  %v3582_v44 = vpop.xlane.xlu1 %3581  ;;  %v3608_v54 = vmul.f32 %v9125_v51, %v10841_v27  ;;  %v12732_v60 = vld [vmem:[#allocation13_spill] sm:$0xff]  ;;  %v12734_v58 = vld [vmem:[#allocation14_spill] sm:$0xff] }
 0x6ed   : > { %v3618_v28 = vpack.c.bf16 %v3606_v45, %v3605_v11  ;;  %9136 = vrcp.f32 %v3582_v44  ;;  %v12743_v11 = vld [vmem:[#allocation19_spill] sm:$0xff] }
 0x6ee   : > { %v9127_v13 = vpop.eup %9126 }
 0x6ef   : > { %v3580_v29 = vpop.xlane.xlu0 %3579  ;;  %7848 = vmatmul.mubr.bf16.gmra.mrb[116].mxu0 %v3618_v28  ;;  %v3607_v0 = vmul.f32 %v9127_v13, %v10845_v1  ;;  %v9129_v19 = vpop.eup %9128 }
 0x6f0   : > { %9138 = vrcp.f32 %v3580_v29  ;;  %7874 = vmatpush3.bf16.xpose.msra.mxu0 %v3822_v26  ;;  %v3610_v43 = vmul.f32 %v9129_v19, %v10847_v63 }
 0x6f1   : > { %v3619_v30 = vpack.c.bf16 %v3608_v54, %v3607_v0 }
 0x6f2   : > { %v9131_v25 = vpop.eup %9130 }
 0x6f3   : > { %v10912_v50 = vpop.permute.xlu0 %4234  ;;  %7851 = vmatprep.mubr.bf16.mxu0 %v3619_v30  ;;  %v3609_v49 = vmul.f32 %v9131_v25, %v10851_v33  ;;  %v9133_v42 = vpop.eup %9132 }
 0x6f4   : > { %8379 = vmatprep.subr.msk.bf16.mxu1 %vm12729_vm15, %v10912_v50  ;;  %v3612_v6 = vmul.f32 %v9133_v42, %v10853_v17  ;;  %v12736_v17 = vld [vmem:[#allocation15_spill] sm:$0xff]  ;;  %vm12740_vm15 = vmmov %vm12712_vm0 }
 0x6f5   : > { %v3620_v16 = vpack.c.bf16 %v3610_v43, %v3609_v49 }
 0x6f6   : > { %v9135_v1 = vpop.eup %9134 }
 0x6f7   : > { %7852 = vmatmul.mubr.bf16.gmra.mrb[120].mxu0 %v3620_v16  ;;  %v3611_v27 = vmul.f32 %v9135_v1, %v10857_v23  ;;  %v9137_v59 = vpop.eup %9136  ;;  %v12738_v23 = vld [vmem:[#allocation16_spill] sm:$0xff] }
 0x6f8   : > { %v3614_v33 = vmul.f32 %v9137_v59, %v10859_v18  ;;  %v12741_v18 = vld [vmem:[#allocation18_spill] sm:$0xff] }
 0x6f9   : > { %v3621_v52 = vpack.c.bf16 %v3612_v6, %v3611_v27 }
 0x6fa   : > { %v9139_v37 = vpop.eup %9138 }
 0x6fb   : > { %7855 = vmatprep.mubr.bf16.mxu0 %v3621_v52  ;;  %v3613_v36 = vmul.f32 %v9139_v37, %v10863_v47  ;;  %v12739_v47 = vld [vmem:[#allocation17_spill] sm:$0xff] }
 0x6fd   : > { %v3622_v63 = vpack.c.bf16 %v3614_v33, %v3613_v36 }
 0x6ff   : > { %7856 = vmatmul.mubr.bf16.gmra.mrb[124].mxu0 %v3622_v63 }
 0x700   : > { %7875 = vmatprep.mubr.msk.bf16.mxu0 %vm12731_vm11, %v12730_v34  ;;  %vm12744_vm11 = vmmov %vm12712_vm0 }
 0x707   : > { %7876 = vmatmul.mubr.msk.bf16.vlgmr.msra.gmra.mrb[128].mxu0 %vm12733_vm9, %v12732_v60  ;;  %vm12762_vm9 = vnez %v12693_v55 }
 0x708   : > { %7879 = vmatprep.mubr.msk.bf16.mxu0 %vm12735_vm12, %v12734_v58  ;;  %vm12763_vm12 = vnez %v12691_v40 }
 0x70f   : > { %7880 = vmatmul.mubr.msk.bf16.gmra.mrb[132].mxu0 %vm12737_vm14, %v12736_v17  ;;  %vm12764_vm14 = vnez %v12697_v4 }
 0x710   : > { %7883 = vmatprep.mubr.msk.bf16.mxu0 %vm12712_vm0, %v12738_v23  ;;  %vm12765_vm0 = vnez %v12701_v24 }
 0x717   : > { %7884 = vmatmul.mubr.msk.bf16.gmra.mrb[136].mxu0 %vm12740_vm15, %v12739_v47  ;;  %vm12766_vm15 = vnez %v12695_v14 }
 0x718   : > { %7887 = vmatprep.mubr.msk.bf16.mxu0 %vm12742_vm10, %v12741_v18  ;;  %vm12761_vm10 = vnez %v12688_v48 }
 0x71f   : > { %7888 = vmatmul.mubr.msk.bf16.gmra.mrb[140].mxu0 %vm12744_vm11, %v12743_v11  ;;  %vm12767_vm11 = vnez %v12699_v8 }
 0x78a   : > { %v10938_v45 = vpop.f32.mrb[112].mxu0 }
 0x78b   : > { %12745 = vst [vmem:[#allocation61_spill] sm:$0xff] %v10938_v45  ;;  %v10940_v51 = vpop.f32.mrb[113].mxu0 }
 0x78c   : > { %12746 = vst [vmem:[#allocation63_spill] sm:$0xff] %v10940_v51  ;;  %v10942_v44 = vpop.f32.mrb[114].mxu0 }
 0x78d   : > { %12747 = vst [vmem:[#allocation62_spill] sm:$0xff] %v10942_v44  ;;  %v10946_v13 = vpop.f32.mrb[115].mxu0 }
 0x78e   : > { %12748 = vst [vmem:[#allocation65_spill] sm:$0xff] %v10946_v13 }
 0x7c2   : > { %v10950_v26 = vpop.f32.mrb[116].mxu0 }
 0x7c3   : > { %12749 = vst [vmem:[#allocation64_spill] sm:$0xff] %v10950_v26  ;;  %v10952_v0 = vpop.f32.mrb[117].mxu0 }
 0x7c4   : > { %12750 = vst [vmem:[#allocation67_spill] sm:$0xff] %v10952_v0  ;;  %v10954_v54 = vpop.f32.mrb[118].mxu0 }
 0x7c5   : > { %12751 = vst [vmem:[#allocation66_spill] sm:$0xff] %v10954_v54  ;;  %v10958_v30 = vpop.f32.mrb[119].mxu0 }
 0x7c6   : > { %12752 = vst [vmem:[#allocation46_spill] sm:$0xff] %v10958_v30 }
 0x7ca   : > { %v10962_v49 = vpop.f32.mrb[120].mxu0 }
 0x7cb   : > { %12753 = vst [vmem:[#allocation44_spill] sm:$0xff] %v10962_v49  ;;  %v10964_v43 = vpop.f32.mrb[121].mxu0 }
 0x7cc   : > { %12754 = vst [vmem:[#allocation50_spill] sm:$0xff] %v10964_v43  ;;  %v10966_v42 = vpop.f32.mrb[122].mxu0 }
 0x7cd   : > { %12755 = vst [vmem:[#allocation48_spill] sm:$0xff] %v10966_v42  ;;  %v10970_v1 = vpop.f32.mrb[123].mxu0 }
 0x7ce   : > { %12756 = vst [vmem:[#allocation28_spill] sm:$0xff] %v10970_v1 }
 0x7d2   : > { %v10974_v6 = vpop.f32.mrb[124].mxu0 }
 0x7d3   : > { %12757 = vst [vmem:[#allocation25_spill] sm:$0xff] %v10974_v6  ;;  %v10976_v59 = vpop.f32.mrb[125].mxu0 }
 0x7d4   : > { %12758 = vst [vmem:[#allocation31_spill] sm:$0xff] %v10976_v59  ;;  %v10978_v52 = vpop.f32.mrb[126].mxu0 }
 0x7d5   : > { %12759 = vst [vmem:[#allocation34_spill] sm:$0xff] %v10978_v52  ;;  %v10982_v36 = vpop.f32.mrb[127].mxu0 }
 0x7d6   : > { %12760 = vst [vmem:[#allocation36_spill] sm:$0xff] %v10982_v36 }
 0x7da   : > { %v7877_v63 = vpop.f32.mrb[128].mxu0 }
 0x7db   : > { %v3923_v16 = vmul.f32 0.05103104, %v7877_v63  ;;  %v3858_v19 = vpop.f32.mrb[129].mxu0 }
 0x7dc   : > { %v7878_v25 = vpop.f32.mrb[130].mxu0  ;;  %v3921_v28 = vmul.f32 0.05103104, %v3858_v19 }
 0x7dd   : > { %v3924_v27 = vmul.f32 0.05103104, %v7878_v25  ;;  %v3861_v29 = vpop.f32.mrb[131].mxu0  ;;  %v10988_v49 = vsel %vm10352_vm1, %v3923_v16, -inf }
 0x7de   : > { %3957 = vmax.xlane.f32.xlu0 %v10988_v49  ;;  %v3922_v42 = vmul.f32 0.05103104, %v3861_v29  ;;  %v10998_v63 = vsel %vm10359_vm2, %v3921_v28, -inf }
 0x7df   : > { %v10993_v37 = vsel %vm10374_vm3, %v3924_v27, -inf }
 0x7e0   : > { %3959 = vmax.xlane.f32.xlu1 %v10993_v37  ;;  %v11003_v16 = vsel %vm10381_vm4, %v3922_v42, -inf }
 0x7e2   : > { %3953 = vmax.xlane.f32.xlu0 %v10998_v63  ;;  %v7881_v19 = vpop.f32.mrb[132].mxu0 }
 0x7e3   : > { %v3927_v25 = vmul.f32 0.05103104, %v7881_v19  ;;  %v3874_v33 = vpop.f32.mrb[133].mxu0 }
 0x7e4   : > { %3955 = vmax.xlane.f32.xlu1 %v11003_v16  ;;  %v7882_v29 = vpop.f32.mrb[134].mxu0  ;;  %v3925_v27 = vmul.f32 0.05103104, %v3874_v33 }
 0x7e5   : > { %v3928_v6 = vmul.f32 0.05103104, %v7882_v29  ;;  %v3877_v52 = vpop.f32.mrb[135].mxu0  ;;  %v11008_v59 = vsel %vm10396_vm5, %v3927_v25, -inf }
 0x7e6   : > { %3965 = vmax.xlane.f32.xlu0 %v11008_v59  ;;  %v3926_v28 = vmul.f32 0.05103104, %v3877_v52  ;;  %v11018_v42 = vsel %vm10419_vm7, %v3925_v27, -inf }
 0x7e7   : > { %v11013_v19 = vsel %vm10403_vm6, %v3928_v6, -inf }
 0x7e8   : > { %3967 = vmax.xlane.f32.xlu1 %v11013_v19  ;;  %v11023_v25 = vsel %vm10425_vm8, %v3926_v28, -inf }
 0x7ea   : > { %3961 = vmax.xlane.f32.xlu0 %v11018_v42  ;;  %v7885_v33 = vpop.f32.mrb[136].mxu0 }
 0x7eb   : > { %v3931_v29 = vmul.f32 0.05103104, %v7885_v33  ;;  %v3890_v36 = vpop.f32.mrb[137].mxu0 }
 0x7ec   : > { %3963 = vmax.xlane.f32.xlu1 %v11023_v25  ;;  %v7886_v52 = vpop.f32.mrb[138].mxu0  ;;  %v3929_v6 = vmul.f32 0.05103104, %v3890_v36 }
 0x7ed   : > { %v3932_v43 = vmul.f32 0.05103104, %v7886_v52  ;;  %v3893_v1 = vpop.f32.mrb[139].mxu0  ;;  %v11028_v26 = vsel %vm12690_vm13, %v3931_v29, -inf }
 0x7ee   : > { %3973 = vmax.xlane.f32.xlu0 %v11028_v26  ;;  %v3930_v27 = vmul.f32 0.05103104, %v3893_v1  ;;  %v11038_v28 = vsel %vm12762_vm9, %v3929_v6, -inf }
 0x7ef   : > { %v11033_v33 = vsel %vm12761_vm10, %v3932_v43, -inf }
 0x7f0   : > { %3975 = vmax.xlane.f32.xlu1 %v11033_v33  ;;  %v11043_v29 = vsel %vm12763_vm12, %v3930_v27, -inf }
 0x7f2   : > { %3969 = vmax.xlane.f32.xlu0 %v11038_v28  ;;  %v7889_v36 = vpop.f32.mrb[140].mxu0 }
 0x7f3   : > { %v3935_v52 = vmul.f32 0.05103104, %v7889_v36  ;;  %v3906_v54 = vpop.f32.mrb[141].mxu0 }
 0x7f4   : > { %3971 = vmax.xlane.f32.xlu1 %v11043_v29  ;;  %v7890_v1 = vpop.f32.mrb[142].mxu0  ;;  %v3933_v43 = vmul.f32 0.05103104, %v3906_v54 }
 0x7f5   : > { %v3909_v0 = vpop.f32.mrb[143].mxu0  ;;  %v3951_v30 = vsel %vm12764_vm14, %v3935_v52, -inf  ;;  %v3936_v27 = vmul.f32 0.05103104, %v7890_v1 }
 0x7f6   : > { %3981 = vmax.xlane.f32.xlu0 %v3951_v30  ;;  %v11050_v6 = vsel %vm12765_vm0, %v3933_v43, -inf  ;;  %v3934_v36 = vmul.f32 0.05103104, %v3909_v0  ;;  %v11067_v43 = vpop.permute.xlu1 %4236  ;;  %vm12768_vm0 = vcmask 523264  }
 0x7f7   : > { %v11059_v54 = vsel %vm12766_vm15, %v3936_v27, -inf  ;;  %vm12770_vm14 = vmmov %vm12768_vm0 }
 0x7f8   : > { %v11064_v52 = vsel %vm12767_vm11, %v3934_v36, -inf  ;;  %vm12769_vm11 = vmmov %vm12768_vm0 }
 0x7f9   : > { %vm12771_vm15 = vmmov %vm12768_vm0 }
 0x7fa   : > { %3977 = vmax.xlane.f32.xlu0 %v11050_v6  ;;  %vm12772_vm9 = vmmov %vm12768_vm0 }
 0x7fb   : > { %vm12773_vm12 = vmmov %vm12768_vm0 }
 0x7fc   : > { %vm12774_vm13 = vmmov %vm12768_vm0 }
 0x805   : > { %4240 = vrot.lane.b32.xlu1 %v12716_v38, %s9564_s21 }
 0x810   : > { %4238 = vrot.lane.b32.xlu0 %v12713_v22, %s9564_s21 }
 0x829   : > { %3983 = vmax.xlane.f32.xlu1 %v11059_v54 }
 0x82d   : > { %3979 = vmax.xlane.f32.xlu1 %v11064_v52 }
 0x86b   : > { %v3958_v38 = vpop.xlane.xlu0 %3957 }
 0x86c   : > { %v3987_v45 = vsub.f32 %v10988_v49, %v3958_v38 }
 0x86d   : > { %v3960_v22 = vpop.xlane.xlu1 %3959 }
 0x86e   : > { %v4005_v1 = vmul.f32 1.442695, %v3987_v45  ;;  %v3988_v0 = vsub.f32 %v10993_v37, %v3960_v22 }
 0x86f   : > { %v3954_v44 = vpop.xlane.xlu0 %3953 }
 0x870   : > { %9140 = vpow2.f32 %v4005_v1  ;;  %v4007_v27 = vmul.f32 1.442695, %v3988_v0  ;;  %v3985_v51 = vsub.f32 %v10998_v63, %v3954_v44 }
 0x871   : > { %v3956_v13 = vpop.xlane.xlu1 %3955 }
 0x872   : > { %9142 = vpow2.f32 %v4007_v27  ;;  %v4001_v36 = vmul.f32 1.442695, %v3985_v51  ;;  %v3986_v3 = vsub.f32 %v11003_v16, %v3956_v13 }
 0x873   : > { %v3966_v51 = vpop.xlane.xlu0 %3965 }
 0x874   : > { %9144 = vpow2.f32 %v4001_v36  ;;  %v4003_v56 = vmul.f32 1.442695, %v3986_v3  ;;  %v3991_v16 = vsub.f32 %v11008_v59, %v3966_v51 }
 0x875   : > { %v3968_v3 = vpop.xlane.xlu1 %3967 }
 0x876   : > { %9146 = vpow2.f32 %v4003_v56  ;;  %v4013_v1 = vmul.f32 1.442695, %v3991_v16  ;;  %v3992_v36 = vsub.f32 %v11013_v19, %v3968_v3 }
 0x877   : > { %v3962_v13 = vpop.xlane.xlu0 %3961 }
 0x878   : > { %v3989_v38 = vsub.f32 %v11018_v42, %v3962_v13  ;;  %9148 = vpow2.f32 %v4013_v1  ;;  %v4015_v8 = vmul.f32 1.442695, %v3992_v36 }
 0x879   : > { %v3964_v63 = vpop.xlane.xlu1 %3963 }
 0x87a   : > { %v11073_v32 = vpop.eup %9140  ;;  %v3990_v0 = vsub.f32 %v11023_v25, %v3964_v63  ;;  %v4009_v9 = vmul.f32 1.442695, %v3989_v38 }
 0x87b   : > { %4037 = vadd.xlane.f32.xlu0 %v11073_v32  ;;  %v3974_v56 = vpop.xlane.xlu0 %3973 }
 0x87c   : > { %v11076_v45 = vpop.eup %9142  ;;  %9150 = vpow2.f32 %v4009_v9  ;;  %v3995_v4 = vsub.f32 %v11028_v26, %v3974_v56 }
 0x87d   : > { %4039 = vadd.xlane.f32.xlu1 %v11076_v45  ;;  %v3976_v27 = vpop.xlane.xlu1 %3975 }
 0x87e   : > { %v11079_v49 = vpop.eup %9144  ;;  %v4021_v51 = vmul.f32 1.442695, %v3995_v4  ;;  %v3996_v13 = vsub.f32 %v11033_v33, %v3976_v27 }
 0x87f   : > { %4033 = vadd.xlane.f32.xlu0 %v11079_v49  ;;  %v3970_v37 = vpop.xlane.xlu0 %3969 }
 0x880   : > { %v11082_v44 = vpop.eup %9146  ;;  %v3993_v25 = vsub.f32 %v11038_v28, %v3970_v37 }
 0x881   : > { %4035 = vadd.xlane.f32.xlu1 %v11082_v44  ;;  %v3972_v14 = vpop.xlane.xlu1 %3971 }
 0x882   : > { %v4017_v9 = vmul.f32 1.442695, %v3993_v25  ;;  %v3994_v33 = vsub.f32 %v11043_v29, %v3972_v14 }
 0x883   : > { %v3982_v22 = vpop.xlane.xlu0 %3981 }
 0x884   : > { %v3999_v24 = vsub.f32 %v3951_v30, %v3982_v22  ;;  %v11099_v30 = vpop.eup %9148  ;;  %v4019_v16 = vmul.f32 1.442695, %v3994_v33 }
 0x885   : > { %v11097_v3 = vpop.permute.xlu1 %4240 }
 0x886   : > { %v4029_v59 = vmul.f32 1.442695, %v3999_v24  ;;  %v11102_v26 = vpop.eup %9150  ;;  %v4023_v24 = vmul.f32 1.442695, %v3996_v13 }
 0x892   : > { %4244 = vrot.lane.b32.xlu1 %v12721_v46, %s9564_s21  ;;  %v4011_v46 = vmul.f32 1.442695, %v3990_v0 }
 0x894   : > { %9152 = vpow2.f32 %v4011_v46  ;;  %v4275_v46 = vsel %vm12768_vm0, %v10912_v50, 0 }
 0x895   : > { %4242 = vrot.lane.b32.xlu0 %v12719_v2, %s9564_s21  ;;  %v3978_v2 = vpop.xlane.xlu0 %3977  ;;  %9154 = vpow2.f32 %v4015_v8 }
 0x896   : > { %v3997_v42 = vsub.f32 %v11050_v6, %v3978_v2  ;;  %9156 = vpow2.f32 %v4029_v59 }
 0x897   : > { %9158 = vpow2.f32 %v4021_v51 }
 0x898   : > { %v4025_v19 = vmul.f32 1.442695, %v3997_v42 }
 0x89a   : > { %9160 = vpow2.f32 %v4025_v19 }
 0x89b   : > { %9162 = vpow2.f32 %v4017_v9 }
 0x89c   : > { %9164 = vpow2.f32 %v4023_v24 }
 0x89e   : > { %v11105_v4 = vpop.eup %9152 }
 0x89f   : > { %v11110_v6 = vpop.eup %9154 }
 0x8a0   : > { %v11113_v63 = vpop.eup %9156 }
 0x8a1   : > { %v11117_v14 = vpop.eup %9158 }
 0x8a4   : > { %v11120_v29 = vpop.eup %9160 }
 0x8a5   : > { %v11123_v22 = vpop.eup %9162 }
 0x8a6   : > { %v11126_v1 = vpop.eup %9164 }
 0x8b4   : > { %4045 = vadd.xlane.f32.xlu0 %v11099_v30 }
 0x8b6   : > { %v3984_v8 = vpop.xlane.xlu1 %3983  ;;  %4041 = vadd.xlane.f32.xlu1 %v11102_v26 }
 0x8b7   : > { %v4000_v28 = vsub.f32 %v11059_v54, %v3984_v8 }
 0x8b8   : > { %4043 = vadd.xlane.f32.xlu0 %v11105_v4 }
 0x8b9   : > { %v4031_v56 = vmul.f32 1.442695, %v4000_v28 }
 0x8ba   : > { %4047 = vadd.xlane.f32.xlu1 %v11110_v6  ;;  %v3980_v37 = vpop.xlane.xlu1 %3979 }
 0x8bb   : > { %9166 = vpow2.f32 %v4031_v56  ;;  %v3998_v38 = vsub.f32 %v11064_v52, %v3980_v37 }
 0x8bc   : > { %4061 = vadd.xlane.f32.xlu0 %v11113_v63  ;;  %9168 = vpow2.f32 %v4019_v16 }
 0x8bd   : > { %v4027_v54 = vmul.f32 1.442695, %v3998_v38 }
 0x8be   : > { %4053 = vadd.xlane.f32.xlu1 %v11117_v14 }
 0x8bf   : > { %9170 = vpow2.f32 %v4027_v54 }
 0x8c0   : > { %4057 = vadd.xlane.f32.xlu0 %v11120_v29 }
 0x8c2   : > { %4049 = vadd.xlane.f32.xlu1 %v11123_v22 }
 0x8c5   : > { %v11128_v52 = vpop.eup %9166 }
 0x8c6   : > { %4063 = vadd.xlane.f32.xlu0 %v11128_v52  ;;  %4055 = vadd.xlane.f32.xlu1 %v11126_v1  ;;  %v11132_v0 = vpop.eup %9168 }
 0x8c9   : > { %v11135_v27 = vpop.eup %9170 }
 0x8ca   : > { %4051 = vadd.xlane.f32.xlu1 %v11132_v0 }
 0x8ce   : > { %4059 = vadd.xlane.f32.xlu1 %v11135_v27 }
 0x8dc   : > { %4246 = vrot.lane.b32.xlu0 %v12724_v53, %s9564_s21  ;;  %v4239_v53 = vpop.permute.xlu0 %4238 }
 0x8df   : > { %4248 = vrot.lane.b32.xlu1 %v12727_v35, %s9564_s21 }
 0x8e0   : > { %4210 = vrot.lane.b32.xlu0 %v12730_v34, %s9564_s21 }
 0x8e3   : > { %4212 = vrot.lane.b32.xlu1 %v12732_v60, %s9564_s21 }
 0x8e4   : > { %4214 = vrot.lane.b32.xlu0 %v12734_v58, %s9564_s21 }
 0x8e7   : > { %4216 = vrot.lane.b32.xlu1 %v12736_v17, %s9564_s21 }
 0x8e8   : > { %4218 = vrot.lane.b32.xlu0 %v12738_v23, %s9564_s21 }
 0x8eb   : > { %4220 = vrot.lane.b32.xlu1 %v12739_v47, %s9564_s21 }
 0x8ec   : > { %4222 = vrot.lane.b32.xlu0 %v12741_v18, %s9564_s21 }
 0x8ef   : > { %4224 = vrot.lane.b32.xlu1 %v12743_v11, %s9564_s21 }
 0x8f0   : > { %4587 = vrot.lane.b32.xlu0 %v10250_v41, %s9564_s21 }
 0x8f3   : > { %4589 = vrot.lane.b32.xlu1 %v10260_v15, %s9564_s21 }
 0x8f4   : > { %4591 = vrot.lane.b32.xlu0 %v10270_v7, %s9564_s21 }
 0x8f7   : > { %4593 = vrot.lane.b32.xlu1 %v10280_v61, %s9564_s21 }
 0x908   : > { %v4038_v35 = vpop.xlane.xlu0 %4037 }
 0x90a   : > { %v4040_v34 = vpop.xlane.xlu1 %4039 }
 0x90b   : > { %9172 = vrcp.f32 %v4040_v34 }
 0x90c   : > { %v4034_v60 = vpop.xlane.xlu0 %4033 }
 0x90d   : > { %9174 = vrcp.f32 %v4034_v60 }
 0x90e   : > { %9176 = vrcp.f32 %v4038_v35  ;;  %v4036_v58 = vpop.xlane.xlu1 %4035 }
 0x90f   : > { %9178 = vrcp.f32 %v4036_v58 }
 0x910   : > { %v4243_v50 = vpop.permute.xlu0 %4242 }
 0x915   : > { %v9173_v17 = vpop.eup %9172 }
 0x916   : > { %v4084_v15 = vmul.f32 %v9173_v17, %v11076_v45  ;;  %v4278_v45 = vsel %vm12770_vm14, %v11067_v43, 0  ;;  %vm12776_vm14 = vmmov %vm12768_vm0 }
 0x917   : > { %v9175_v41 = vpop.eup %9174 }
 0x918   : > { %v9177_v23 = vpop.eup %9176  ;;  %v4081_v7 = vmul.f32 %v9175_v41, %v11079_v49  ;;  %v4281_v49 = vsel %vm12772_vm9, %v4239_v53, 0  ;;  %vm12777_vm9 = vmmov %vm12768_vm0 }
 0x919   : > { %v9179_v47 = vpop.eup %9178  ;;  %v4083_v61 = vmul.f32 %v9177_v23, %v11073_v32  ;;  %v4284_v32 = vsel %vm12774_vm13, %v11097_v3, 0  ;;  %vm12778_vm13 = vmmov %vm12768_vm0 }
 0x91a   : > { %v4082_v18 = vmul.f32 %v9179_v47, %v11082_v44  ;;  %v4245_v44 = vpop.permute.xlu1 %4244 }
 0x91b   : > { %v4098_v36 = vpack.c.bf16 %v4084_v15, %v4083_v61  ;;  %v4290_v51 = vsel %vm12777_vm9, %v4245_v44, 0  ;;  %vm12784_vm9 = vmmov %vm12768_vm0 }
 0x91c   : > { %v4097_v11 = vpack.c.bf16 %v4082_v18, %v4081_v7  ;;  %v12781_v18 = vld [vmem:[#allocation53_spill] sm:$0xff] }
 0x91e   : > { %7907 = vmatprep.mubr.bf16.mxu1 %v4097_v11 }
 0x91f   : > { %7908 = vmatmul.mubr.bf16.vlgmr.msra.gmra.mrb[144].mxu1 %v4098_v36 }
 0x920   : > { %7924 = vmatpush3.bf16.xpose.msra.mxu1 %v4275_v46 }
 0x921   : > { %8380 = vmatprep.subr.msk.bf16.mxu1 %vm12769_vm11, %v11067_v43  ;;  %vm12775_vm11 = vmmov %vm12768_vm0 }
 0x922   : > { %v4287_v2 = vsel %vm12775_vm11, %v4243_v50, 0  ;;  %vm12782_vm11 = vmmov %vm12768_vm0 }
 0x928   : > { %7926 = vmatpush3.bf16.xpose.msra.mxu1 %v4278_v45 }
 0x929   : > { %8381 = vmatprep.subr.msk.bf16.mxu1 %vm12771_vm15, %v4239_v53  ;;  %vm12780_vm15 = vmmov %vm12768_vm0 }
 0x930   : > { %7928 = vmatpush3.bf16.xpose.msra.mxu1 %v4281_v49 }
 0x931   : > { %8382 = vmatprep.subr.msk.bf16.mxu1 %vm12773_vm12, %v11097_v3  ;;  %vm12779_vm12 = vmmov %vm12768_vm0 }
 0x938   : > { %7930 = vmatpush3.bf16.xpose.msra.mxu1 %v4284_v32 }
 0x939   : > { %8383 = vmatprep.subr.msk.bf16.mxu1 %vm12768_vm0, %v4243_v50 }
 0x940   : > { %7932 = vmatpush3.bf16.xpose.msra.mxu1 %v4287_v2 }
 0x941   : > { %8384 = vmatprep.subr.msk.bf16.mxu1 %vm12776_vm14, %v4245_v44  ;;  %v4046_v43 = vpop.xlane.xlu0 %4045  ;;  %vm12783_vm14 = vmmov %vm12768_vm0 }
 0x943   : > { %v4042_v59 = vpop.xlane.xlu1 %4041 }
 0x944   : > { %9180 = vrcp.f32 %v4042_v59 }
 0x945   : > { %9182 = vrcp.f32 %v4046_v43  ;;  %v4044_v42 = vpop.xlane.xlu0 %4043 }
 0x946   : > { %9184 = vrcp.f32 %v4044_v42 }
 0x947   : > { %v4048_v25 = vpop.xlane.xlu1 %4047 }
 0x948   : > { %7934 = vmatpush3.bf16.xpose.msra.mxu1 %v4290_v51  ;;  %9186 = vrcp.f32 %v4048_v25 }
 0x949   : > { %v4062_v19 = vpop.xlane.xlu0 %4061 }
 0x94b   : > { %v4054_v13 = vpop.xlane.xlu1 %4053 }
 0x94d   : > { %v4058_v24 = vpop.xlane.xlu0 %4057 }
 0x94e   : > { %v9181_v3 = vpop.eup %9180 }
 0x94f   : > { %v9183_v9 = vpop.eup %9182  ;;  %v4050_v8 = vpop.xlane.xlu1 %4049  ;;  %v4085_v28 = vmul.f32 %v9181_v3, %v11102_v26 }
 0x950   : > { %v9185_v33 = vpop.eup %9184  ;;  %v4087_v53 = vmul.f32 %v9183_v9, %v11099_v30 }
 0x951   : > { %v4086_v56 = vmul.f32 %v9185_v33, %v11105_v4  ;;  %v12790_v33 = vld [vmem:[#allocation57_spill] sm:$0xff] }
 0x952   : > { %v9187_v37 = vpop.eup %9186 }
 0x953   : > { %v4064_v16 = vpop.xlane.xlu0 %4063  ;;  %v4056_v38 = vpop.xlane.xlu1 %4055  ;;  %v4099_v54 = vpack.c.bf16 %v4086_v56, %v4085_v28  ;;  %v4088_v35 = vmul.f32 %v9187_v37, %v11110_v6  ;;  %v12792_v28 = vld [vmem:[#allocation56_spill] sm:$0xff]  ;;  %v12793_v56 = vld [vmem:[#allocation59_spill] sm:$0xff]  ;;  %v12795_v37 = vld [vmem:[#allocation58_spill] sm:$0xff] }
 0x954   : > { %9188 = vrcp.f32 %v4056_v38 }
 0x955   : > { %7911 = vmatprep.mubr.bf16.mxu1 %v4099_v54  ;;  %v4100_v34 = vpack.c.bf16 %v4088_v35, %v4087_v53  ;;  %9190 = vrcp.f32 %v4050_v8  ;;  %v12789_v8 = vld [vmem:[#allocation54_spill] sm:$0xff] }
 0x956   : > { %9192 = vrcp.f32 %v4054_v13 }
 0x957   : > { %v4247_v60 = vpop.permute.xlu0 %4246  ;;  %7912 = vmatmul.mubr.bf16.gmra.mrb[148].mxu1 %v4100_v34  ;;  %v4052_v58 = vpop.xlane.xlu1 %4051 }
 0x958   : > { %9194 = vrcp.f32 %v4052_v58  ;;  %8385 = vmatprep.subr.msk.bf16.mxu1 %vm12778_vm13, %v4247_v60  ;;  %v4293_v26 = vsel %vm12779_vm12, %v4247_v60, 0  ;;  %vm12787_vm13 = vmmov %vm12768_vm0 }
 0x959   : > { %7936 = vmatpush3.bf16.xpose.msra.mxu1 %v4293_v26  ;;  %9196 = vrcp.f32 %v4058_v24  ;;  %v12786_v24 = vld [vmem:[#allocation55_spill] sm:$0xff]  ;;  %vm12788_vm12 = vmmov %vm12768_vm0 }
 0x95b   : > { %v4211_v4 = vpop.permute.xlu0 %4210  ;;  %v4060_v17 = vpop.xlane.xlu1 %4059 }
 0x95c   : > { %9198 = vrcp.f32 %v4060_v17 }
 0x95d   : > { %9200 = vrcp.f32 %v4064_v16 }
 0x95e   : > { %v9189_v30 = vpop.eup %9188  ;;  %9202 = vrcp.f32 %v4062_v19 }
 0x95f   : > { %v4215_v6 = vpop.permute.xlu0 %4214  ;;  %v4249_v41 = vpop.permute.xlu1 %4248  ;;  %v4092_v61 = vmul.f32 %v9189_v30, %v11126_v1 }
 0x960   : > { %v9191_v23 = vpop.eup %9190  ;;  %8386 = vmatprep.subr.msk.bf16.mxu1 %vm12780_vm15, %v4249_v41  ;;  %v4296_v47 = vsel %vm12768_vm0, %v4249_v41, 0  ;;  %vm12791_vm15 = vmmov %vm12768_vm0 }
 0x961   : > { %v9193_v15 = vpop.eup %9192  ;;  %7938 = vmatpush3.bf16.xpose.msra.mxu1 %v4296_v47  ;;  %v4089_v46 = vmul.f32 %v9191_v23, %v11123_v22 }
 0x962   : > { %v9195_v7 = vpop.eup %9194  ;;  %8019 = vmatprep.subr.bf16.mxu1 %v12781_v18  ;;  %v4091_v32 = vmul.f32 %v9193_v15, %v11117_v14 }
 0x963   : > { %v4219_v11 = vpop.permute.xlu0 %4218  ;;  %v4213_v36 = vpop.permute.xlu1 %4212  ;;  %v4090_v45 = vmul.f32 %v9195_v7, %v11132_v0 }
 0x964   : > { %v9197_v49 = vpop.eup %9196  ;;  %v4102_v2 = vpack.c.bf16 %v4092_v61, %v4091_v32 }
 0x965   : > { %v4101_v50 = vpack.c.bf16 %v4090_v45, %v4089_v46  ;;  %v4093_v51 = vmul.f32 %v9197_v49, %v11120_v29 }
 0x966   : > { %v9199_v44 = vpop.eup %9198 }
 0x967   : > { %v9201_v43 = vpop.eup %9200  ;;  %v4223_v59 = vpop.permute.xlu0 %4222  ;;  %7915 = vmatprep.mubr.bf16.mxu1 %v4101_v50  ;;  %v4094_v1 = vmul.f32 %v9199_v44, %v11135_v27 }
 0x968   : > { %v4217_v42 = vpop.permute.xlu1 %4216  ;;  %7916 = vmatmul.mubr.bf16.gmra.mrb[152].mxu1 %v4102_v2  ;;  %v9203_v25 = vpop.eup %9202  ;;  %v4096_v22 = vmul.f32 %v9201_v43, %v11128_v52 }
 0x969   : > { %v4103_v19 = vpack.c.bf16 %v4094_v1, %v4093_v51  ;;  %v4095_v14 = vmul.f32 %v9203_v25, %v11113_v63  ;;  %v12785_v63 = vld [vmem:[#allocation52_spill] sm:$0xff] }
 0x96b   : > { %v4588_v0 = vpop.permute.xlu0 %4587  ;;  %7919 = vmatprep.mubr.bf16.mxu1 %v4103_v19  ;;  %v4104_v3 = vpack.c.bf16 %v4096_v22, %v4095_v14 }
 0x96c   : > { %v4221_v13 = vpop.permute.xlu1 %4220  ;;  %7955 = vmatprep.subr.bf16.mxu0 %v4588_v0 }
 0x96d   : > { %7956 = vmatpush3.bf16.msra.mxu0 %v4588_v0 }
 0x96f   : > { %v4592_v27 = vpop.permute.xlu0 %4591 }
 0x970   : > { %v4225_v9 = vpop.permute.xlu1 %4224  ;;  %7920 = vmatmul.mubr.bf16.gmra.mrb[156].mxu1 %v4104_v3 }
 0x971   : > { %7939 = vmatprep.mubr.msk.bf16.mxu1 %vm12782_vm11, %v4211_v4  ;;  %vm12794_vm11 = vmmov %vm12768_vm0 }
 0x974   : > { %v4590_v29 = vpop.permute.xlu1 %4589 }
 0x975   : > { %7957 = vmatprep.subr.bf16.mxu0 %v4590_v29 }
 0x976   : > { %7958 = vmatpush3.bf16.msra.mxu0 %v4590_v29 }
 0x977   : > { %7959 = vmatprep.subr.bf16.mxu0 %v4592_v27 }
 0x978   : > { %7940 = vmatmul.mubr.msk.bf16.vlgmr.msra.gmra.mrb[160].mxu1 %vm12783_vm14, %v4213_v36  ;;  %v4594_v52 = vpop.permute.xlu1 %4593  ;;  %vm12812_vm14 = vnez %v12689_v39 }
 0x979   : > { %8020 = vmatpush3.bf16.msra.mxu1 %v12781_v18  ;;  %7943 = vmatprep.mubr.msk.bf16.mxu1 %vm12784_vm9, %v4215_v6  ;;  %vm12813_vm9 = vnez %v12691_v40 }
 0x97a   : > { %7960 = vmatpush3.bf16.msra.mxu0 %v4592_v27  ;;  %8021 = vmatprep.subr.bf16.mxu1 %v12785_v63 }
 0x97b   : > { %7961 = vmatprep.subr.bf16.mxu0 %v4594_v52 }
 0x97d   : > { %8022 = vmatpush3.bf16.msra.mxu1 %v12785_v63 }
 0x97e   : > { %7962 = vmatpush3.bf16.msra.mxu0 %v4594_v52  ;;  %8023 = vmatprep.subr.bf16.mxu1 %v12786_v24 }
 0x980   : > { %7944 = vmatmul.mubr.msk.bf16.gmra.mrb[164].mxu1 %vm12787_vm13, %v4217_v42  ;;  %vm12814_vm13 = vnez %v12693_v55 }
 0x981   : > { %8024 = vmatpush3.bf16.msra.mxu1 %v12786_v24  ;;  %7947 = vmatprep.mubr.msk.bf16.mxu1 %vm12788_vm12, %v4219_v11 }
 0x982   : > { %8025 = vmatprep.subr.bf16.mxu1 %v12789_v8 }
 0x985   : > { %8026 = vmatpush3.bf16.msra.mxu1 %v12789_v8 }
 0x986   : > { %8027 = vmatprep.subr.bf16.mxu1 %v12790_v33 }
 0x988   : > { %7948 = vmatmul.mubr.msk.bf16.gmra.mrb[168].mxu1 %vm12791_vm15, %v4221_v13 }
 0x989   : > { %8028 = vmatpush3.bf16.msra.mxu1 %v12790_v33  ;;  %7951 = vmatprep.mubr.msk.bf16.mxu1 %vm12768_vm0, %v4223_v59 }
 0x98a   : > { %8029 = vmatprep.subr.bf16.mxu1 %v12792_v28 }
 0x98d   : > { %8030 = vmatpush3.bf16.msra.mxu1 %v12792_v28 }
 0x98e   : > { %8031 = vmatprep.subr.bf16.mxu1 %v12793_v56 }
 0x990   : > { %7952 = vmatmul.mubr.msk.bf16.gmra.mrb[172].mxu1 %vm12794_vm11, %v4225_v9 }
 0x991   : > { %8032 = vmatpush3.bf16.msra.mxu1 %v12793_v56 }
 0x992   : > { %8033 = vmatprep.subr.bf16.mxu1 %v12795_v37 }
 0x995   : > { %8034 = vmatpush3.bf16.msra.mxu1 %v12795_v37 }
 0x9f2   : > { %v11226_v16 = vpop.f32.mrb[144].mxu1 }
 0x9f3   : > { %12796 = vst [vmem:[#allocation38_spill] sm:$0xff] %v11226_v16  ;;  %v11228_v38 = vpop.f32.mrb[145].mxu1 }
 0x9f4   : > { %12797 = vst [vmem:[#allocation40_spill] sm:$0xff] %v11228_v38  ;;  %v11230_v54 = vpop.f32.mrb[146].mxu1 }
 0x9f5   : > { %12798 = vst [vmem:[#allocation42_spill] sm:$0xff] %v11230_v54  ;;  %v11232_v53 = vpop.f32.mrb[147].mxu1 }
 0x9f6   : > { %12799 = vst [vmem:[#allocation12_spill] sm:$0xff] %v11232_v53 }
 0xa2a   : > { %v11234_v35 = vpop.f32.mrb[148].mxu1 }
 0xa2b   : > { %12800 = vst [vmem:[#allocation13_spill] sm:$0xff] %v11234_v35  ;;  %v11236_v34 = vpop.f32.mrb[149].mxu1 }
 0xa2c   : > { %12801 = vst [vmem:[#allocation14_spill] sm:$0xff] %v11236_v34  ;;  %v11238_v60 = vpop.f32.mrb[150].mxu1 }
 0xa2d   : > { %12802 = vst [vmem:[#allocation15_spill] sm:$0xff] %v11238_v60  ;;  %v11240_v58 = vpop.f32.mrb[151].mxu1 }
 0xa2e   : > { %12803 = vst [vmem:[#allocation16_spill] sm:$0xff] %v11240_v58 }
 0xa3b   : > { %v11242_v26 = vpop.f32.mrb[152].mxu1 }
 0xa3c   : > { %12804 = vst [vmem:[#allocation17_spill] sm:$0xff] %v11242_v26  ;;  %v11244_v4 = vpop.f32.mrb[153].mxu1 }
 0xa3d   : > { %12805 = vst [vmem:[#allocation18_spill] sm:$0xff] %v11244_v4  ;;  %v11246_v17 = vpop.f32.mrb[154].mxu1  ;;  %v12826_v4 = vld [vmem:[#allocation49_spill] sm:$0xff] }
 0xa3e   : > { %12806 = vst [vmem:[#allocation19_spill] sm:$0xff] %v11246_v17  ;;  %v11248_v30 = vpop.f32.mrb[155].mxu1 }
 0xa3f   : > { %12807 = vst [vmem:[#allocation53_spill] sm:$0xff] %v11248_v30 }
 0xa43   : > { %v11250_v6 = vpop.f32.mrb[156].mxu1 }
 0xa44   : > { %12808 = vst [vmem:[#allocation52_spill] sm:$0xff] %v11250_v6  ;;  %v11252_v41 = vpop.f32.mrb[157].mxu1 }
 0xa45   : > { %12809 = vst [vmem:[#allocation55_spill] sm:$0xff] %v11252_v41  ;;  %v11254_v23 = vpop.f32.mrb[158].mxu1 }
 0xa46   : > { %12810 = vst [vmem:[#allocation54_spill] sm:$0xff] %v11254_v23  ;;  %v11256_v47 = vpop.f32.mrb[159].mxu1 }
 0xa47   : > { %12811 = vst [vmem:[#allocation88_spill] sm:$0xff] %v11256_v47 }
 0xa4b   : > { %v7941_v15 = vpop.f32.mrb[160].mxu1 }
 0xa4c   : > { %v4397_v7 = vmul.f32 0.05103104, %v7941_v15  ;;  %v4332_v61 = vpop.f32.mrb[161].mxu1 }
 0xa4d   : > { %v7942_v11 = vpop.f32.mrb[162].mxu1  ;;  %v4395_v36 = vmul.f32 0.05103104, %v4332_v61 }
 0xa4e   : > { %v4335_v46 = vpop.f32.mrb[163].mxu1  ;;  %v4413_v45 = vsel %vm10352_vm1, %v4397_v7, -inf  ;;  %v4398_v50 = vmul.f32 0.05103104, %v7942_v11 }
 0xa4f   : > { %v4396_v49 = vmul.f32 0.05103104, %v4335_v46  ;;  %4431 = vmax.xlane.f32.xlu0 %v4413_v45  ;;  %v11267_v44 = vsel %vm10359_vm2, %v4395_v36, -inf }
 0xa50   : > { %v4414_v25 = vsel %vm10374_vm3, %v4398_v50, -inf }
 0xa51   : > { %v11262_v32 = vsel %vm10381_vm4, %v4396_v49, -inf }
 0xa52   : > { %4429 = vmax.xlane.f32.xlu1 %v11262_v32 }
 0xa53   : > { %4427 = vmax.xlane.f32.xlu0 %v11267_v44  ;;  %v7945_v2 = vpop.f32.mrb[164].mxu1 }
 0xa54   : > { %v4348_v43 = vpop.f32.mrb[165].mxu1  ;;  %v4401_v42 = vmul.f32 0.05103104, %v7945_v2 }
 0xa55   : > { %v7946_v59 = vpop.f32.mrb[166].mxu1  ;;  %v4399_v0 = vmul.f32 0.05103104, %v4348_v43 }
 0xa56   : > { %v4402_v51 = vmul.f32 0.05103104, %v7946_v59  ;;  %v4351_v1 = vpop.f32.mrb[167].mxu1  ;;  %v11279_v13 = vsel %vm10396_vm5, %v4401_v42, -inf }
 0xa57   : > { %4433 = vmax.xlane.f32.xlu0 %v4414_v25  ;;  %v4400_v19 = vmul.f32 0.05103104, %v4351_v1  ;;  %v11289_v7 = vsel %vm10419_vm7, %v4399_v0, -inf  ;;  %v12815_v0 = vld [vmem:[#allocation70_spill] sm:$0xff] }
 0xa58   : > { %v11274_v22 = vsel %vm10403_vm6, %v4402_v51, -inf  ;;  %vm12816_vm12 = vnez %v12815_v0 }
 0xa59   : > { %4441 = vmax.xlane.f32.xlu1 %v11274_v22  ;;  %v11284_v9 = vsel %vm10425_vm8, %v4400_v19, -inf }
 0xa5b   : > { %4439 = vmax.xlane.f32.xlu0 %v11279_v13  ;;  %v7949_v14 = vpop.f32.mrb[168].mxu1 }
 0xa5c   : > { %v4364_v3 = vpop.f32.mrb[169].mxu1  ;;  %v4405_v27 = vmul.f32 0.05103104, %v7949_v14 }
 0xa5d   : > { %4437 = vmax.xlane.f32.xlu1 %v11284_v9  ;;  %v7950_v29 = vpop.f32.mrb[170].mxu1  ;;  %v4403_v36 = vmul.f32 0.05103104, %v4364_v3 }
 0xa5e   : > { %v4406_v52 = vmul.f32 0.05103104, %v7950_v29  ;;  %v4367_v15 = vpop.f32.mrb[171].mxu1  ;;  %v11299_v46 = vsel %vm12812_vm14, %v4405_v27, -inf  ;;  %v12817_v29 = vld [vmem:[#allocation68_spill] sm:$0xff] }
 0xa5f   : > { %4435 = vmax.xlane.f32.xlu0 %v11289_v7  ;;  %v4404_v61 = vmul.f32 0.05103104, %v4367_v15  ;;  %v11309_v1 = vsel %vm12814_vm13, %v4403_v36, -inf  ;;  %vm12818_vm15 = vnez %v12817_v29 }
 0xa60   : > { %v11294_v11 = vsel %vm12761_vm10, %v4406_v52, -inf  ;;  %v12819_v52 = vld [vmem:[#allocation71_spill] sm:$0xff] }
 0xa61   : > { %4449 = vmax.xlane.f32.xlu1 %v11294_v11  ;;  %v11304_v2 = vsel %vm12813_vm9, %v4404_v61, -inf  ;;  %vm12820_vm0 = vnez %v12819_v52  ;;  %v12821_v61 = vld [vmem:[#allocation69_spill] sm:$0xff] }
 0xa62   : > { %vm12822_vm11 = vnez %v12821_v61 }
 0xa63   : > { %4447 = vmax.xlane.f32.xlu0 %v11299_v46  ;;  %v7953_v49 = vpop.f32.mrb[172].mxu1 }
 0xa64   : > { %v4380_v50 = vpop.f32.mrb[173].mxu1  ;;  %v4409_v59 = vmul.f32 0.05103104, %v7953_v49  ;;  %v12823_v49 = vld [vmem:[#allocation47_spill] sm:$0xff] }
 0xa65   : > { %4445 = vmax.xlane.f32.xlu1 %v11304_v2  ;;  %v7954_v43 = vpop.f32.mrb[174].mxu1  ;;  %v4407_v3 = vmul.f32 0.05103104, %v4380_v50  ;;  %v12824_v50 = vld [vmem:[#allocation45_spill] sm:$0xff] }
 0xa66   : > { %v4410_v42 = vmul.f32 0.05103104, %v7954_v43  ;;  %v4383_v51 = vpop.f32.mrb[175].mxu1  ;;  %v11319_v27 = vsel %vm12818_vm15, %v4409_v59, -inf }
 0xa67   : > { %4443 = vmax.xlane.f32.xlu0 %v11309_v1  ;;  %v4408_v19 = vmul.f32 0.05103104, %v4383_v51  ;;  %v11329_v36 = vsel %vm12822_vm11, %v4407_v3, -inf }
 0xa68   : > { %v11314_v14 = vsel %vm12816_vm12, %v4410_v42, -inf }
 0xa69   : > { %4457 = vmax.xlane.f32.xlu1 %v11314_v14  ;;  %v11324_v15 = vsel %vm12820_vm0, %v4408_v19, -inf  ;;  %vm12829_vm0 = vcmask 523264  }
 0xa6a   : > { %vm12830_vm12 = vmmov %vm12829_vm0 }
 0xa6b   : > { %4455 = vmax.xlane.f32.xlu0 %v11319_v27  ;;  %vm12831_vm11 = vmmov %vm12829_vm0 }
 0xa6c   : > { %vm12833_vm15 = vmmov %vm12829_vm0 }
 0xa6d   : > { %4453 = vmax.xlane.f32.xlu1 %v11324_v15  ;;  %vm12834_vm9 = vmmov %vm12829_vm0 }
 0xa6e   : > { %vm12836_vm13 = vmmov %vm12829_vm0 }
 0xa6f   : > { %4451 = vmax.xlane.f32.xlu0 %v11329_v36  ;;  %vm12861_vm10 = vmmov %vm12829_vm0 }
 0xa7e   : > { %4597 = vrot.lane.b32.xlu1 %v12823_v49, %s9564_s21 }
 0xa85   : > { %4595 = vrot.lane.b32.xlu0 %v12824_v50, %s9564_s21 }
 0xadc   : > { %v4432_v43 = vpop.xlane.xlu0 %4431 }
 0xadd   : > { %v4461_v59 = vsub.f32 %v4413_v45, %v4432_v43 }
 0xadf   : > { %v4479_v42 = vmul.f32 1.442695, %v4461_v59  ;;  %v4430_v51 = vpop.xlane.xlu1 %4429 }
 0xae0   : > { %v4460_v19 = vsub.f32 %v11262_v32, %v4430_v51  ;;  %v4428_v23 = vpop.xlane.xlu0 %4427 }
 0xae1   : > { %9204 = vpow2.f32 %v4479_v42  ;;  %v4459_v6 = vsub.f32 %v11267_v44, %v4428_v23 }
 0xae2   : > { %v4477_v3 = vmul.f32 1.442695, %v4460_v19 }
 0xae3   : > { %v4475_v47 = vmul.f32 1.442695, %v4459_v6 }
 0xae4   : > { %9206 = vpow2.f32 %v4477_v3  ;;  %v4434_v41 = vpop.xlane.xlu0 %4433  ;;  %v12825_v3 = vld [vmem:[#allocation51_spill] sm:$0xff] }
 0xae5   : > { %9208 = vpow2.f32 %v4475_v47  ;;  %v4462_v17 = vsub.f32 %v4414_v25, %v4434_v41 }
 0xae6   : > { %v4442_v49 = vpop.xlane.xlu1 %4441 }
 0xae7   : > { %v4481_v26 = vmul.f32 1.442695, %v4462_v17  ;;  %v4466_v54 = vsub.f32 %v11274_v22, %v4442_v49 }
 0xae8   : > { %v4440_v30 = vpop.xlane.xlu0 %4439 }
 0xae9   : > { %9210 = vpow2.f32 %v4481_v26  ;;  %v4465_v35 = vsub.f32 %v11279_v13, %v4440_v30  ;;  %v4489_v38 = vmul.f32 1.442695, %v4466_v54 }
 0xaea   : > { %v4438_v50 = vpop.xlane.xlu1 %4437 }
 0xaeb   : > { %v11338_v45 = vpop.eup %9204  ;;  %v4464_v34 = vsub.f32 %v11284_v9, %v4438_v50  ;;  %v4487_v16 = vmul.f32 1.442695, %v4465_v35 }
 0xaec   : > { %v4436_v43 = vpop.xlane.xlu0 %4435  ;;  %4511 = vadd.xlane.f32.xlu1 %v11338_v45 }
 0xaed   : > { %v4463_v60 = vsub.f32 %v11289_v7, %v4436_v43 }
 0xaee   : > { %v11341_v32 = vpop.eup %9206  ;;  %v4450_v59 = vpop.xlane.xlu1 %4449 }
 0xaef   : > { %v11343_v23 = vpop.eup %9208  ;;  %4509 = vadd.xlane.f32.xlu0 %v11341_v32  ;;  %v4483_v58 = vmul.f32 1.442695, %v4463_v60 }
 0xaf0   : > { %v4448_v6 = vpop.xlane.xlu0 %4447  ;;  %4507 = vadd.xlane.f32.xlu1 %v11343_v23 }
 0xaf1   : > { %9212 = vpow2.f32 %v4483_v58  ;;  %v4469_v60 = vsub.f32 %v11299_v46, %v4448_v6  ;;  %v12827_v6 = vld [vmem:[#allocation29_spill] sm:$0xff] }
 0xaf2   : > { %v4446_v41 = vpop.xlane.xlu1 %4445  ;;  %9214 = vpow2.f32 %v4487_v16 }
 0xaf3   : > { %v11347_v17 = vpop.eup %9210  ;;  %v4468_v53 = vsub.f32 %v11304_v2, %v4446_v41  ;;  %v4495_v54 = vmul.f32 1.442695, %v4469_v60  ;;  %v12828_v41 = vld [vmem:[#allocation26_spill] sm:$0xff] }
 0xaf4   : > { %v4444_v26 = vpop.xlane.xlu0 %4443  ;;  %4513 = vadd.xlane.f32.xlu1 %v11347_v17 }
 0xaf5   : > { %v4493_v7 = vmul.f32 1.442695, %v4468_v53 }
 0xaf6   : > { %v4458_v47 = vpop.xlane.xlu1 %4457 }
 0xaf8   : > { %v4456_v44 = vpop.xlane.xlu0 %4455 }
 0xaf9   : > { %v4473_v9 = vsub.f32 %v11319_v27, %v4456_v44 }
 0xafa   : > { %v4454_v25 = vpop.xlane.xlu1 %4453 }
 0xafb   : > { %v4472_v35 = vsub.f32 %v11324_v15, %v4454_v25  ;;  %v11363_v58 = vpop.eup %9212 }
 0xafc   : > { %v4452_v42 = vpop.xlane.xlu0 %4451 }
 0xafd   : > { %v4471_v16 = vsub.f32 %v11329_v36, %v4452_v42  ;;  %v4501_v53 = vmul.f32 1.442695, %v4472_v35 }
 0xafe   : > { %v4598_v19 = vpop.permute.xlu1 %4597 }
 0xb00   : > { %v4596_v51 = vpop.permute.xlu0 %4595 }
 0xb01   : > { %7963 = vmatprep.subr.bf16.mxu0 %v4596_v51 }
 0xb02   : > { %7964 = vmatpush3.bf16.msra.mxu0 %v4596_v51  ;;  %v4485_v51 = vmul.f32 1.442695, %v4464_v34  ;;  %v4474_v34 = vsub.f32 %v11314_v14, %v4458_v47  ;;  %v4503_v14 = vmul.f32 1.442695, %v4473_v9  ;;  %v12838_v9 = vld [vmem:[#allocation37_spill] sm:$0xff] }
 0xb03   : > { %7965 = vmatprep.subr.bf16.mxu0 %v4598_v19 }
 0xb04   : > { %9216 = vpow2.f32 %v4485_v51  ;;  %v4505_v46 = vmul.f32 1.442695, %v4474_v34  ;;  %v4757_v34 = vsel %vm12830_vm12, %v12828_v41, 0  ;;  %vm12837_vm12 = vmmov %vm12829_vm0 }
 0xb05   : > { %4601 = vrot.lane.b32.xlu1 %v12825_v3, %s9564_s21  ;;  %4599 = vrot.lane.b32.xlu0 %v12826_v4, %s9564_s21  ;;  %v4467_v3 = vsub.f32 %v11309_v1, %v4444_v26  ;;  %v4470_v4 = vsub.f32 %v11294_v11, %v4450_v59  ;;  %9218 = vpow2.f32 %v4489_v38  ;;  %v11368_v38 = vpop.eup %9214  ;;  %v4499_v11 = vmul.f32 1.442695, %v4471_v16 }
 0xb06   : > { %7966 = vmatpush3.bf16.msra.mxu0 %v4598_v19  ;;  %9220 = vpow2.f32 %v4493_v7 }
 0xb07   : > { %v4491_v30 = vmul.f32 1.442695, %v4467_v3  ;;  %v4497_v13 = vmul.f32 1.442695, %v4470_v4 }
 0xb09   : > { %9222 = vpow2.f32 %v4491_v30 }
 0xb0a   : > { %9224 = vpow2.f32 %v4497_v13 }
 0xb0b   : > { %9226 = vpow2.f32 %v4495_v54 }
 0xb0c   : > { %9228 = vpow2.f32 %v4501_v53 }
 0xb0d   : > { %9230 = vpow2.f32 %v4499_v11 }
 0xb0e   : > { %v11370_v22 = vpop.eup %9216  ;;  %9232 = vpow2.f32 %v4505_v46 }
 0xb0f   : > { %v11375_v2 = vpop.eup %9218  ;;  %9234 = vpow2.f32 %v4503_v14  ;;  %v12840_v14 = vld [vmem:[#allocation39_spill] sm:$0xff] }
 0xb10   : > { %v11377_v1 = vpop.eup %9220 }
 0xb13   : > { %v11381_v15 = vpop.eup %9222 }
 0xb14   : > { %v11383_v36 = vpop.eup %9224 }
 0xb15   : > { %v11387_v27 = vpop.eup %9226 }
 0xb16   : > { %v11389_v49 = vpop.eup %9228 }
 0xb17   : > { %v11393_v50 = vpop.eup %9230 }
 0xb18   : > { %v11395_v43 = vpop.eup %9232 }
 0xb19   : > { %v11399_v59 = vpop.eup %9234 }
 0xb24   : > { %4515 = vadd.xlane.f32.xlu0 %v11363_v58 }
 0xb28   : > { %4519 = vadd.xlane.f32.xlu0 %v11368_v38 }
 0xb29   : > { %4517 = vadd.xlane.f32.xlu1 %v11370_v22 }
 0xb2c   : > { %4521 = vadd.xlane.f32.xlu0 %v11375_v2 }
 0xb2d   : > { %4525 = vadd.xlane.f32.xlu1 %v11377_v1 }
 0xb30   : > { %4523 = vadd.xlane.f32.xlu0 %v11381_v15 }
 0xb31   : > { %4529 = vadd.xlane.f32.xlu1 %v11383_v36 }
 0xb34   : > { %4527 = vadd.xlane.f32.xlu0 %v11387_v27 }
 0xb35   : > { %4533 = vadd.xlane.f32.xlu1 %v11389_v49 }
 0xb38   : > { %4531 = vadd.xlane.f32.xlu0 %v11393_v50 }
 0xb39   : > { %4537 = vadd.xlane.f32.xlu1 %v11395_v43 }
 0xb3c   : > { %4535 = vadd.xlane.f32.xlu0 %v11399_v59 }
 0xb4a   : > { %5192 = vrot.lane.b32.xlu1 %v12827_v6, %s9564_s21 }
 0xb52   : > { %5190 = vrot.lane.b32.xlu0 %v12828_v41, %s9564_s21 }
 0xb79   : > { %v4512_v26 = vpop.xlane.xlu1 %4511 }
 0xb7c   : > { %v4510_v47 = vpop.xlane.xlu0 %4509 }
 0xb7d   : > { %9236 = vrcp.f32 %v4510_v47  ;;  %v4508_v44 = vpop.xlane.xlu1 %4507 }
 0xb7e   : > { %9238 = vrcp.f32 %v4508_v44 }
 0xb7f   : > { %9240 = vrcp.f32 %v4512_v26 }
 0xb80   : > { %v4600_v25 = vpop.permute.xlu0 %4599 }
 0xb81   : > { %7967 = vmatprep.subr.bf16.mxu0 %v4600_v25  ;;  %v4514_v42 = vpop.xlane.xlu1 %4513 }
 0xb82   : > { %9242 = vrcp.f32 %v4514_v42  ;;  %7968 = vmatpush3.bf16.msra.mxu0 %v4600_v25  ;;  %v12843_v25 = vld [vmem:[#allocation41_spill] sm:$0xff] }
 0xb85   : > { %v4602_v19 = vpop.permute.xlu1 %4601 }
 0xb86   : > { %7969 = vmatprep.subr.bf16.mxu0 %v4602_v19 }
 0xb87   : > { %v9237_v51 = vpop.eup %9236  ;;  %7970 = vmatpush3.bf16.msra.mxu0 %v4602_v19 }
 0xb88   : > { %v9239_v3 = vpop.eup %9238  ;;  %8387 = vmatprep.subr.msk.bf16.mxu0 %vm12829_vm0, %v12828_v41  ;;  %v4556_v4 = vmul.f32 %v9237_v51, %v11341_v32  ;;  %v4760_v32 = vsel %vm12831_vm11, %v12827_v6, 0  ;;  %vm12839_vm11 = vmmov %vm12829_vm0 }
 0xb89   : > { %v4555_v7 = vmul.f32 %v9239_v3, %v11343_v23  ;;  %v9241_v60 = vpop.eup %9240  ;;  %v12832_v23 = vld [vmem:[#allocation32_spill] sm:$0xff]  ;;  %v4769_v46 = vsel %vm12839_vm11, %v12838_v9, 0  ;;  %vm12847_vm11 = vmmov %vm12829_vm0 }
 0xb8a   : > { %v4557_v35 = vmul.f32 %v9241_v60, %v11338_v45  ;;  %v4763_v45 = vsel %vm12834_vm9, %v12832_v23, 0  ;;  %vm12842_vm9 = vmmov %vm12829_vm0 }
 0xb8b   : > { %v4571_v30 = vpack.c.bf16 %v4556_v4, %v4555_v7  ;;  %v4772_v47 = vsel %vm12842_vm9, %v12840_v14, 0  ;;  %vm12850_vm9 = vmmov %vm12829_vm0 }
 0xb8c   : > { %v9243_v13 = vpop.eup %9242 }
 0xb8d   : > { %v4558_v54 = vmul.f32 %v9243_v13, %v11347_v17  ;;  %7971 = vmatprep.mubr.bf16.mxu0 %v4571_v30  ;;  %v12835_v17 = vld [vmem:[#allocation35_spill] sm:$0xff] }
 0xb8e   : > { %v4766_v53 = vsel %vm12837_vm12, %v12835_v17, 0  ;;  %vm12845_vm12 = vmmov %vm12829_vm0 }
 0xb8f   : > { %v4572_v16 = vpack.c.bf16 %v4558_v54, %v4557_v35  ;;  %v4775_v7 = vsel %vm12845_vm12, %v12843_v25, 0  ;;  %v12846_v54 = vld [vmem:[#allocation43_spill] sm:$0xff]  ;;  %vm12854_vm12 = vmmov %vm12829_vm0 }
 0xb91   : > { %7972 = vmatmul.mubr.bf16.vlgmr.msra.gmra.mrb[144].mxu0 %v4572_v16 }
 0xb92   : > { %7988 = vmatpush3.bf16.xpose.msra.mxu0 %v4757_v34 }
 0xb93   : > { %8388 = vmatprep.subr.msk.bf16.mxu0 %vm12829_vm0, %v12827_v6 }
 0xb9a   : > { %7990 = vmatpush3.bf16.xpose.msra.mxu0 %v4760_v32 }
 0xb9b   : > { %8389 = vmatprep.subr.msk.bf16.mxu0 %vm12833_vm15, %v12832_v23  ;;  %vm12841_vm15 = vmmov %vm12829_vm0 }
 0xba2   : > { %7992 = vmatpush3.bf16.xpose.msra.mxu0 %v4763_v45 }
 0xba3   : > { %8390 = vmatprep.subr.msk.bf16.mxu0 %vm12836_vm13, %v12835_v17  ;;  %vm12844_vm13 = vmmov %vm12829_vm0 }
 0xbaa   : > { %7994 = vmatpush3.bf16.xpose.msra.mxu0 %v4766_v53 }
 0xbab   : > { %8391 = vmatprep.subr.msk.bf16.mxu0 %vm12829_vm0, %v12838_v9 }
 0xbb1   : > { %v4516_v11 = vpop.xlane.xlu0 %4515 }
 0xbb2   : > { %7996 = vmatpush3.bf16.xpose.msra.mxu0 %v4769_v46  ;;  %9244 = vrcp.f32 %v4516_v11 }
 0xbb3   : > { %8392 = vmatprep.subr.msk.bf16.mxu0 %vm12841_vm15, %v12840_v14  ;;  %vm12848_vm15 = vmmov %vm12829_vm0 }
 0xbb5   : > { %v4520_v6 = vpop.xlane.xlu0 %4519 }
 0xbb6   : > { %v4518_v41 = vpop.xlane.xlu1 %4517 }
 0xbb7   : > { %9246 = vrcp.f32 %v4518_v41 }
 0xbb8   : > { %9248 = vrcp.f32 %v4520_v6 }
 0xbb9   : > { %v4522_v26 = vpop.xlane.xlu0 %4521 }
 0xbba   : > { %9250 = vrcp.f32 %v4522_v26  ;;  %7998 = vmatpush3.bf16.xpose.msra.mxu0 %v4772_v47  ;;  %v4526_v44 = vpop.xlane.xlu1 %4525 }
 0xbbb   : > { %8393 = vmatprep.subr.msk.bf16.mxu0 %vm12844_vm13, %v12843_v25  ;;  %9252 = vrcp.f32 %v4526_v44  ;;  %vm12852_vm13 = vmmov %vm12829_vm0 }
 0xbbc   : > { %v9245_v51 = vpop.eup %9244 }
 0xbbd   : > { %v4524_v42 = vpop.xlane.xlu0 %4523  ;;  %v4559_v13 = vmul.f32 %v9245_v51, %v11363_v58 }
 0xbbe   : > { %9254 = vrcp.f32 %v4524_v42  ;;  %v4530_v19 = vpop.xlane.xlu1 %4529 }
 0xbbf   : > { %9256 = vrcp.f32 %v4530_v19 }
 0xbc1   : > { %v9247_v3 = vpop.eup %9246  ;;  %v4528_v4 = vpop.xlane.xlu0 %4527 }
 0xbc2   : > { %v9249_v60 = vpop.eup %9248  ;;  %9258 = vrcp.f32 %v4528_v4  ;;  %8000 = vmatpush3.bf16.xpose.msra.mxu0 %v4775_v7  ;;  %v4534_v30 = vpop.xlane.xlu1 %4533  ;;  %v4560_v35 = vmul.f32 %v9247_v3, %v11370_v22  ;;  %v4778_v22 = vsel %vm12847_vm11, %v12846_v54, 0  ;;  %vm12857_vm11 = vmmov %vm12829_vm0 }
 0xbc3   : > { %8394 = vmatprep.subr.msk.bf16.mxu0 %vm12829_vm0, %v12846_v54  ;;  %9260 = vrcp.f32 %v4534_v30  ;;  %v4561_v45 = vmul.f32 %v9249_v60, %v11368_v38 }
 0xbc4   : > { %v9251_v16 = vpop.eup %9250  ;;  %v4573_v34 = vpack.c.bf16 %v4560_v35, %v4559_v13 }
 0xbc5   : > { %v4532_v32 = vpop.xlane.xlu0 %4531  ;;  %v4562_v53 = vmul.f32 %v9251_v16, %v11375_v2  ;;  %v9253_v11 = vpop.eup %9252  ;;  %v12849_v16 = vld [vmem:[#allocation20_spill] sm:$0xff] }
 0xbc6   : > { %9262 = vrcp.f32 %v4532_v32  ;;  %7975 = vmatprep.mubr.bf16.mxu0 %v4573_v34  ;;  %v4538_v46 = vpop.xlane.xlu1 %4537  ;;  %v4564_v47 = vmul.f32 %v9253_v11, %v11377_v1  ;;  %v12851_v34 = vld [vmem:[#allocation21_spill] sm:$0xff]  ;;  %v12853_v32 = vld [vmem:[#allocation22_spill] sm:$0xff] }
 0xbc7   : > { %v4574_v6 = vpack.c.bf16 %v4562_v53, %v4561_v45  ;;  %9264 = vrcp.f32 %v4538_v46  ;;  %v12862_v45 = vld [vmem:[#allocation33_spill] sm:$0xff] }
 0xbc8   : > { %v9255_v41 = vpop.eup %9254 }
 0xbc9   : > { %v4536_v58 = vpop.xlane.xlu0 %4535  ;;  %7976 = vmatmul.mubr.bf16.gmra.mrb[148].mxu0 %v4574_v6  ;;  %v4563_v26 = vmul.f32 %v9255_v41, %v11381_v15  ;;  %v9257_v44 = vpop.eup %9256 }
 0xbca   : > { %9266 = vrcp.f32 %v4536_v58  ;;  %8002 = vmatpush3.bf16.xpose.msra.mxu0 %v4778_v22  ;;  %v4566_v51 = vmul.f32 %v9257_v44, %v11383_v36 }
 0xbcb   : > { %v4575_v38 = vpack.c.bf16 %v4564_v47, %v4563_v26 }
 0xbcc   : > { %v9259_v2 = vpop.eup %9258 }
 0xbcd   : > { %v11448_v42 = vpop.permute.xlu0 %5190  ;;  %7979 = vmatprep.mubr.bf16.mxu0 %v4575_v38  ;;  %v4565_v19 = vmul.f32 %v9259_v2, %v11387_v27  ;;  %v9261_v3 = vpop.eup %9260 }
 0xbce   : > { %8395 = vmatprep.subr.msk.bf16.mxu1 %vm12848_vm15, %v11448_v42  ;;  %v4568_v7 = vmul.f32 %v9261_v3, %v11389_v49  ;;  %v12855_v49 = vld [vmem:[#allocation23_spill] sm:$0xff]  ;;  %vm12859_vm15 = vmmov %vm12829_vm0 }
 0xbcf   : > { %v4576_v4 = vpack.c.bf16 %v4566_v51, %v4565_v19 }
 0xbd0   : > { %v9263_v15 = vpop.eup %9262 }
 0xbd1   : > { %7980 = vmatmul.mubr.bf16.gmra.mrb[152].mxu0 %v4576_v4  ;;  %v4567_v1 = vmul.f32 %v9263_v15, %v11393_v50  ;;  %v9265_v60 = vpop.eup %9264  ;;  %v12856_v50 = vld [vmem:[#allocation24_spill] sm:$0xff] }
 0xbd2   : > { %v4570_v27 = vmul.f32 %v9265_v60, %v11395_v43  ;;  %v12860_v43 = vld [vmem:[#allocation30_spill] sm:$0xff] }
 0xbd3   : > { %v4577_v30 = vpack.c.bf16 %v4568_v7, %v4567_v1 }
 0xbd4   : > { %v9267_v13 = vpop.eup %9266 }
 0xbd5   : > { %7983 = vmatprep.mubr.bf16.mxu0 %v4577_v30  ;;  %v4569_v35 = vmul.f32 %v9267_v13, %v11399_v59  ;;  %v12858_v59 = vld [vmem:[#allocation27_spill] sm:$0xff] }
 0xbd7   : > { %v4578_v36 = vpack.c.bf16 %v4570_v27, %v4569_v35 }
 0xbd9   : > { %7984 = vmatmul.mubr.bf16.gmra.mrb[156].mxu0 %v4578_v36 }
 0xbda   : > { %8003 = vmatprep.mubr.msk.bf16.mxu0 %vm12850_vm9, %v12849_v16  ;;  %vm12863_vm9 = vmmov %vm12829_vm0 }
 0xbe1   : > { %8004 = vmatmul.mubr.msk.bf16.vlgmr.msra.gmra.mrb[160].mxu0 %vm12852_vm13, %v12851_v34  ;;  %vm12881_vm13 = vnez %v12693_v55 }
 0xbe2   : > { %8007 = vmatprep.mubr.msk.bf16.mxu0 %vm12854_vm12, %v12853_v32  ;;  %vm12882_vm12 = vnez %v12691_v40 }
 0xbe9   : > { %8008 = vmatmul.mubr.msk.bf16.gmra.mrb[164].mxu0 %vm12829_vm0, %v12855_v49  ;;  %vm12883_vm0 = vnez %v12817_v29 }
 0xbea   : > { %8011 = vmatprep.mubr.msk.bf16.mxu0 %vm12857_vm11, %v12856_v50  ;;  %vm12884_vm11 = vnez %v12821_v61 }
 0xbf1   : > { %8012 = vmatmul.mubr.msk.bf16.gmra.mrb[168].mxu0 %vm12859_vm15, %v12858_v59  ;;  %vm12885_vm15 = vnez %v12815_v0 }
 0xbf2   : > { %8015 = vmatprep.mubr.msk.bf16.mxu0 %vm12861_vm10, %v12860_v43  ;;  %vm12880_vm10 = vnez %v12688_v48 }
 0xbf9   : > { %8016 = vmatmul.mubr.msk.bf16.gmra.mrb[172].mxu0 %vm12863_vm9, %v12862_v45  ;;  %vm12886_vm9 = vnez %v12819_v52 }
 0xc64   : > { %v11474_v53 = vpop.f32.mrb[144].mxu0 }
 0xc65   : > { %12864 = vst [vmem:[#allocation47_spill] sm:$0xff] %v11474_v53  ;;  %v11476_v11 = vpop.f32.mrb[145].mxu0 }
 0xc66   : > { %12865 = vst [vmem:[#allocation45_spill] sm:$0xff] %v11476_v11  ;;  %v11478_v46 = vpop.f32.mrb[146].mxu0 }
 0xc67   : > { %12866 = vst [vmem:[#allocation51_spill] sm:$0xff] %v11478_v46  ;;  %v11482_v41 = vpop.f32.mrb[147].mxu0 }
 0xc68   : > { %12867 = vst [vmem:[#allocation49_spill] sm:$0xff] %v11482_v41 }
 0xc9c   : > { %v11486_v22 = vpop.f32.mrb[148].mxu0 }
 0xc9d   : > { %12868 = vst [vmem:[#allocation29_spill] sm:$0xff] %v11486_v22  ;;  %v11488_v26 = vpop.f32.mrb[149].mxu0 }
 0xc9e   : > { %12869 = vst [vmem:[#allocation26_spill] sm:$0xff] %v11488_v26  ;;  %v11490_v47 = vpop.f32.mrb[150].mxu0 }
 0xc9f   : > { %12870 = vst [vmem:[#allocation32_spill] sm:$0xff] %v11490_v47  ;;  %v11494_v38 = vpop.f32.mrb[151].mxu0 }
 0xca0   : > { %12871 = vst [vmem:[#allocation35_spill] sm:$0xff] %v11494_v38 }
 0xca4   : > { %v11498_v19 = vpop.f32.mrb[152].mxu0 }
 0xca5   : > { %12872 = vst [vmem:[#allocation37_spill] sm:$0xff] %v11498_v19  ;;  %v11500_v51 = vpop.f32.mrb[153].mxu0 }
 0xca6   : > { %12873 = vst [vmem:[#allocation39_spill] sm:$0xff] %v11500_v51  ;;  %v11502_v3 = vpop.f32.mrb[154].mxu0 }
 0xca7   : > { %12874 = vst [vmem:[#allocation41_spill] sm:$0xff] %v11502_v3  ;;  %v11506_v15 = vpop.f32.mrb[155].mxu0 }
 0xca8   : > { %12875 = vst [vmem:[#allocation43_spill] sm:$0xff] %v11506_v15 }
 0xcac   : > { %v11510_v7 = vpop.f32.mrb[156].mxu0 }
 0xcad   : > { %12876 = vst [vmem:[#allocation20_spill] sm:$0xff] %v11510_v7  ;;  %v11512_v60 = vpop.f32.mrb[157].mxu0 }
 0xcae   : > { %12877 = vst [vmem:[#allocation21_spill] sm:$0xff] %v11512_v60  ;;  %v11514_v30 = vpop.f32.mrb[158].mxu0 }
 0xcaf   : > { %12878 = vst [vmem:[#allocation22_spill] sm:$0xff] %v11514_v30  ;;  %v11518_v35 = vpop.f32.mrb[159].mxu0 }
 0xcb0   : > { %12879 = vst [vmem:[#allocation23_spill] sm:$0xff] %v11518_v35 }
 0xcb4   : > { %v8005_v36 = vpop.f32.mrb[160].mxu0 }
 0xcb5   : > { %v4879_v4 = vmul.f32 0.05103104, %v8005_v36  ;;  %v4814_v44 = vpop.f32.mrb[161].mxu0 }
 0xcb6   : > { %v8006_v2 = vpop.f32.mrb[162].mxu0  ;;  %v4877_v58 = vmul.f32 0.05103104, %v4814_v44 }
 0xcb7   : > { %v4880_v1 = vmul.f32 0.05103104, %v8006_v2  ;;  %v4817_v6 = vpop.f32.mrb[163].mxu0  ;;  %v11524_v19 = vsel %vm10352_vm1, %v4879_v4, -inf }
 0xcb8   : > { %4913 = vmax.xlane.f32.xlu0 %v11524_v19  ;;  %v4878_v3 = vmul.f32 0.05103104, %v4817_v6  ;;  %v11534_v36 = vsel %vm10359_vm2, %v4877_v58, -inf }
 0xcb9   : > { %v11529_v13 = vsel %vm10374_vm3, %v4880_v1, -inf }
 0xcba   : > { %4915 = vmax.xlane.f32.xlu1 %v11529_v13  ;;  %v11539_v4 = vsel %vm10381_vm4, %v4878_v3, -inf }
 0xcbc   : > { %4909 = vmax.xlane.f32.xlu0 %v11534_v36  ;;  %v8009_v44 = vpop.f32.mrb[164].mxu0 }
 0xcbd   : > { %v4883_v2 = vmul.f32 0.05103104, %v8009_v44  ;;  %v4830_v27 = vpop.f32.mrb[165].mxu0 }
 0xcbe   : > { %4911 = vmax.xlane.f32.xlu1 %v11539_v4  ;;  %v8010_v6 = vpop.f32.mrb[166].mxu0  ;;  %v4881_v1 = vmul.f32 0.05103104, %v4830_v27 }
 0xcbf   : > { %v4884_v7 = vmul.f32 0.05103104, %v8010_v6  ;;  %v4833_v30 = vpop.f32.mrb[167].mxu0  ;;  %v11544_v60 = vsel %vm10396_vm5, %v4883_v2, -inf }
 0xcc0   : > { %4921 = vmax.xlane.f32.xlu0 %v11544_v60  ;;  %v4882_v58 = vmul.f32 0.05103104, %v4833_v30  ;;  %v11554_v3 = vsel %vm10419_vm7, %v4881_v1, -inf }
 0xcc1   : > { %v11549_v44 = vsel %vm10403_vm6, %v4884_v7, -inf }
 0xcc2   : > { %4923 = vmax.xlane.f32.xlu1 %v11549_v44  ;;  %v11559_v2 = vsel %vm10425_vm8, %v4882_v58, -inf }
 0xcc4   : > { %4917 = vmax.xlane.f32.xlu0 %v11554_v3  ;;  %v8013_v27 = vpop.f32.mrb[168].mxu0 }
 0xcc5   : > { %v4887_v6 = vmul.f32 0.05103104, %v8013_v27  ;;  %v4846_v35 = vpop.f32.mrb[169].mxu0 }
 0xcc6   : > { %4919 = vmax.xlane.f32.xlu1 %v11559_v2  ;;  %v8014_v30 = vpop.f32.mrb[170].mxu0  ;;  %v4885_v7 = vmul.f32 0.05103104, %v4846_v35 }
 0xcc7   : > { %v4888_v51 = vmul.f32 0.05103104, %v8014_v30  ;;  %v4849_v15 = vpop.f32.mrb[171].mxu0  ;;  %v11564_v22 = vsel %vm12812_vm14, %v4887_v6, -inf }
 0xcc8   : > { %4929 = vmax.xlane.f32.xlu0 %v11564_v22  ;;  %v4886_v1 = vmul.f32 0.05103104, %v4849_v15  ;;  %v11574_v58 = vsel %vm12881_vm13, %v4885_v7, -inf }
 0xcc9   : > { %v11569_v27 = vsel %vm12880_vm10, %v4888_v51, -inf }
 0xcca   : > { %4931 = vmax.xlane.f32.xlu1 %v11569_v27  ;;  %v11579_v6 = vsel %vm12882_vm12, %v4886_v1, -inf }
 0xccc   : > { %4925 = vmax.xlane.f32.xlu0 %v11574_v58  ;;  %v8017_v35 = vpop.f32.mrb[172].mxu0 }
 0xccd   : > { %v4891_v30 = vmul.f32 0.05103104, %v8017_v35  ;;  %v4862_v47 = vpop.f32.mrb[173].mxu0 }
 0xcce   : > { %4927 = vmax.xlane.f32.xlu1 %v11579_v6  ;;  %v8018_v15 = vpop.f32.mrb[174].mxu0  ;;  %v4889_v51 = vmul.f32 0.05103104, %v4862_v47 }
 0xccf   : > { %v4865_v26 = vpop.f32.mrb[175].mxu0  ;;  %v4907_v38 = vsel %vm12883_vm0, %v4891_v30, -inf  ;;  %v4892_v1 = vmul.f32 0.05103104, %v8018_v15 }
 0xcd0   : > { %4937 = vmax.xlane.f32.xlu0 %v4907_v38  ;;  %v11586_v7 = vsel %vm12884_vm11, %v4889_v51, -inf  ;;  %v4890_v35 = vmul.f32 0.05103104, %v4865_v26  ;;  %v11603_v51 = vpop.permute.xlu1 %5192 }
 0xcd1   : > { %v11595_v47 = vsel %vm12885_vm15, %v4892_v1, -inf }
 0xcd2   : > { %v11600_v30 = vsel %vm12886_vm9, %v4890_v35, -inf  ;;  %vm12887_vm9 = vcmask 523264  }
 0xcd3   : > { %vm12888_vm15 = vmmov %vm12887_vm9 }
 0xcd4   : > { %4933 = vmax.xlane.f32.xlu0 %v11586_v7  ;;  %vm12889_vm11 = vmmov %vm12887_vm9 }
 0xcd5   : > { %vm12890_vm0 = vmmov %vm12887_vm9 }
 0xcd6   : > { %vm12891_vm13 = vmmov %vm12890_vm0 }
 0xcd7   : > { %vm12892_vm12 = vmmov %vm12890_vm0 }
 0xcd8   : > { %vm12893_vm14 = vmmov %vm12890_vm0 }
 0xcdf   : > { %5196 = vrot.lane.b32.xlu1 %v12835_v17, %s9564_s21 }
 0xcea   : > { %5194 = vrot.lane.b32.xlu0 %v12832_v23, %s9564_s21 }
 0xd03   : > { %4939 = vmax.xlane.f32.xlu1 %v11595_v47 }
 0xd07   : > { %4935 = vmax.xlane.f32.xlu1 %v11600_v30 }
 0xd45   : > { %v4914_v17 = vpop.xlane.xlu0 %4913 }
 0xd46   : > { %v4943_v11 = vsub.f32 %v11524_v19, %v4914_v17 }
 0xd47   : > { %v4916_v23 = vpop.xlane.xlu1 %4915 }
 0xd48   : > { %v4961_v15 = vmul.f32 1.442695, %v4943_v11  ;;  %v4944_v26 = vsub.f32 %v11529_v13, %v4916_v23 }
 0xd49   : > { %v4910_v41 = vpop.xlane.xlu0 %4909 }
 0xd4a   : > { %9268 = vpow2.f32 %v4961_v15  ;;  %v4963_v1 = vmul.f32 1.442695, %v4944_v26  ;;  %v4941_v53 = vsub.f32 %v11534_v36, %v4910_v41 }
 0xd4b   : > { %v4912_v46 = vpop.xlane.xlu1 %4911 }
 0xd4c   : > { %9270 = vpow2.f32 %v4963_v1  ;;  %v4957_v35 = vmul.f32 1.442695, %v4941_v53  ;;  %v4942_v56 = vsub.f32 %v11539_v4, %v4912_v46 }
 0xd4d   : > { %v4922_v53 = vpop.xlane.xlu0 %4921 }
 0xd4e   : > { %9272 = vpow2.f32 %v4957_v35  ;;  %v4959_v37 = vmul.f32 1.442695, %v4942_v56  ;;  %v4947_v4 = vsub.f32 %v11544_v60, %v4922_v53 }
 0xd50   : > { %9274 = vpow2.f32 %v4959_v37  ;;  %v4924_v37 = vpop.xlane.xlu1 %4923  ;;  %v4969_v15 = vmul.f32 1.442695, %v4947_v4 }
 0xd51   : > { %v4918_v46 = vpop.xlane.xlu0 %4917  ;;  %v4948_v35 = vsub.f32 %v11549_v44, %v4924_v37 }
 0xd52   : > { %v4945_v17 = vsub.f32 %v11554_v3, %v4918_v46  ;;  %9276 = vpow2.f32 %v4969_v15 }
 0xd53   : > { %v4971_v28 = vmul.f32 1.442695, %v4948_v35 }
 0xd54   : > { %v11609_v52 = vpop.eup %9268  ;;  %v4920_v36 = vpop.xlane.xlu1 %4919  ;;  %v4965_v0 = vmul.f32 1.442695, %v4945_v17 }
 0xd55   : > { %4993 = vadd.xlane.f32.xlu0 %v11609_v52  ;;  %v4930_v56 = vpop.xlane.xlu0 %4929  ;;  %v4946_v26 = vsub.f32 %v11559_v2, %v4920_v36 }
 0xd56   : > { %v11612_v11 = vpop.eup %9270  ;;  %9278 = vpow2.f32 %v4965_v0  ;;  %v4951_v61 = vsub.f32 %v11564_v22, %v4930_v56 }
 0xd57   : > { %4995 = vadd.xlane.f32.xlu1 %v11612_v11 }
 0xd58   : > { %v11615_v19 = vpop.eup %9272  ;;  %v4932_v1 = vpop.xlane.xlu1 %4931  ;;  %v4977_v53 = vmul.f32 1.442695, %v4951_v61 }
 0xd59   : > { %4989 = vadd.xlane.f32.xlu0 %v11615_v19  ;;  %v4926_v13 = vpop.xlane.xlu0 %4925  ;;  %v4952_v46 = vsub.f32 %v11569_v27, %v4932_v1 }
 0xd5a   : > { %v11618_v41 = vpop.eup %9274  ;;  %v4949_v2 = vsub.f32 %v11574_v58, %v4926_v13 }
 0xd5b   : > { %4991 = vadd.xlane.f32.xlu1 %v11618_v41 }
 0xd5c   : > { %v4928_v29 = vpop.xlane.xlu1 %4927  ;;  %v4973_v0 = vmul.f32 1.442695, %v4949_v2 }
 0xd5d   : > { %v4938_v23 = vpop.xlane.xlu0 %4937  ;;  %v4950_v27 = vsub.f32 %v11579_v6, %v4928_v29 }
 0xd5e   : > { %v4955_v33 = vsub.f32 %v4907_v38, %v4938_v23  ;;  %v11635_v38 = vpop.eup %9276 }
 0xd5f   : > { %v4975_v4 = vmul.f32 1.442695, %v4950_v27 }
 0xd60   : > { %v4985_v60 = vmul.f32 1.442695, %v4955_v33  ;;  %v11633_v37 = vpop.permute.xlu1 %5196  ;;  %v11638_v22 = vpop.eup %9278  ;;  %v4979_v33 = vmul.f32 1.442695, %v4952_v46 }
 0xd6c   : > { %5200 = vrot.lane.b32.xlu1 %v12840_v14, %s9564_s21  ;;  %v4967_v14 = vmul.f32 1.442695, %v4946_v26 }
 0xd6e   : > { %9280 = vpow2.f32 %v4967_v14  ;;  %v5231_v14 = vsel %vm12887_vm9, %v11448_v42, 0  ;;  %vm12894_vm9 = vmmov %vm12890_vm0 }
 0xd6f   : > { %5198 = vrot.lane.b32.xlu0 %v12838_v9, %s9564_s21  ;;  %v4934_v9 = vpop.xlane.xlu0 %4933  ;;  %9282 = vpow2.f32 %v4971_v28 }
 0xd70   : > { %v4953_v3 = vsub.f32 %v11586_v7, %v4934_v9  ;;  %9284 = vpow2.f32 %v4985_v60 }
 0xd71   : > { %9286 = vpow2.f32 %v4977_v53 }
 0xd72   : > { %v4981_v44 = vmul.f32 1.442695, %v4953_v3 }
 0xd74   : > { %9288 = vpow2.f32 %v4981_v44 }
 0xd75   : > { %9290 = vpow2.f32 %v4973_v0 }
 0xd76   : > { %9292 = vpow2.f32 %v4979_v33 }
 0xd78   : > { %v11641_v61 = vpop.eup %9280 }
 0xd79   : > { %v11646_v7 = vpop.eup %9282 }
 0xd7a   : > { %v11649_v36 = vpop.eup %9284 }
 0xd7b   : > { %v11653_v29 = vpop.eup %9286 }
 0xd7e   : > { %v11656_v6 = vpop.eup %9288 }
 0xd7f   : > { %v11659_v23 = vpop.eup %9290 }
 0xd80   : > { %v11662_v15 = vpop.eup %9292 }
 0xd8e   : > { %5001 = vadd.xlane.f32.xlu0 %v11635_v38 }
 0xd90   : > { %4997 = vadd.xlane.f32.xlu1 %v11638_v22  ;;  %v4940_v28 = vpop.xlane.xlu1 %4939 }
 0xd91   : > { %v4956_v58 = vsub.f32 %v11595_v47, %v4940_v28 }
 0xd92   : > { %4999 = vadd.xlane.f32.xlu0 %v11641_v61 }
 0xd93   : > { %v4987_v56 = vmul.f32 1.442695, %v4956_v58 }
 0xd94   : > { %5003 = vadd.xlane.f32.xlu1 %v11646_v7  ;;  %v4936_v13 = vpop.xlane.xlu1 %4935 }
 0xd95   : > { %9294 = vpow2.f32 %v4987_v56  ;;  %v4954_v17 = vsub.f32 %v11600_v30, %v4936_v13 }
 0xd96   : > { %5017 = vadd.xlane.f32.xlu0 %v11649_v36  ;;  %9296 = vpow2.f32 %v4975_v4 }
 0xd97   : > { %v4983_v47 = vmul.f32 1.442695, %v4954_v17 }
 0xd98   : > { %5009 = vadd.xlane.f32.xlu1 %v11653_v29 }
 0xd99   : > { %9298 = vpow2.f32 %v4983_v47 }
 0xd9a   : > { %5013 = vadd.xlane.f32.xlu0 %v11656_v6 }
 0xd9c   : > { %5005 = vadd.xlane.f32.xlu1 %v11659_v23 }
 0xd9f   : > { %v11664_v30 = vpop.eup %9294 }
 0xda0   : > { %5011 = vadd.xlane.f32.xlu1 %v11662_v15  ;;  %5019 = vadd.xlane.f32.xlu0 %v11664_v30  ;;  %v11668_v26 = vpop.eup %9296 }
 0xda3   : > { %v11671_v1 = vpop.eup %9298 }
 0xda4   : > { %5007 = vadd.xlane.f32.xlu1 %v11668_v26 }
 0xda8   : > { %5015 = vadd.xlane.f32.xlu1 %v11671_v1 }
 0xdb6   : > { %5202 = vrot.lane.b32.xlu0 %v12843_v25, %s9564_s21  ;;  %v5195_v25 = vpop.permute.xlu0 %5194 }
 0xdb9   : > { %5204 = vrot.lane.b32.xlu1 %v12846_v54, %s9564_s21 }
 0xdba   : > { %5166 = vrot.lane.b32.xlu0 %v12849_v16, %s9564_s21 }
 0xdbd   : > { %5168 = vrot.lane.b32.xlu1 %v12851_v34, %s9564_s21 }
 0xdbe   : > { %5170 = vrot.lane.b32.xlu0 %v12853_v32, %s9564_s21 }
 0xdc1   : > { %5172 = vrot.lane.b32.xlu1 %v12855_v49, %s9564_s21 }
 0xdc2   : > { %5174 = vrot.lane.b32.xlu0 %v12856_v50, %s9564_s21 }
 0xdc5   : > { %5176 = vrot.lane.b32.xlu1 %v12858_v59, %s9564_s21 }
 0xdc6   : > { %5178 = vrot.lane.b32.xlu0 %v12860_v43, %s9564_s21 }
 0xdc9   : > { %5180 = vrot.lane.b32.xlu1 %v12862_v45, %s9564_s21 }
 0xdca   : > { %5543 = vrot.lane.b32.xlu0 %v12781_v18, %s9564_s21 }
 0xdcd   : > { %5545 = vrot.lane.b32.xlu1 %v12785_v63, %s9564_s21 }
 0xdce   : > { %5547 = vrot.lane.b32.xlu0 %v12786_v24, %s9564_s21 }
 0xdd2   : > { %5549 = vrot.lane.b32.xlu0 %v12789_v8, %s9564_s21 }
 0xde2   : > { %v4994_v54 = vpop.xlane.xlu0 %4993 }
 0xde4   : > { %v4996_v16 = vpop.xlane.xlu1 %4995 }
 0xde5   : > { %9300 = vrcp.f32 %v4996_v16 }
 0xde6   : > { %v4990_v34 = vpop.xlane.xlu0 %4989 }
 0xde7   : > { %9302 = vrcp.f32 %v4990_v34 }
 0xde8   : > { %9304 = vrcp.f32 %v4994_v54  ;;  %v4992_v32 = vpop.xlane.xlu1 %4991 }
 0xde9   : > { %9306 = vrcp.f32 %v4992_v32 }
 0xdea   : > { %v5199_v42 = vpop.permute.xlu0 %5198 }
 0xdec   : > { %v5201_v9 = vpop.permute.xlu1 %5200 }
 0xdef   : > { %v9301_v49 = vpop.eup %9300 }
 0xdf0   : > { %v5040_v63 = vmul.f32 %v9301_v49, %v11612_v11  ;;  %v5234_v11 = vsel %vm12889_vm11, %v11603_v51, 0  ;;  %vm12896_vm11 = vmmov %vm12890_vm0 }
 0xdf1   : > { %v9303_v18 = vpop.eup %9302 }
 0xdf2   : > { %v9305_v50 = vpop.eup %9304  ;;  %v5037_v24 = vmul.f32 %v9303_v18, %v11615_v19  ;;  %v5237_v19 = vsel %vm12891_vm13, %v5195_v25, 0  ;;  %vm12897_vm13 = vmmov %vm12890_vm0 }
 0xdf3   : > { %v9307_v59 = vpop.eup %9306  ;;  %v5039_v8 = vmul.f32 %v9305_v50, %v11609_v52  ;;  %v5240_v52 = vsel %vm12893_vm14, %v11633_v37, 0  ;;  %v5246_v53 = vsel %vm12897_vm13, %v5201_v9, 0  ;;  %vm12898_vm14 = vmmov %vm12890_vm0 }
 0xdf4   : > { %v5038_v43 = vmul.f32 %v9307_v59, %v11618_v41  ;;  %vm12903_vm13 = vmmov %vm12890_vm0 }
 0xdf5   : > { %v5054_v35 = vpack.c.bf16 %v5040_v63, %v5039_v8 }
 0xdf6   : > { %v5053_v45 = vpack.c.bf16 %v5038_v43, %v5037_v24 }
 0xdf8   : > { %8035 = vmatprep.mubr.bf16.mxu1 %v5053_v45 }
 0xdf9   : > { %8036 = vmatmul.mubr.bf16.vlgmr.msra.gmra.mrb[176].mxu1 %v5054_v35 }
 0xdfa   : > { %8052 = vmatpush3.bf16.xpose.msra.mxu1 %v5231_v14 }
 0xdfb   : > { %8396 = vmatprep.subr.msk.bf16.mxu1 %vm12888_vm15, %v11603_v51  ;;  %vm12895_vm15 = vmmov %vm12890_vm0 }
 0xdfc   : > { %v5243_v41 = vsel %vm12895_vm15, %v5199_v42, 0  ;;  %vm12901_vm15 = vmmov %vm12890_vm0 }
 0xe02   : > { %8054 = vmatpush3.bf16.xpose.msra.mxu1 %v5234_v11 }
 0xe03   : > { %8397 = vmatprep.subr.msk.bf16.mxu1 %vm12890_vm0, %v5195_v25 }
 0xe0a   : > { %8056 = vmatpush3.bf16.xpose.msra.mxu1 %v5237_v19 }
 0xe0b   : > { %8398 = vmatprep.subr.msk.bf16.mxu1 %vm12892_vm12, %v11633_v37  ;;  %vm12899_vm12 = vmmov %vm12890_vm0 }
 0xe12   : > { %8058 = vmatpush3.bf16.xpose.msra.mxu1 %v5240_v52 }
 0xe13   : > { %8399 = vmatprep.subr.msk.bf16.mxu1 %vm12894_vm9, %v5199_v42  ;;  %vm12900_vm9 = vmmov %vm12890_vm0 }
 0xe1a   : > { %8060 = vmatpush3.bf16.xpose.msra.mxu1 %v5243_v41 }
 0xe1b   : > { %8400 = vmatprep.subr.msk.bf16.mxu1 %vm12896_vm11, %v5201_v9  ;;  %v5002_v51 = vpop.xlane.xlu0 %5001  ;;  %vm12902_vm11 = vmmov %vm12890_vm0 }
 0xe1d   : > { %v4998_v60 = vpop.xlane.xlu1 %4997 }
 0xe1e   : > { %9308 = vrcp.f32 %v4998_v60 }
 0xe1f   : > { %9310 = vrcp.f32 %v5002_v51  ;;  %v5000_v3 = vpop.xlane.xlu0 %4999 }
 0xe20   : > { %9312 = vrcp.f32 %v5000_v3 }
 0xe21   : > { %v5004_v2 = vpop.xlane.xlu1 %5003 }
 0xe22   : > { %8062 = vmatpush3.bf16.xpose.msra.mxu1 %v5246_v53  ;;  %9314 = vrcp.f32 %v5004_v2 }
 0xe23   : > { %v5018_v44 = vpop.xlane.xlu0 %5017 }
 0xe25   : > { %v5010_v46 = vpop.xlane.xlu1 %5009 }
 0xe27   : > { %v5014_v33 = vpop.xlane.xlu0 %5013 }
 0xe28   : > { %v9309_v37 = vpop.eup %9308 }
 0xe29   : > { %v9311_v0 = vpop.eup %9310  ;;  %v5006_v28 = vpop.xlane.xlu1 %5005  ;;  %v5041_v58 = vmul.f32 %v9309_v37, %v11638_v22 }
 0xe2a   : > { %v9313_v27 = vpop.eup %9312  ;;  %v5043_v25 = vmul.f32 %v9311_v0, %v11635_v38 }
 0xe2b   : > { %v5042_v56 = vmul.f32 %v9313_v27, %v11641_v61 }
 0xe2c   : > { %v9315_v13 = vpop.eup %9314 }
 0xe2d   : > { %v5020_v4 = vpop.xlane.xlu0 %5019  ;;  %v5012_v17 = vpop.xlane.xlu1 %5011  ;;  %v5055_v47 = vpack.c.bf16 %v5042_v56, %v5041_v58  ;;  %v5044_v54 = vmul.f32 %v9315_v13, %v11646_v7 }
 0xe2e   : > { %9316 = vrcp.f32 %v5012_v17 }
 0xe2f   : > { %8039 = vmatprep.mubr.bf16.mxu1 %v5055_v47  ;;  %v5056_v16 = vpack.c.bf16 %v5044_v54, %v5043_v25  ;;  %9318 = vrcp.f32 %v5006_v28 }
 0xe30   : > { %9320 = vrcp.f32 %v5010_v46 }
 0xe31   : > { %v5203_v34 = vpop.permute.xlu0 %5202  ;;  %8040 = vmatmul.mubr.bf16.gmra.mrb[180].mxu1 %v5056_v16  ;;  %v5008_v32 = vpop.xlane.xlu1 %5007 }
 0xe32   : > { %v5249_v22 = vsel %vm12898_vm14, %v5203_v34, 0  ;;  %9322 = vrcp.f32 %v5008_v32  ;;  %8401 = vmatprep.subr.msk.bf16.mxu1 %vm12899_vm12, %v5203_v34  ;;  %vm12904_vm14 = vmmov %vm12890_vm0 }
 0xe33   : > { %8064 = vmatpush3.bf16.xpose.msra.mxu1 %v5249_v22  ;;  %9324 = vrcp.f32 %v5014_v33  ;;  %vm12905_vm12 = vmmov %vm12890_vm0 }
 0xe35   : > { %v5167_v61 = vpop.permute.xlu0 %5166  ;;  %v5016_v49 = vpop.xlane.xlu1 %5015 }
 0xe36   : > { %9326 = vrcp.f32 %v5016_v49 }
 0xe37   : > { %9328 = vrcp.f32 %v5020_v4 }
 0xe38   : > { %v9317_v38 = vpop.eup %9316  ;;  %9330 = vrcp.f32 %v5018_v44 }
 0xe39   : > { %v5171_v7 = vpop.permute.xlu0 %5170  ;;  %v5205_v18 = vpop.permute.xlu1 %5204  ;;  %v5048_v43 = vmul.f32 %v9317_v38, %v11662_v15 }
 0xe3a   : > { %v9319_v50 = vpop.eup %9318  ;;  %v5252_v59 = vsel %vm12890_vm0, %v5205_v18, 0  ;;  %8402 = vmatprep.subr.msk.bf16.mxu1 %vm12900_vm9, %v5205_v18  ;;  %vm12906_vm9 = vmmov %vm12890_vm0 }
 0xe3b   : > { %v9321_v63 = vpop.eup %9320  ;;  %8066 = vmatpush3.bf16.xpose.msra.mxu1 %v5252_v59  ;;  %v5045_v35 = vmul.f32 %v9319_v50, %v11659_v23 }
 0xe3c   : > { %v9323_v24 = vpop.eup %9322  ;;  %v5047_v19 = vmul.f32 %v9321_v63, %v11653_v29 }
 0xe3d   : > { %v5175_v8 = vpop.permute.xlu0 %5174  ;;  %v5169_v45 = vpop.permute.xlu1 %5168  ;;  %v5046_v14 = vmul.f32 %v9323_v24, %v11668_v26 }
 0xe3e   : > { %v9325_v11 = vpop.eup %9324  ;;  %v5058_v41 = vpack.c.bf16 %v5048_v43, %v5047_v19 }
 0xe3f   : > { %v5057_v52 = vpack.c.bf16 %v5046_v14, %v5045_v35  ;;  %v5049_v3 = vmul.f32 %v9325_v11, %v11656_v6 }
 0xe40   : > { %v9327_v42 = vpop.eup %9326 }
 0xe41   : > { %v9329_v9 = vpop.eup %9328  ;;  %v5179_v51 = vpop.permute.xlu0 %5178  ;;  %8043 = vmatprep.mubr.bf16.mxu1 %v5057_v52  ;;  %v5050_v15 = vmul.f32 %v9327_v42, %v11671_v1 }
 0xe42   : > { %v5173_v60 = vpop.permute.xlu1 %5172  ;;  %8044 = vmatmul.mubr.bf16.gmra.mrb[184].mxu1 %v5058_v41  ;;  %v9331_v53 = vpop.eup %9330  ;;  %v5052_v23 = vmul.f32 %v9329_v9, %v11664_v30 }
 0xe43   : > { %v5059_v2 = vpack.c.bf16 %v5050_v15, %v5049_v3  ;;  %v5051_v29 = vmul.f32 %v9331_v53, %v11649_v36 }
 0xe45   : > { %v5544_v26 = vpop.permute.xlu0 %5543  ;;  %8047 = vmatprep.mubr.bf16.mxu1 %v5059_v2  ;;  %v5060_v46 = vpack.c.bf16 %v5052_v23, %v5051_v29 }
 0xe46   : > { %v5177_v44 = vpop.permute.xlu1 %5176  ;;  %8083 = vmatprep.subr.bf16.mxu0 %v5544_v26 }
 0xe47   : > { %8084 = vmatpush3.bf16.msra.mxu0 %v5544_v26 }
 0xe49   : > { %v5548_v6 = vpop.permute.xlu0 %5547 }
 0xe4a   : > { %v5181_v37 = vpop.permute.xlu1 %5180  ;;  %8048 = vmatmul.mubr.bf16.gmra.mrb[188].mxu1 %v5060_v46 }
 0xe4b   : > { %8067 = vmatprep.mubr.msk.bf16.mxu1 %vm12901_vm15, %v5167_v61  ;;  %vm12907_vm15 = vmmov %vm12890_vm0 }
 0xe4d   : > { %v5550_v30 = vpop.permute.xlu0 %5549 }
 0xe4e   : > { %v5546_v0 = vpop.permute.xlu1 %5545 }
 0xe4f   : > { %8085 = vmatprep.subr.bf16.mxu0 %v5546_v0 }
 0xe50   : > { %8086 = vmatpush3.bf16.msra.mxu0 %v5546_v0 }
 0xe51   : > { %8087 = vmatprep.subr.bf16.mxu0 %v5548_v6 }
 0xe52   : > { %8068 = vmatmul.mubr.msk.bf16.vlgmr.msra.gmra.mrb[192].mxu1 %vm12902_vm11, %v5169_v45  ;;  %vm12976_vm11 = vmmov %vm12890_vm0 }
 0xe53   : > { %8071 = vmatprep.mubr.msk.bf16.mxu1 %vm12903_vm13, %v5171_v7  ;;  %vm12978_vm13 = vmmov %vm12890_vm0 }
 0xe54   : > { %8088 = vmatpush3.bf16.msra.mxu0 %v5548_v6 }
 0xe55   : > { %8089 = vmatprep.subr.bf16.mxu0 %v5550_v30 }
 0xe58   : > { %8090 = vmatpush3.bf16.msra.mxu0 %v5550_v30  ;;  %v12915_v30 = vld [vmem:[#allocation56_spill] sm:$0xff] }
 0xe5a   : > { %8072 = vmatmul.mubr.msk.bf16.gmra.mrb[196].mxu1 %vm12904_vm14, %v5173_v60  ;;  %vm12980_vm14 = vmmov %vm12890_vm0 }
 0xe5b   : > { %8075 = vmatprep.mubr.msk.bf16.mxu1 %vm12905_vm12, %v5175_v8  ;;  %vm12982_vm12 = vmmov %vm12890_vm0 }
 0xe62   : > { %8076 = vmatmul.mubr.msk.bf16.gmra.mrb[200].mxu1 %vm12890_vm0, %v5177_v44 }
 0xe63   : > { %8079 = vmatprep.mubr.msk.bf16.mxu1 %vm12906_vm9, %v5179_v51  ;;  %vm12985_vm9 = vmmov %vm12890_vm0 }
 0xe6a   : > { %8080 = vmatmul.mubr.msk.bf16.gmra.mrb[204].mxu1 %vm12907_vm15, %v5181_v37  ;;  %v12911_v37 = vld [vmem:[#allocation68_spill] sm:$0xff]  ;;  %vm12987_vm15 = vmmov %vm12890_vm0 }
 0xecc   : > { %v11746_v36 = vpop.f32.mrb[176].mxu1 }
 0xecd   : > { %v11748_v1 = vpop.f32.mrb[177].mxu1 }
 0xece   : > { %v11750_v33 = vpop.f32.mrb[178].mxu1 }
 0xecf   : > { %v11752_v28 = vpop.f32.mrb[179].mxu1 }
 0xf04   : > { %v11754_v27 = vpop.f32.mrb[180].mxu1 }
 0xf05   : > { %v11756_v58 = vpop.f32.mrb[181].mxu1 }
 0xf06   : > { %v11758_v56 = vpop.f32.mrb[182].mxu1 }
 0xf07   : > { %v11760_v13 = vpop.f32.mrb[183].mxu1 }
 0xf15   : > { %v11762_v4 = vpop.f32.mrb[184].mxu1 }
 0xf16   : > { %v11764_v17 = vpop.f32.mrb[185].mxu1 }
 0xf17   : > { %v11766_v47 = vpop.f32.mrb[186].mxu1 }
 0xf18   : > { %v11768_v25 = vpop.f32.mrb[187].mxu1 }
 0xf1d   : > { %v11770_v54 = vpop.f32.mrb[188].mxu1 }
 0xf1e   : > { %v11772_v16 = vpop.f32.mrb[189].mxu1 }
 0xf1f   : > { %v11774_v34 = vpop.f32.mrb[190].mxu1 }
 0xf20   : > { %v11776_v32 = vpop.f32.mrb[191].mxu1 }
 0xf25   : > { %v8069_v22 = vpop.f32.mrb[192].mxu1 }
 0xf26   : > { %v5353_v61 = vmul.f32 0.05103104, %v8069_v22  ;;  %v5288_v49 = vpop.f32.mrb[193].mxu1 }
 0xf27   : > { %v8070_v38 = vpop.f32.mrb[194].mxu1  ;;  %v5351_v7 = vmul.f32 0.05103104, %v5288_v49  ;;  %v12917_v49 = vld [vmem:[#allocation70_spill] sm:$0xff] }
 0xf28   : > { %v5291_v18 = vpop.f32.mrb[195].mxu1  ;;  %v5369_v50 = vsel %vm10352_vm1, %v5353_v61, -inf  ;;  %v5354_v24 = vmul.f32 0.05103104, %v8070_v38  ;;  %vm12908_vm1 = vnez %v12689_v39 }
 0xf29   : > { %v5352_v59 = vmul.f32 0.05103104, %v5291_v18  ;;  %5387 = vmax.xlane.f32.xlu0 %v5369_v50  ;;  %v5367_v43 = vsel %vm10359_vm2, %v5351_v7, -inf  ;;  %vm12909_vm2 = vnez %v12691_v40  ;;  %v12913_v40 = vld [vmem:[#allocation69_spill] sm:$0xff]  ;;  %v12919_v7 = vld [vmem:[#allocation71_spill] sm:$0xff] }
 0xf2a   : > { %v5370_v19 = vsel %vm10374_vm3, %v5354_v24, -inf  ;;  %vm12910_vm3 = vnez %v12693_v55  ;;  %v12916_v55 = vld [vmem:[#allocation57_spill] sm:$0xff] }
 0xf2b   : > { %v11782_v63 = vsel %vm10381_vm4, %v5352_v59, -inf  ;;  %vm12912_vm4 = vnez %v12911_v37 }
 0xf2c   : > { %5385 = vmax.xlane.f32.xlu1 %v11782_v63 }
 0xf2d   : > { %5383 = vmax.xlane.f32.xlu0 %v5367_v43  ;;  %v8073_v8 = vpop.f32.mrb[196].mxu1 }
 0xf2e   : > { %v5304_v45 = vpop.f32.mrb[197].mxu1  ;;  %v5357_v14 = vmul.f32 0.05103104, %v8073_v8 }
 0xf2f   : > { %v8074_v35 = vpop.f32.mrb[198].mxu1  ;;  %v5355_v20 = vmul.f32 0.05103104, %v5304_v45 }
 0xf30   : > { %v5358_v11 = vmul.f32 0.05103104, %v8074_v35  ;;  %v5307_v31 = vpop.f32.mrb[199].mxu1  ;;  %v5373_v42 = vsel %vm10396_vm5, %v5357_v14, -inf  ;;  %vm12914_vm5 = vnez %v12913_v40 }
 0xf31   : > { %5389 = vmax.xlane.f32.xlu0 %v5370_v19  ;;  %v5356_v10 = vmul.f32 0.05103104, %v5307_v31  ;;  %v5371_v15 = vsel %vm10419_vm7, %v5355_v20, -inf  ;;  %vm12920_vm7 = vnez %v12919_v7 }
 0xf32   : > { %v11791_v52 = vsel %vm10403_vm6, %v5358_v11, -inf  ;;  %vm12918_vm6 = vnez %v12917_v49 }
 0xf33   : > { %5397 = vmax.xlane.f32.xlu1 %v11791_v52  ;;  %v11798_v51 = vsel %vm10425_vm8, %v5356_v10, -inf  ;;  %vm12972_vm8 = vmmov %vm12890_vm0 }
 0xf35   : > { %5395 = vmax.xlane.f32.xlu0 %v5373_v42  ;;  %v8077_v41 = vpop.f32.mrb[200].mxu1 }
 0xf36   : > { %v5320_v9 = vpop.f32.mrb[201].mxu1  ;;  %v5361_v60 = vmul.f32 0.05103104, %v8077_v41 }
 0xf37   : > { %5393 = vmax.xlane.f32.xlu1 %v11798_v51  ;;  %v8078_v62 = vpop.f32.mrb[202].mxu1  ;;  %v5359_v21 = vmul.f32 0.05103104, %v5320_v9 }
 0xf38   : > { %v5362_v12 = vmul.f32 0.05103104, %v8078_v62  ;;  %v5323_v3 = vpop.f32.mrb[203].mxu1  ;;  %v11810_v2 = vsel %vm12908_vm1, %v5361_v60, -inf  ;;  %vm12989_vm1 = vmmov %vm12890_vm0 }
 0xf39   : > { %5391 = vmax.xlane.f32.xlu0 %v5371_v15  ;;  %v5360_v53 = vmul.f32 0.05103104, %v5323_v3  ;;  %v11820_v46 = vsel %vm12910_vm3, %v5359_v21, -inf  ;;  %vm12993_vm3 = vmmov %vm12890_vm0 }
 0xf3a   : > { %v11805_v5 = vsel %vm12880_vm10, %v5362_v12, -inf  ;;  %vm12974_vm10 = vmmov %vm12890_vm0 }
 0xf3b   : > { %5405 = vmax.xlane.f32.xlu1 %v11805_v5  ;;  %v11815_v57 = vsel %vm12909_vm2, %v5360_v53, -inf  ;;  %vm12991_vm2 = vmmov %vm12890_vm0 }
 0xf3d   : > { %5403 = vmax.xlane.f32.xlu0 %v11810_v2  ;;  %v8081_v23 = vpop.f32.mrb[204].mxu1 }
 0xf3e   : > { %v5336_v26 = vpop.f32.mrb[205].mxu1  ;;  %v5365_v44 = vmul.f32 0.05103104, %v8081_v23 }
 0xf3f   : > { %5401 = vmax.xlane.f32.xlu1 %v11815_v57  ;;  %v8082_v48 = vpop.f32.mrb[206].mxu1  ;;  %v5363_v39 = vmul.f32 0.05103104, %v5336_v26 }
 0xf40   : > { %v5339_v29 = vpop.f32.mrb[207].mxu1  ;;  %v11825_v6 = vsel %vm12912_vm4, %v5365_v44, -inf  ;;  %v5366_v22 = vmul.f32 0.05103104, %v8082_v48  ;;  %vm12995_vm4 = vmmov %vm12890_vm0 }
 0xf41   : > { %5399 = vmax.xlane.f32.xlu0 %v11820_v46  ;;  %v11830_v0 = vsel %vm12914_vm5, %v5363_v39, -inf  ;;  %v5364_v61 = vmul.f32 0.05103104, %v5339_v29  ;;  %vm12997_vm5 = vmmov %vm12890_vm0 }
 0xf42   : > { %v11839_v38 = vsel %vm12918_vm6, %v5366_v22, -inf  ;;  %vm12999_vm6 = vmmov %vm12890_vm0 }
 0xf43   : > { %v11844_v18 = vsel %vm12920_vm7, %v5364_v61, -inf  ;;  %vm13001_vm7 = vmmov %vm12890_vm0 }
 0xf45   : > { %5411 = vmax.xlane.f32.xlu0 %v11825_v6 }
 0xf49   : > { %5407 = vmax.xlane.f32.xlu0 %v11830_v0 }
 0xf50   : > { %5553 = vrot.lane.b32.xlu1 %v12915_v30, %s9564_s21 }
 0xf5f   : > { %5551 = vrot.lane.b32.xlu0 %v12916_v55, %s9564_s21 }
 0xf74   : > { %5413 = vmax.xlane.f32.xlu1 %v11839_v38 }
 0xf78   : > { %5409 = vmax.xlane.f32.xlu1 %v11844_v18 }
 0xfb6   : > { %v5388_v59 = vpop.xlane.xlu0 %5387 }
 0xfb7   : > { %v5417_v24 = vsub.f32 %v5369_v50, %v5388_v59  ;;  %v12921_v59 = vld [vmem:[#allocation58_spill] sm:$0xff] }
 0xfb9   : > { %v5435_v8 = vmul.f32 1.442695, %v5417_v24  ;;  %v5386_v35 = vpop.xlane.xlu1 %5385  ;;  %v12922_v24 = vld [vmem:[#allocation59_spill] sm:$0xff] }
 0xfba   : > { %v5384_v45 = vpop.xlane.xlu0 %5383  ;;  %v5416_v31 = vsub.f32 %v11782_v63, %v5386_v35 }
 0xfbb   : > { %9332 = vpow2.f32 %v5435_v8  ;;  %v5415_v14 = vsub.f32 %v5367_v43, %v5384_v45 }
 0xfbc   : > { %v5433_v62 = vmul.f32 1.442695, %v5416_v31 }
 0xfbd   : > { %v5431_v11 = vmul.f32 1.442695, %v5415_v14 }
 0xfbe   : > { %v5390_v10 = vpop.xlane.xlu0 %5389 }
 0xfbf   : > { %9334 = vpow2.f32 %v5431_v11  ;;  %v5418_v20 = vsub.f32 %v5370_v19, %v5390_v10 }
 0xfc0   : > { %v5398_v41 = vpop.xlane.xlu1 %5397 }
 0xfc1   : > { %v5437_v9 = vmul.f32 1.442695, %v5418_v20  ;;  %v5422_v60 = vsub.f32 %v11791_v52, %v5398_v41 }
 0xfc2   : > { %v5396_v12 = vpop.xlane.xlu0 %5395 }
 0xfc3   : > { %9336 = vpow2.f32 %v5437_v9  ;;  %v5421_v3 = vsub.f32 %v5373_v42, %v5396_v12  ;;  %v5445_v43 = vmul.f32 1.442695, %v5422_v60 }
 0xfc4   : > { %v5394_v50 = vpop.xlane.xlu1 %5393  ;;  %9338 = vpow2.f32 %v5433_v62 }
 0xfc5   : > { %v11849_v53 = vpop.eup %9332  ;;  %v5443_v21 = vmul.f32 1.442695, %v5421_v3  ;;  %v5420_v63 = vsub.f32 %v11798_v51, %v5394_v50 }
 0xfc6   : > { %v5392_v23 = vpop.xlane.xlu0 %5391  ;;  %5467 = vadd.xlane.f32.xlu1 %v11849_v53 }
 0xfc7   : > { %9340 = vpow2.f32 %v5443_v21  ;;  %v5419_v19 = vsub.f32 %v5371_v15, %v5392_v23  ;;  %v5441_v42 = vmul.f32 1.442695, %v5420_v63  ;;  %v11907_v23 = vld [vmem:[#allocation7 + $0xc8] ss:$12 sps:$4 sm:$0xff]  }
 0xfc8   : > { %9342 = vpow2.f32 %v5445_v43  ;;  %v5406_v37 = vpop.xlane.xlu1 %5405  ;;  %8147 = vmatprep.subr.bf16.mxu1 %v11907_v23 }
 0xfc9   : > { %v11853_v26 = vpop.eup %9334  ;;  %v5439_v48 = vmul.f32 1.442695, %v5419_v19  ;;  %v5426_v45 = vsub.f32 %v11805_v5, %v5406_v37  ;;  %v11913_v19 = vld [vmem:[#allocation7 + $0x8] ss:$12 sps:$4 sm:$0xff]   ;;  %v11928_v37 = vld [vmem:[#allocation7 + $0x110] ss:$12 sps:$4 sm:$0xff]  }
 0xfca   : > { %v5404_v52 = vpop.xlane.xlu0 %5403  ;;  %5463 = vadd.xlane.f32.xlu1 %v11853_v26  ;;  %8155 = vmatpush3.bf16.msra.mxu1 %v11913_v19 }
 0xfcb   : > { %9344 = vpow2.f32 %v5439_v48  ;;  %v5453_v11 = vmul.f32 1.442695, %v5426_v45  ;;  %v5425_v31 = vsub.f32 %v11810_v2, %v5404_v52  ;;  %v11916_v48 = vld [vmem:[#allocation7 + $0xe0] ss:$12 sps:$4 sm:$0xff]  }
 0xfcc   : > { %9346 = vpow2.f32 %v5441_v42  ;;  %v5402_v55 = vpop.xlane.xlu1 %5401  ;;  %8148 = vmatprep.subr.bf16.mxu1 %v11916_v48  ;;  %v11919_v52 = vld [vmem:[#allocation7 + $0x20] ss:$12 sps:$4 sm:$0xff]   ;;  %v11922_v42 = vld [vmem:[#allocation7 + $0xf8] ss:$12 sps:$4 sm:$0xff]  }
 0xfcd   : > { %v11856_v44 = vpop.eup %9336  ;;  %v5424_v35 = vsub.f32 %v11815_v57, %v5402_v55  ;;  %v5451_v41 = vmul.f32 1.442695, %v5425_v31  ;;  %v12923_v55 = vld [vmem:[#allocation65_spill] sm:$0xff] }
 0xfce   : > { %v5400_v29 = vpop.xlane.xlu0 %5399  ;;  %5469 = vadd.xlane.f32.xlu1 %v11856_v44  ;;  %v11859_v39 = vpop.eup %9338  ;;  %8156 = vmatpush3.bf16.msra.mxu1 %v11919_v52  ;;  %v12930_v31 = vld [vmem:[#allocation45_spill] sm:$0xff] }
 0xfcf   : > { %v5423_v8 = vsub.f32 %v11820_v46, %v5400_v29  ;;  %v5449_v10 = vmul.f32 1.442695, %v5424_v35  ;;  %v11924_v29 = vld [vmem:[#allocation7 + $0x38] ss:$12 sps:$4 sm:$0xff]   ;;  %8149 = vmatprep.subr.bf16.mxu1 %v11922_v42  ;;  %v11948_v35 = vld [vmem:[#allocation7 + $0x140] ss:$12 sps:$4 sm:$0xff]  }
 0xfd0   : > { %v5554_v7 = vpop.permute.xlu1 %5553 }
 0xfd1   : > { %v11861_v51 = vpop.eup %9340  ;;  %v5447_v14 = vmul.f32 1.442695, %v5423_v8  ;;  %v12927_v8 = vld [vmem:[#allocation47_spill] sm:$0xff] }
 0xfd2   : > { %v5412_v15 = vpop.xlane.xlu0 %5411  ;;  %5475 = vadd.xlane.f32.xlu0 %v11861_v51  ;;  %5465 = vadd.xlane.f32.xlu1 %v11859_v39  ;;  %v11865_v40 = vpop.eup %9342 }
 0xfd3   : > { %9348 = vpow2.f32 %v5447_v14  ;;  %v5429_v5 = vsub.f32 %v11825_v6, %v5412_v15  ;;  %8157 = vmatpush3.bf16.msra.mxu1 %v11924_v29  ;;  %v11930_v15 = vld [vmem:[#allocation7 + $0x50] ss:$12 sps:$4 sm:$0xff]   ;;  %v11950_v14 = vld [vmem:[#allocation7 + $0x80] ss:$12 sps:$4 sm:$0xff]  }
 0xfd4   : > { %9350 = vpow2.f32 %v5453_v11  ;;  %8150 = vmatprep.subr.bf16.mxu1 %v11928_v37  ;;  %v12929_v11 = vld [vmem:[#allocation49_spill] sm:$0xff] }
 0xfd5   : > { %v11867_v30 = vpop.eup %9344  ;;  %9352 = vpow2.f32 %v5449_v10  ;;  %v5459_v50 = vmul.f32 1.442695, %v5429_v5  ;;  %v12931_v10 = vpack.i.bf16 %v12929_v11, %v12930_v31  ;;  %v12936_v5 = vld [vmem:[#allocation26_spill] sm:$0xff]  ;;  %v12945_v11 = vld [vmem:[#allocation64_spill] sm:$0xff] }
 0xfd6   : > { %v5408_v22 = vpop.xlane.xlu0 %5407  ;;  %5471 = vadd.xlane.f32.xlu1 %v11867_v30  ;;  %5477 = vadd.xlane.f32.xlu0 %v11865_v40  ;;  %v11871_v61 = vpop.eup %9346  ;;  %9354 = vpow2.f32 %v5451_v41  ;;  %v12933_v41 = vld [vmem:[#allocation61_spill] sm:$0xff] }
 0xfd7   : > { %v5427_v9 = vsub.f32 %v11830_v0, %v5408_v22  ;;  %v12924_v22 = vld [vmem:[#allocation63_spill] sm:$0xff]  ;;  %8158 = vmatpush3.bf16.msra.mxu1 %v11930_v15 }
 0xfd9   : > { %v5455_v57 = vmul.f32 1.442695, %v5427_v9 }
 0xfda   : > { %v5552_v49 = vpop.permute.xlu0 %5551  ;;  %5473 = vadd.xlane.f32.xlu0 %v11871_v61 }
 0xfdb   : > { %8091 = vmatprep.subr.bf16.mxu0 %v5552_v49 }
 0xfdc   : > { %8092 = vmatpush3.bf16.msra.mxu0 %v5552_v49  ;;  %v12925_v49 = vpack.i.bf16 %v12923_v55, %v12924_v22  ;;  %v11976_v55 = vld [vmem:[#allocation7 + $0x170] ss:$12 sps:$4 sm:$0xff]  }
 0xfdd   : > { %8093 = vmatprep.subr.bf16.mxu0 %v5554_v7  ;;  %v11886_v3 = vpop.eup %9348  ;;  %v11978_v22 = vld [vmem:[#allocation7 + $0xb0] ss:$12 sps:$4 sm:$0xff]  }
 0xfde   : > { %v11889_v21 = vpop.eup %9350 }
 0xfdf   : > { %v11891_v0 = vpop.eup %9352 }
 0xfe0   : > { %8094 = vmatpush3.bf16.msra.mxu0 %v5554_v7  ;;  %v11895_v6 = vpop.eup %9354  ;;  %v11938_v7 = vld [vmem:[#allocation7 + $0x128] ss:$12 sps:$4 sm:$0xff]  }
 0xfe1   : > { %8151 = vmatprep.subr.bf16.mxu1 %v11938_v7 }
 0xfe7   : > { %5557 = vrot.lane.b32.xlu1 %v12921_v59, %s9564_s21  ;;  %v11940_v59 = vld [vmem:[#allocation7 + $0x68] ss:$12 sps:$4 sm:$0xff]  }
 0xfe8   : > { %8159 = vmatpush3.bf16.msra.mxu1 %v11940_v59 }
 0xfe9   : > { %8152 = vmatprep.subr.bf16.mxu1 %v11948_v35 }
 0xfec   : > { %8160 = vmatpush3.bf16.msra.mxu1 %v11950_v14 }
 0xff0   : > { %5555 = vrot.lane.b32.xlu0 %v12922_v24, %s9564_s21  ;;  %v12926_v24 = vld [vmem:[#allocation51_spill] sm:$0xff] }
 0xff1   : > { %v12928_v45 = vpack.i.bf16 %v12926_v24, %v12927_v8  ;;  %v12942_v24 = vld [vmem:[#allocation29_spill] sm:$0xff] }
0x1001   : > { %v5414_v20 = vpop.xlane.xlu1 %5413 }
0x1002   : > { %v5430_v60 = vsub.f32 %v11839_v38, %v5414_v20  ;;  %v12932_v20 = vld [vmem:[#allocation62_spill] sm:$0xff] }
0x1003   : > { %v12934_v9 = vpack.i.bf16 %v12932_v20, %v12933_v41  ;;  %v12948_v20 = vld [vmem:[#allocation39_spill] sm:$0xff] }
0x1004   : > { %v5461_v2 = vmul.f32 1.442695, %v5430_v60  ;;  %v11964_v60 = vld [vmem:[#allocation7 + $0x98] ss:$12 sps:$4 sm:$0xff]  }
0x1005   : > { %v5410_v62 = vpop.xlane.xlu1 %5409 }
0x1006   : > { %v5428_v46 = vsub.f32 %v11844_v18, %v5410_v62  ;;  %v11962_v62 = vld [vmem:[#allocation7 + $0x158] ss:$12 sps:$4 sm:$0xff]  }
0x1007   : > { %8153 = vmatprep.subr.bf16.mxu1 %v11962_v62 }
0x1008   : > { %v5457_v12 = vmul.f32 1.442695, %v5428_v46  ;;  %v12935_v46 = vld [vmem:[#allocation35_spill] sm:$0xff]  ;;  %8161 = vmatpush3.bf16.msra.mxu1 %v11964_v60 }
0x1009   : > { %8154 = vmatprep.subr.bf16.mxu1 %v11976_v55 }
0x100a   : > { %9356 = vpow2.f32 %v5457_v12  ;;  %v12938_v12 = vld [vmem:[#allocation46_spill] sm:$0xff] }
0x100b   : > { %5479 = vadd.xlane.f32.xlu1 %v11886_v3  ;;  %9358 = vpow2.f32 %v5455_v57  ;;  %v12937_v57 = vpack.i.bf16 %v12935_v46, %v12936_v5  ;;  %v12951_v46 = vld [vmem:[#allocation50_spill] sm:$0xff] }
0x100c   : > { %9360 = vpow2.f32 %v5461_v2  ;;  %v12939_v2 = vld [vmem:[#allocation67_spill] sm:$0xff]  ;;  %8162 = vmatpush3.bf16.msra.mxu1 %v11978_v22 }
0x100d   : > { %9362 = vpow2.f32 %v5459_v50  ;;  %v12940_v50 = vpack.i.bf16 %v12938_v12, %v12939_v2  ;;  %v12954_v12 = vld [vmem:[#allocation37_spill] sm:$0xff] }
0x100f   : > { %5485 = vadd.xlane.f32.xlu1 %v11889_v21  ;;  %5481 = vadd.xlane.f32.xlu0 %v11891_v0 }
0x1013   : > { %5483 = vadd.xlane.f32.xlu0 %v11895_v6 }
0x1014   : > { %v11898_v38 = vpop.eup %9356 }
0x1015   : > { %5489 = vadd.xlane.f32.xlu1 %v11898_v38  ;;  %v11901_v18 = vpop.eup %9358 }
0x1016   : > { %v11904_v43 = vpop.eup %9360 }
0x1017   : > { %5487 = vadd.xlane.f32.xlu0 %v11901_v18  ;;  %v11909_v63 = vpop.eup %9362 }
0x1019   : > { %5493 = vadd.xlane.f32.xlu1 %v11904_v43 }
0x101b   : > { %5491 = vadd.xlane.f32.xlu0 %v11909_v63 }
0x102a   : > { %8490 = vrot.lane.b32.xlu1 %v12925_v49, %s9564_s21  ;;  %v12941_v49 = vld [vmem:[#allocation32_spill] sm:$0xff] }
0x102b   : > { %v12943_v8 = vpack.i.bf16 %v12941_v49, %v12942_v24  ;;  %v12957_v49 = vld [vmem:[#allocation44_spill] sm:$0xff] }
0x102e   : > { %8495 = vrot.lane.b32.xlu1 %v12928_v45, %s9564_s21  ;;  %v12944_v45 = vld [vmem:[#allocation66_spill] sm:$0xff] }
0x102f   : > { %v12946_v31 = vpack.i.bf16 %v12944_v45, %v12945_v11  ;;  %v12960_v45 = vld [vmem:[#allocation21_spill] sm:$0xff] }
0x1031   : > { %8485 = vrot.lane.b32.xlu0 %v12931_v10, %s9564_s21  ;;  %v12947_v10 = vld [vmem:[#allocation43_spill] sm:$0xff] }
0x1032   : > { %8500 = vrot.lane.b32.xlu1 %v12934_v9, %s9564_s21  ;;  %v12949_v41 = vpack.i.bf16 %v12947_v10, %v12948_v20  ;;  %v12950_v9 = vld [vmem:[#allocation28_spill] sm:$0xff]  ;;  %v12963_v10 = vld [vmem:[#allocation31_spill] sm:$0xff] }
0x1033   : > { %v12952_v5 = vpack.i.bf16 %v12950_v9, %v12951_v46  ;;  %v12966_v9 = vld [vmem:[#allocation20_spill] sm:$0xff] }
0x1035   : > { %8505 = vrot.lane.b32.xlu0 %v12937_v57, %s9564_s21  ;;  %v12953_v57 = vld [vmem:[#allocation41_spill] sm:$0xff] }
0x1036   : > { %8510 = vrot.lane.b32.xlu1 %v12940_v50, %s9564_s21  ;;  %v12955_v2 = vpack.i.bf16 %v12953_v57, %v12954_v12  ;;  %v12956_v50 = vld [vmem:[#allocation48_spill] sm:$0xff]  ;;  %v12969_v57 = vld [vmem:[#allocation25_spill] sm:$0xff] }
0x1037   : > { %v12958_v24 = vpack.i.bf16 %v12956_v50, %v12957_v49 }
0x1039   : > { %8515 = vrot.lane.b32.xlu0 %v12943_v8, %s9564_s21  ;;  %v12959_v8 = vld [vmem:[#allocation23_spill] sm:$0xff] }
0x103a   : > { %8520 = vrot.lane.b32.xlu1 %v12946_v31, %s9564_s21  ;;  %v12961_v11 = vpack.i.bf16 %v12959_v8, %v12960_v45  ;;  %v12962_v31 = vld [vmem:[#allocation36_spill] sm:$0xff] }
0x103b   : > { %v12964_v20 = vpack.i.bf16 %v12962_v31, %v12963_v10 }
0x103d   : > { %8525 = vrot.lane.b32.xlu0 %v12949_v41, %s9564_s21  ;;  %v12965_v41 = vld [vmem:[#allocation22_spill] sm:$0xff] }
0x103e   : > { %8530 = vrot.lane.b32.xlu1 %v12952_v5, %s9564_s21  ;;  %v12967_v46 = vpack.i.bf16 %v12965_v41, %v12966_v9  ;;  %v12968_v5 = vld [vmem:[#allocation34_spill] sm:$0xff] }
0x103f   : > { %v12970_v12 = vpack.i.bf16 %v12968_v5, %v12969_v57 }
0x1041   : > { %8535 = vrot.lane.b32.xlu0 %v12955_v2, %s9564_s21 }
0x1042   : > { %8540 = vrot.lane.b32.xlu1 %v12958_v24, %s9564_s21 }
0x1045   : > { %8545 = vrot.lane.b32.xlu0 %v12961_v11, %s9564_s21 }
0x1046   : > { %8550 = vrot.lane.b32.xlu1 %v12964_v20, %s9564_s21 }
0x1049   : > { %8555 = vrot.lane.b32.xlu0 %v12967_v46, %s9564_s21 }
0x104a   : > { %8560 = vrot.lane.b32.xlu1 %v12970_v12, %s9564_s21 }
0x1053   : > { %v5468_v2 = vpop.xlane.xlu1 %5467 }
0x1057   : > { %v5464_v50 = vpop.xlane.xlu1 %5463 }
0x1058   : > { %9364 = vrcp.f32 %v5464_v50 }
0x105b   : > { %v5470_v49 = vpop.xlane.xlu1 %5469 }
0x105c   : > { %9366 = vrcp.f32 %v5470_v49  ;;  %v8918_v49 = vld [vmem:[#allocation7 + $0x4] ss:$12 sps:$4 sm:$0xff]  }
0x105f   : > { %v5476_v24 = vpop.xlane.xlu0 %5475  ;;  %v5466_v8 = vpop.xlane.xlu1 %5465 }
0x1060   : > { %9368 = vrcp.f32 %v5466_v8 }
0x1061   : > { %9370 = vrcp.f32 %v5468_v2 }
0x1062   : > { %v9365_v10 = vpop.eup %9364 }
0x1063   : > { %v5478_v45 = vpop.xlane.xlu0 %5477  ;;  %v5472_v11 = vpop.xlane.xlu1 %5471  ;;  %v5511_v46 = vmul.f32 %v9365_v10, %v11853_v26  ;;  %v8921_v26 = vld [vmem:[#allocation7 + $0x1c] ss:$12 sps:$4 sm:$0xff]  }
0x1064   : > { %9372 = vrcp.f32 %v5472_v11 }
0x1066   : > { %v9367_v20 = vpop.eup %9366 }
0x1067   : > { %v5474_v31 = vpop.xlane.xlu0 %5473  ;;  %v5558_v12 = vpop.permute.xlu1 %5557  ;;  %v5514_v2 = vmul.f32 %v9367_v20, %v11856_v44 }
0x1068   : > { %9374 = vrcp.f32 %v5474_v31 }
0x1069   : > { %9376 = vrcp.f32 %v5478_v45 }
0x106a   : > { %v9369_v41 = vpop.eup %9368  ;;  %9378 = vrcp.f32 %v5476_v24  ;;  %v8916_v24 = vld [vmem:[#allocation7] ss:$12 sps:$4 sm:$0xff]  }
0x106b   : > { %v5556_v9 = vpop.permute.xlu0 %5555  ;;  %v5512_v5 = vmul.f32 %v9369_v41, %v11859_v39  ;;  %v9371_v57 = vpop.eup %9370 }
0x106c   : > { %8095 = vmatprep.subr.bf16.mxu0 %v5556_v9  ;;  %v5513_v45 = vmul.f32 %v9371_v57, %v11849_v53  ;;  %v8924_v53 = vld [vmem:[#allocation7 + $0x34] ss:$12 sps:$4 sm:$0xff]   ;;  %v8922_v57 = vld [vmem:[#allocation7 + $0x30] ss:$12 sps:$4 sm:$0xff]  }
0x106d   : > { %8096 = vmatpush3.bf16.msra.mxu0 %v5556_v9  ;;  %v5527_v50 = vpack.c.bf16 %v5512_v5, %v5511_v46  ;;  %v8919_v9 = vld [vmem:[#allocation7 + $0x18] ss:$12 sps:$4 sm:$0xff]  }
0x106e   : > { %8097 = vmatprep.subr.bf16.mxu0 %v5558_v12  ;;  %v9373_v8 = vpop.eup %9372  ;;  %v5528_v31 = vpack.c.bf16 %v5514_v2, %v5513_v45  ;;  %v8927_v2 = vld [vmem:[#allocation7 + $0x4c] ss:$12 sps:$4 sm:$0xff]  }
0x106f   : > { %8099 = vmatprep.mubr.bf16.mxu0 %v5527_v50  ;;  %v5515_v39 = vmul.f32 %v9373_v8, %v11867_v30  ;;  %v8925_v30 = vld [vmem:[#allocation7 + $0x48] ss:$12 sps:$4 sm:$0xff]   ;;  %v8928_v50 = vld [vmem:[#allocation7 + $0x60] ss:$12 sps:$4 sm:$0xff]  }
0x1070   : > { %v8936_v8 = vld [vmem:[#allocation7 + $0x94] ss:$12 sps:$4 sm:$0xff]   ;;  %v8940_v45 = vld [vmem:[#allocation7 + $0xac] ss:$12 sps:$4 sm:$0xff]  }
0x1071   : > { %8098 = vmatpush3.bf16.msra.mxu0 %v5558_v12 }
0x1072   : > { %v9375_v11 = vpop.eup %9374  ;;  %6425 = vmatprep.subr.bf16.mxu0 %v8918_v49  ;;  %v8933_v49 = vld [vmem:[#allocation7 + $0x7c] ss:$12 sps:$4 sm:$0xff]  }
0x1073   : > { %v9377_v10 = vpop.eup %9376  ;;  %v5516_v41 = vmul.f32 %v9375_v11, %v11871_v61  ;;  %v8930_v61 = vld [vmem:[#allocation7 + $0x64] ss:$12 sps:$4 sm:$0xff]  }
0x1074   : > { %8100 = vmatmul.mubr.bf16.vlgmr.msra.gmra.mrb[176].mxu0 %v5528_v31  ;;  %v9379_v44 = vpop.eup %9378  ;;  %v5518_v46 = vmul.f32 %v9377_v10, %v11865_v40  ;;  %v8931_v40 = vld [vmem:[#allocation7 + $0x78] ss:$12 sps:$4 sm:$0xff]   ;;  %v8943_v31 = vld [vmem:[#allocation7 + $0xc0] ss:$12 sps:$4 sm:$0xff]  }
0x1075   : > { %v5529_v20 = vpack.c.bf16 %v5516_v41, %v5515_v39  ;;  %6426 = vmatpush1.bf16.msra.mxu0 %v8916_v24  ;;  %v5517_v5 = vmul.f32 %v9379_v44, %v11861_v51  ;;  %v8934_v51 = vld [vmem:[#allocation7 + $0x90] ss:$12 sps:$4 sm:$0xff]   ;;  %v8938_v24 = vld [vmem:[#allocation7 + $0xa8] ss:$12 sps:$4 sm:$0xff]   ;;  %v8948_v10 = vld [vmem:[#allocation7 + $0xd8] ss:$12 sps:$4 sm:$0xff]  }
0x1076   : > { %6427 = vmatprep.subr.bf16.mxu0 %v8921_v26  ;;  %v8945_v11 = vld [vmem:[#allocation7 + $0xc4] ss:$12 sps:$4 sm:$0xff]   ;;  %v8950_v26 = vld [vmem:[#allocation7 + $0xdc] ss:$12 sps:$4 sm:$0xff]   ;;  %v8955_v39 = vld [vmem:[#allocation7 + $0xf4] ss:$12 sps:$4 sm:$0xff]  }
0x1077   : > { %8103 = vmatprep.mubr.bf16.mxu0 %v5529_v20  ;;  %v5530_v12 = vpack.c.bf16 %v5518_v46, %v5517_v5  ;;  %v8953_v44 = vld [vmem:[#allocation7 + $0xf0] ss:$12 sps:$4 sm:$0xff]   ;;  %v8960_v20 = vld [vmem:[#allocation7 + $0x10c] ss:$12 sps:$4 sm:$0xff]  }
0x1078   : > { %v8965_v5 = vld [vmem:[#allocation7 + $0x124] ss:$12 sps:$4 sm:$0xff]  }
0x1079   : > { %6428 = vmatpush1.bf16.msra.mxu0 %v8919_v9 }
0x107a   : > { %6429 = vmatprep.subr.bf16.mxu0 %v8924_v53  ;;  %v8958_v53 = vld [vmem:[#allocation7 + $0x108] ss:$12 sps:$4 sm:$0xff]  }
0x107c   : > { %8104 = vmatmul.mubr.bf16.gmra.mrb[180].mxu0 %v5530_v12  ;;  %v8963_v12 = vld [vmem:[#allocation7 + $0x120] ss:$12 sps:$4 sm:$0xff]  }
0x107d   : > { %6430 = vmatpush1.bf16.msra.mxu0 %v8922_v57 }
0x107e   : > { %6431 = vmatprep.subr.bf16.mxu0 %v8927_v2 }
0x1081   : > { %6432 = vmatpush1.bf16.msra.mxu0 %v8925_v30  ;;  %v8970_v30 = vld [vmem:[#allocation7 + $0x13c] ss:$12 sps:$4 sm:$0xff]  }
0x1082   : > { %6433 = vmatprep.subr.bf16.mxu0 %v8930_v61 }
0x1085   : > { %6434 = vmatpush1.bf16.msra.mxu0 %v8928_v50 }
0x1086   : > { %6435 = vmatprep.subr.bf16.mxu0 %v8933_v49  ;;  %v8968_v49 = vld [vmem:[#allocation7 + $0x138] ss:$12 sps:$4 sm:$0xff]  }
0x1089   : > { %6436 = vmatpush1.bf16.msra.mxu0 %v8931_v40 }
0x108a   : > { %6437 = vmatprep.subr.bf16.mxu0 %v8936_v8  ;;  %v8975_v8 = vld [vmem:[#allocation7 + $0x154] ss:$12 sps:$4 sm:$0xff]  }
0x108d   : > { %6438 = vmatpush1.bf16.msra.mxu0 %v8934_v51 }
0x108e   : > { %6439 = vmatprep.subr.bf16.mxu0 %v8940_v45 }
0x1091   : > { %6440 = vmatpush1.bf16.msra.mxu0 %v8938_v24 }
0x1092   : > { %6441 = vmatprep.subr.bf16.mxu0 %v8945_v11 }
0x1095   : > { %6442 = vmatpush1.bf16.msra.mxu0 %v8943_v31 }
0x1096   : > { %6443 = vmatprep.subr.bf16.mxu0 %v8950_v26  ;;  %v8973_v26 = vld [vmem:[#allocation7 + $0x150] ss:$12 sps:$4 sm:$0xff]  }
0x1098   : > { %v5480_v41 = vpop.xlane.xlu1 %5479 }
0x1099   : > { %6444 = vmatpush1.bf16.msra.mxu0 %v8948_v10  ;;  %9380 = vrcp.f32 %v5480_v41  ;;  %v8979_v41 = vld [vmem:[#allocation7 + $0x16c] ss:$12 sps:$4 sm:$0xff]  }
0x109a   : > { %6445 = vmatprep.subr.bf16.mxu0 %v8955_v39 }
0x109c   : > { %v5482_v9 = vpop.xlane.xlu0 %5481  ;;  %v5486_v46 = vpop.xlane.xlu1 %5485 }
0x109d   : > { %9382 = vrcp.f32 %v5482_v9  ;;  %6446 = vmatpush1.bf16.msra.mxu0 %v8953_v44 }
0x109e   : > { %6447 = vmatprep.subr.bf16.mxu0 %v8960_v20  ;;  %9384 = vrcp.f32 %v5486_v46 }
0x10a0   : > { %v5484_v57 = vpop.xlane.xlu0 %5483 }
0x10a1   : > { %9386 = vrcp.f32 %v5484_v57  ;;  %6448 = vmatpush1.bf16.msra.mxu0 %v8958_v53  ;;  %v12971_v57 = vld [vmem:[#allocation75_spill] sm:$0xff] }
0x10a2   : > { %v5490_v2 = vpop.xlane.xlu1 %5489  ;;  %6449 = vmatprep.subr.bf16.mxu0 %v8965_v5 }
0x10a3   : > { %9388 = vrcp.f32 %v5490_v2  ;;  %v9381_v50 = vpop.eup %9380 }
0x10a4   : > { %v5488_v61 = vpop.xlane.xlu0 %5487  ;;  %v5519_v24 = vmul.f32 %v9381_v50, %v11886_v3  ;;  %v8977_v50 = vld [vmem:[#allocation7 + $0x168] ss:$12 sps:$4 sm:$0xff]  }
0x10a5   : > { %9390 = vrcp.f32 %v5488_v61  ;;  %6450 = vmatpush1.bf16.msra.mxu0 %v8963_v12  ;;  %v12973_v12 = vld [vmem:[#allocation73_spill] sm:$0xff] }
0x10a6   : > { %v5494_v40 = vpop.xlane.xlu1 %5493  ;;  %6451 = vmatprep.subr.bf16.mxu0 %v8970_v30 }
0x10a7   : > { %v9383_v51 = vpop.eup %9382  ;;  %9392 = vrcp.f32 %v5494_v40 }
0x10a8   : > { %v5492_v45 = vpop.xlane.xlu0 %5491  ;;  %v5520_v11 = vmul.f32 %v9383_v51, %v11891_v0  ;;  %v9385_v31 = vpop.eup %9384 }
0x10a9   : > { %9394 = vrcp.f32 %v5492_v45  ;;  %6452 = vmatpush1.bf16.msra.mxu0 %v8968_v49  ;;  %v5522_v5 = vmul.f32 %v9385_v31, %v11889_v21  ;;  %v12975_v21 = vld [vmem:[#allocation40_spill] sm:$0xff] }
0x10aa   : > { %v8491_v10 = vpop.permute.xlu1 %8490  ;;  %v5531_v39 = vpack.c.bf16 %v5520_v11, %v5519_v24  ;;  %6453 = vmatprep.subr.bf16.mxu0 %v8975_v8  ;;  %v12977_v11 = vld [vmem:[#allocation12_spill] sm:$0xff] }
0x10ab   : > { %v9387_v44 = vpop.eup %9386  ;;  %v8493_v20 = vunpack.i.h.bf16 %v8491_v10  ;;  %v8492_v9 = vunpack.i.l.bf16 %v8491_v10 }
0x10ac   : > { %v8486_v46 = vpop.permute.xlu0 %8485  ;;  %8107 = vmatprep.mubr.bf16.mxu0 %v5531_v39  ;;  %v5521_v53 = vmul.f32 %v9387_v44, %v11895_v6 }
0x10ad   : > { %v9389_v3 = vpop.eup %9388  ;;  %v5857_v0 = vsel %vm12972_vm8, %v12971_v57, %v8493_v20  ;;  %v5856_v2 = vsel %vm12974_vm10, %v12973_v12, %v8492_v9  ;;  %v8488_v30 = vunpack.i.h.bf16 %v8486_v46  ;;  %v8487_v61 = vunpack.i.l.bf16 %v8486_v46  ;;  %6454 = vmatpush1.bf16.msra.mxu0 %v8973_v26  ;;  %v12979_v46 = vld [vmem:[#allocation38_spill] sm:$0xff]  ;;  %vm13003_vm8 = vmmov %vm12890_vm0 }
0x10ae   : > { %v12038_v49 = vpack.c.bf16 %v5857_v0, %v5856_v2  ;;  %v8496_v40 = vpop.permute.xlu1 %8495  ;;  %v5532_v8 = vpack.c.bf16 %v5522_v5, %v5521_v53  ;;  %6455 = vmatprep.subr.bf16.mxu0 %v8979_v41  ;;  %v5524_v26 = vmul.f32 %v9389_v3, %v11898_v38  ;;  %v12981_v5 = vld [vmem:[#allocation42_spill] sm:$0xff]  ;;  %vm13005_vm10 = vmmov %vm12890_vm0 }
0x10af   : > { %v9391_v51 = vpop.eup %9390  ;;  %v8498_v6 = vunpack.i.h.bf16 %v8496_v40  ;;  %v8497_v45 = vunpack.i.l.bf16 %v8496_v40  ;;  %v5872_v24 = vsel %vm12976_vm11, %v12975_v21, %v8487_v61  ;;  %v5873_v31 = vsel %vm12978_vm13, %v12977_v11, %v8488_v30  ;;  %v12983_v38 = vld [vmem:[#allocation14_spill] sm:$0xff]  ;;  %v12984_v40 = vld [vmem:[#allocation16_spill] sm:$0xff]  ;;  %vm13007_vm11 = vmmov %vm12890_vm0 }
0x10b0   : > { %v8506_v10 = vpop.permute.xlu0 %8505  ;;  %8108 = vmatmul.mubr.bf16.gmra.mrb[184].mxu0 %v5532_v8  ;;  %v5523_v39 = vmul.f32 %v9391_v51, %v11901_v18  ;;  %v12046_v44 = vpack.c.bf16 %v5873_v31, %v5872_v24  ;;  %v12986_v11 = vld [vmem:[#allocation72_spill] sm:$0xff]  ;;  %vm13009_vm13 = vmmov %vm12890_vm0 }
0x10b1   : > { %v9393_v20 = vpop.eup %9392  ;;  %v8508_v9 = vunpack.i.h.bf16 %v8506_v10  ;;  %v8507_v41 = vunpack.i.l.bf16 %v8506_v10  ;;  %6456 = vmatpush1.bf16.msra.mxu0 %v8977_v50  ;;  %v5874_v53 = vsel %vm12980_vm14, %v12979_v46, %v8497_v45  ;;  %v5875_v57 = vsel %vm12982_vm12, %v12981_v5, %v8498_v6  ;;  %v12988_v10 = vld [vmem:[#allocation74_spill] sm:$0xff]  ;;  %v12990_v5 = vld [vmem:[#allocation13_spill] sm:$0xff]  ;;  %vm13011_vm14 = vmmov %vm12890_vm0 }
0x10b2   : > { %v8501_v0 = vpop.permute.xlu1 %8500  ;;  %v5533_v12 = vpack.c.bf16 %v5524_v26, %v5523_v39  ;;  %v12052_v2 = vpack.c.bf16 %v5875_v57, %v5874_v53  ;;  %v5526_v6 = vmul.f32 %v9393_v20, %v11904_v43  ;;  %v12992_v43 = vld [vmem:[#allocation15_spill] sm:$0xff]  ;;  %vm13013_vm12 = vmmov %vm12890_vm0 }
0x10b3   : > { %v9395_v30 = vpop.eup %9394  ;;  %v8503_v18 = vunpack.i.h.bf16 %v8501_v0  ;;  %v8502_v61 = vunpack.i.l.bf16 %v8501_v0  ;;  %v5876_v3 = vsel %vm12890_vm0, %v12983_v38, %v8507_v41  ;;  %v5877_v8 = vsel %vm12985_vm9, %v12984_v40, %v8508_v9  ;;  %vm13016_vm9 = vmmov %vm12890_vm0 }
0x10b4   : > { %v8516_v50 = vpop.permute.xlu0 %8515  ;;  %8111 = vmatprep.mubr.bf16.mxu0 %v5533_v12  ;;  %v12058_v51 = vpack.c.bf16 %v5877_v8, %v5876_v3  ;;  %v5525_v45 = vmul.f32 %v9395_v30, %v11909_v63  ;;  %v12994_v12 = vld [vmem:[#allocation79_spill] sm:$0xff] }
0x10b5   : > { %v8518_v21 = vunpack.i.h.bf16 %v8516_v50  ;;  %v8517_v24 = vunpack.i.l.bf16 %v8516_v50  ;;  %v5858_v31 = vsel %vm12987_vm15, %v12986_v11, %v8502_v61  ;;  %v5859_v39 = vsel %vm12989_vm1, %v12988_v10, %v8503_v18  ;;  %v12996_v18 = vld [vmem:[#allocation77_spill] sm:$0xff]  ;;  %vm13018_vm15 = vmmov %vm12890_vm0 }
0x10b6   : > { %6699 = vmatprep.mubr.bf16.mxu1 %v12058_v51  ;;  %v8511_v26 = vpop.permute.xlu1 %8510  ;;  %v5534_v9 = vpack.c.bf16 %v5526_v6, %v5525_v45  ;;  %v12067_v41 = vpack.c.bf16 %v5859_v39, %v5858_v31  ;;  %v12998_v6 = vld [vmem:[#allocation18_spill] sm:$0xff]  ;;  %vm13020_vm1 = vmmov %vm12890_vm0 }
0x10b7   : > { %v8513_v46 = vunpack.i.h.bf16 %v8511_v26  ;;  %v8512_v53 = vunpack.i.l.bf16 %v8511_v26  ;;  %v5878_v63 = vsel %vm12991_vm2, %v12990_v5, %v8517_v24  ;;  %v5879_v20 = vsel %vm12993_vm3, %v12992_v43, %v8518_v21  ;;  %v13000_v24 = vld [vmem:[#allocation53_spill] sm:$0xff]  ;;  %vm13022_vm2 = vmmov %vm12890_vm0 }
0x10b8   : > { %v8526_v57 = vpop.permute.xlu0 %8525  ;;  %8112 = vmatmul.mubr.bf16.gmra.mrb[188].mxu0 %v5534_v9  ;;  %v12073_v0 = vpack.c.bf16 %v5879_v20, %v5878_v63  ;;  %v13002_v9 = vld [vmem:[#allocation76_spill] sm:$0xff]  ;;  %vm13024_vm3 = vmmov %vm12890_vm0 }
0x10b9   : > { %v5861_v30 = vsel %vm12995_vm4, %v12994_v12, %v8513_v46  ;;  %v5860_v61 = vsel %vm12997_vm5, %v12996_v18, %v8512_v53  ;;  %v8528_v38 = vunpack.i.h.bf16 %v8526_v57  ;;  %v8527_v3 = vunpack.i.l.bf16 %v8526_v57  ;;  %6457 = vmatprep.mubr.bf16.mxu0 %v12046_v44  ;;  %v13004_v53 = vld [vmem:[#allocation78_spill] sm:$0xff]  ;;  %v13006_v12 = vld [vmem:[#allocation17_spill] sm:$0xff]  ;;  %v13008_v18 = vld [vmem:[#allocation19_spill] sm:$0xff] }
0x10ba   : > { %v5910_v40 = vpack.c.bf16 %v5861_v30, %v5860_v61  ;;  %v8521_v8 = vpop.permute.xlu1 %8520  ;;  %vm13026_vm4 = vmmov %vm12890_vm0 }
0x10bb   : > { %v8523_v50 = vunpack.i.h.bf16 %v8521_v8  ;;  %v8522_v45 = vunpack.i.l.bf16 %v8521_v8  ;;  %v5880_v21 = vsel %vm12999_vm6, %v12998_v6, %v8527_v3  ;;  %v5881_v11 = vsel %vm13001_vm7, %v13000_v24, %v8528_v38  ;;  %vm13028_vm5 = vmmov %vm12890_vm0 }
0x10bc   : > { %v8536_v31 = vpop.permute.xlu0 %8535  ;;  %6700 = vmatmul.mubr.bf16.vlgmr.msra.gmra.mrb[208].mxu1 %v5910_v40  ;;  %v5917_v10 = vpack.c.bf16 %v5881_v11, %v5880_v21  ;;  %v13012_v21 = vld [vmem:[#allocation83_spill] sm:$0xff]  ;;  %vm13030_vm6 = vmmov %vm12890_vm0 }
0x10bd   : > { %v8538_v39 = vunpack.i.h.bf16 %v8536_v31  ;;  %v8537_v26 = vunpack.i.l.bf16 %v8536_v31  ;;  %6707 = vmatprep.mubr.bf16.mxu1 %v12073_v0  ;;  %v5862_v46 = vsel %vm13003_vm8, %v13002_v9, %v8522_v45  ;;  %v5863_v5 = vsel %vm13005_vm10, %v13004_v53, %v8523_v50  ;;  %v13010_v45 = vld [vmem:[#allocation81_spill] sm:$0xff]  ;;  %v13015_v53 = vld [vmem:[#allocation88_spill] sm:$0xff]  ;;  %vm13032_vm7 = vmmov %vm12890_vm0 }
0x10be   : > { %v8531_v63 = vpop.permute.xlu1 %8530  ;;  %v5913_v43 = vpack.c.bf16 %v5863_v5, %v5862_v46  ;;  %v13014_v46 = vld [vmem:[#allocation55_spill] sm:$0xff]  ;;  %vm13034_vm8 = vmmov %vm12890_vm0 }
0x10bf   : > { %v8533_v20 = vunpack.i.h.bf16 %v8531_v63  ;;  %v8532_v57 = vunpack.i.l.bf16 %v8531_v63  ;;  %v5882_v30 = vsel %vm13007_vm11, %v13006_v12, %v8537_v26  ;;  %v5883_v61 = vsel %vm13009_vm13, %v13008_v18, %v8538_v39  ;;  %vm13035_vm10 = vmmov %vm12890_vm0 }
0x10c0   : > { %v8546_v38 = vpop.permute.xlu0 %8545  ;;  %6458 = vmatmul.mubr.bf16.vlgmr.msra.gmra.mrb[192].mxu0 %v12038_v49  ;;  %v5920_v3 = vpack.c.bf16 %v5883_v61, %v5882_v30  ;;  %vm13036_vm11 = vmmov %vm12890_vm0 }
0x10c1   : > { %v8548_v8 = vunpack.i.h.bf16 %v8546_v38  ;;  %v8547_v6 = vunpack.i.l.bf16 %v8546_v38  ;;  %6467 = vmatprep.mubr.bf16.mxu0 %v12052_v2  ;;  %v5864_v50 = vsel %vm13011_vm14, %v13010_v45, %v8532_v57  ;;  %v5865_v24 = vsel %vm13013_vm12, %v13012_v21, %v8533_v20  ;;  %v13017_v57 = vld [vmem:[#allocation80_spill] sm:$0xff]  ;;  %v13019_v20 = vld [vmem:[#allocation82_spill] sm:$0xff]  ;;  %vm13037_vm13 = vmmov %vm12890_vm0 }
0x10c2   : > { %v8541_v11 = vpop.permute.xlu1 %8540  ;;  %v5916_v31 = vpack.c.bf16 %v5865_v24, %v5864_v50  ;;  %vm13038_vm14 = vmmov %vm12890_vm0 }
0x10c3   : > { %v8543_v26 = vunpack.i.h.bf16 %v8541_v11  ;;  %v8542_v9 = vunpack.i.l.bf16 %v8541_v11  ;;  %v5884_v39 = vsel %vm12890_vm0, %v13014_v46, %v8547_v6  ;;  %v5885_v5 = vsel %vm13016_vm9, %v13015_v53, %v8548_v8  ;;  %v13021_v6 = vld [vmem:[#allocation52_spill] sm:$0xff]  ;;  %v13023_v8 = vld [vmem:[#allocation54_spill] sm:$0xff]  ;;  %v13025_v53 = vld [vmem:[#allocation85_spill] sm:$0xff] }
0x10c4   : > { %v8556_v63 = vpop.permute.xlu0 %8555  ;;  %6708 = vmatmul.mubr.bf16.gmra.mrb[212].mxu1 %v5913_v43  ;;  %v5923_v12 = vpack.c.bf16 %v5885_v5, %v5884_v39  ;;  %v13027_v5 = vld [vmem:[#allocation87_spill] sm:$0xff]  ;;  %vm13039_vm12 = vmmov %vm12890_vm0 }
0x10c5   : > { %v8558_v30 = vunpack.i.h.bf16 %v8556_v63  ;;  %v8557_v18 = vunpack.i.l.bf16 %v8556_v63  ;;  %6715 = vmatprep.mubr.bf16.mxu1 %v5917_v10  ;;  %v5866_v61 = vsel %vm13018_vm15, %v13017_v57, %v8542_v9  ;;  %v5867_v38 = vsel %vm13020_vm1, %v13019_v20, %v8543_v26  ;;  %vm13040_vm9 = vmmov %vm12890_vm0 }
0x10c6   : > { %v8551_v45 = vpop.permute.xlu1 %8550  ;;  %v5919_v50 = vpack.c.bf16 %v5867_v38, %v5866_v61  ;;  %v13031_v38 = vld [vmem:[#allocation86_spill] sm:$0xff]  ;;  %vm13041_vm15 = vmmov %vm12890_vm0 }
0x10c7   : > { %v8553_v21 = vunpack.i.h.bf16 %v8551_v45  ;;  %v8552_v24 = vunpack.i.l.bf16 %v8551_v45  ;;  %v5886_v11 = vsel %vm13022_vm2, %v13021_v6, %v8557_v18  ;;  %v5887_v46 = vsel %vm13024_vm3, %v13023_v8, %v8558_v30  ;;  %v13029_v18 = vld [vmem:[#allocation84_spill] sm:$0xff]  ;;  %v8995_v8 = vld [vmem:[#allocation7 + $0x1d0] ss:$12 sps:$4 sm:$0xff]   ;;  %vm13042_vm1 = vmmov %vm12890_vm0 }
0x10c8   : > { %6468 = vmatmul.mubr.bf16.gmra.mrb[196].mxu0 %v12067_v41  ;;  %v5926_v39 = vpack.c.bf16 %v5887_v46, %v5886_v11  ;;  %v8992_v11 = vld [vmem:[#allocation7 + $0x1c8] ss:$12 sps:$4 sm:$0xff]   ;;  %v8996_v46 = vld [vmem:[#allocation7 + $0x1e0] ss:$12 sps:$4 sm:$0xff]   ;;  %vm13043_vm2 = vmmov %vm12890_vm0 }
0x10c9   : > { %6477 = vmatprep.mubr.bf16.mxu0 %v12058_v51  ;;  %v5868_v9 = vsel %vm13026_vm4, %v13025_v53, %v8552_v24  ;;  %v5869_v26 = vsel %vm13028_vm5, %v13027_v5, %v8553_v21  ;;  %v13033_v51 = vmov 0   ;;  %v8980_v21 = vld [vmem:[#allocation7 + $0x180] ss:$12 sps:$4 sm:$0xff]   ;;  %v8999_v53 = vld [vmem:[#allocation7 + $0x1e8] ss:$12 sps:$4 sm:$0xff]   ;;  %vm13044_vm3 = vmmov %vm12890_vm0 }
0x10ca   : > { %v8561_v63 = vpop.permute.xlu1 %8560  ;;  %v5922_v57 = vpack.c.bf16 %v5869_v26, %v5868_v9  ;;  %v8987_v24 = vld [vmem:[#allocation7 + $0x1a0] ss:$12 sps:$4 sm:$0xff]   ;;  %v9002_v9 = vld [vmem:[#allocation7 + $0x1fc] ss:$12 sps:$4 sm:$0xff]   ;;  %v9000_v5 = vld [vmem:[#allocation7 + $0x1f8] ss:$12 sps:$4 sm:$0xff]  }
0x10cb   : > { %v8563_v61 = vunpack.i.h.bf16 %v8561_v63  ;;  %v8562_v20 = vunpack.i.l.bf16 %v8561_v63  ;;  %v9003_v26 = vld [vmem:[#allocation7 + $0x200] ss:$12 sps:$4 sm:$0xff]   ;;  %v9004_v63 = vld [vmem:[#allocation7 + $0x210] ss:$12 sps:$4 sm:$0xff]   ;;  %vm13045_vm4 = vmmov %vm12890_vm0 }
0x10cc   : > { %6716 = vmatmul.mubr.bf16.gmra.mrb[216].mxu1 %v5916_v31  ;;  %vm13046_vm5 = vmmov %vm12890_vm0 }
0x10cd   : > { %6723 = vmatprep.mubr.bf16.mxu1 %v5920_v3  ;;  %v5870_v30 = vsel %vm13030_vm6, %v13029_v18, %v8562_v20  ;;  %v5871_v45 = vsel %vm13032_vm7, %v13031_v38, %v8563_v61  ;;  %v9007_v61 = vld [vmem:[#allocation7 + $0x218] ss:$12 sps:$4 sm:$0xff]   ;;  %v9008_v18 = vld [vmem:[#allocation7 + $0x228] ss:$12 sps:$4 sm:$0xff]   ;;  %vm13047_vm6 = vmmov %vm12890_vm0 }
0x10ce   : > { %v5925_v6 = vpack.c.bf16 %v5871_v45, %v5870_v30  ;;  %v9010_v20 = vld [vmem:[#allocation7 + $0x22c] ss:$12 sps:$4 sm:$0xff]   ;;  %v9011_v30 = vld [vmem:[#allocation7 + $0x230] ss:$12 sps:$4 sm:$0xff]   ;;  %vm13048_vm7 = vmmov %vm12890_vm0 }
0x10d0   : > { %6478 = vmatmul.mubr.bf16.gmra.mrb[200].mxu0 %v5910_v40  ;;  %v8982_v40 = vld [vmem:[#allocation7 + $0x184] ss:$12 sps:$4 sm:$0xff]  }
0x10d1   : > { %6487 = vmatprep.mubr.bf16.mxu0 %v12073_v0  ;;  %6538 = vmatprep.subr.bf16.mxu0 %v8982_v40  ;;  %v8983_v0 = vld [vmem:[#allocation7 + $0x188] ss:$12 sps:$4 sm:$0xff]  }
0x10d2   : > { %6539 = vmatpush1.bf16.msra.mxu0 %v8980_v21  ;;  %8115 = vmatprep.subr.bf16.mxu1 %v8983_v0 }
0x10d3   : > { %8116 = vmatpush3.bf16.msra.mxu1 %v8983_v0 }
0x10d4   : > { %6724 = vmatmul.mubr.bf16.gmra.mrb[220].mxu1 %v5919_v50  ;;  %8117 = vmatprep.subr.bf16.mxu1 %v8987_v24 }
0x10d5   : > { %6731 = vmatprep.mubr.bf16.mxu1 %v5923_v12 }
0x10d7   : > { %8118 = vmatpush3.bf16.msra.mxu1 %v8987_v24 }
0x10d8   : > { %6488 = vmatmul.mubr.bf16.gmra.mrb[204].mxu0 %v5913_v43  ;;  %v8984_v43 = vld [vmem:[#allocation7 + $0x198] ss:$12 sps:$4 sm:$0xff]  }
0x10d9   : > { %6497 = vmatprep.mubr.bf16.mxu0 %v5917_v10  ;;  %v8986_v10 = vld [vmem:[#allocation7 + $0x19c] ss:$12 sps:$4 sm:$0xff]  }
0x10da   : > { %6540 = vmatprep.subr.bf16.mxu0 %v8986_v10 }
0x10db   : > { %6541 = vmatpush1.bf16.msra.mxu0 %v8984_v43 }
0x10dc   : > { %6732 = vmatmul.mubr.bf16.gmra.mrb[224].mxu1 %v5922_v57 }
0x10dd   : > { %6739 = vmatprep.mubr.bf16.mxu1 %v5926_v39 }
0x10e0   : > { %6498 = vmatmul.mubr.bf16.gmra.mrb[208].mxu0 %v5916_v31  ;;  %v8990_v31 = vld [vmem:[#allocation7 + $0x1b4] ss:$12 sps:$4 sm:$0xff]  }
0x10e1   : > { %6507 = vmatprep.mubr.bf16.mxu0 %v5920_v3  ;;  %v8988_v3 = vld [vmem:[#allocation7 + $0x1b0] ss:$12 sps:$4 sm:$0xff]   ;;  %6542 = vmatprep.subr.bf16.mxu0 %v8990_v31 }
0x10e2   : > { %6543 = vmatpush1.bf16.msra.mxu0 %v8988_v3 }
0x10e4   : > { %6740 = vmatmul.mubr.bf16.gmra.mrb[228].mxu1 %v5925_v6 }
0x10e8   : > { %6508 = vmatmul.mubr.bf16.gmra.mrb[212].mxu0 %v5919_v50  ;;  %v8994_v50 = vld [vmem:[#allocation7 + $0x1cc] ss:$12 sps:$4 sm:$0xff]  }
0x10e9   : > { %6517 = vmatprep.mubr.bf16.mxu0 %v5923_v12  ;;  %v8991_v12 = vld [vmem:[#allocation7 + $0x1b8] ss:$12 sps:$4 sm:$0xff]   ;;  %6544 = vmatprep.subr.bf16.mxu0 %v8994_v50 }
0x10ea   : > { %8119 = vmatprep.subr.bf16.mxu1 %v8991_v12  ;;  %6545 = vmatpush1.bf16.msra.mxu0 %v8992_v11 }
0x10eb   : > { %8120 = vmatpush3.bf16.msra.mxu1 %v8991_v12 }
0x10ec   : > { %8121 = vmatprep.subr.bf16.mxu1 %v8995_v8 }
0x10ef   : > { %8122 = vmatpush3.bf16.msra.mxu1 %v8995_v8 }
0x10f0   : > { %6518 = vmatmul.mubr.bf16.gmra.mrb[216].mxu0 %v5922_v57  ;;  %8123 = vmatprep.subr.bf16.mxu1 %v8999_v53  ;;  %v9006_v57 = vld [vmem:[#allocation7 + $0x214] ss:$12 sps:$4 sm:$0xff]  }
0x10f1   : > { %6527 = vmatprep.mubr.bf16.mxu0 %v5926_v39  ;;  %v8998_v39 = vld [vmem:[#allocation7 + $0x1e4] ss:$12 sps:$4 sm:$0xff]  }
0x10f2   : > { %6546 = vmatprep.subr.bf16.mxu0 %v8998_v39 }
0x10f3   : > { %6547 = vmatpush1.bf16.msra.mxu0 %v8996_v46  ;;  %8124 = vmatpush3.bf16.msra.mxu1 %v8999_v53 }
0x10f4   : > { %6548 = vmatprep.subr.bf16.mxu0 %v9002_v9  ;;  %8125 = vmatprep.subr.bf16.mxu1 %v9003_v26 }
0x10f7   : > { %6549 = vmatpush1.bf16.msra.mxu0 %v9000_v5  ;;  %8126 = vmatpush3.bf16.msra.mxu1 %v9003_v26 }
0x10f8   : > { %6528 = vmatmul.mubr.bf16.gmra.mrb[220].mxu0 %v5925_v6  ;;  %6550 = vmatprep.subr.bf16.mxu0 %v9006_v57 }
0x10f9   : > { %6570 = vmatprep.mubr.bf16.mxu0 %v13033_v51  ;;  %8127 = vmatprep.subr.bf16.mxu1 %v9007_v61 }
0x10fb   : > { %6551 = vmatpush1.bf16.msra.mxu0 %v9004_v63  ;;  %8128 = vmatpush3.bf16.msra.mxu1 %v9007_v61 }
0x10fc   : > { %6552 = vmatprep.subr.bf16.mxu0 %v9010_v20  ;;  %8129 = vmatprep.subr.bf16.mxu1 %v9011_v30 }
0x10ff   : > { %6553 = vmatpush1.bf16.msra.mxu0 %v9008_v18  ;;  %8130 = vmatpush3.bf16.msra.mxu1 %v9011_v30 }
0x1100   : > { %7619 = vmatprep.subr.bf16.mxu0 %v11907_v23 }
0x1147   : > { %v8101_v38 = vpop.f32.mrb[176].mxu0 }
0x1148   : > { %v5601_v45 = vpop.f32.mrb[177].mxu0 }
0x1149   : > { %v8102_v6 = vpop.f32.mrb[178].mxu0 }
0x114a   : > { %v8569_v21 = vpack.i.bf16 %v8102_v6, %v8101_v38  ;;  %v5604_v40 = vpop.f32.mrb[179].mxu0 }
0x114b   : > { %v8564_v0 = vpack.i.bf16 %v5604_v40, %v5601_v45 }
0x114c   : > { %8570 = vrot.lane.b32.xlu1 %v8569_v21, %s9564_s21 }
0x114d   : > { %8565 = vrot.lane.b32.xlu0 %v8564_v0, %s9564_s21 }
0x114f   : > { %v8105_v10 = vpop.f32.mrb[180].mxu0 }
0x1150   : > { %v5617_v43 = vpop.f32.mrb[181].mxu0 }
0x1151   : > { %v8106_v24 = vpop.f32.mrb[182].mxu0 }
0x1152   : > { %v8579_v3 = vpack.i.bf16 %v8106_v24, %v8105_v10  ;;  %v5620_v31 = vpop.f32.mrb[183].mxu0 }
0x1153   : > { %v8574_v12 = vpack.i.bf16 %v5620_v31, %v5617_v43 }
0x1154   : > { %8580 = vrot.lane.b32.xlu1 %v8579_v3, %s9564_s21 }
0x1155   : > { %8575 = vrot.lane.b32.xlu0 %v8574_v12, %s9564_s21 }
0x1183   : > { %v8109_v23 = vpop.f32.mrb[184].mxu0 }
0x1184   : > { %v5633_v50 = vpop.f32.mrb[185].mxu0 }
0x1185   : > { %v8110_v11 = vpop.f32.mrb[186].mxu0 }
0x1186   : > { %v8589_v8 = vpack.i.bf16 %v8110_v11, %v8109_v23  ;;  %v5636_v46 = vpop.f32.mrb[187].mxu0 }
0x1187   : > { %v8584_v39 = vpack.i.bf16 %v5636_v46, %v5633_v50 }
0x1188   : > { %8590 = vrot.lane.b32.xlu1 %v8589_v8, %s9564_s21 }
0x1189   : > { %8585 = vrot.lane.b32.xlu0 %v8584_v39, %s9564_s21 }
0x118b   : > { %v8113_v53 = vpop.f32.mrb[188].mxu0 }
0x118c   : > { %v5649_v9 = vpop.f32.mrb[189].mxu0 }
0x118d   : > { %v8114_v5 = vpop.f32.mrb[190].mxu0 }
0x118e   : > { %v8599_v26 = vpack.i.bf16 %v8114_v5, %v8113_v53  ;;  %v5652_v63 = vpop.f32.mrb[191].mxu0 }
0x118f   : > { %v8594_v57 = vpack.i.bf16 %v5652_v63, %v5649_v9  ;;  %v7647_v61 = vpop.f32.mrb[208].mxu1 }
0x1190   : > { %8600 = vrot.lane.b32.xlu1 %v8599_v26, %s9564_s21  ;;  %v7648_v20 = vpop.f32.mrb[209].mxu1 }
0x1191   : > { %v12131_v18 = vadd.f32 %v7648_v20, %v7647_v61  ;;  %8595 = vrot.lane.b32.xlu0 %v8594_v57, %s9564_s21  ;;  %v7650_v30 = vpop.f32.mrb[210].mxu1 }
0x1192   : > { %v7651_v38 = vpop.f32.mrb[211].mxu1 }
0x1193   : > { %v12134_v45 = vadd.f32 %v7651_v38, %v7650_v30 }
0x1197   : > { %v7653_v6 = vpop.f32.mrb[212].mxu1 }
0x1198   : > { %v7654_v21 = vpop.f32.mrb[213].mxu1 }
0x1199   : > { %v12136_v40 = vadd.f32 %v7654_v21, %v7653_v6  ;;  %v7656_v0 = vpop.f32.mrb[214].mxu1 }
0x119a   : > { %v7657_v10 = vpop.f32.mrb[215].mxu1 }
0x119b   : > { %v12138_v43 = vadd.f32 %v7657_v10, %v7656_v0 }
0x119f   : > { %v7659_v24 = vpop.f32.mrb[216].mxu1 }
0x11a0   : > { %v7660_v3 = vpop.f32.mrb[217].mxu1 }
0x11a1   : > { %v12140_v31 = vadd.f32 %v7660_v3, %v7659_v24  ;;  %v7662_v12 = vpop.f32.mrb[218].mxu1 }
0x11a2   : > { %v7663_v23 = vpop.f32.mrb[219].mxu1 }
0x11a3   : > { %v12142_v50 = vadd.f32 %v7663_v23, %v7662_v12 }
0x11a7   : > { %v7665_v11 = vpop.f32.mrb[220].mxu1 }
0x11a8   : > { %v7666_v8 = vpop.f32.mrb[221].mxu1 }
0x11a9   : > { %v12144_v46 = vadd.f32 %v7666_v8, %v7665_v11  ;;  %v7668_v39 = vpop.f32.mrb[222].mxu1 }
0x11aa   : > { %v7669_v53 = vpop.f32.mrb[223].mxu1 }
0x11ab   : > { %v12146_v9 = vadd.f32 %v7669_v53, %v7668_v39 }
0x11af   : > { %v7671_v5 = vpop.f32.mrb[224].mxu1 }
0x11b0   : > { %v7672_v26 = vpop.f32.mrb[225].mxu1 }
0x11b1   : > { %v12148_v63 = vadd.f32 %v7672_v26, %v7671_v5  ;;  %v7674_v57 = vpop.f32.mrb[226].mxu1 }
0x11b2   : > { %v7675_v61 = vpop.f32.mrb[227].mxu1 }
0x11b3   : > { %v12150_v20 = vadd.f32 %v7675_v61, %v7674_v57 }
0x11b7   : > { %v7677_v30 = vpop.f32.mrb[228].mxu1 }
0x11b8   : > { %v7678_v38 = vpop.f32.mrb[229].mxu1 }
0x11b9   : > { %v12152_v6 = vadd.f32 %v7678_v38, %v7677_v30  ;;  %v7680_v21 = vpop.f32.mrb[230].mxu1 }
0x11ba   : > { %v7681_v0 = vpop.f32.mrb[231].mxu1 }
0x11bb   : > { %v12154_v10 = vadd.f32 %v7681_v0, %v7680_v21 }
0x11be   : > { %v8571_v24 = vpop.permute.xlu1 %8570 }
0x11bf   : > { %v8573_v3 = vunpack.i.h.bf16 %v8571_v24  ;;  %v8572_v12 = vunpack.i.l.bf16 %v8571_v24  ;;  %v8566_v23 = vpop.permute.xlu0 %8565 }
0x11c0   : > { %v8568_v11 = vunpack.i.h.bf16 %v8566_v23  ;;  %v8567_v8 = vunpack.i.l.bf16 %v8566_v23 }
0x11c1   : > { %v5891_v39 = vsel %vm13034_vm8, %v11750_v33, %v8573_v3  ;;  %v5890_v53 = vsel %vm13035_vm10, %v11746_v36, %v8572_v12 }
0x11c2   : > { %v5909_v5 = vpack.c.bf16 %v5891_v39, %v5890_v53  ;;  %v5889_v26 = vsel %vm13036_vm11, %v11752_v28, %v8568_v11  ;;  %v5888_v57 = vsel %vm13037_vm13, %v11748_v1, %v8567_v8 }
0x11c3   : > { %v5906_v61 = vpack.c.bf16 %v5889_v26, %v5888_v57 }
0x11c5   : > { %6571 = vmatmul.mubr.bf16.vlgmr.msra.gmra.mrb[192].mxu0 %v5906_v61  ;;  %8131 = vmatprep.mubr.bf16.mxu1 %v5906_v61 }
0x11c6   : > { %v8581_v30 = vpop.permute.xlu1 %8580  ;;  %8132 = vmatmul.mubr.bf16.vlgmr.msra.gmra.mrb[232].mxu1 %v5909_v5  ;;  %6580 = vmatprep.mubr.bf16.mxu0 %v13033_v51 }
0x11c7   : > { %v8583_v38 = vunpack.i.h.bf16 %v8581_v30  ;;  %v8582_v21 = vunpack.i.l.bf16 %v8581_v30  ;;  %v8576_v33 = vpop.permute.xlu0 %8575  ;;  %7620 = vmatpush3.bf16.msra.mxu0 %v11913_v19 }
0x11c8   : > { %v8578_v36 = vunpack.i.h.bf16 %v8576_v33  ;;  %v8577_v0 = vunpack.i.l.bf16 %v8576_v33  ;;  %7621 = vmatprep.subr.bf16.mxu0 %v11916_v48 }
0x11c9   : > { %v5894_v28 = vsel %vm13038_vm14, %v11754_v27, %v8582_v21  ;;  %v5895_v1 = vsel %vm13039_vm12, %v11758_v56, %v8583_v38 }
0x11ca   : > { %v5892_v24 = vsel %vm12890_vm0, %v11756_v58, %v8577_v0  ;;  %v5893_v3 = vsel %vm13040_vm9, %v11760_v13, %v8578_v36  ;;  %v5915_v12 = vpack.c.bf16 %v5895_v1, %v5894_v28 }
0x11cb   : > { %v5912_v23 = vpack.c.bf16 %v5893_v3, %v5892_v24  ;;  %7622 = vmatpush3.bf16.msra.mxu0 %v11919_v52 }
0x11cc   : > { %7623 = vmatprep.subr.bf16.mxu0 %v11922_v42 }
0x11cd   : > { %6581 = vmatmul.mubr.bf16.gmra.mrb[196].mxu0 %v5909_v5  ;;  %8135 = vmatprep.mubr.bf16.mxu1 %v5912_v23 }
0x11ce   : > { %8136 = vmatmul.mubr.bf16.gmra.mrb[236].mxu1 %v5915_v12  ;;  %6590 = vmatprep.mubr.bf16.mxu0 %v13033_v51 }
0x11cf   : > { %7624 = vmatpush3.bf16.msra.mxu0 %v11924_v29 }
0x11d0   : > { %7625 = vmatprep.subr.bf16.mxu0 %v11928_v37 }
0x11d3   : > { %7626 = vmatpush3.bf16.msra.mxu0 %v11930_v15 }
0x11d4   : > { %7627 = vmatprep.subr.bf16.mxu0 %v11938_v7 }
0x11d5   : > { %6591 = vmatmul.mubr.bf16.gmra.mrb[200].mxu0 %v5912_v23 }
0x11d6   : > { %6600 = vmatprep.mubr.bf16.mxu0 %v13033_v51 }
0x11d7   : > { %7628 = vmatpush3.bf16.msra.mxu0 %v11940_v59 }
0x11d8   : > { %7629 = vmatprep.subr.bf16.mxu0 %v11948_v35 }
0x11db   : > { %7630 = vmatpush3.bf16.msra.mxu0 %v11950_v14 }
0x11dc   : > { %7631 = vmatprep.subr.bf16.mxu0 %v11962_v62 }
0x11dd   : > { %6601 = vmatmul.mubr.bf16.gmra.mrb[204].mxu0 %v5915_v12 }
0x11de   : > { %6610 = vmatprep.mubr.bf16.mxu0 %v13033_v51 }
0x11df   : > { %7632 = vmatpush3.bf16.msra.mxu0 %v11964_v60 }
0x11e0   : > { %7633 = vmatprep.subr.bf16.mxu0 %v11976_v55 }
0x11e3   : > { %7634 = vmatpush3.bf16.msra.mxu0 %v11978_v22 }
0x11fa   : > { %v8591_v27 = vpop.permute.xlu1 %8590 }
0x11fb   : > { %v8593_v58 = vunpack.i.h.bf16 %v8591_v27  ;;  %v8592_v56 = vunpack.i.l.bf16 %v8591_v27  ;;  %v8586_v13 = vpop.permute.xlu0 %8585 }
0x11fc   : > { %v8588_v19 = vunpack.i.h.bf16 %v8586_v13  ;;  %v8587_v48 = vunpack.i.l.bf16 %v8586_v13 }
0x11fd   : > { %v5898_v52 = vsel %vm13041_vm15, %v11762_v4, %v8592_v56  ;;  %v5899_v42 = vsel %vm13042_vm1, %v11766_v47, %v8593_v58 }
0x11fe   : > { %v5896_v29 = vsel %vm13043_vm2, %v11764_v17, %v8587_v48  ;;  %v5897_v37 = vsel %vm13044_vm3, %v11768_v25, %v8588_v19  ;;  %v5921_v15 = vpack.c.bf16 %v5899_v42, %v5898_v52 }
0x11ff   : > { %v5918_v7 = vpack.c.bf16 %v5897_v37, %v5896_v29 }
0x1201   : > { %6611 = vmatmul.mubr.bf16.gmra.mrb[208].mxu0 %v5918_v7  ;;  %8139 = vmatprep.mubr.bf16.mxu1 %v5918_v7 }
0x1202   : > { %v8601_v59 = vpop.permute.xlu1 %8600  ;;  %8140 = vmatmul.mubr.bf16.gmra.mrb[240].mxu1 %v5921_v15  ;;  %6620 = vmatprep.mubr.bf16.mxu0 %v13033_v51 }
0x1203   : > { %v8603_v35 = vunpack.i.h.bf16 %v8601_v59  ;;  %v8602_v14 = vunpack.i.l.bf16 %v8601_v59  ;;  %v8596_v4 = vpop.permute.xlu0 %8595 }
0x1204   : > { %v8598_v62 = vunpack.i.h.bf16 %v8596_v4  ;;  %v8597_v60 = vunpack.i.l.bf16 %v8596_v4 }
0x1205   : > { %v5902_v47 = vsel %vm13045_vm4, %v11770_v54, %v8602_v14  ;;  %v5903_v17 = vsel %vm13046_vm5, %v11774_v34, %v8603_v35  ;;  %v13049_v54 = vld [vmem:[#allocation60_spill] sm:$0xff] }
0x1206   : > { %v5900_v25 = vsel %vm13047_vm6, %v11772_v16, %v8597_v60  ;;  %v5901_v55 = vsel %vm13048_vm7, %v11776_v32, %v8598_v62  ;;  %v5927_v22 = vpack.c.bf16 %v5903_v17, %v5902_v47  ;;  %v6028_v16 = vsub.s32 0, %v13049_v54  ;;  %v6024_v32 = vld [vmem:[%s12404_s3] sm:$0x7] }
0x1207   : > { %v5924_v11 = vpack.c.bf16 %v5901_v55, %v5900_v25  ;;  %v6032_v34 = vsub.s32 1, %v13049_v54 }
0x1208   : > { %v12219_v8 = vrot.slane %v6024_v32, %v6028_v16 }
0x1209   : > { %6621 = vmatmul.mubr.bf16.gmra.mrb[212].mxu0 %v5921_v15  ;;  %8143 = vmatprep.mubr.bf16.mxu1 %v5924_v11 }
0x120a   : > { %8144 = vmatmul.mubr.bf16.gmra.mrb[244].mxu1 %v5927_v22  ;;  %6630 = vmatprep.mubr.bf16.mxu0 %v13033_v51 }
0x1211   : > { %6631 = vmatmul.mubr.bf16.gmra.mrb[216].mxu0 %v5924_v11 }
0x1212   : > { %6640 = vmatprep.mubr.bf16.mxu0 %v13033_v51  ;;  %v12221_v51 = vrot.slane %v6024_v32, %v6032_v34 }
0x1219   : > { %6641 = vmatmul.mubr.bf16.gmra.mrb[220].mxu0 %v5927_v22 }
0x121a   : > { %6683 = vmatprep.mubr.bf16.mxu0 %v12046_v44 }
0x1221   : > { %6684 = vmatmul.mubr.bf16.vlgmr.msra.gmra.mrb[224].mxu0 %v12038_v49 }
0x1222   : > { %6691 = vmatprep.mubr.bf16.mxu0 %v12052_v2  ;;  %v6036_v2 = vsub.s32 2, %v13049_v54 }
0x1224   : > { %v12243_v33 = vrot.slane %v6024_v32, %v6036_v2 }
0x1226   : > { %v6710_v0 = vadd.f32 %v12136_v40, %v12243_v33  ;;  %v6702_v3 = vadd.f32 %v12131_v18, %v12243_v33  ;;  %v6713_v40 = vadd.f32 %v12138_v43, %v12243_v33  ;;  %v6705_v18 = vadd.f32 %v12134_v45, %v12243_v33 }
0x1227   : > { %v6726_v16 = vadd.f32 %v12144_v46, %v12243_v33  ;;  %v6729_v46 = vadd.f32 %v12146_v9, %v12243_v33 }
0x1229   : > { %6692 = vmatmul.mubr.bf16.gmra.mrb[228].mxu0 %v12067_v41 }
0x1298   : > { %v6572_v44 = vpop.f32.mrb[192].mxu0 }
0x1299   : > { %v8195_v49 = vadd.f32 %v6572_v44, %v12219_v8  ;;  %v6574_v39 = vpop.f32.mrb[193].mxu0  ;;  %v12224_v53 = vpop.f32.mrb[232].mxu1 }
0x129a   : > { %v8196_v41 = vadd.f32 %v6574_v39, %v12221_v51  ;;  %v6576_v5 = vpop.f32.mrb[194].mxu0  ;;  %v12228_v26 = vpop.f32.mrb[233].mxu1 }
0x129b   : > { %6845 = vst [vmem:[%s12232_s5] sm:$0xff] %v8195_v49  ;;  %v8197_v57 = vadd.f32 %v6576_v5, %v12219_v8  ;;  %v6578_v61 = vpop.f32.mrb[195].mxu0  ;;  %v12236_v30 = vpop.f32.mrb[234].mxu1  ;;  %v6718_v49 = vadd.f32 %v12140_v31, %v12243_v33  ;;  %v6721_v31 = vadd.f32 %v12142_v50, %v12243_v33 }
0x129c   : > { %6846 = vst [vmem:[%s12232_s5 + $0x8] sm:$0xff] %v8196_v41  ;;  %v8198_v38 = vadd.f32 %v6578_v61, %v12221_v51  ;;  %v12240_v21 = vpop.f32.mrb[235].mxu1 }
0x129d   : > { %6848 = vst [vmem:[%s12232_s5 + $0x18] sm:$0xff] %v8197_v57 }
0x129e   : > { %6849 = vst [vmem:[%s12232_s5 + $0x20] sm:$0xff] %v8198_v38 }
0x12a0   : > { %v6582_v36 = vpop.f32.mrb[196].mxu0 }
0x12a1   : > { %v8199_v28 = vadd.f32 %v6582_v36, %v12219_v8  ;;  %v6584_v1 = vpop.f32.mrb[197].mxu0  ;;  %v8137_v24 = vpop.f32.mrb[236].mxu1 }
0x12a2   : > { %v8200_v12 = vadd.f32 %v6584_v1, %v12221_v51  ;;  %v6807_v23 = vadd.f32 %v8137_v24, %v6710_v0  ;;  %v6586_v27 = vpop.f32.mrb[198].mxu0  ;;  %v6798_v58 = vpop.f32.mrb[237].mxu1 }
0x12a3   : > { %6851 = vst [vmem:[%s12232_s5 + $0x30] sm:$0xff] %v8199_v28  ;;  %v8201_v56 = vadd.f32 %v6586_v27, %v12219_v8  ;;  %v6799_v13 = vadd.f32 %v6798_v58, %v6702_v3  ;;  %v6588_v19 = vpop.f32.mrb[199].mxu0  ;;  %v8138_v48 = vpop.f32.mrb[238].mxu1  ;;  %v6742_v3 = vadd.f32 %v12152_v6, %v12243_v33  ;;  %v6734_v27 = vadd.f32 %v12148_v63, %v12243_v33 }
0x12a4   : > { %6852 = vst [vmem:[%s12232_s5 + $0x38] sm:$0xff] %v8200_v12  ;;  %6865 = vst [vmem:[%s12232_s5 + $0xa0] sm:$0xff] %v6807_v23  ;;  %v8202_v52 = vadd.f32 %v6588_v19, %v12221_v51  ;;  %v6810_v42 = vadd.f32 %v8138_v48, %v6713_v40  ;;  %v6801_v29 = vpop.f32.mrb[239].mxu1  ;;  %v6745_v6 = vadd.f32 %v12154_v10, %v12243_v33 }
0x12a5   : > { %6854 = vst [vmem:[%s12232_s5 + $0x48] sm:$0xff] %v8201_v56  ;;  %6859 = vst [vmem:[%s12232_s5 + $0x70] sm:$0xff] %v6799_v13  ;;  %v6802_v43 = vadd.f32 %v6801_v29, %v6705_v18  ;;  %v6737_v63 = vadd.f32 %v12150_v20, %v12243_v33 }
0x12a6   : > { %6855 = vst [vmem:[%s12232_s5 + $0x50] sm:$0xff] %v8202_v52  ;;  %6868 = vst [vmem:[%s12232_s5 + $0xb8] sm:$0xff] %v6810_v42 }
0x12a7   : > { %6862 = vst [vmem:[%s12232_s5 + $0x88] sm:$0xff] %v6802_v43 }
0x12a8   : > { %v6592_v37 = vpop.f32.mrb[200].mxu0 }
0x12a9   : > { %v8203_v15 = vadd.f32 %v6592_v37, %v12219_v8  ;;  %v6594_v45 = vpop.f32.mrb[201].mxu0 }
0x12aa   : > { %v8204_v7 = vadd.f32 %v6594_v45, %v12221_v51  ;;  %v6596_v59 = vpop.f32.mrb[202].mxu0 }
0x12ab   : > { %6857 = vst [vmem:[%s12232_s5 + $0x60] sm:$0xff] %v8203_v15  ;;  %v8205_v35 = vadd.f32 %v6596_v59, %v12219_v8  ;;  %v6598_v14 = vpop.f32.mrb[203].mxu0 }
0x12ac   : > { %6858 = vst [vmem:[%s12232_s5 + $0x68] sm:$0xff] %v8204_v7  ;;  %v8206_v4 = vadd.f32 %v6598_v14, %v12221_v51 }
0x12ad   : > { %6860 = vst [vmem:[%s12232_s5 + $0x78] sm:$0xff] %v8205_v35 }
0x12ae   : > { %6861 = vst [vmem:[%s12232_s5 + $0x80] sm:$0xff] %v8206_v4 }
0x12b0   : > { %v6602_v62 = vpop.f32.mrb[204].mxu0 }
0x12b1   : > { %v8207_v60 = vadd.f32 %v6602_v62, %v12219_v8  ;;  %v6604_v47 = vpop.f32.mrb[205].mxu0 }
0x12b2   : > { %v8208_v17 = vadd.f32 %v6604_v47, %v12221_v51  ;;  %v6606_v25 = vpop.f32.mrb[206].mxu0 }
0x12b3   : > { %6863 = vst [vmem:[%s12232_s5 + $0x90] sm:$0xff] %v8207_v60  ;;  %v8209_v55 = vadd.f32 %v6606_v25, %v12219_v8  ;;  %v6608_v22 = vpop.f32.mrb[207].mxu0 }
0x12b4   : > { %6864 = vst [vmem:[%s12232_s5 + $0x98] sm:$0xff] %v8208_v17  ;;  %v8210_v11 = vadd.f32 %v6608_v22, %v12221_v51 }
0x12b5   : > { %6866 = vst [vmem:[%s12232_s5 + $0xa8] sm:$0xff] %v8209_v55 }
0x12b6   : > { %6867 = vst [vmem:[%s12232_s5 + $0xb0] sm:$0xff] %v8210_v11 }
0x12d4   : > { %v6612_v54 = vpop.f32.mrb[208].mxu0 }
0x12d5   : > { %v8211_v34 = vadd.f32 %v6612_v54, %v12219_v8  ;;  %v6614_v32 = vpop.f32.mrb[209].mxu0  ;;  %v8141_v44 = vpop.f32.mrb[240].mxu1 }
0x12d6   : > { %v8212_v39 = vadd.f32 %v6614_v32, %v12221_v51  ;;  %v6823_v2 = vadd.f32 %v8141_v44, %v6726_v16  ;;  %v6616_v41 = vpop.f32.mrb[210].mxu0  ;;  %v6814_v5 = vpop.f32.mrb[241].mxu1 }
0x12d7   : > { %6869 = vst [vmem:[%s12232_s5 + $0xc0] sm:$0xff] %v8211_v34  ;;  %v8213_v57 = vadd.f32 %v6616_v41, %v12219_v8  ;;  %v6815_v61 = vadd.f32 %v6814_v5, %v6718_v49  ;;  %v6618_v38 = vpop.f32.mrb[211].mxu0  ;;  %v8142_v36 = vpop.f32.mrb[242].mxu1 }
0x12d8   : > { %6870 = vst [vmem:[%s12232_s5 + $0xc8] sm:$0xff] %v8212_v39  ;;  %6877 = vst [vmem:[%s12232_s5 + $0x100] sm:$0xff] %v6823_v2  ;;  %v8214_v0 = vadd.f32 %v6618_v38, %v12221_v51  ;;  %v6826_v28 = vadd.f32 %v8142_v36, %v6729_v46  ;;  %v6817_v1 = vpop.f32.mrb[243].mxu1 }
0x12d9   : > { %6872 = vst [vmem:[%s12232_s5 + $0xd8] sm:$0xff] %v8213_v57  ;;  %6871 = vst [vmem:[%s12232_s5 + $0xd0] sm:$0xff] %v6815_v61  ;;  %v6818_v9 = vadd.f32 %v6817_v1, %v6721_v31 }
0x12da   : > { %6873 = vst [vmem:[%s12232_s5 + $0xe0] sm:$0xff] %v8214_v0  ;;  %6880 = vst [vmem:[%s12232_s5 + $0x118] sm:$0xff] %v6826_v28 }
0x12db   : > { %6874 = vst [vmem:[%s12232_s5 + $0xe8] sm:$0xff] %v6818_v9 }
0x12dc   : > { %v6622_v24 = vpop.f32.mrb[212].mxu0 }
0x12dd   : > { %v8215_v50 = vadd.f32 %v6622_v24, %v12219_v8  ;;  %v6624_v12 = vpop.f32.mrb[213].mxu0  ;;  %v8145_v23 = vpop.f32.mrb[244].mxu1 }
0x12de   : > { %v8216_v58 = vadd.f32 %v6624_v12, %v12221_v51  ;;  %v6839_v40 = vadd.f32 %v8145_v23, %v6742_v3  ;;  %v6626_v56 = vpop.f32.mrb[214].mxu0  ;;  %v6830_v13 = vpop.f32.mrb[245].mxu1 }
0x12df   : > { %6875 = vst [vmem:[%s12232_s5 + $0xf0] sm:$0xff] %v8215_v50  ;;  %v8217_v19 = vadd.f32 %v6626_v56, %v12219_v8  ;;  %v6831_v48 = vadd.f32 %v6830_v13, %v6734_v27  ;;  %v6628_v18 = vpop.f32.mrb[215].mxu0  ;;  %v8146_v52 = vpop.f32.mrb[246].mxu1 }
0x12e0   : > { %6876 = vst [vmem:[%s12232_s5 + $0xf8] sm:$0xff] %v8216_v58  ;;  %6889 = vst [vmem:[%s12232_s5 + $0x160] sm:$0xff] %v6839_v40  ;;  %v8218_v42 = vadd.f32 %v6628_v18, %v12221_v51  ;;  %v6842_v29 = vadd.f32 %v8146_v52, %v6745_v6  ;;  %v6833_v43 = vpop.f32.mrb[247].mxu1 }
0x12e1   : > { %6878 = vst [vmem:[%s12232_s5 + $0x108] sm:$0xff] %v8217_v19  ;;  %6883 = vst [vmem:[%s12232_s5 + $0x130] sm:$0xff] %v6831_v48  ;;  %v6834_v10 = vadd.f32 %v6833_v43, %v6737_v63 }
0x12e2   : > { %6879 = vst [vmem:[%s12232_s5 + $0x110] sm:$0xff] %v8218_v42  ;;  %6892 = vst [vmem:[%s12232_s5 + $0x178] sm:$0xff] %v6842_v29 }
0x12e3   : > { %6886 = vst [vmem:[%s12232_s5 + $0x148] sm:$0xff] %v6834_v10 }
0x12e4   : > { %v6632_v37 = vpop.f32.mrb[216].mxu0 }
0x12e5   : > { %v8219_v15 = vadd.f32 %v6632_v37, %v12219_v8  ;;  %v6634_v20 = vpop.f32.mrb[217].mxu0 }
0x12e6   : > { %v8220_v45 = vadd.f32 %v6634_v20, %v12221_v51  ;;  %v6636_v7 = vpop.f32.mrb[218].mxu0 }
0x12e7   : > { %6881 = vst [vmem:[%s12232_s5 + $0x120] sm:$0xff] %v8219_v15  ;;  %v8221_v59 = vadd.f32 %v6636_v7, %v12219_v8  ;;  %v6638_v35 = vpop.f32.mrb[219].mxu0 }
0x12e8   : > { %6882 = vst [vmem:[%s12232_s5 + $0x128] sm:$0xff] %v8220_v45  ;;  %v8222_v14 = vadd.f32 %v6638_v35, %v12221_v51 }
0x12e9   : > { %6884 = vst [vmem:[%s12232_s5 + $0x138] sm:$0xff] %v8221_v59 }
0x12ea   : > { %6885 = vst [vmem:[%s12232_s5 + $0x140] sm:$0xff] %v8222_v14 }
0x12ec   : > { %v6642_v4 = vpop.f32.mrb[220].mxu0 }
0x12ed   : > { %v8223_v62 = vadd.f32 %v6642_v4, %v12219_v8  ;;  %v6644_v60 = vpop.f32.mrb[221].mxu0 }
0x12ee   : > { %v8224_v47 = vadd.f32 %v6644_v60, %v12221_v51  ;;  %v6646_v17 = vpop.f32.mrb[222].mxu0 }
0x12ef   : > { %6887 = vst [vmem:[%s12232_s5 + $0x150] sm:$0xff] %v8223_v62  ;;  %v8225_v25 = vadd.f32 %v6646_v17, %v12219_v8  ;;  %v6648_v55 = vpop.f32.mrb[223].mxu0 }
0x12f0   : > { %6888 = vst [vmem:[%s12232_s5 + $0x158] sm:$0xff] %v8224_v47  ;;  %v8226_v22 = vadd.f32 %v6648_v55, %v12221_v51 }
0x12f1   : > { %6890 = vst [vmem:[%s12232_s5 + $0x168] sm:$0xff] %v8225_v25 }
0x12f2   : > { %6891 = vst [vmem:[%s12232_s5 + $0x170] sm:$0xff] %v8226_v22 }
0x12f4   : > { %v7635_v11 = vpop.f32.mrb[224].mxu0 }
0x12f5   : > { %v7636_v54 = vpop.f32.mrb[225].mxu0 }
0x12f6   : > { %v7637_v16 = vadd.f32 %v7636_v54, %v7635_v11  ;;  %v7638_v34 = vpop.f32.mrb[226].mxu0 }
0x12f7   : > { %v7639_v32 = vpop.f32.mrb[227].mxu0 }
0x12f8   : > { %v6686_v44 = vadd.f32 %v7637_v16, %v12243_v33  ;;  %v7640_v49 = vadd.f32 %v7639_v32, %v7638_v34 }
0x12fa   : > { %v6783_v39 = vadd.f32 %v12228_v26, %v6686_v44  ;;  %v6689_v8 = vadd.f32 %v7640_v49, %v12243_v33 }
0x12fc   : > { %6847 = vst [vmem:[%s12232_s5 + $0x10] sm:$0xff] %v6783_v39  ;;  %v6786_v51 = vadd.f32 %v12240_v21, %v6689_v8  ;;  %v7641_v2 = vpop.f32.mrb[228].mxu0 }
0x12fd   : > { %v7642_v41 = vpop.f32.mrb[229].mxu0 }
0x12fe   : > { %6850 = vst [vmem:[%s12232_s5 + $0x28] sm:$0xff] %v6786_v51  ;;  %v7643_v5 = vadd.f32 %v7642_v41, %v7641_v2  ;;  %v7644_v46 = vpop.f32.mrb[230].mxu0 }
0x12ff   : > { %v7645_v57 = vpop.f32.mrb[231].mxu0 }
0x1300   : > { %v6694_v61 = vadd.f32 %v7643_v5, %v12243_v33  ;;  %v7646_v38 = vadd.f32 %v7645_v57, %v7644_v46 }
0x1302   : > { %v6791_v26 = vadd.f32 %v12224_v53, %v6694_v61  ;;  %v6697_v36 = vadd.f32 %v7646_v38, %v12243_v33 }
0x1304   : > { %6853 = vst [vmem:[%s12232_s5 + $0x40] sm:$0xff] %v6791_v26  ;;  %v6794_v21 = vadd.f32 %v12236_v30, %v6697_v36 }
0x1306   : > { %6856 = vst [vmem:[%s12232_s5 + $0x58] sm:$0xff] %v6794_v21 }
0x1307   : > { %9495 = shalt.err (!%p9492_p2)
}
0x1308   : > { %s9496_s10 = scalar_lea.hbm %s12352_s24, 6144  ;;  %s9500_s21 = scalar_lea.hbm %s12405_s4, 12288 }
0x1309   : > { %p9497_p13 = scmp.ne.s32.totalorder %s12352_s24, %s9496_s10  ;;  %p9501_p4 = scmp.lt.u32.totalorder %s12352_s24, %s12405_s4 }
0x130a   : > { %p9502_p7 = scmp.lt.u32.totalorder %s9500_s21, %s9496_s10  ;;  %p9504_p11 = scmp.lt.u32.totalorder %s9496_s10, %s12352_s24 }
0x130b   : > { %p9498_p6 = pnand %p9497_p13, %p13050_p0 }
0x130c   : > { %p9503_p8 = por %p9502_p7, %p9501_p4 }
0x130d   : > { %p9499_p10 = pneg %p9498_p6 }
0x130e   : > { %p9505_p1 = por %p9504_p11, %p9503_p8 }
0x1310   : > { %p9506_p3 = pnand %p9505_p1, %p9499_p10 }
0x1312   : > { %9509 = shalt.err (!%p9506_p3)
}
0x1313   : > { %s9566_s5 = smov 384   ;;  %s9567_s25 = smov 24  }
0x1314   : > { %8417 = dma.vmem_to_hbm [thread:$0]  (%p13050_p0), %s12354_s7, 6144, %s12352_s24, %s6894_s19, %s9566_s5, %s9566_s5, %s9567_s25  }
0x1315 PF: > { %s6922_s28 = sand.u32 1, %s9540_s15   ;;  %p13051_p5 = scmp.ne.s32.totalorder %s12548_s22, 0 }
0x1316   : > { %p13052_p9 = scmp.ge.s32.totalorder %s9552_s18, 2  ;;  %s6923_s26 = scalar_lea.sflag [#allocation4], %s6922_s28 }
0x1318   : > { %p8431_p12 = pnand %p13052_p9, %p13051_p5 }
0x131a   : > { %9535 = dma.done.wait (!%p8431_p12), %s6923_s26, 6144  }
0x131b   : > { %9537 = vsyncadd (!%p8431_p12), %s6923_s26, 4294961152  ;;  %p18_p2 = scmp.ge.s32.totalorder %s9703_s11, 4   ;;  %s13053_s15 = smov %s9544_s16 }
0x131c   : > { %s13054_s16 = smov %s9548_s17  ;;  %s13055_s17 = smov %s9712_s14 }
0x131d   : > { %s13056_s18 = smov %s9703_s11  ;;  %20 = sbr.rel (!%p18_p2) target bundleno = 6 (0x6), region = 89 }
0x1324   :  { %6928 = vsyncpa [#allocation3], 1 }
0x1325   :  { %6930 = vsyncpa [#allocation3 + $0x1], 1 }
0x1326   :  { %6931 = vsyncpa [#allocation6], 1 }
0x1327   :  { %6932 = vsyncpa [#allocation4], 1 }
0x1328   :  { %6934 = vsyncpa [#allocation4 + $0x1], 1 }

</bundles_post_ra>
